<compile_context>
chip_gen: v5e
topology: v5e:2x2
jax: 0.10.0
libtpu: 0.0.40
codegen_flags: <defaults>
</compile_context>

<pallas_src>
import jax
import jax.numpy as jnp
from jax import lax
from jax.experimental import pallas as pl
from jax.experimental.pallas import tpu as pltpu


def _round_up(x, m):
    return ((x + m - 1) // m) * m


def _pick_row_tile(rows):
    for cand in (512, 256, 128, 64, 32, 16, 8):
        if rows % cand == 0:
            return cand
    return rows


# --------------------------- Kernel 1: GRU rollout ---------------------------
def _gru_rollout_kernel(ids_ref,      # (Tt, Bp, 1) int32
                        h0_ref,       # (Bp, Hp) f32
                        emb_wi_ref,   # (V, 3Hp) bf16   (== emb @ W_i, pre-fused)
                        w_h_ref,      # (Hp, 3Hp) bf16
                        b_g_ref,      # (1, 3Hp) f32    [b_ir+b_hr | b_iz+b_hz | b_in]
                        b_hn_ref,     # (1, Hp) f32
                        hseq_ref,     # (Tt, Bp, Hp) f32 output block
                        h_scr):       # (Bp, Hp) f32 VMEM carry
    t = pl.program_id(0)

    @pl.when(t == 0)
    def _init():
        h_scr[...] = h0_ref[...]

    Tt, Bp, _ = ids_ref.shape
    Hp = h_scr.shape[-1]
    V = emb_wi_ref.shape[0]
    f32 = jnp.float32

    # Hoisted loop invariants (broadcasts are not CSE'd by JAX).
    iota_v = lax.broadcasted_iota(jnp.int32, (Bp, V), 1)
    b_g = b_g_ref[...]
    b_hn = b_hn_ref[...]

    h = h_scr[...]                                        # (Bp, Hp) f32 carry
    for s in range(Tt):                                   # static unroll, Tt <= 8
        ids_col = ids_ref[s]                              # (Bp, 1) int32
        one_hot = jnp.where(iota_v == ids_col, 1.0, 0.0).astype(jnp.bfloat16)
        # Fused gather + input projection: one (Bp,V)x(V,3Hp) MXU dot.
        i_g = jnp.dot(one_hot, emb_wi_ref[...],
                      preferred_element_type=f32) + b_g   # (Bp, 3Hp)
        # Fused hidden projection: one (Bp,Hp)x(Hp,3Hp) MXU dot.
        h_g = jnp.dot(h.astype(jnp.bfloat16), w_h_ref[...],
                      preferred_element_type=f32)         # (Bp, 3Hp)
        # PyTorch gate order (r, z, n); lane-aligned 128-wide slices.
        r = jax.nn.sigmoid(i_g[:, :Hp] + h_g[:, :Hp])
        z = jax.nn.sigmoid(i_g[:, Hp:2 * Hp] + h_g[:, Hp:2 * Hp])
        n = jnp.tanh(i_g[:, 2 * Hp:] + r * (h_g[:, 2 * Hp:] + b_hn))
        h = (1.0 - z) * n + z * h
        hseq_ref[s] = h                                   # (Bp, Hp) lane-dense store
    h_scr[...] = h


# ---------------- Kernel 2: vocab projection + log_softmax -------------------
def _vocab_proj_kernel(h_ref,       # (rt, Hp) f32
                       w_out_ref,   # (Hp, Vp) bf16
                       b_out_ref,   # (1, Vp) f32 (padded vocab lanes = -1e9)
                       logp_ref):   # (rt, Vp) f32
    f32 = jnp.float32
    logits = jnp.dot(h_ref[...].astype(jnp.bfloat16), w_out_ref[...],
                     preferred_element_type=f32) + b_out_ref[...]
    m = jnp.max(logits, axis=-1, keepdims=True)
    s = logits - m
    lse = jnp.log(jnp.sum(jnp.exp(s), axis=-1, keepdims=True))
    logp_ref[...] = s - lse


# ------------------------------ jit wrapper ----------------------------------
@jax.jit
def _generator_forward(tokens_tb, h0, emb_wi, w_h, b_g, b_hn, w_out, b_out):
    """Fused T-step teacher-forced rollout.

    tokens_tb: (T, B) int32; h0: (B, H) f32  ->  logp: (T, B, V), h_final: (B, H)
    """
    T, B = tokens_tb.shape
    H = h0.shape[-1]
    V = emb_wi.shape[0]
    Hp = w_h.shape[0]
    Vp = w_out.shape[-1]

    Bp = _round_up(max(B, 1), 16)            # bf16 packs 16 rows / vreg
    Tt = min(T, 8)                            # timesteps per grid iteration
    Tpad = _round_up(T, Tt)

    ids = jnp.pad(tokens_tb.astype(jnp.int32),
                  ((0, Tpad - T), (0, Bp - B)))[..., None]        # (Tpad, Bp, 1)
    h0p = jnp.pad(h0.astype(jnp.float32),
                  ((0, Bp - B), (0, Hp - H)))                     # (Bp, Hp)

    def resident(shape):
        return pl.BlockSpec(shape, lambda t, _s=shape: (0,) * len(_s))

    # --- sequential GRU recurrence: h_t sequence only ---
    h_seq = pl.pallas_call(
        _gru_rollout_kernel,
        grid_spec=pltpu.PrefetchScalarGridSpec(
            num_scalar_prefetch=0,
            grid=(Tpad // Tt,),
            in_specs=[
                pl.BlockSpec((Tt, Bp, 1), lambda t: (t, 0, 0)),   # token ids
                resident((Bp, Hp)),                               # h0
                resident(emb_wi.shape),                           # emb @ W_i (bf16)
                resident(w_h.shape),                              # W_h fused (bf16)
                resident(b_g.shape),                              # combined biases
                resident(b_hn.shape),                             # b_hn
            ],
            out_specs=pl.BlockSpec((Tt, Bp, Hp), lambda t: (t, 0, 0)),
            scratch_shapes=[pltpu.VMEM((Bp, Hp), jnp.float32)],   # hidden carry
        ),
        out_shape=jax.ShapeDtypeStruct((Tpad, Bp, Hp), jnp.float32),
        compiler_params=pltpu.CompilerParams(
            dimension_semantics=("arbitrary",)),                  # sequential carry
    )(ids, h0p, emb_wi, w_h, b_g, b_hn)

    h_fin = h_seq[T - 1]                                          # (Bp, Hp)

    # --- parallel vocab projection + log_softmax over all T*Bp rows ---
    rows = Tpad * Bp
    row_tile = _pick_row_tile(rows)
    h2d = h_seq.reshape(rows, Hp)

    logp2d = pl.pallas_call(
        _vocab_proj_kernel,
        grid_spec=pltpu.PrefetchScalarGridSpec(
            num_scalar_prefetch=0,
            grid=(rows // row_tile,),
            in_specs=[
                pl.BlockSpec((row_tile, Hp), lambda i: (i, 0)),
                resident(w_out.shape),
                resident(b_out.shape),
            ],
            out_specs=pl.BlockSpec((row_tile, Vp), lambda i: (i, 0)),
        ),
        out_shape=jax.ShapeDtypeStruct((rows, Vp), jnp.float32),
        compiler_params=pltpu.CompilerParams(
            dimension_semantics=("parallel",)),                   # both TCs on v7x
    )(h2d, w_out, b_out)

    logp = logp2d.reshape(Tpad, Bp, Vp)[:T, :B, :V]
    return logp, h_fin[:B, :H]


# ----------------------------- Generator module ------------------------------
class Generator:
    """JAX/Pallas port of the SeqGAN Generator forward pass."""

    def __init__(self, embedding_dim, hidden_dim, vocab_size, max_seq_len, key):
        self.embedding_dim = embedding_dim
        self.hidden_dim = hidden_dim
        self.vocab_size = vocab_size
        self.max_seq_len = max_seq_len

        E, H, V = embedding_dim, hidden_dim, vocab_size
        Hp = _round_up(H, 128)                 # lane-dense gate / hidden width
        Vp = _round_up(V, 128)
        self._Hp, self._Vp = Hp, Vp

        ks = jax.random.split(key, 15)
        g = 1.0 / float(H) ** 0.5
        u = lambda k, shape: jax.random.uniform(k, shape, jnp.float32, -g, g)

        # nn.Embedding default init: N(0, 1).
        emb = jax.random.normal(ks[0], (V, E), jnp.float32)
        # nn.GRU default init U(-1/sqrt(H), 1/sqrt(H)); gate order (r, z, n).
        w_ir, w_iz, w_in = u(ks[1], (E, H)), u(ks[2], (E, H)), u(ks[3], (E, H))
        w_hr, w_hz, w_hn = u(ks[4], (H, H)), u(ks[5], (H, H)), u(ks[6], (H, H))
        b_ir, b_hr = u(ks[7], (1, H)), u(ks[8], (1, H))
        b_iz, b_hz = u(ks[9], (1, H)), u(ks[10], (1, H))
        b_in, b_hn = u(ks[11], (1, H)), u(ks[12], (1, H))
        # nn.Linear(hidden_dim, vocab_size) default init U(-1/sqrt(H), 1/sqrt(H)).
        w_out, b_out = u(ks[13], (H, V)), u(ks[14], (1, V))

        padH = lambda w: jnp.pad(w, ((0, 0), (0, Hp - H)))          # pad cols H->Hp
        padHH = lambda w: jnp.pad(w, ((0, Hp - H), (0, Hp - H)))    # pad both

        # Fused input-gate weights, folded with the embedding table once:
        #   emb_wi[v] = emb[v] @ [W_ir | W_iz | W_in]   (H-padded columns)
        w_i = jnp.concatenate([padH(w_ir), padH(w_iz), padH(w_in)], axis=1)
        self.emb_wi = (emb @ w_i).astype(jnp.bfloat16)              # (V, 3Hp)
        # Fused hidden-gate weights.
        self.w_h = jnp.concatenate([padHH(w_hr), padHH(w_hz), padHH(w_hn)],
                                   axis=1).astype(jnp.bfloat16)     # (Hp, 3Hp)
        # Combined biases: r/z get b_ih+b_hh, n keeps b_in (b_hn separate
        # because of the r * (W_hn h + b_hn) form).
        self.b_g = jnp.concatenate([padH(b_ir + b_hr), padH(b_iz + b_hz),
                                    padH(b_in)], axis=1)            # (1, 3Hp) f32
        self.b_hn = padH(b_hn)                                      # (1, Hp) f32
        # Output projection; padded vocab lanes get a -1e9 bias so log_softmax
        # normalization ignores them.
        self.w_out = jnp.pad(w_out, ((0, Hp - H), (0, Vp - V))).astype(jnp.bfloat16)
        self.b_out = jnp.pad(b_out, ((0, 0), (0, Vp - V)), constant_values=-1e9)

    def _params(self):
        return (self.emb_wi, self.w_h, self.b_g, self.b_hn, self.w_out, self.b_out)

    def init_hidden(self, batch_size=1):
        # Matches torch.zeros(1, batch_size, hidden_dim)
        return jnp.zeros((1, batch_size, self.hidden_dim), jnp.float32)

    def forward(self, inp, hidden):
        """Single step, same API as the PyTorch module: (B,) ids, (1,B,H)."""
        tokens_tb = jnp.reshape(inp, (1, -1)).astype(jnp.int32)     # (1, B)
        h0 = jnp.reshape(hidden, (-1, self.hidden_dim))             # (B, H)
        logp_seq, h_fin = _generator_forward(tokens_tb, h0, *self._params())
        return logp_seq[0], h_fin.reshape(1, -1, self.hidden_dim)

    def forward_seq(self, tokens_tb, hidden):
        """Fused teacher-forced rollout: tokens (T,B) ids, hidden (1,B,H)."""
        h0 = jnp.reshape(hidden, (-1, self.hidden_dim))
        logp_seq, h_fin = _generator_forward(tokens_tb.astype(jnp.int32), h0,
                                             *self._params())
        return logp_seq, h_fin.reshape(1, -1, self.hidden_dim)


# --------------------------------- main --------------------------------------
if __name__ == "__main__":
    key = jax.random.PRNGKey(0)
    k_params, k_tokens = jax.random.split(key)

    embedding_dim = 32
    hidden_dim = 32
    vocab_size = 256
    max_seq_len = 8
    batch = 4

    gen = Generator(embedding_dim, hidden_dim, vocab_size, max_seq_len, k_params)

    tokens = jax.random.randint(k_tokens, (max_seq_len, batch), 0, vocab_size,
                                jnp.int32)                          # (T, B)
    hidden = gen.init_hidden(batch)

    # Fused rollout: one sequential pallas_call (GRU) + one parallel pallas_call
    # (vocab projection + log_softmax) for all max_seq_len steps.
    logp_seq, h_T = gen.forward_seq(tokens, hidden)
    logp_seq = jax.block_until_ready(logp_seq)
    h_T = jax.block_until_ready(h_T)

    assert logp_seq.shape == (max_seq_len, batch, vocab_size)
    assert h_T.shape == (1, batch, hidden_dim)
    row_sums = jnp.exp(logp_seq).sum(axis=-1)
    assert bool(jnp.all(jnp.abs(row_sums - 1.0) < 1e-4))
    assert bool(jnp.all(jnp.isfinite(logp_seq))) and bool(jnp.all(jnp.isfinite(h_T)))

    # Single-step forward() (original PyTorch API) must match the fused rollout.
    h = hidden
    step_out = []
    for i in range(max_seq_len):
        out, h = gen.forward(tokens[i], h)
        step_out.append(out)
    step_out = jax.block_until_ready(jnp.stack(step_out, axis=0))
    h = jax.block_until_ready(h)

    assert step_out.shape == (max_seq_len, batch, vocab_size)
    assert bool(jnp.all(jnp.abs(step_out - logp_seq) < 1e-4))
    assert bool(jnp.all(jnp.abs(h - h_T) < 1e-4))

    print("KERNEL_OK")
</pallas_src>

<mosaic_0001>
module attributes {stable_mosaic.version = 11 : i64} {
  func.func @_vocab_proj_kernel(%arg0: i32, %arg1: memref<128x128xf32, #tpu.memory_space<vmem>>, %arg2: memref<128x256xbf16, #tpu.memory_space<vmem>>, %arg3: memref<1x256xf32, #tpu.memory_space<vmem>>, %arg4: memref<128x256xf32, #tpu.memory_space<vmem>>) attributes {dimension_semantics = [#tpu.dimension_semantics<parallel>], iteration_bounds = array<i64: 1>, scalar_prefetch = 0 : i64, scratch_operands = 0 : i64, tpu.core_type = #tpu.core_type<tc>, window_params = [{transform_indices = @transform_0, window_bounds = array<i64: 128, 128>}, {pipeline_mode = #tpu.pipeline_mode<synchronous>, transform_indices = @transform_1, window_bounds = array<i64: 128, 256>}, {pipeline_mode = #tpu.pipeline_mode<synchronous>, transform_indices = @transform_2, window_bounds = array<i64: 1, 256>}, {transform_indices = @transform_3, window_bounds = array<i64: 128, 256>}]} {
    %c0 = arith.constant 0 : index
    %c0_0 = arith.constant 0 : index
    %0 = vector.load %arg1[%c0, %c0_0] : memref<128x128xf32, #tpu.memory_space<vmem>>, vector<128x128xf32>
    %1 = arith.truncf %0 : vector<128x128xf32> to vector<128x128xbf16>
    %c0_1 = arith.constant 0 : index
    %c0_2 = arith.constant 0 : index
    %2 = vector.load %arg2[%c0_1, %c0_2] : memref<128x256xbf16, #tpu.memory_space<vmem>>, vector<128x256xbf16>
    %cst = arith.constant dense<0.000000e+00> : vector<128x256xf32>
    %3 = tpu.matmul %1, %2, %cst {dimension_numbers = #tpu.dot_dimension_numbers<[1], [0], [0], [1], [0, 0, 1, 1], [], []>} : vector<128x128xbf16>, vector<128x256xbf16>, vector<128x256xf32> -> vector<128x256xf32>
    %c0_3 = arith.constant 0 : index
    %c0_4 = arith.constant 0 : index
    %4 = vector.load %arg3[%c0_3, %c0_4] : memref<1x256xf32, #tpu.memory_space<vmem>>, vector<1x256xf32>
    %5 = vector.broadcast %4 : vector<1x256xf32> to vector<128x256xf32>
    %6 = arith.addf %3, %5 : vector<128x256xf32>
    %cst_5 = arith.constant dense<0xFF800000> : vector<128xf32>
    %7 = vector.multi_reduction <maximumf>, %6, %cst_5 [1] : vector<128x256xf32> to vector<128xf32>
    %8 = vector.shape_cast %7 : vector<128xf32> to vector<128x1xf32>
    %9 = vector.broadcast %8 : vector<128x1xf32> to vector<128x256xf32>
    %10 = arith.subf %6, %9 : vector<128x256xf32>
    %11 = math.exp %10 : vector<128x256xf32>
    %cst_6 = arith.constant dense<0.000000e+00> : vector<128xf32>
    %12 = vector.multi_reduction <add>, %11, %cst_6 [1] : vector<128x256xf32> to vector<128xf32>
    %13 = vector.shape_cast %12 : vector<128xf32> to vector<128x1xf32>
    %14 = math.log %13 : vector<128x1xf32>
    %15 = vector.broadcast %14 : vector<128x1xf32> to vector<128x256xf32>
    %16 = arith.subf %10, %15 : vector<128x256xf32>
    %c0_7 = arith.constant 0 : index
    %c0_8 = arith.constant 0 : index
    %17 = vector.load %arg4[%c0_7, %c0_8] : memref<128x256xf32, #tpu.memory_space<vmem>>, vector<128x256xf32>
    tpu.vector_store %arg4[%c0_7, %c0_8], %16 {strides = array<i32>} : memref<128x256xf32, #tpu.memory_space<vmem>>, vector<128x256xf32>,
    return
  }
  func.func @transform_0(%arg0: i32) -> (i32, i32) {
    %c0_i32 = arith.constant 0 : i32
    %c0_i32_0 = arith.constant 0 : i32
    return %arg0, %c0_i32 : i32, i32
  }
  func.func @transform_1(%arg0: i32) -> (i32, i32) {
    %c0_i32 = arith.constant 0 : i32
    %c0_i32_0 = arith.constant 0 : i32
    %c0_i32_1 = arith.constant 0 : i32
    return %c0_i32, %c0_i32_0 : i32, i32
  }
  func.func @transform_2(%arg0: i32) -> (i32, i32) {
    %c0_i32 = arith.constant 0 : i32
    %c0_i32_0 = arith.constant 0 : i32
    %c0_i32_1 = arith.constant 0 : i32
    return %c0_i32, %c0_i32_0 : i32, i32
  }
  func.func @transform_3(%arg0: i32) -> (i32, i32) {
    %c0_i32 = arith.constant 0 : i32
    %c0_i32_0 = arith.constant 0 : i32
    return %arg0, %c0_i32 : i32, i32
  }
}

module attributes {stable_mosaic.version = 11 : i64} {
  func.func @_gru_rollout_kernel(%arg0: i32, %arg1: memref<8x16x1xi32, #tpu.memory_space<vmem>>, %arg2: memref<16x128xf32, #tpu.memory_space<vmem>>, %arg3: memref<256x384xbf16, #tpu.memory_space<vmem>>, %arg4: memref<128x384xbf16, #tpu.memory_space<vmem>>, %arg5: memref<1x384xf32, #tpu.memory_space<vmem>>, %arg6: memref<1x128xf32, #tpu.memory_space<vmem>>, %arg7: memref<8x16x128xf32, #tpu.memory_space<vmem>>, %arg8: memref<16x128xf32, #tpu.memory_space<vmem>>) attributes {dimension_semantics = [#tpu.dimension_semantics<arbitrary>], iteration_bounds = array<i64: 1>, scalar_prefetch = 0 : i64, scratch_operands = 1 : i64, tpu.core_type = #tpu.core_type<tc>, window_params = [{transform_indices = @transform_0, window_bounds = array<i64: 8, 16, 1>}, {pipeline_mode = #tpu.pipeline_mode<synchronous>, transform_indices = @transform_1, window_bounds = array<i64: 16, 128>}, {pipeline_mode = #tpu.pipeline_mode<synchronous>, transform_indices = @transform_2, window_bounds = array<i64: 256, 384>}, {pipeline_mode = #tpu.pipeline_mode<synchronous>, transform_indices = @transform_3, window_bounds = array<i64: 128, 384>}, {pipeline_mode = #tpu.pipeline_mode<synchronous>, transform_indices = @transform_4, window_bounds = array<i64: 1, 384>}, {pipeline_mode = #tpu.pipeline_mode<synchronous>, transform_indices = @transform_5, window_bounds = array<i64: 1, 128>}, {transform_indices = @transform_6, window_bounds = array<i64: 8, 16, 128>}]} {
    %c0_i32 = arith.constant 0 : i32
    %0 = arith.cmpi eq, %arg0, %c0_i32 : i32
    %1 = arith.extui %0 : i1 to i32
    %c0_i32_0 = arith.constant 0 : i32
    %2 = arith.cmpi ne, %1, %c0_i32_0 : i32
    scf.if %2 {
      %c0_136 = arith.constant 0 : index
      %c0_137 = arith.constant 0 : index
      %376 = vector.load %arg2[%c0_136, %c0_137] : memref<16x128xf32, #tpu.memory_space<vmem>>, vector<16x128xf32>
      %c0_138 = arith.constant 0 : index
      %c0_139 = arith.constant 0 : index
      %377 = vector.load %arg8[%c0_138, %c0_139] : memref<16x128xf32, #tpu.memory_space<vmem>>, vector<16x128xf32>
      tpu.vector_store %arg8[%c0_138, %c0_139], %376 {strides = array<i32>} : memref<16x128xf32, #tpu.memory_space<vmem>>, vector<16x128xf32>,
    } else {
    }
    %3 = tpu.iota {dimensions = array<i32: 1>} : vector<16x256xi32>
    %c0 = arith.constant 0 : index
    %c0_1 = arith.constant 0 : index
    %4 = vector.load %arg5[%c0, %c0_1] : memref<1x384xf32, #tpu.memory_space<vmem>>, vector<1x384xf32>
    %c0_2 = arith.constant 0 : index
    %c0_3 = arith.constant 0 : index
    %5 = vector.load %arg6[%c0_2, %c0_3] : memref<1x128xf32, #tpu.memory_space<vmem>>, vector<1x128xf32>
    %c0_4 = arith.constant 0 : index
    %c0_5 = arith.constant 0 : index
    %6 = vector.load %arg8[%c0_4, %c0_5] : memref<16x128xf32, #tpu.memory_space<vmem>>, vector<16x128xf32>
    %c0_6 = arith.constant 0 : index
    %c0_7 = arith.constant 0 : index
    %c0_8 = arith.constant 0 : index
    %7 = vector.load %arg1[%c0_6, %c0_7, %c0_8] : memref<8x16x1xi32, #tpu.memory_space<vmem>>, vector<1x16x1xi32>
    %8 = vector.shape_cast %7 : vector<1x16x1xi32> to vector<16x1xi32>
    %9 = vector.broadcast %8 : vector<16x1xi32> to vector<16x256xi32>
    %10 = arith.cmpi eq, %3, %9 : vector<16x256xi32>
    %cst = arith.constant 1.000000e+00 : f32
    %cst_9 = arith.constant 0.000000e+00 : f32
    %11 = vector.broadcast %cst : f32 to vector<16x256xf32>
    %12 = vector.broadcast %cst_9 : f32 to vector<16x256xf32>
    %13 = arith.select %10, %11, %12 : vector<16x256xi1>, vector<16x256xf32>
    %14 = arith.truncf %13 : vector<16x256xf32> to vector<16x256xbf16>
    %c0_10 = arith.constant 0 : index
    %c0_11 = arith.constant 0 : index
    %15 = vector.load %arg3[%c0_10, %c0_11] : memref<256x384xbf16, #tpu.memory_space<vmem>>, vector<256x384xbf16>
    %cst_12 = arith.constant dense<0.000000e+00> : vector<16x384xf32>
    %16 = tpu.matmul %14, %15, %cst_12 {dimension_numbers = #tpu.dot_dimension_numbers<[1], [0], [0], [1], [0, 0, 1, 1], [], []>} : vector<16x256xbf16>, vector<256x384xbf16>, vector<16x384xf32> -> vector<16x384xf32>
    %17 = vector.broadcast %4 : vector<1x384xf32> to vector<16x384xf32>
    %18 = arith.addf %16, %17 : vector<16x384xf32>
    %19 = arith.truncf %6 : vector<16x128xf32> to vector<16x128xbf16>
    %c0_13 = arith.constant 0 : index
    %c0_14 = arith.constant 0 : index
    %20 = vector.load %arg4[%c0_13, %c0_14] : memref<128x384xbf16, #tpu.memory_space<vmem>>, vector<128x384xbf16>
    %cst_15 = arith.constant dense<0.000000e+00> : vector<16x384xf32>
    %21 = tpu.matmul %19, %20, %cst_15 {dimension_numbers = #tpu.dot_dimension_numbers<[1], [0], [0], [1], [0, 0, 1, 1], [], []>} : vector<16x128xbf16>, vector<128x384xbf16>, vector<16x384xf32> -> vector<16x384xf32>
    %22 = vector.extract_strided_slice %18 {offsets = [0, 0], sizes = [16, 128], strides = [1, 1]} : vector<16x384xf32> to vector<16x128xf32>
    %23 = vector.extract_strided_slice %21 {offsets = [0, 0], sizes = [16, 128], strides = [1, 1]} : vector<16x384xf32> to vector<16x128xf32>
    %24 = arith.addf %22, %23 : vector<16x128xf32>
    %25 = arith.negf %24 : vector<16x128xf32>
    %26 = math.exp %25 : vector<16x128xf32>
    %cst_16 = arith.constant 1.000000e+00 : f32
    %27 = vector.broadcast %cst_16 : f32 to vector<16x128xf32>
    %28 = arith.addf %27, %26 : vector<16x128xf32>
    %29 = arith.divf %27, %28 : vector<16x128xf32>
    %30 = vector.extract_strided_slice %18 {offsets = [0, 128], sizes = [16, 128], strides = [1, 1]} : vector<16x384xf32> to vector<16x128xf32>
    %31 = vector.extract_strided_slice %21 {offsets = [0, 128], sizes = [16, 128], strides = [1, 1]} : vector<16x384xf32> to vector<16x128xf32>
    %32 = arith.addf %30, %31 : vector<16x128xf32>
    %33 = arith.negf %32 : vector<16x128xf32>
    %34 = math.exp %33 : vector<16x128xf32>
    %cst_17 = arith.constant 1.000000e+00 : f32
    %35 = vector.broadcast %cst_17 : f32 to vector<16x128xf32>
    %36 = arith.addf %35, %34 : vector<16x128xf32>
    %37 = arith.divf %35, %36 : vector<16x128xf32>
    %38 = vector.extract_strided_slice %18 {offsets = [0, 256], sizes = [16, 128], strides = [1, 1]} : vector<16x384xf32> to vector<16x128xf32>
    %39 = vector.extract_strided_slice %21 {offsets = [0, 256], sizes = [16, 128], strides = [1, 1]} : vector<16x384xf32> to vector<16x128xf32>
    %40 = vector.broadcast %5 : vector<1x128xf32> to vector<16x128xf32>
    %41 = arith.addf %39, %40 : vector<16x128xf32>
    %42 = arith.mulf %29, %41 : vector<16x128xf32>
    %43 = arith.addf %38, %42 : vector<16x128xf32>
    %44 = math.tanh %43 : vector<16x128xf32>
    %cst_18 = arith.constant 1.000000e+00 : f32
    %45 = vector.broadcast %cst_18 : f32 to vector<16x128xf32>
    %46 = arith.subf %45, %37 : vector<16x128xf32>
    %47 = arith.mulf %46, %44 : vector<16x128xf32>
    %48 = arith.mulf %37, %6 : vector<16x128xf32>
    %49 = arith.addf %47, %48 : vector<16x128xf32>
    %c0_19 = arith.constant 0 : index
    %c0_20 = arith.constant 0 : index
    %c0_21 = arith.constant 0 : index
    %50 = vector.load %arg7[%c0_19, %c0_20, %c0_21] : memref<8x16x128xf32, #tpu.memory_space<vmem>>, vector<1x16x128xf32>
    %51 = vector.shape_cast %50 : vector<1x16x128xf32> to vector<16x128xf32>
    %52 = vector.shape_cast %49 : vector<16x128xf32> to vector<1x16x128xf32>
    tpu.vector_store %arg7[%c0_19, %c0_20, %c0_21], %52 {strides = array<i32>} : memref<8x16x128xf32, #tpu.memory_space<vmem>>, vector<1x16x128xf32>,
    %c1 = arith.constant 1 : index
    %c0_22 = arith.constant 0 : index
    %c0_23 = arith.constant 0 : index
    %53 = vector.load %arg1[%c1, %c0_22, %c0_23] : memref<8x16x1xi32, #tpu.memory_space<vmem>>, vector<1x16x1xi32>
    %54 = vector.shape_cast %53 : vector<1x16x1xi32> to vector<16x1xi32>
    %55 = vector.broadcast %54 : vector<16x1xi32> to vector<16x256xi32>
    %56 = arith.cmpi eq, %3, %55 : vector<16x256xi32>
    %cst_24 = arith.constant 1.000000e+00 : f32
    %cst_25 = arith.constant 0.000000e+00 : f32
    %57 = vector.broadcast %cst_24 : f32 to vector<16x256xf32>
    %58 = vector.broadcast %cst_25 : f32 to vector<16x256xf32>
    %59 = arith.select %56, %57, %58 : vector<16x256xi1>, vector<16x256xf32>
    %60 = arith.truncf %59 : vector<16x256xf32> to vector<16x256xbf16>
    %c0_26 = arith.constant 0 : index
    %c0_27 = arith.constant 0 : index
    %61 = vector.load %arg3[%c0_26, %c0_27] : memref<256x384xbf16, #tpu.memory_space<vmem>>, vector<256x384xbf16>
    %cst_28 = arith.constant dense<0.000000e+00> : vector<16x384xf32>
    %62 = tpu.matmul %60, %61, %cst_28 {dimension_numbers = #tpu.dot_dimension_numbers<[1], [0], [0], [1], [0, 0, 1, 1], [], []>} : vector<16x256xbf16>, vector<256x384xbf16>, vector<16x384xf32> -> vector<16x384xf32>
    %63 = vector.broadcast %4 : vector<1x384xf32> to vector<16x384xf32>
    %64 = arith.addf %62, %63 : vector<16x384xf32>
    %65 = arith.truncf %49 : vector<16x128xf32> to vector<16x128xbf16>
    %c0_29 = arith.constant 0 : index
    %c0_30 = arith.constant 0 : index
    %66 = vector.load %arg4[%c0_29, %c0_30] : memref<128x384xbf16, #tpu.memory_space<vmem>>, vector<128x384xbf16>
    %cst_31 = arith.constant dense<0.000000e+00> : vector<16x384xf32>
    %67 = tpu.matmul %65, %66, %cst_31 {dimension_numbers = #tpu.dot_dimension_numbers<[1], [0], [0], [1], [0, 0, 1, 1], [], []>} : vector<16x128xbf16>, vector<128x384xbf16>, vector<16x384xf32> -> vector<16x384xf32>
    %68 = vector.extract_strided_slice %64 {offsets = [0, 0], sizes = [16, 128], strides = [1, 1]} : vector<16x384xf32> to vector<16x128xf32>
    %69 = vector.extract_strided_slice %67 {offsets = [0, 0], sizes = [16, 128], strides = [1, 1]} : vector<16x384xf32> to vector<16x128xf32>
    %70 = arith.addf %68, %69 : vector<16x128xf32>
    %71 = arith.negf %70 : vector<16x128xf32>
    %72 = math.exp %71 : vector<16x128xf32>
    %cst_32 = arith.constant 1.000000e+00 : f32
    %73 = vector.broadcast %cst_32 : f32 to vector<16x128xf32>
    %74 = arith.addf %73, %72 : vector<16x128xf32>
    %75 = arith.divf %73, %74 : vector<16x128xf32>
    %76 = vector.extract_strided_slice %64 {offsets = [0, 128], sizes = [16, 128], strides = [1, 1]} : vector<16x384xf32> to vector<16x128xf32>
    %77 = vector.extract_strided_slice %67 {offsets = [0, 128], sizes = [16, 128], strides = [1, 1]} : vector<16x384xf32> to vector<16x128xf32>
    %78 = arith.addf %76, %77 : vector<16x128xf32>
    %79 = arith.negf %78 : vector<16x128xf32>
    %80 = math.exp %79 : vector<16x128xf32>
    %cst_33 = arith.constant 1.000000e+00 : f32
    %81 = vector.broadcast %cst_33 : f32 to vector<16x128xf32>
    %82 = arith.addf %81, %80 : vector<16x128xf32>
    %83 = arith.divf %81, %82 : vector<16x128xf32>
    %84 = vector.extract_strided_slice %64 {offsets = [0, 256], sizes = [16, 128], strides = [1, 1]} : vector<16x384xf32> to vector<16x128xf32>
    %85 = vector.extract_strided_slice %67 {offsets = [0, 256], sizes = [16, 128], strides = [1, 1]} : vector<16x384xf32> to vector<16x128xf32>
    %86 = vector.broadcast %5 : vector<1x128xf32> to vector<16x128xf32>
    %87 = arith.addf %85, %86 : vector<16x128xf32>
    %88 = arith.mulf %75, %87 : vector<16x128xf32>
    %89 = arith.addf %84, %88 : vector<16x128xf32>
    %90 = math.tanh %89 : vector<16x128xf32>
    %cst_34 = arith.constant 1.000000e+00 : f32
    %91 = vector.broadcast %cst_34 : f32 to vector<16x128xf32>
    %92 = arith.subf %91, %83 : vector<16x128xf32>
    %93 = arith.mulf %92, %90 : vector<16x128xf32>
    %94 = arith.mulf %83, %49 : vector<16x128xf32>
    %95 = arith.addf %93, %94 : vector<16x128xf32>
    %c1_35 = arith.constant 1 : index
    %c0_36 = arith.constant 0 : index
    %c0_37 = arith.constant 0 : index
    %96 = vector.load %arg7[%c1_35, %c0_36, %c0_37] : memref<8x16x128xf32, #tpu.memory_space<vmem>>, vector<1x16x128xf32>
    %97 = vector.shape_cast %96 : vector<1x16x128xf32> to vector<16x128xf32>
    %98 = vector.shape_cast %95 : vector<16x128xf32> to vector<1x16x128xf32>
    tpu.vector_store %arg7[%c1_35, %c0_36, %c0_37], %98 {strides = array<i32>} : memref<8x16x128xf32, #tpu.memory_space<vmem>>, vector<1x16x128xf32>,
    %c2 = arith.constant 2 : index
    %c0_38 = arith.constant 0 : index
    %c0_39 = arith.constant 0 : index
    %99 = vector.load %arg1[%c2, %c0_38, %c0_39] : memref<8x16x1xi32, #tpu.memory_space<vmem>>, vector<1x16x1xi32>
    %100 = vector.shape_cast %99 : vector<1x16x1xi32> to vector<16x1xi32>
    %101 = vector.broadcast %100 : vector<16x1xi32> to vector<16x256xi32>
    %102 = arith.cmpi eq, %3, %101 : vector<16x256xi32>
    %cst_40 = arith.constant 1.000000e+00 : f32
    %cst_41 = arith.constant 0.000000e+00 : f32
    %103 = vector.broadcast %cst_40 : f32 to vector<16x256xf32>
    %104 = vector.broadcast %cst_41 : f32 to vector<16x256xf32>
    %105 = arith.select %102, %103, %104 : vector<16x256xi1>, vector<16x256xf32>
    %106 = arith.truncf %105 : vector<16x256xf32> to vector<16x256xbf16>
    %c0_42 = arith.constant 0 : index
    %c0_43 = arith.constant 0 : index
    %107 = vector.load %arg3[%c0_42, %c0_43] : memref<256x384xbf16, #tpu.memory_space<vmem>>, vector<256x384xbf16>
    %cst_44 = arith.constant dense<0.000000e+00> : vector<16x384xf32>
    %108 = tpu.matmul %106, %107, %cst_44 {dimension_numbers = #tpu.dot_dimension_numbers<[1], [0], [0], [1], [0, 0, 1, 1], [], []>} : vector<16x256xbf16>, vector<256x384xbf16>, vector<16x384xf32> -> vector<16x384xf32>
    %109 = vector.broadcast %4 : vector<1x384xf32> to vector<16x384xf32>
    %110 = arith.addf %108, %109 : vector<16x384xf32>
    %111 = arith.truncf %95 : vector<16x128xf32> to vector<16x128xbf16>
    %c0_45 = arith.constant 0 : index
    %c0_46 = arith.constant 0 : index
    %112 = vector.load %arg4[%c0_45, %c0_46] : memref<128x384xbf16, #tpu.memory_space<vmem>>, vector<128x384xbf16>
    %cst_47 = arith.constant dense<0.000000e+00> : vector<16x384xf32>
    %113 = tpu.matmul %111, %112, %cst_47 {dimension_numbers = #tpu.dot_dimension_numbers<[1], [0], [0], [1], [0, 0, 1, 1], [], []>} : vector<16x128xbf16>, vector<128x384xbf16>, vector<16x384xf32> -> vector<16x384xf32>
    %114 = vector.extract_strided_slice %110 {offsets = [0, 0], sizes = [16, 128], strides = [1, 1]} : vector<16x384xf32> to vector<16x128xf32>
    %115 = vector.extract_strided_slice %113 {offsets = [0, 0], sizes = [16, 128], strides = [1, 1]} : vector<16x384xf32> to vector<16x128xf32>
    %116 = arith.addf %114, %115 : vector<16x128xf32>
    %117 = arith.negf %116 : vector<16x128xf32>
    %118 = math.exp %117 : vector<16x128xf32>
    %cst_48 = arith.constant 1.000000e+00 : f32
    %119 = vector.broadcast %cst_48 : f32 to vector<16x128xf32>
    %120 = arith.addf %119, %118 : vector<16x128xf32>
    %121 = arith.divf %119, %120 : vector<16x128xf32>
    %122 = vector.extract_strided_slice %110 {offsets = [0, 128], sizes = [16, 128], strides = [1, 1]} : vector<16x384xf32> to vector<16x128xf32>
    %123 = vector.extract_strided_slice %113 {offsets = [0, 128], sizes = [16, 128], strides = [1, 1]} : vector<16x384xf32> to vector<16x128xf32>
    %124 = arith.addf %122, %123 : vector<16x128xf32>
    %125 = arith.negf %124 : vector<16x128xf32>
    %126 = math.exp %125 : vector<16x128xf32>
    %cst_49 = arith.constant 1.000000e+00 : f32
    %127 = vector.broadcast %cst_49 : f32 to vector<16x128xf32>
    %128 = arith.addf %127, %126 : vector<16x128xf32>
    %129 = arith.divf %127, %128 : vector<16x128xf32>
    %130 = vector.extract_strided_slice %110 {offsets = [0, 256], sizes = [16, 128], strides = [1, 1]} : vector<16x384xf32> to vector<16x128xf32>
    %131 = vector.extract_strided_slice %113 {offsets = [0, 256], sizes = [16, 128], strides = [1, 1]} : vector<16x384xf32> to vector<16x128xf32>
    %132 = vector.broadcast %5 : vector<1x128xf32> to vector<16x128xf32>
    %133 = arith.addf %131, %132 : vector<16x128xf32>
    %134 = arith.mulf %121, %133 : vector<16x128xf32>
    %135 = arith.addf %130, %134 : vector<16x128xf32>
    %136 = math.tanh %135 : vector<16x128xf32>
    %cst_50 = arith.constant 1.000000e+00 : f32
    %137 = vector.broadcast %cst_50 : f32 to vector<16x128xf32>
    %138 = arith.subf %137, %129 : vector<16x128xf32>
    %139 = arith.mulf %138, %136 : vector<16x128xf32>
    %140 = arith.mulf %129, %95 : vector<16x128xf32>
    %141 = arith.addf %139, %140 : vector<16x128xf32>
    %c2_51 = arith.constant 2 : index
    %c0_52 = arith.constant 0 : index
    %c0_53 = arith.constant 0 : index
    %142 = vector.load %arg7[%c2_51, %c0_52, %c0_53] : memref<8x16x128xf32, #tpu.memory_space<vmem>>, vector<1x16x128xf32>
    %143 = vector.shape_cast %142 : vector<1x16x128xf32> to vector<16x128xf32>
    %144 = vector.shape_cast %141 : vector<16x128xf32> to vector<1x16x128xf32>
    tpu.vector_store %arg7[%c2_51, %c0_52, %c0_53], %144 {strides = array<i32>} : memref<8x16x128xf32, #tpu.memory_space<vmem>>, vector<1x16x128xf32>,
    %c3 = arith.constant 3 : index
    %c0_54 = arith.constant 0 : index
    %c0_55 = arith.constant 0 : index
    %145 = vector.load %arg1[%c3, %c0_54, %c0_55] : memref<8x16x1xi32, #tpu.memory_space<vmem>>, vector<1x16x1xi32>
    %146 = vector.shape_cast %145 : vector<1x16x1xi32> to vector<16x1xi32>
    %147 = vector.broadcast %146 : vector<16x1xi32> to vector<16x256xi32>
    %148 = arith.cmpi eq, %3, %147 : vector<16x256xi32>
    %cst_56 = arith.constant 1.000000e+00 : f32
    %cst_57 = arith.constant 0.000000e+00 : f32
    %149 = vector.broadcast %cst_56 : f32 to vector<16x256xf32>
    %150 = vector.broadcast %cst_57 : f32 to vector<16x256xf32>
    %151 = arith.select %148, %149, %150 : vector<16x256xi1>, vector<16x256xf32>
    %152 = arith.truncf %151 : vector<16x256xf32> to vector<16x256xbf16>
    %c0_58 = arith.constant 0 : index
    %c0_59 = arith.constant 0 : index
    %153 = vector.load %arg3[%c0_58, %c0_59] : memref<256x384xbf16, #tpu.memory_space<vmem>>, vector<256x384xbf16>
    %cst_60 = arith.constant dense<0.000000e+00> : vector<16x384xf32>
    %154 = tpu.matmul %152, %153, %cst_60 {dimension_numbers = #tpu.dot_dimension_numbers<[1], [0], [0], [1], [0, 0, 1, 1], [], []>} : vector<16x256xbf16>, vector<256x384xbf16>, vector<16x384xf32> -> vector<16x384xf32>
    %155 = vector.broadcast %4 : vector<1x384xf32> to vector<16x384xf32>
    %156 = arith.addf %154, %155 : vector<16x384xf32>
    %157 = arith.truncf %141 : vector<16x128xf32> to vector<16x128xbf16>
    %c0_61 = arith.constant 0 : index
    %c0_62 = arith.constant 0 : index
    %158 = vector.load %arg4[%c0_61, %c0_62] : memref<128x384xbf16, #tpu.memory_space<vmem>>, vector<128x384xbf16>
    %cst_63 = arith.constant dense<0.000000e+00> : vector<16x384xf32>
    %159 = tpu.matmul %157, %158, %cst_63 {dimension_numbers = #tpu.dot_dimension_numbers<[1], [0], [0], [1], [0, 0, 1, 1], [], []>} : vector<16x128xbf16>, vector<128x384xbf16>, vector<16x384xf32> -> vector<16x384xf32>
    %160 = vector.extract_strided_slice %156 {offsets = [0, 0], sizes = [16, 128], strides = [1, 1]} : vector<16x384xf32> to vector<16x128xf32>
    %161 = vector.extract_strided_slice %159 {offsets = [0, 0], sizes = [16, 128], strides = [1, 1]} : vector<16x384xf32> to vector<16x128xf32>
    %162 = arith.addf %160, %161 : vector<16x128xf32>
    %163 = arith.negf %162 : vector<16x128xf32>
    %164 = math.exp %163 : vector<16x128xf32>
    %cst_64 = arith.constant 1.000000e+00 : f32
    %165 = vector.broadcast %cst_64 : f32 to vector<16x128xf32>
    %166 = arith.addf %165, %164 : vector<16x128xf32>
    %167 = arith.divf %165, %166 : vector<16x128xf32>
    %168 = vector.extract_strided_slice %156 {offsets = [0, 128], sizes = [16, 128], strides = [1, 1]} : vector<16x384xf32> to vector<16x128xf32>
    %169 = vector.extract_strided_slice %159 {offsets = [0, 128], sizes = [16, 128], strides = [1, 1]} : vector<16x384xf32> to vector<16x128xf32>
    %170 = arith.addf %168, %169 : vector<16x128xf32>
    %171 = arith.negf %170 : vector<16x128xf32>
    %172 = math.exp %171 : vector<16x128xf32>
    %cst_65 = arith.constant 1.000000e+00 : f32
    %173 = vector.broadcast %cst_65 : f32 to vector<16x128xf32>
    %174 = arith.addf %173, %172 : vector<16x128xf32>
    %175 = arith.divf %173, %174 : vector<16x128xf32>
    %176 = vector.extract_strided_slice %156 {offsets = [0, 256], sizes = [16, 128], strides = [1, 1]} : vector<16x384xf32> to vector<16x128xf32>
    %177 = vector.extract_strided_slice %159 {offsets = [0, 256], sizes = [16, 128], strides = [1, 1]} : vector<16x384xf32> to vector<16x128xf32>
    %178 = vector.broadcast %5 : vector<1x128xf32> to vector<16x128xf32>
    %179 = arith.addf %177, %178 : vector<16x128xf32>
    %180 = arith.mulf %167, %179 : vector<16x128xf32>
    %181 = arith.addf %176, %180 : vector<16x128xf32>
    %182 = math.tanh %181 : vector<16x128xf32>
    %cst_66 = arith.constant 1.000000e+00 : f32
    %183 = vector.broadcast %cst_66 : f32 to vector<16x128xf32>
    %184 = arith.subf %183, %175 : vector<16x128xf32>
    %185 = arith.mulf %184, %182 : vector<16x128xf32>
    %186 = arith.mulf %175, %141 : vector<16x128xf32>
    %187 = arith.addf %185, %186 : vector<16x128xf32>
    %c3_67 = arith.constant 3 : index
    %c0_68 = arith.constant 0 : index
    %c0_69 = arith.constant 0 : index
    %188 = vector.load %arg7[%c3_67, %c0_68, %c0_69] : memref<8x16x128xf32, #tpu.memory_space<vmem>>, vector<1x16x128xf32>
    %189 = vector.shape_cast %188 : vector<1x16x128xf32> to vector<16x128xf32>
    %190 = vector.shape_cast %187 : vector<16x128xf32> to vector<1x16x128xf32>
    tpu.vector_store %arg7[%c3_67, %c0_68, %c0_69], %190 {strides = array<i32>} : memref<8x16x128xf32, #tpu.memory_space<vmem>>, vector<1x16x128xf32>,
    %c4 = arith.constant 4 : index
    %c0_70 = arith.constant 0 : index
    %c0_71 = arith.constant 0 : index
    %191 = vector.load %arg1[%c4, %c0_70, %c0_71] : memref<8x16x1xi32, #tpu.memory_space<vmem>>, vector<1x16x1xi32>
    %192 = vector.shape_cast %191 : vector<1x16x1xi32> to vector<16x1xi32>
    %193 = vector.broadcast %192 : vector<16x1xi32> to vector<16x256xi32>
    %194 = arith.cmpi eq, %3, %193 : vector<16x256xi32>
    %cst_72 = arith.constant 1.000000e+00 : f32
    %cst_73 = arith.constant 0.000000e+00 : f32
    %195 = vector.broadcast %cst_72 : f32 to vector<16x256xf32>
    %196 = vector.broadcast %cst_73 : f32 to vector<16x256xf32>
    %197 = arith.select %194, %195, %196 : vector<16x256xi1>, vector<16x256xf32>
    %198 = arith.truncf %197 : vector<16x256xf32> to vector<16x256xbf16>
    %c0_74 = arith.constant 0 : index
    %c0_75 = arith.constant 0 : index
    %199 = vector.load %arg3[%c0_74, %c0_75] : memref<256x384xbf16, #tpu.memory_space<vmem>>, vector<256x384xbf16>
    %cst_76 = arith.constant dense<0.000000e+00> : vector<16x384xf32>
    %200 = tpu.matmul %198, %199, %cst_76 {dimension_numbers = #tpu.dot_dimension_numbers<[1], [0], [0], [1], [0, 0, 1, 1], [], []>} : vector<16x256xbf16>, vector<256x384xbf16>, vector<16x384xf32> -> vector<16x384xf32>
    %201 = vector.broadcast %4 : vector<1x384xf32> to vector<16x384xf32>
    %202 = arith.addf %200, %201 : vector<16x384xf32>
    %203 = arith.truncf %187 : vector<16x128xf32> to vector<16x128xbf16>
    %c0_77 = arith.constant 0 : index
    %c0_78 = arith.constant 0 : index
    %204 = vector.load %arg4[%c0_77, %c0_78] : memref<128x384xbf16, #tpu.memory_space<vmem>>, vector<128x384xbf16>
    %cst_79 = arith.constant dense<0.000000e+00> : vector<16x384xf32>
    %205 = tpu.matmul %203, %204, %cst_79 {dimension_numbers = #tpu.dot_dimension_numbers<[1], [0], [0], [1], [0, 0, 1, 1], [], []>} : vector<16x128xbf16>, vector<128x384xbf16>, vector<16x384xf32> -> vector<16x384xf32>
    %206 = vector.extract_strided_slice %202 {offsets = [0, 0], sizes = [16, 128], strides = [1, 1]} : vector<16x384xf32> to vector<16x128xf32>
    %207 = vector.extract_strided_slice %205 {offsets = [0, 0], sizes = [16, 128], strides = [1, 1]} : vector<16x384xf32> to vector<16x128xf32>
    %208 = arith.addf %206, %207 : vector<16x128xf32>
    %209 = arith.negf %208 : vector<16x128xf32>
    %210 = math.exp %209 : vector<16x128xf32>
    %cst_80 = arith.constant 1.000000e+00 : f32
    %211 = vector.broadcast %cst_80 : f32 to vector<16x128xf32>
    %212 = arith.addf %211, %210 : vector<16x128xf32>
    %213 = arith.divf %211, %212 : vector<16x128xf32>
    %214 = vector.extract_strided_slice %202 {offsets = [0, 128], sizes = [16, 128], strides = [1, 1]} : vector<16x384xf32> to vector<16x128xf32>
    %215 = vector.extract_strided_slice %205 {offsets = [0, 128], sizes = [16, 128], strides = [1, 1]} : vector<16x384xf32> to vector<16x128xf32>
    %216 = arith.addf %214, %215 : vector<16x128xf32>
    %217 = arith.negf %216 : vector<16x128xf32>
    %218 = math.exp %217 : vector<16x128xf32>
    %cst_81 = arith.constant 1.000000e+00 : f32
    %219 = vector.broadcast %cst_81 : f32 to vector<16x128xf32>
    %220 = arith.addf %219, %218 : vector<16x128xf32>
    %221 = arith.divf %219, %220 : vector<16x128xf32>
    %222 = vector.extract_strided_slice %202 {offsets = [0, 256], sizes = [16, 128], strides = [1, 1]} : vector<16x384xf32> to vector<16x128xf32>
    %223 = vector.extract_strided_slice %205 {offsets = [0, 256], sizes = [16, 128], strides = [1, 1]} : vector<16x384xf32> to vector<16x128xf32>
    %224 = vector.broadcast %5 : vector<1x128xf32> to vector<16x128xf32>
    %225 = arith.addf %223, %224 : vector<16x128xf32>
    %226 = arith.mulf %213, %225 : vector<16x128xf32>
    %227 = arith.addf %222, %226 : vector<16x128xf32>
    %228 = math.tanh %227 : vector<16x128xf32>
    %cst_82 = arith.constant 1.000000e+00 : f32
    %229 = vector.broadcast %cst_82 : f32 to vector<16x128xf32>
    %230 = arith.subf %229, %221 : vector<16x128xf32>
    %231 = arith.mulf %230, %228 : vector<16x128xf32>
    %232 = arith.mulf %221, %187 : vector<16x128xf32>
    %233 = arith.addf %231, %232 : vector<16x128xf32>
    %c4_83 = arith.constant 4 : index
    %c0_84 = arith.constant 0 : index
    %c0_85 = arith.constant 0 : index
    %234 = vector.load %arg7[%c4_83, %c0_84, %c0_85] : memref<8x16x128xf32, #tpu.memory_space<vmem>>, vector<1x16x128xf32>
    %235 = vector.shape_cast %234 : vector<1x16x128xf32> to vector<16x128xf32>
    %236 = vector.shape_cast %233 : vector<16x128xf32> to vector<1x16x128xf32>
    tpu.vector_store %arg7[%c4_83, %c0_84, %c0_85], %236 {strides = array<i32>} : memref<8x16x128xf32, #tpu.memory_space<vmem>>, vector<1x16x128xf32>,
    %c5 = arith.constant 5 : index
    %c0_86 = arith.constant 0 : index
    %c0_87 = arith.constant 0 : index
    %237 = vector.load %arg1[%c5, %c0_86, %c0_87] : memref<8x16x1xi32, #tpu.memory_space<vmem>>, vector<1x16x1xi32>
    %238 = vector.shape_cast %237 : vector<1x16x1xi32> to vector<16x1xi32>
    %239 = vector.broadcast %238 : vector<16x1xi32> to vector<16x256xi32>
    %240 = arith.cmpi eq, %3, %239 : vector<16x256xi32>
    %cst_88 = arith.constant 1.000000e+00 : f32
    %cst_89 = arith.constant 0.000000e+00 : f32
    %241 = vector.broadcast %cst_88 : f32 to vector<16x256xf32>
    %242 = vector.broadcast %cst_89 : f32 to vector<16x256xf32>
    %243 = arith.select %240, %241, %242 : vector<16x256xi1>, vector<16x256xf32>
    %244 = arith.truncf %243 : vector<16x256xf32> to vector<16x256xbf16>
    %c0_90 = arith.constant 0 : index
    %c0_91 = arith.constant 0 : index
    %245 = vector.load %arg3[%c0_90, %c0_91] : memref<256x384xbf16, #tpu.memory_space<vmem>>, vector<256x384xbf16>
    %cst_92 = arith.constant dense<0.000000e+00> : vector<16x384xf32>
    %246 = tpu.matmul %244, %245, %cst_92 {dimension_numbers = #tpu.dot_dimension_numbers<[1], [0], [0], [1], [0, 0, 1, 1], [], []>} : vector<16x256xbf16>, vector<256x384xbf16>, vector<16x384xf32> -> vector<16x384xf32>
    %247 = vector.broadcast %4 : vector<1x384xf32> to vector<16x384xf32>
    %248 = arith.addf %246, %247 : vector<16x384xf32>
    %249 = arith.truncf %233 : vector<16x128xf32> to vector<16x128xbf16>
    %c0_93 = arith.constant 0 : index
    %c0_94 = arith.constant 0 : index
    %250 = vector.load %arg4[%c0_93, %c0_94] : memref<128x384xbf16, #tpu.memory_space<vmem>>, vector<128x384xbf16>
    %cst_95 = arith.constant dense<0.000000e+00> : vector<16x384xf32>
    %251 = tpu.matmul %249, %250, %cst_95 {dimension_numbers = #tpu.dot_dimension_numbers<[1], [0], [0], [1], [0, 0, 1, 1], [], []>} : vector<16x128xbf16>, vector<128x384xbf16>, vector<16x384xf32> -> vector<16x384xf32>
    %252 = vector.extract_strided_slice %248 {offsets = [0, 0], sizes = [16, 128], strides = [1, 1]} : vector<16x384xf32> to vector<16x128xf32>
    %253 = vector.extract_strided_slice %251 {offsets = [0, 0], sizes = [16, 128], strides = [1, 1]} : vector<16x384xf32> to vector<16x128xf32>
    %254 = arith.addf %252, %253 : vector<16x128xf32>
    %255 = arith.negf %254 : vector<16x128xf32>
    %256 = math.exp %255 : vector<16x128xf32>
    %cst_96 = arith.constant 1.000000e+00 : f32
    %257 = vector.broadcast %cst_96 : f32 to vector<16x128xf32>
    %258 = arith.addf %257, %256 : vector<16x128xf32>
    %259 = arith.divf %257, %258 : vector<16x128xf32>
    %260 = vector.extract_strided_slice %248 {offsets = [0, 128], sizes = [16, 128], strides = [1, 1]} : vector<16x384xf32> to vector<16x128xf32>
    %261 = vector.extract_strided_slice %251 {offsets = [0, 128], sizes = [16, 128], strides = [1, 1]} : vector<16x384xf32> to vector<16x128xf32>
    %262 = arith.addf %260, %261 : vector<16x128xf32>
    %263 = arith.negf %262 : vector<16x128xf32>
    %264 = math.exp %263 : vector<16x128xf32>
    %cst_97 = arith.constant 1.000000e+00 : f32
    %265 = vector.broadcast %cst_97 : f32 to vector<16x128xf32>
    %266 = arith.addf %265, %264 : vector<16x128xf32>
    %267 = arith.divf %265, %266 : vector<16x128xf32>
    %268 = vector.extract_strided_slice %248 {offsets = [0, 256], sizes = [16, 128], strides = [1, 1]} : vector<16x384xf32> to vector<16x128xf32>
    %269 = vector.extract_strided_slice %251 {offsets = [0, 256], sizes = [16, 128], strides = [1, 1]} : vector<16x384xf32> to vector<16x128xf32>
    %270 = vector.broadcast %5 : vector<1x128xf32> to vector<16x128xf32>
    %271 = arith.addf %269, %270 : vector<16x128xf32>
    %272 = arith.mulf %259, %271 : vector<16x128xf32>
    %273 = arith.addf %268, %272 : vector<16x128xf32>
    %274 = math.tanh %273 : vector<16x128xf32>
    %cst_98 = arith.constant 1.000000e+00 : f32
    %275 = vector.broadcast %cst_98 : f32 to vector<16x128xf32>
    %276 = arith.subf %275, %267 : vector<16x128xf32>
    %277 = arith.mulf %276, %274 : vector<16x128xf32>
    %278 = arith.mulf %267, %233 : vector<16x128xf32>
    %279 = arith.addf %277, %278 : vector<16x128xf32>
    %c5_99 = arith.constant 5 : index
    %c0_100 = arith.constant 0 : index
    %c0_101 = arith.constant 0 : index
    %280 = vector.load %arg7[%c5_99, %c0_100, %c0_101] : memref<8x16x128xf32, #tpu.memory_space<vmem>>, vector<1x16x128xf32>
    %281 = vector.shape_cast %280 : vector<1x16x128xf32> to vector<16x128xf32>
    %282 = vector.shape_cast %279 : vector<16x128xf32> to vector<1x16x128xf32>
    tpu.vector_store %arg7[%c5_99, %c0_100, %c0_101], %282 {strides = array<i32>} : memref<8x16x128xf32, #tpu.memory_space<vmem>>, vector<1x16x128xf32>,
    %c6 = arith.constant 6 : index
    %c0_102 = arith.constant 0 : index
    %c0_103 = arith.constant 0 : index
    %283 = vector.load %arg1[%c6, %c0_102, %c0_103] : memref<8x16x1xi32, #tpu.memory_space<vmem>>, vector<1x16x1xi32>
    %284 = vector.shape_cast %283 : vector<1x16x1xi32> to vector<16x1xi32>
    %285 = vector.broadcast %284 : vector<16x1xi32> to vector<16x256xi32>
    %286 = arith.cmpi eq, %3, %285 : vector<16x256xi32>
    %cst_104 = arith.constant 1.000000e+00 : f32
    %cst_105 = arith.constant 0.000000e+00 : f32
    %287 = vector.broadcast %cst_104 : f32 to vector<16x256xf32>
    %288 = vector.broadcast %cst_105 : f32 to vector<16x256xf32>
    %289 = arith.select %286, %287, %288 : vector<16x256xi1>, vector<16x256xf32>
    %290 = arith.truncf %289 : vector<16x256xf32> to vector<16x256xbf16>
    %c0_106 = arith.constant 0 : index
    %c0_107 = arith.constant 0 : index
    %291 = vector.load %arg3[%c0_106, %c0_107] : memref<256x384xbf16, #tpu.memory_space<vmem>>, vector<256x384xbf16>
    %cst_108 = arith.constant dense<0.000000e+00> : vector<16x384xf32>
    %292 = tpu.matmul %290, %291, %cst_108 {dimension_numbers = #tpu.dot_dimension_numbers<[1], [0], [0], [1], [0, 0, 1, 1], [], []>} : vector<16x256xbf16>, vector<256x384xbf16>, vector<16x384xf32> -> vector<16x384xf32>
    %293 = vector.broadcast %4 : vector<1x384xf32> to vector<16x384xf32>
    %294 = arith.addf %292, %293 : vector<16x384xf32>
    %295 = arith.truncf %279 : vector<16x128xf32> to vector<16x128xbf16>
    %c0_109 = arith.constant 0 : index
    %c0_110 = arith.constant 0 : index
    %296 = vector.load %arg4[%c0_109, %c0_110] : memref<128x384xbf16, #tpu.memory_space<vmem>>, vector<128x384xbf16>
    %cst_111 = arith.constant dense<0.000000e+00> : vector<16x384xf32>
    %297 = tpu.matmul %295, %296, %cst_111 {dimension_numbers = #tpu.dot_dimension_numbers<[1], [0], [0], [1], [0, 0, 1, 1], [], []>} : vector<16x128xbf16>, vector<128x384xbf16>, vector<16x384xf32> -> vector<16x384xf32>
    %298 = vector.extract_strided_slice %294 {offsets = [0, 0], sizes = [16, 128], strides = [1, 1]} : vector<16x384xf32> to vector<16x128xf32>
    %299 = vector.extract_strided_slice %297 {offsets = [0, 0], sizes = [16, 128], strides = [1, 1]} : vector<16x384xf32> to vector<16x128xf32>
    %300 = arith.addf %298, %299 : vector<16x128xf32>
    %301 = arith.negf %300 : vector<16x128xf32>
    %302 = math.exp %301 : vector<16x128xf32>
    %cst_112 = arith.constant 1.000000e+00 : f32
    %303 = vector.broadcast %cst_112 : f32 to vector<16x128xf32>
    %304 = arith.addf %303, %302 : vector<16x128xf32>
    %305 = arith.divf %303, %304 : vector<16x128xf32>
    %306 = vector.extract_strided_slice %294 {offsets = [0, 128], sizes = [16, 128], strides = [1, 1]} : vector<16x384xf32> to vector<16x128xf32>
    %307 = vector.extract_strided_slice %297 {offsets = [0, 128], sizes = [16, 128], strides = [1, 1]} : vector<16x384xf32> to vector<16x128xf32>
    %308 = arith.addf %306, %307 : vector<16x128xf32>
    %309 = arith.negf %308 : vector<16x128xf32>
    %310 = math.exp %309 : vector<16x128xf32>
    %cst_113 = arith.constant 1.000000e+00 : f32
    %311 = vector.broadcast %cst_113 : f32 to vector<16x128xf32>
    %312 = arith.addf %311, %310 : vector<16x128xf32>
    %313 = arith.divf %311, %312 : vector<16x128xf32>
    %314 = vector.extract_strided_slice %294 {offsets = [0, 256], sizes = [16, 128], strides = [1, 1]} : vector<16x384xf32> to vector<16x128xf32>
    %315 = vector.extract_strided_slice %297 {offsets = [0, 256], sizes = [16, 128], strides = [1, 1]} : vector<16x384xf32> to vector<16x128xf32>
    %316 = vector.broadcast %5 : vector<1x128xf32> to vector<16x128xf32>
    %317 = arith.addf %315, %316 : vector<16x128xf32>
    %318 = arith.mulf %305, %317 : vector<16x128xf32>
    %319 = arith.addf %314, %318 : vector<16x128xf32>
    %320 = math.tanh %319 : vector<16x128xf32>
    %cst_114 = arith.constant 1.000000e+00 : f32
    %321 = vector.broadcast %cst_114 : f32 to vector<16x128xf32>
    %322 = arith.subf %321, %313 : vector<16x128xf32>
    %323 = arith.mulf %322, %320 : vector<16x128xf32>
    %324 = arith.mulf %313, %279 : vector<16x128xf32>
    %325 = arith.addf %323, %324 : vector<16x128xf32>
    %c6_115 = arith.constant 6 : index
    %c0_116 = arith.constant 0 : index
    %c0_117 = arith.constant 0 : index
    %326 = vector.load %arg7[%c6_115, %c0_116, %c0_117] : memref<8x16x128xf32, #tpu.memory_space<vmem>>, vector<1x16x128xf32>
    %327 = vector.shape_cast %326 : vector<1x16x128xf32> to vector<16x128xf32>
    %328 = vector.shape_cast %325 : vector<16x128xf32> to vector<1x16x128xf32>
    tpu.vector_store %arg7[%c6_115, %c0_116, %c0_117], %328 {strides = array<i32>} : memref<8x16x128xf32, #tpu.memory_space<vmem>>, vector<1x16x128xf32>,
    %c7 = arith.constant 7 : index
    %c0_118 = arith.constant 0 : index
    %c0_119 = arith.constant 0 : index
    %329 = vector.load %arg1[%c7, %c0_118, %c0_119] : memref<8x16x1xi32, #tpu.memory_space<vmem>>, vector<1x16x1xi32>
    %330 = vector.shape_cast %329 : vector<1x16x1xi32> to vector<16x1xi32>
    %331 = vector.broadcast %330 : vector<16x1xi32> to vector<16x256xi32>
    %332 = arith.cmpi eq, %3, %331 : vector<16x256xi32>
    %cst_120 = arith.constant 1.000000e+00 : f32
    %cst_121 = arith.constant 0.000000e+00 : f32
    %333 = vector.broadcast %cst_120 : f32 to vector<16x256xf32>
    %334 = vector.broadcast %cst_121 : f32 to vector<16x256xf32>
    %335 = arith.select %332, %333, %334 : vector<16x256xi1>, vector<16x256xf32>
    %336 = arith.truncf %335 : vector<16x256xf32> to vector<16x256xbf16>
    %c0_122 = arith.constant 0 : index
    %c0_123 = arith.constant 0 : index
    %337 = vector.load %arg3[%c0_122, %c0_123] : memref<256x384xbf16, #tpu.memory_space<vmem>>, vector<256x384xbf16>
    %cst_124 = arith.constant dense<0.000000e+00> : vector<16x384xf32>
    %338 = tpu.matmul %336, %337, %cst_124 {dimension_numbers = #tpu.dot_dimension_numbers<[1], [0], [0], [1], [0, 0, 1, 1], [], []>} : vector<16x256xbf16>, vector<256x384xbf16>, vector<16x384xf32> -> vector<16x384xf32>
    %339 = vector.broadcast %4 : vector<1x384xf32> to vector<16x384xf32>
    %340 = arith.addf %338, %339 : vector<16x384xf32>
    %341 = arith.truncf %325 : vector<16x128xf32> to vector<16x128xbf16>
    %c0_125 = arith.constant 0 : index
    %c0_126 = arith.constant 0 : index
    %342 = vector.load %arg4[%c0_125, %c0_126] : memref<128x384xbf16, #tpu.memory_space<vmem>>, vector<128x384xbf16>
    %cst_127 = arith.constant dense<0.000000e+00> : vector<16x384xf32>
    %343 = tpu.matmul %341, %342, %cst_127 {dimension_numbers = #tpu.dot_dimension_numbers<[1], [0], [0], [1], [0, 0, 1, 1], [], []>} : vector<16x128xbf16>, vector<128x384xbf16>, vector<16x384xf32> -> vector<16x384xf32>
    %344 = vector.extract_strided_slice %340 {offsets = [0, 0], sizes = [16, 128], strides = [1, 1]} : vector<16x384xf32> to vector<16x128xf32>
    %345 = vector.extract_strided_slice %343 {offsets = [0, 0], sizes = [16, 128], strides = [1, 1]} : vector<16x384xf32> to vector<16x128xf32>
    %346 = arith.addf %344, %345 : vector<16x128xf32>
    %347 = arith.negf %346 : vector<16x128xf32>
    %348 = math.exp %347 : vector<16x128xf32>
    %cst_128 = arith.constant 1.000000e+00 : f32
    %349 = vector.broadcast %cst_128 : f32 to vector<16x128xf32>
    %350 = arith.addf %349, %348 : vector<16x128xf32>
    %351 = arith.divf %349, %350 : vector<16x128xf32>
    %352 = vector.extract_strided_slice %340 {offsets = [0, 128], sizes = [16, 128], strides = [1, 1]} : vector<16x384xf32> to vector<16x128xf32>
    %353 = vector.extract_strided_slice %343 {offsets = [0, 128], sizes = [16, 128], strides = [1, 1]} : vector<16x384xf32> to vector<16x128xf32>
    %354 = arith.addf %352, %353 : vector<16x128xf32>
    %355 = arith.negf %354 : vector<16x128xf32>
    %356 = math.exp %355 : vector<16x128xf32>
    %cst_129 = arith.constant 1.000000e+00 : f32
    %357 = vector.broadcast %cst_129 : f32 to vector<16x128xf32>
    %358 = arith.addf %357, %356 : vector<16x128xf32>
    %359 = arith.divf %357, %358 : vector<16x128xf32>
    %360 = vector.extract_strided_slice %340 {offsets = [0, 256], sizes = [16, 128], strides = [1, 1]} : vector<16x384xf32> to vector<16x128xf32>
    %361 = vector.extract_strided_slice %343 {offsets = [0, 256], sizes = [16, 128], strides = [1, 1]} : vector<16x384xf32> to vector<16x128xf32>
    %362 = vector.broadcast %5 : vector<1x128xf32> to vector<16x128xf32>
    %363 = arith.addf %361, %362 : vector<16x128xf32>
    %364 = arith.mulf %351, %363 : vector<16x128xf32>
    %365 = arith.addf %360, %364 : vector<16x128xf32>
    %366 = math.tanh %365 : vector<16x128xf32>
    %cst_130 = arith.constant 1.000000e+00 : f32
    %367 = vector.broadcast %cst_130 : f32 to vector<16x128xf32>
    %368 = arith.subf %367, %359 : vector<16x128xf32>
    %369 = arith.mulf %368, %366 : vector<16x128xf32>
    %370 = arith.mulf %359, %325 : vector<16x128xf32>
    %371 = arith.addf %369, %370 : vector<16x128xf32>
    %c7_131 = arith.constant 7 : index
    %c0_132 = arith.constant 0 : index
    %c0_133 = arith.constant 0 : index
    %372 = vector.load %arg7[%c7_131, %c0_132, %c0_133] : memref<8x16x128xf32, #tpu.memory_space<vmem>>, vector<1x16x128xf32>
    %373 = vector.shape_cast %372 : vector<1x16x128xf32> to vector<16x128xf32>
    %374 = vector.shape_cast %371 : vector<16x128xf32> to vector<1x16x128xf32>
    tpu.vector_store %arg7[%c7_131, %c0_132, %c0_133], %374 {strides = array<i32>} : memref<8x16x128xf32, #tpu.memory_space<vmem>>, vector<1x16x128xf32>,
    %c0_134 = arith.constant 0 : index
    %c0_135 = arith.constant 0 : index
    %375 = vector.load %arg8[%c0_134, %c0_135] : memref<16x128xf32, #tpu.memory_space<vmem>>, vector<16x128xf32>
    tpu.vector_store %arg8[%c0_134, %c0_135], %371 {strides = array<i32>} : memref<16x128xf32, #tpu.memory_space<vmem>>, vector<16x128xf32>,
    return
  }
  func.func @transform_0(%arg0: i32) -> (i32, i32, i32) {
    %c0_i32 = arith.constant 0 : i32
    %c0_i32_0 = arith.constant 0 : i32
    %c0_i32_1 = arith.constant 0 : i32
    return %arg0, %c0_i32, %c0_i32_0 : i32, i32, i32
  }
  func.func @transform_1(%arg0: i32) -> (i32, i32) {
    %c0_i32 = arith.constant 0 : i32
    %c0_i32_0 = arith.constant 0 : i32
    %c0_i32_1 = arith.constant 0 : i32
    return %c0_i32, %c0_i32_0 : i32, i32
  }
  func.func @transform_2(%arg0: i32) -> (i32, i32) {
    %c0_i32 = arith.constant 0 : i32
    %c0_i32_0 = arith.constant 0 : i32
    %c0_i32_1 = arith.constant 0 : i32
    return %c0_i32, %c0_i32_0 : i32, i32
  }
  func.func @transform_3(%arg0: i32) -> (i32, i32) {
    %c0_i32 = arith.constant 0 : i32
    %c0_i32_0 = arith.constant 0 : i32
    %c0_i32_1 = arith.constant 0 : i32
    return %c0_i32, %c0_i32_0 : i32, i32
  }
  func.func @transform_4(%arg0: i32) -> (i32, i32) {
    %c0_i32 = arith.constant 0 : i32
    %c0_i32_0 = arith.constant 0 : i32
    %c0_i32_1 = arith.constant 0 : i32
    return %c0_i32, %c0_i32_0 : i32, i32
  }
  func.func @transform_5(%arg0: i32) -> (i32, i32) {
    %c0_i32 = arith.constant 0 : i32
    %c0_i32_0 = arith.constant 0 : i32
    %c0_i32_1 = arith.constant 0 : i32
    return %c0_i32, %c0_i32_0 : i32, i32
  }
  func.func @transform_6(%arg0: i32) -> (i32, i32, i32) {
    %c0_i32 = arith.constant 0 : i32
    %c0_i32_0 = arith.constant 0 : i32
    %c0_i32_1 = arith.constant 0 : i32
    return %arg0, %c0_i32, %c0_i32_0 : i32, i32, i32
  }
}

</mosaic_0001>

<bundles_post_ra>
// kernel: _generator_forward.3
= control target key start
LH: loop header
LB: loop body
LE: loop exit
PB: predicated region body
PF: predicated region fallthrough
CT: control target
= control target key end

     0   :  { %s1277_s1 = inlined_call_operand.vmem [shape: bf16[128,256], index: 1, kind: input, shape index: {}]   ;;  %s1278_s0 = inlined_call_operand.vmem [shape: f32[128,128], index: 0, kind: input, shape index: {}]   ;;  %s1279_s2 = inlined_call_operand.vmem [shape: f32[1,256], index: 2, kind: input, shape index: {}]   ;;  %s1280_s3 = inlined_call_operand.vmem [shape: f32[128,256], index: 3, kind: output, shape index: {}]  }
   0x1   :  { %v588_v0 = vld [vmem:[%s1277_s1 + $0x70] sm:$0xf]  ;;  %v609_v1 = vld [vmem:[%s1277_s1 + $0x74] sm:$0xf0]  ;;  %v608_v2 = vld [vmem:[%s1277_s1 + $0x74] sm:$0xf] }
   0x2   :  { %v589_v3 = vor.u32 %v609_v1, %v588_v0  ;;  %v590_v4 = vld [vmem:[%s1277_s1 + $0x78] sm:$0xf0]  ;;  %v580_v5 = vld [vmem:[%s1277_s1 + $0x60] sm:$0xf]  ;;  %v607_v6 = vld [vmem:[%s1277_s1 + $0x64] sm:$0xf0] }
   0x3   :  { %v593_v7 = vor.u32 %v608_v2, %v590_v4  ;;  %v606_v8 = vld [vmem:[%s1277_s1 + $0x64] sm:$0xf]  ;;  %v582_v9 = vld [vmem:[%s1277_s1 + $0x68] sm:$0xf0]  ;;  %v581_v10 = vor.u32 %v607_v6, %v580_v5  ;;  %v572_v12 = vld [vmem:[%s1277_s1 + $0x50] sm:$0xf] }
   0x4   :  { %140 = vmatpush.bf16.msra.mxu0 %v589_v3  ;;  %610 = vmatpush.bf16.msra.mxu2 %v589_v3  ;;  %v585_v11 = vor.u32 %v606_v8, %v582_v9  ;;  %v605_v13 = vld [vmem:[%s1277_s1 + $0x54] sm:$0xf0]  ;;  %v604_v14 = vld [vmem:[%s1277_s1 + $0x54] sm:$0xf]  ;;  %v574_v15 = vld [vmem:[%s1277_s1 + $0x58] sm:$0xf0] }
   0x5   :  { %189 = vmatpush.bf16.msra.mxu1 %v593_v7  ;;  %618 = vmatpush.bf16.msra.mxu3 %v593_v7  ;;  %v573_v16 = vor.u32 %v605_v13, %v572_v12  ;;  %v577_v17 = vor.u32 %v604_v14, %v574_v15  ;;  %v564_v18 = vld [vmem:[%s1277_s1 + $0x40] sm:$0xf]  ;;  %v603_v19 = vld [vmem:[%s1277_s1 + $0x44] sm:$0xf0]  ;;  %v602_v20 = vld [vmem:[%s1277_s1 + $0x44] sm:$0xf] }
   0x6   :  { %v566_v21 = vld [vmem:[%s1277_s1 + $0x48] sm:$0xf0]  ;;  %v565_v22 = vor.u32 %v603_v19, %v564_v18  ;;  %v556_v24 = vld [vmem:[%s1277_s1 + $0x30] sm:$0xf]  ;;  %v601_v25 = vld [vmem:[%s1277_s1 + $0x34] sm:$0xf0] }
   0x7   :  { %v569_v23 = vor.u32 %v602_v20, %v566_v21  ;;  %v600_v26 = vld [vmem:[%s1277_s1 + $0x34] sm:$0xf]  ;;  %v558_v27 = vld [vmem:[%s1277_s1 + $0x38] sm:$0xf0]  ;;  %v557_v28 = vor.u32 %v601_v25, %v556_v24  ;;  %v548_v30 = vld [vmem:[%s1277_s1 + $0x20] sm:$0xf] }
   0x8   :  { %141 = vmatpush.bf16.msra.mxu0 %v581_v10  ;;  %611 = vmatpush.bf16.msra.mxu2 %v581_v10  ;;  %v561_v29 = vor.u32 %v600_v26, %v558_v27  ;;  %v599_v31 = vld [vmem:[%s1277_s1 + $0x24] sm:$0xf0]  ;;  %v598_v32 = vld [vmem:[%s1277_s1 + $0x24] sm:$0xf]  ;;  %v550_v33 = vld [vmem:[%s1277_s1 + $0x28] sm:$0xf0] }
   0x9   :  { %190 = vmatpush.bf16.msra.mxu1 %v585_v11  ;;  %619 = vmatpush.bf16.msra.mxu3 %v585_v11  ;;  %v549_v34 = vor.u32 %v599_v31, %v548_v30  ;;  %v553_v35 = vor.u32 %v598_v32, %v550_v33  ;;  %v540_v36 = vld [vmem:[%s1277_s1 + $0x10] sm:$0xf]  ;;  %v597_v37 = vld [vmem:[%s1277_s1 + $0x14] sm:$0xf0]  ;;  %v596_v38 = vld [vmem:[%s1277_s1 + $0x14] sm:$0xf] }
   0xa   :  { %v542_v39 = vld [vmem:[%s1277_s1 + $0x18] sm:$0xf0]  ;;  %v541_v40 = vor.u32 %v597_v37, %v540_v36  ;;  %v532_v42 = vld [vmem:[%s1277_s1] sm:$0xf]  ;;  %v595_v43 = vld [vmem:[%s1277_s1 + $0x4] sm:$0xf0] }
   0xb   :  { %v545_v41 = vor.u32 %v596_v38, %v542_v39  ;;  %v594_v44 = vld [vmem:[%s1277_s1 + $0x4] sm:$0xf]  ;;  %v534_v45 = vld [vmem:[%s1277_s1 + $0x8] sm:$0xf0]  ;;  %v533_v47 = vor.u32 %v595_v43, %v532_v42  ;;  %v16_v54 = vld [vmem:[%s1278_s0 + $0x10] sm:$0xff] }
   0xc   :  { %142 = vmatpush.bf16.msra.mxu0 %v573_v16  ;;  %612 = vmatpush.bf16.msra.mxu2 %v573_v16  ;;  %v14_v46 = vld [vmem:[%s1278_s0] sm:$0xff]  ;;  %v15_v48 = vld [vmem:[%s1278_s0 + $0x8] sm:$0xff]  ;;  %v537_v51 = vor.u32 %v594_v44, %v534_v45  ;;  %v17_v55 = vld [vmem:[%s1278_s0 + $0x18] sm:$0xff] }
   0xd   :  { %191 = vmatpush.bf16.msra.mxu1 %v577_v17  ;;  %620 = vmatpush.bf16.msra.mxu3 %v577_v17  ;;  %v22_v49 = vld [vmem:[%s1278_s0 + $0x40] sm:$0xff]  ;;  %v23_v50 = vld [vmem:[%s1278_s0 + $0x48] sm:$0xff]  ;;  %v30_v52 = vpack.c.bf16 %v15_v48, %v14_v46  ;;  %v24_v56 = vld [vmem:[%s1278_s0 + $0x50] sm:$0xff]  ;;  %v31_v58 = vpack.c.bf16 %v17_v55, %v16_v54 }
   0xe   :  { %v34_v53 = vpack.c.bf16 %v23_v50, %v22_v49  ;;  %v25_v57 = vld [vmem:[%s1278_s0 + $0x58] sm:$0xff]  ;;  %v18_v60 = vld [vmem:[%s1278_s0 + $0x20] sm:$0xff]  ;;  %v19_v61 = vld [vmem:[%s1278_s0 + $0x28] sm:$0xff] }
   0xf   :  { %v35_v59 = vpack.c.bf16 %v25_v57, %v24_v56  ;;  %v26_v62 = vld [vmem:[%s1278_s0 + $0x60] sm:$0xff]  ;;  %v27_v63 = vld [vmem:[%s1278_s0 + $0x68] sm:$0xff]  ;;  %v32_v0 = vpack.c.bf16 %v19_v61, %v18_v60  ;;  %v20_v2 = vld [vmem:[%s1278_s0 + $0x30] sm:$0xff] }
  0x10   :  { %143 = vmatpush.bf16.msra.mxu0 %v565_v22  ;;  %613 = vmatpush.bf16.msra.mxu2 %v565_v22  ;;  %v36_v1 = vpack.c.bf16 %v27_v63, %v26_v62  ;;  %v21_v3 = vld [vmem:[%s1278_s0 + $0x38] sm:$0xff]  ;;  %v28_v4 = vld [vmem:[%s1278_s0 + $0x70] sm:$0xff]  ;;  %v54_v8 = vld [vmem:[%s1279_s2] sm:$0x3] }
  0x11   :  { %192 = vmatpush.bf16.msra.mxu1 %v569_v23  ;;  %621 = vmatpush.bf16.msra.mxu3 %v569_v23  ;;  %v29_v5 = vld [vmem:[%s1278_s0 + $0x78] sm:$0xff]  ;;  %v33_v6 = vpack.c.bf16 %v21_v3, %v20_v2  ;;  %v889_v9 = vperm.slane %v54_v8, 0  ;;  %v891_v10 = vperm.slane %v54_v8, 1 }
  0x12   :  { %v37_v7 = vpack.c.bf16 %v29_v5, %v28_v4 }
  0x14   :  { %144 = vmatpush.bf16.msra.mxu0 %v557_v28  ;;  %614 = vmatpush.bf16.msra.mxu2 %v557_v28 }
  0x15   :  { %193 = vmatpush.bf16.msra.mxu1 %v561_v29  ;;  %622 = vmatpush.bf16.msra.mxu3 %v561_v29 }
  0x18   :  { %145 = vmatpush.bf16.msra.mxu0 %v549_v34  ;;  %615 = vmatpush.bf16.msra.mxu2 %v549_v34 }
  0x19   :  { %194 = vmatpush.bf16.msra.mxu1 %v553_v35  ;;  %623 = vmatpush.bf16.msra.mxu3 %v553_v35 }
  0x1c   :  { %146 = vmatpush.bf16.msra.mxu0 %v541_v40  ;;  %616 = vmatpush.bf16.msra.mxu2 %v541_v40 }
  0x1d   :  { %195 = vmatpush.bf16.msra.mxu1 %v545_v41  ;;  %624 = vmatpush.bf16.msra.mxu3 %v545_v41 }
  0x20   :  { %147 = vmatpush.bf16.msra.mxu0 %v533_v47  ;;  %617 = vmatpush.bf16.msra.mxu2 %v533_v47 }
  0x21   :  { %196 = vmatpush.bf16.msra.mxu1 %v537_v51  ;;  %625 = vmatpush.bf16.msra.mxu3 %v537_v51 }
  0x23   :  { %148 = vmatmul.bf16.vlgmr.msra.gmra.mxu0 %v30_v52  ;;  %168 = vmatmul.bf16.vlgmr.msra.gmra.mxu2 %v34_v53 }
  0x24   :  { %197 = vmatmul.bf16.vlgmr.msra.gmra.mxu1 %v30_v52  ;;  %217 = vmatmul.bf16.vlgmr.msra.gmra.mxu3 %v34_v53 }
  0x33   :  { %153 = vmatmul.bf16.gmra.mxu0 %v31_v58  ;;  %173 = vmatmul.bf16.gmra.mxu2 %v35_v59 }
  0x34   :  { %202 = vmatmul.bf16.gmra.mxu1 %v31_v58  ;;  %222 = vmatmul.bf16.gmra.mxu3 %v35_v59 }
  0x43   :  { %158 = vmatmul.bf16.gmra.mxu0 %v32_v0  ;;  %178 = vmatmul.bf16.gmra.mxu2 %v36_v1 }
  0x44   :  { %207 = vmatmul.bf16.gmra.mxu1 %v32_v0  ;;  %227 = vmatmul.bf16.gmra.mxu3 %v36_v1 }
  0x53   :  { %163 = vmatmul.bf16.gmra.mxu0 %v33_v6  ;;  %183 = vmatmul.bf16.gmra.mxu2 %v37_v7 }
  0x54   :  { %212 = vmatmul.bf16.gmra.mxu1 %v33_v6  ;;  %232 = vmatmul.bf16.gmra.mxu3 %v37_v7 }
  0xa0   :  { %v149_v11 = vpop.f32.mrf.mxu0 }
  0xa1   :  { %v894_v12 = vadd.f32 %v149_v11, %v889_v9  ;;  %v198_v13 = vpop.f32.mrf.mxu1 }
  0xa2   :  { %v897_v14 = vadd.f32 %v198_v13, %v891_v10 }
  0xa4   :  { %v238_v15 = vmax.f32 %v894_v12, %v897_v14 }
  0xa6   :  { %239 = vmax.xlane.f32.xlu0 %v238_v15  ;;  %v169_v16 = vpop.f32.mrf.mxu2 }
  0xa7   :  { %v902_v17 = vadd.f32 %v169_v16, %v889_v9  ;;  %v218_v18 = vpop.f32.mrf.mxu3 }
  0xa8   :  { %v905_v19 = vadd.f32 %v218_v18, %v891_v10  ;;  %v151_v20 = vpop.f32.mrf.mxu0 }
  0xa9   :  { %v908_v21 = vadd.f32 %v151_v20, %v889_v9  ;;  %v200_v22 = vpop.f32.mrf.mxu1 }
  0xaa   :  { %v911_v23 = vadd.f32 %v200_v22, %v891_v10  ;;  %v262_v24 = vmax.f32 %v902_v17, %v905_v19 }
  0xac   :  { %263 = vmax.xlane.f32.xlu2 %v262_v24  ;;  %v241_v25 = vmax.f32 %v908_v21, %v911_v23 }
  0xae   :  { %242 = vmax.xlane.f32.xlu0 %v241_v25  ;;  %v171_v26 = vpop.f32.mrf.mxu2 }
  0xaf   :  { %v220_v27 = vpop.f32.mrf.mxu3  ;;  %v918_v28 = vadd.f32 %v171_v26, %v889_v9 }
  0xb0   :  { %v921_v29 = vadd.f32 %v220_v27, %v891_v10  ;;  %v154_v30 = vpop.f32.mrf.mxu0 }
  0xb1   :  { %v924_v31 = vadd.f32 %v154_v30, %v889_v9  ;;  %v203_v32 = vpop.f32.mrf.mxu1 }
  0xb2   :  { %v927_v33 = vadd.f32 %v203_v32, %v891_v10  ;;  %v265_v35 = vmax.f32 %v918_v28, %v921_v29 }
  0xb4   :  { %v244_v34 = vmax.f32 %v924_v31, %v927_v33 }
  0xb6   :  { %245 = vmax.xlane.f32.xlu1 %v244_v34  ;;  %266 = vmax.xlane.f32.xlu0 %v265_v35  ;;  %v174_v36 = vpop.f32.mrf.mxu2 }
  0xb7   :  { %v934_v37 = vadd.f32 %v174_v36, %v889_v9  ;;  %v223_v38 = vpop.f32.mrf.mxu3 }
  0xb8   :  { %v937_v39 = vadd.f32 %v223_v38, %v891_v10  ;;  %v156_v40 = vpop.f32.mrf.mxu0 }
  0xb9   :  { %v205_v41 = vpop.f32.mrf.mxu1  ;;  %v945_v46 = vadd.f32 %v156_v40, %v889_v9 }
  0xba   :  { %v268_v42 = vmax.f32 %v934_v37, %v937_v39  ;;  %v948_v47 = vadd.f32 %v205_v41, %v891_v10 }
  0xbc   :  { %v247_v52 = vmax.f32 %v945_v46, %v948_v47 }
  0xbe   :  { %269 = vmax.xlane.f32.xlu1 %v268_v42  ;;  %v176_v43 = vpop.f32.mrf.mxu2 }
  0xbf   :  { %v942_v44 = vadd.f32 %v176_v43, %v889_v9  ;;  %v225_v45 = vpop.f32.mrf.mxu3 }
  0xc0   :  { %v951_v48 = vadd.f32 %v225_v45, %v891_v10  ;;  %v159_v49 = vpop.f32.mrf.mxu0 }
  0xc1   :  { %v208_v50 = vpop.f32.mrf.mxu1  ;;  %v958_v53 = vadd.f32 %v159_v49, %v889_v9 }
  0xc2   :  { %v271_v51 = vmax.f32 %v942_v44, %v951_v48  ;;  %v961_v54 = vadd.f32 %v208_v50, %v891_v10 }
  0xc4   :  { %272 = vmax.xlane.f32.xlu2 %v271_v51  ;;  %v250_v61 = vmax.f32 %v958_v53, %v961_v54 }
  0xc6   :  { %248 = vmax.xlane.f32.xlu1 %v247_v52  ;;  %v179_v55 = vpop.f32.mrf.mxu2 }
  0xc7   :  { %v964_v56 = vadd.f32 %v179_v55, %v889_v9  ;;  %v228_v57 = vpop.f32.mrf.mxu3 }
  0xc8   :  { %v967_v58 = vadd.f32 %v228_v57, %v891_v10  ;;  %v161_v59 = vpop.f32.mrf.mxu0 }
  0xc9   :  { %v210_v60 = vpop.f32.mrf.mxu1  ;;  %v974_v63 = vadd.f32 %v161_v59, %v889_v9 }
  0xca   :  { %v274_v62 = vmax.f32 %v964_v56, %v967_v58  ;;  %v977_v0 = vadd.f32 %v210_v60, %v891_v10 }
  0xcc   :  { %251 = vmax.xlane.f32.xlu2 %v250_v61  ;;  %275 = vmax.xlane.f32.xlu0 %v274_v62  ;;  %v253_v7 = vmax.f32 %v974_v63, %v977_v0 }
  0xce   :  { %v181_v1 = vpop.f32.mrf.mxu2 }
  0xcf   :  { %v230_v2 = vpop.f32.mrf.mxu3  ;;  %v1009_v34 = vadd.f32 %v181_v1, %v889_v9 }
  0xd0   :  { %v164_v3 = vpop.f32.mrf.mxu0  ;;  %v1012_v35 = vadd.f32 %v230_v2, %v891_v10 }
  0xd1   :  { %v980_v4 = vadd.f32 %v164_v3, %v889_v9  ;;  %v213_v5 = vpop.f32.mrf.mxu1 }
  0xd2   :  { %v983_v6 = vadd.f32 %v213_v5, %v891_v10  ;;  %v277_v40 = vmax.f32 %v1009_v34, %v1012_v35 }
  0xd4   :  { %254 = vmax.xlane.f32.xlu2 %v253_v7  ;;  %v256_v8 = vmax.f32 %v980_v4, %v983_v6 }
  0xd6   :  { %257 = vmax.xlane.f32.xlu0 %v256_v8  ;;  %v184_v11 = vpop.f32.mrf.mxu2 }
  0xd7   :  { %v990_v13 = vadd.f32 %v184_v11, %v889_v9  ;;  %v233_v15 = vpop.f32.mrf.mxu3 }
  0xd8   :  { %v993_v16 = vadd.f32 %v233_v15, %v891_v10  ;;  %v166_v18 = vpop.f32.mrf.mxu0 }
  0xd9   :  { %v996_v20 = vadd.f32 %v166_v18, %v889_v9  ;;  %v215_v22 = vpop.f32.mrf.mxu1 }
  0xda   :  { %v999_v24 = vadd.f32 %v215_v22, %v891_v10  ;;  %v280_v25 = vmax.f32 %v990_v13, %v993_v16 }
  0xdc   :  { %281 = vmax.xlane.f32.xlu2 %v280_v25  ;;  %v259_v26 = vmax.f32 %v996_v20, %v999_v24 }
  0xde   :  { %260 = vmax.xlane.f32.xlu1 %v259_v26  ;;  %v186_v27 = vpop.f32.mrf.mxu2 }
  0xdf   :  { %v1006_v30 = vadd.f32 %v186_v27, %v889_v9  ;;  %v235_v32 = vpop.f32.mrf.mxu3 }
  0xe0   :  { %v1015_v36 = vadd.f32 %v235_v32, %v891_v10 }
  0xe2   :  { %v283_v38 = vmax.f32 %v1006_v30, %v1015_v36 }
  0xe4   :  { %284 = vmax.xlane.f32.xlu0 %v283_v38 }
  0xe6   :  { %278 = vmax.xlane.f32.xlu1 %v277_v40 }
 0x119   :  { %v240_v41 = vpop.xlane.xlu0 %239 }
 0x11a   :  { %v1022_v42 = vsub.f32 %v894_v12, %v240_v41  ;;  %v1025_v9 = vsub.f32 %v897_v14, %v240_v41 }
 0x11c   :  { %v318_v43 = vmul.f32 1.442695, %v1022_v42  ;;  %v320_v10 = vmul.f32 1.442695, %v1025_v9 }
 0x11e   :  { %626 = vpow2.f32 %v318_v43 }
 0x11f   :  { %628 = vpow2.f32 %v320_v10  ;;  %v264_v45 = vpop.xlane.xlu2 %263 }
 0x120   :  { %v1030_v49 = vsub.f32 %v902_v17, %v264_v45  ;;  %v1033_v50 = vsub.f32 %v905_v19, %v264_v45 }
 0x121   :  { %v243_v51 = vpop.xlane.xlu0 %242 }
 0x122   :  { %v350_v12 = vmul.f32 1.442695, %v1030_v49  ;;  %v352_v52 = vmul.f32 1.442695, %v1033_v50  ;;  %v1038_v14 = vsub.f32 %v908_v21, %v243_v51  ;;  %v1041_v55 = vsub.f32 %v911_v23, %v243_v51 }
 0x124   :  { %v627_v57 = vpop.eup %626  ;;  %630 = vpow2.f32 %v350_v12  ;;  %v322_v59 = vmul.f32 1.442695, %v1038_v14  ;;  %v324_v17 = vmul.f32 1.442695, %v1041_v55 }
 0x125   :  { %v629_v60 = vpop.eup %628  ;;  %632 = vpow2.f32 %v352_v52 }
 0x126   :  { %634 = vpow2.f32 %v322_v59  ;;  %v382_v19 = vadd.f32 %v629_v60, %v627_v57 }
 0x127   :  { %636 = vpow2.f32 %v324_v17 }
 0x128   :  { %383 = vadd.xlane.f32.xlu1 %v382_v19 }
 0x129   :  { %v246_v61 = vpop.xlane.xlu1 %245  ;;  %v267_v62 = vpop.xlane.xlu0 %266 }
 0x12a   :  { %v631_v1 = vpop.eup %630  ;;  %v1046_v21 = vsub.f32 %v924_v31, %v246_v61  ;;  %v1049_v23 = vsub.f32 %v927_v33, %v246_v61  ;;  %v1052_v2 = vsub.f32 %v918_v28, %v267_v62  ;;  %v1055_v3 = vsub.f32 %v921_v29, %v267_v62 }
 0x12b   :  { %v633_v5 = vpop.eup %632 }
 0x12c   :  { %v635_v7 = vpop.eup %634  ;;  %v326_v8 = vmul.f32 1.442695, %v1046_v21  ;;  %v328_v11 = vmul.f32 1.442695, %v1049_v23  ;;  %v354_v15 = vmul.f32 1.442695, %v1052_v2  ;;  %v406_v18 = vadd.f32 %v633_v5, %v631_v1 }
 0x12d   :  { %v637_v31 = vpop.eup %636  ;;  %v356_v22 = vmul.f32 1.442695, %v1055_v3 }
 0x12e   :  { %638 = vpow2.f32 %v326_v8  ;;  %407 = vadd.xlane.f32.xlu0 %v406_v18  ;;  %v385_v33 = vadd.f32 %v637_v31, %v635_v7 }
 0x12f   :  { %640 = vpow2.f32 %v328_v11 }
 0x130   :  { %642 = vpow2.f32 %v354_v15  ;;  %386 = vadd.xlane.f32.xlu2 %v385_v33 }
 0x131   :  { %644 = vpow2.f32 %v356_v22  ;;  %v270_v28 = vpop.xlane.xlu1 %269 }
 0x132   :  { %v1062_v29 = vsub.f32 %v934_v37, %v270_v28  ;;  %v1065_v25 = vsub.f32 %v937_v39, %v270_v28 }
 0x134   :  { %v639_v26 = vpop.eup %638  ;;  %v358_v27 = vmul.f32 1.442695, %v1062_v29  ;;  %v360_v32 = vmul.f32 1.442695, %v1065_v25 }
 0x135   :  { %v641_v38 = vpop.eup %640 }
 0x136   :  { %v643_v40 = vpop.eup %642  ;;  %646 = vpow2.f32 %v358_v27  ;;  %v388_v41 = vadd.f32 %v641_v38, %v639_v26 }
 0x137   :  { %v645_v43 = vpop.eup %644  ;;  %648 = vpow2.f32 %v360_v32  ;;  %v273_v10 = vpop.xlane.xlu2 %272 }
 0x138   :  { %v1070_v45 = vsub.f32 %v942_v44, %v273_v10  ;;  %v1073_v37 = vsub.f32 %v951_v48, %v273_v10  ;;  %389 = vadd.xlane.f32.xlu0 %v388_v41  ;;  %v409_v39 = vadd.f32 %v645_v43, %v643_v40 }
 0x139   :  { %v249_v51 = vpop.xlane.xlu1 %248 }
 0x13a   :  { %v362_v12 = vmul.f32 1.442695, %v1070_v45  ;;  %v364_v52 = vmul.f32 1.442695, %v1073_v37  ;;  %410 = vadd.xlane.f32.xlu1 %v409_v39  ;;  %v1078_v57 = vsub.f32 %v945_v46, %v249_v51  ;;  %v1081_v59 = vsub.f32 %v948_v47, %v249_v51 }
 0x13c   :  { %v647_v17 = vpop.eup %646  ;;  %650 = vpow2.f32 %v362_v12  ;;  %v330_v44 = vmul.f32 1.442695, %v1078_v57  ;;  %v332_v48 = vmul.f32 1.442695, %v1081_v59 }
 0x13d   :  { %v649_v60 = vpop.eup %648  ;;  %652 = vpow2.f32 %v364_v52 }
 0x13e   :  { %654 = vpow2.f32 %v330_v44  ;;  %v412_v19 = vadd.f32 %v649_v60, %v647_v17 }
 0x13f   :  { %656 = vpow2.f32 %v332_v48  ;;  %v252_v61 = vpop.xlane.xlu2 %251  ;;  %v276_v62 = vpop.xlane.xlu0 %275 }
 0x140   :  { %v1086_v1 = vsub.f32 %v958_v53, %v252_v61  ;;  %v1089_v46 = vsub.f32 %v961_v54, %v252_v61  ;;  %413 = vadd.xlane.f32.xlu2 %v412_v19  ;;  %v1092_v47 = vsub.f32 %v964_v56, %v276_v62  ;;  %v1095_v5 = vsub.f32 %v967_v58, %v276_v62 }
 0x142   :  { %v651_v7 = vpop.eup %650  ;;  %v334_v8 = vmul.f32 1.442695, %v1086_v1  ;;  %v336_v11 = vmul.f32 1.442695, %v1089_v46  ;;  %v366_v15 = vmul.f32 1.442695, %v1092_v47 }
 0x143   :  { %v653_v18 = vpop.eup %652  ;;  %v368_v53 = vmul.f32 1.442695, %v1095_v5 }
 0x144   :  { %v655_v31 = vpop.eup %654  ;;  %658 = vpow2.f32 %v334_v8  ;;  %v415_v54 = vadd.f32 %v653_v18, %v651_v7 }
 0x145   :  { %v657_v22 = vpop.eup %656  ;;  %660 = vpow2.f32 %v336_v11 }
 0x146   :  { %662 = vpow2.f32 %v366_v15  ;;  %416 = vadd.xlane.f32.xlu0 %v415_v54  ;;  %v391_v56 = vadd.f32 %v657_v22, %v655_v31 }
 0x147   :  { %664 = vpow2.f32 %v368_v53  ;;  %v255_v58 = vpop.xlane.xlu2 %254 }
 0x148   :  { %v1102_v33 = vsub.f32 %v974_v63, %v255_v58  ;;  %v1105_v28 = vsub.f32 %v977_v0, %v255_v58  ;;  %392 = vadd.xlane.f32.xlu1 %v391_v56 }
 0x149   :  { %v258_v26 = vpop.xlane.xlu0 %257 }
 0x14a   :  { %v659_v27 = vpop.eup %658  ;;  %v338_v32 = vmul.f32 1.442695, %v1102_v33  ;;  %v340_v38 = vmul.f32 1.442695, %v1105_v28  ;;  %v1110_v40 = vsub.f32 %v980_v4, %v258_v26  ;;  %v1113_v41 = vsub.f32 %v983_v6, %v258_v26 }
 0x14b   :  { %v661_v43 = vpop.eup %660 }
 0x14c   :  { %v663_v10 = vpop.eup %662  ;;  %666 = vpow2.f32 %v338_v32  ;;  %v342_v63 = vmul.f32 1.442695, %v1110_v40  ;;  %v344_v0 = vmul.f32 1.442695, %v1113_v41  ;;  %v394_v39 = vadd.f32 %v661_v43, %v659_v27 }
 0x14d   :  { %v665_v51 = vpop.eup %664  ;;  %668 = vpow2.f32 %v340_v38 }
 0x14e   :  { %670 = vpow2.f32 %v342_v63  ;;  %395 = vadd.xlane.f32.xlu2 %v394_v39  ;;  %v418_v12 = vadd.f32 %v665_v51, %v663_v10 }
 0x14f   :  { %672 = vpow2.f32 %v344_v0  ;;  %v282_v52 = vpop.xlane.xlu2 %281 }
 0x150   :  { %v1118_v4 = vsub.f32 %v990_v13, %v282_v52  ;;  %v1121_v6 = vsub.f32 %v993_v16, %v282_v52  ;;  %419 = vadd.xlane.f32.xlu1 %v418_v12 }
 0x151   :  { %v261_v17 = vpop.xlane.xlu1 %260 }
 0x152   :  { %v667_v44 = vpop.eup %666  ;;  %v374_v48 = vmul.f32 1.442695, %v1118_v4  ;;  %v376_v60 = vmul.f32 1.442695, %v1121_v6  ;;  %v1126_v19 = vsub.f32 %v996_v20, %v261_v17  ;;  %v1129_v61 = vsub.f32 %v999_v24, %v261_v17 }
 0x153   :  { %v669_v62 = vpop.eup %668 }
 0x154   :  { %v671_v7 = vpop.eup %670  ;;  %674 = vpow2.f32 %v374_v48  ;;  %v346_v13 = vmul.f32 1.442695, %v1126_v19  ;;  %v348_v16 = vmul.f32 1.442695, %v1129_v61  ;;  %v397_v8 = vadd.f32 %v669_v62, %v667_v44 }
 0x155   :  { %v673_v11 = vpop.eup %672  ;;  %676 = vpow2.f32 %v376_v60 }
 0x156   :  { %678 = vpow2.f32 %v346_v13  ;;  %398 = vadd.xlane.f32.xlu0 %v397_v8  ;;  %v400_v15 = vadd.f32 %v673_v11, %v671_v7 }
 0x157   :  { %680 = vpow2.f32 %v348_v16  ;;  %v285_v18 = vpop.xlane.xlu0 %284 }
 0x158   :  { %401 = vadd.xlane.f32.xlu1 %v400_v15  ;;  %v1134_v20 = vsub.f32 %v1006_v30, %v285_v18  ;;  %v1137_v24 = vsub.f32 %v1015_v36, %v285_v18 }
 0x159   :  { %v279_v53 = vpop.xlane.xlu1 %278 }
 0x15a   :  { %v675_v31 = vpop.eup %674  ;;  %v378_v54 = vmul.f32 1.442695, %v1134_v20  ;;  %v380_v22 = vmul.f32 1.442695, %v1137_v24  ;;  %v1142_v56 = vsub.f32 %v1009_v34, %v279_v53  ;;  %v1145_v58 = vsub.f32 %v1012_v35, %v279_v53 }
 0x15b   :  { %v677_v26 = vpop.eup %676 }
 0x15c   :  { %v679_v27 = vpop.eup %678  ;;  %682 = vpow2.f32 %v378_v54  ;;  %v370_v30 = vmul.f32 1.442695, %v1142_v56  ;;  %v372_v36 = vmul.f32 1.442695, %v1145_v58  ;;  %v424_v32 = vadd.f32 %v677_v26, %v675_v31 }
 0x15d   :  { %v681_v38 = vpop.eup %680  ;;  %684 = vpow2.f32 %v380_v22 }
 0x15e   :  { %686 = vpow2.f32 %v370_v30  ;;  %425 = vadd.xlane.f32.xlu0 %v424_v32  ;;  %v403_v43 = vadd.f32 %v681_v38, %v679_v27 }
 0x15f   :  { %688 = vpow2.f32 %v372_v36 }
 0x160   :  { %404 = vadd.xlane.f32.xlu2 %v403_v43 }
 0x162   :  { %v683_v34 = vpop.eup %682 }
 0x163   :  { %v685_v10 = vpop.eup %684 }
 0x164   :  { %v687_v63 = vpop.eup %686  ;;  %v427_v35 = vadd.f32 %v685_v10, %v683_v34 }
 0x165   :  { %v689_v0 = vpop.eup %688 }
 0x166   :  { %428 = vadd.xlane.f32.xlu1 %v427_v35  ;;  %v421_v39 = vadd.f32 %v689_v0, %v687_v63 }
 0x168   :  { %422 = vadd.xlane.f32.xlu2 %v421_v39 }
 0x19b   :  { %v384_v51 = vpop.xlane.xlu1 %383 }
 0x19c   :  { %690 = vlog2.f32 %v384_v51 }
 0x1a1   :  { %v408_v12 = vpop.xlane.xlu0 %407 }
 0x1a2   :  { %v691_v52 = vpop.eup %690  ;;  %692 = vlog2.f32 %v408_v12 }
 0x1a3   :  { %v431_v17 = vmul.f32 0.6931472, %v691_v52  ;;  %v387_v44 = vpop.xlane.xlu2 %386 }
 0x1a4   :  { %694 = vlog2.f32 %v387_v44 }
 0x1a5   :  { %v462_v48 = vsub.f32 %v1022_v42, %v431_v17  ;;  %v463_v60 = vsub.f32 %v1025_v9, %v431_v17 }
 0x1a7   :  { %494 = vst [vmem:[%s1280_s3] sm:$0xff] %v462_v48 }
 0x1a8   :  { %v693_v62 = vpop.eup %692  ;;  %495 = vst [vmem:[%s1280_s3 + $0x8] sm:$0xff] %v463_v60 }
 0x1a9   :  { %v447_v7 = vmul.f32 0.6931472, %v693_v62 }
 0x1aa   :  { %v695_v13 = vpop.eup %694 }
 0x1ab   :  { %v478_v16 = vsub.f32 %v1030_v49, %v447_v7  ;;  %v479_v8 = vsub.f32 %v1033_v50, %v447_v7  ;;  %v433_v11 = vmul.f32 0.6931472, %v695_v13  ;;  %v390_v15 = vpop.xlane.xlu0 %389 }
 0x1ac   :  { %696 = vlog2.f32 %v390_v15 }
 0x1ad   :  { %510 = vst [vmem:[%s1280_s3 + $0x80] sm:$0xff] %v478_v16  ;;  %v464_v42 = vsub.f32 %v1038_v14, %v433_v11  ;;  %v465_v9 = vsub.f32 %v1041_v55, %v433_v11  ;;  %v411_v18 = vpop.xlane.xlu1 %410 }
 0x1ae   :  { %511 = vst [vmem:[%s1280_s3 + $0x88] sm:$0xff] %v479_v8  ;;  %698 = vlog2.f32 %v411_v18 }
 0x1af   :  { %496 = vst [vmem:[%s1280_s3 + $0x10] sm:$0xff] %v464_v42 }
 0x1b0   :  { %497 = vst [vmem:[%s1280_s3 + $0x18] sm:$0xff] %v465_v9 }
 0x1b2   :  { %v697_v49 = vpop.eup %696 }
 0x1b3   :  { %v435_v50 = vmul.f32 0.6931472, %v697_v49  ;;  %v414_v53 = vpop.xlane.xlu2 %413 }
 0x1b4   :  { %v699_v14 = vpop.eup %698  ;;  %700 = vlog2.f32 %v414_v53 }
 0x1b5   :  { %v449_v55 = vmul.f32 0.6931472, %v699_v14  ;;  %v466_v31 = vsub.f32 %v1046_v21, %v435_v50  ;;  %v467_v54 = vsub.f32 %v1049_v23, %v435_v50 }
 0x1b7   :  { %v480_v22 = vsub.f32 %v1052_v2, %v449_v55  ;;  %v481_v26 = vsub.f32 %v1055_v3, %v449_v55  ;;  %498 = vst [vmem:[%s1280_s3 + $0x20] sm:$0xff] %v466_v31 }
 0x1b8   :  { %499 = vst [vmem:[%s1280_s3 + $0x28] sm:$0xff] %v467_v54 }
 0x1b9   :  { %512 = vst [vmem:[%s1280_s3 + $0x90] sm:$0xff] %v480_v22  ;;  %v417_v27 = vpop.xlane.xlu0 %416 }
 0x1ba   :  { %v701_v21 = vpop.eup %700  ;;  %513 = vst [vmem:[%s1280_s3 + $0x98] sm:$0xff] %v481_v26  ;;  %702 = vlog2.f32 %v417_v27 }
 0x1bb   :  { %v451_v23 = vmul.f32 0.6931472, %v701_v21  ;;  %v393_v2 = vpop.xlane.xlu1 %392 }
 0x1bc   :  { %704 = vlog2.f32 %v393_v2 }
 0x1bd   :  { %v482_v3 = vsub.f32 %v1062_v29, %v451_v23  ;;  %v483_v30 = vsub.f32 %v1065_v25, %v451_v23 }
 0x1bf   :  { %514 = vst [vmem:[%s1280_s3 + $0xa0] sm:$0xff] %v482_v3 }
 0x1c0   :  { %v703_v36 = vpop.eup %702  ;;  %515 = vst [vmem:[%s1280_s3 + $0xa8] sm:$0xff] %v483_v30 }
 0x1c1   :  { %v453_v32 = vmul.f32 0.6931472, %v703_v36  ;;  %v396_v38 = vpop.xlane.xlu2 %395 }
 0x1c2   :  { %v705_v43 = vpop.eup %704  ;;  %706 = vlog2.f32 %v396_v38 }
 0x1c3   :  { %v484_v34 = vsub.f32 %v1070_v45, %v453_v32  ;;  %v485_v10 = vsub.f32 %v1073_v37, %v453_v32  ;;  %v437_v29 = vmul.f32 0.6931472, %v705_v43  ;;  %v420_v63 = vpop.xlane.xlu1 %419 }
 0x1c4   :  { %708 = vlog2.f32 %v420_v63 }
 0x1c5   :  { %516 = vst [vmem:[%s1280_s3 + $0xb0] sm:$0xff] %v484_v34  ;;  %v468_v25 = vsub.f32 %v1078_v57, %v437_v29  ;;  %v469_v35 = vsub.f32 %v1081_v59, %v437_v29 }
 0x1c6   :  { %517 = vst [vmem:[%s1280_s3 + $0xb8] sm:$0xff] %v485_v10 }
 0x1c7   :  { %500 = vst [vmem:[%s1280_s3 + $0x30] sm:$0xff] %v468_v25 }
 0x1c8   :  { %v707_v45 = vpop.eup %706  ;;  %501 = vst [vmem:[%s1280_s3 + $0x38] sm:$0xff] %v469_v35 }
 0x1c9   :  { %v439_v37 = vmul.f32 0.6931472, %v707_v45  ;;  %v399_v0 = vpop.xlane.xlu0 %398 }
 0x1ca   :  { %v709_v39 = vpop.eup %708  ;;  %710 = vlog2.f32 %v399_v0 }
 0x1cb   :  { %v470_v57 = vsub.f32 %v1086_v1, %v439_v37  ;;  %v471_v59 = vsub.f32 %v1089_v46, %v439_v37  ;;  %v455_v51 = vmul.f32 0.6931472, %v709_v39  ;;  %v402_v12 = vpop.xlane.xlu1 %401 }
 0x1cc   :  { %712 = vlog2.f32 %v402_v12 }
 0x1cd   :  { %502 = vst [vmem:[%s1280_s3 + $0x40] sm:$0xff] %v470_v57  ;;  %v486_v52 = vsub.f32 %v1092_v47, %v455_v51  ;;  %v487_v17 = vsub.f32 %v1095_v5, %v455_v51 }
 0x1ce   :  { %503 = vst [vmem:[%s1280_s3 + $0x48] sm:$0xff] %v471_v59 }
 0x1cf   :  { %518 = vst [vmem:[%s1280_s3 + $0xc0] sm:$0xff] %v486_v52 }
 0x1d0   :  { %v711_v1 = vpop.eup %710  ;;  %519 = vst [vmem:[%s1280_s3 + $0xc8] sm:$0xff] %v487_v17 }
 0x1d1   :  { %v441_v46 = vmul.f32 0.6931472, %v711_v1  ;;  %v426_v44 = vpop.xlane.xlu0 %425 }
 0x1d2   :  { %v713_v48 = vpop.eup %712  ;;  %714 = vlog2.f32 %v426_v44 }
 0x1d3   :  { %v472_v47 = vsub.f32 %v1102_v33, %v441_v46  ;;  %v473_v5 = vsub.f32 %v1105_v28, %v441_v46  ;;  %v443_v60 = vmul.f32 0.6931472, %v713_v48  ;;  %v405_v62 = vpop.xlane.xlu2 %404 }
 0x1d4   :  { %716 = vlog2.f32 %v405_v62 }
 0x1d5   :  { %504 = vst [vmem:[%s1280_s3 + $0x50] sm:$0xff] %v472_v47  ;;  %v474_v7 = vsub.f32 %v1110_v40, %v443_v60  ;;  %v475_v13 = vsub.f32 %v1113_v41, %v443_v60 }
 0x1d6   :  { %505 = vst [vmem:[%s1280_s3 + $0x58] sm:$0xff] %v473_v5 }
 0x1d7   :  { %506 = vst [vmem:[%s1280_s3 + $0x60] sm:$0xff] %v474_v7 }
 0x1d8   :  { %v715_v33 = vpop.eup %714  ;;  %507 = vst [vmem:[%s1280_s3 + $0x68] sm:$0xff] %v475_v13 }
 0x1d9   :  { %v459_v28 = vmul.f32 0.6931472, %v715_v33  ;;  %v429_v16 = vpop.xlane.xlu1 %428 }
 0x1da   :  { %v717_v8 = vpop.eup %716  ;;  %718 = vlog2.f32 %v429_v16 }
 0x1db   :  { %v490_v40 = vsub.f32 %v1118_v4, %v459_v28  ;;  %v491_v41 = vsub.f32 %v1121_v6, %v459_v28  ;;  %v445_v11 = vmul.f32 0.6931472, %v717_v8  ;;  %v423_v15 = vpop.xlane.xlu2 %422 }
 0x1dc   :  { %720 = vlog2.f32 %v423_v15 }
 0x1dd   :  { %522 = vst [vmem:[%s1280_s3 + $0xe0] sm:$0xff] %v490_v40  ;;  %v476_v42 = vsub.f32 %v1126_v19, %v445_v11  ;;  %v477_v9 = vsub.f32 %v1129_v61, %v445_v11 }
 0x1de   :  { %523 = vst [vmem:[%s1280_s3 + $0xe8] sm:$0xff] %v491_v41 }
 0x1df   :  { %508 = vst [vmem:[%s1280_s3 + $0x70] sm:$0xff] %v476_v42 }
 0x1e0   :  { %v719_v4 = vpop.eup %718  ;;  %509 = vst [vmem:[%s1280_s3 + $0x78] sm:$0xff] %v477_v9 }
 0x1e1   :  { %v461_v6 = vmul.f32 0.6931472, %v719_v4 }
 0x1e2   :  { %v721_v18 = vpop.eup %720 }
 0x1e3   :  { %v492_v49 = vsub.f32 %v1134_v20, %v461_v6  ;;  %v493_v19 = vsub.f32 %v1137_v24, %v461_v6  ;;  %v457_v61 = vmul.f32 0.6931472, %v721_v18 }
 0x1e5   :  { %524 = vst [vmem:[%s1280_s3 + $0xf0] sm:$0xff] %v492_v49  ;;  %v488_v50 = vsub.f32 %v1142_v56, %v457_v61  ;;  %v489_v53 = vsub.f32 %v1145_v58, %v457_v61 }
 0x1e6   :  { %525 = vst [vmem:[%s1280_s3 + $0xf8] sm:$0xff] %v493_v19 }
 0x1e7   :  { %520 = vst [vmem:[%s1280_s3 + $0xd0] sm:$0xff] %v488_v50 }
 0x1e8   :  { %521 = vst [vmem:[%s1280_s3 + $0xd8] sm:$0xff] %v489_v53 }

// kernel: _generator_forward.2
= control target key start
LH: loop header
LB: loop body
LE: loop exit
PB: predicated region body
PF: predicated region fallthrough
CT: control target
= control target key end

     0   :  { %11 = vsyncpa [#allocation4], 0  ;;  %s10281_s0 = inlined_call_operand.vmem [shape: s32[8,16,1], index: 0, kind: input, shape index: {}]   ;;  %s10282_s1 = inlined_call_operand.vmem [shape: f32[16,128], index: 1, kind: input, shape index: {}]   ;;  %s10283_s2 = inlined_call_operand.hbm [shape: bf16[256,384], index: 2, kind: input, shape index: {}]   ;;  %s10284_s3 = inlined_call_operand.hbm [shape: bf16[128,384], index: 3, kind: input, shape index: {}]   ;;  %s10285_s4 = inlined_call_operand.vmem [shape: f32[1,384], index: 4, kind: input, shape index: {}]   ;;  %s10286_s5 = inlined_call_operand.vmem [shape: f32[1,128], index: 5, kind: input, shape index: {}]   ;;  %s10287_s6 = inlined_call_operand.vmem [shape: f32[8,16,128], index: 6, kind: output, shape index: {}]  }
   0x1   :  { %s21_s23 = sshll.u32 %s10283_s2, 4  ;;  %s22_s23 = int_to_ptr.hbm [resolvable:$true] %s21_s23 }
   0x2   :  { %12 = vsyncpa [#allocation6], 0  ;;  %s9149_s24 = smov [#allocation3]   ;;  %s34_s28 = sshll.u32 %s10284_s3, 4  ;;  %s35_s28 = int_to_ptr.hbm [resolvable:$true] %s34_s28 }
   0x3   :  { %s23_s25 = sshll.u32 %s9149_s24, 4  ;;  %s9150_s29 = smov 192   ;;  %s24_s25 = int_to_ptr.vmem [resolvable:$true] %s23_s25 }
   0x4   :  { %s9151_s30 = smov 12   ;;  %s9152_s7 = smov [#allocation5]  }
   0x5   :  { %29 = dma.hbm_to_vmem [thread:$0]  %s22_s23, 6144, %s24_s25, [#allocation4], %s9150_s29, %s9150_s29, %s9151_s30  }
   0x6   :  { %s36_s8 = sshll.u32 %s9152_s7, 4  ;;  %s37_s8 = int_to_ptr.vmem [resolvable:$true] %s36_s8 }
   0x7   :  { %42 = dma.hbm_to_vmem [thread:$0]  %s35_s28, 3072, %s37_s8, [#allocation6], %s9150_s29, %s9150_s29, %s9151_s30  }
   0x8   :  { %9145 = dma.done.wait [#allocation4], 6144  }
   0x9   :  { %9146 = vsyncadd [#allocation4], 4294961152 }
   0xa   :  { %9147 = dma.done.wait [#allocation6], 3072  }
   0xb   :  { %9148 = vsyncadd [#allocation6], 4294964224  ;;  %v9153_v0 = vmov 0   ;;  %v6190_v1 = vld [vmem:[%s10281_s0 + $0x10] sm:$0xff]  ;;  %v70_v2 = vld [vmem:[%s10281_s0] sm:$0xff] }
   0xc   :  { %8929 = vset.pattern.permute.xlu1 %v9153_v0  ;;  %8928 = vset.pattern.permute.xlu0 %v9153_v0  ;;  %v6498_v3 = vld [vmem:[%s10281_s0 + $0x20] sm:$0xff]  ;;  %v6191_v4 = vld [vmem:[%s10281_s0 + $0x18] sm:$0xff]  ;;  %v71_v5 = vld [vmem:[%s10281_s0 + $0x8] sm:$0xff] }
   0xd   :  { %8930 = vset.pattern.permute.xlu2 %v9153_v0  ;;  %807 = vperm.xlu1 %8929, %v6190_v1   ;;  %v6499_v6 = vld [vmem:[%s10281_s0 + $0x28] sm:$0xff]  ;;  %v8368_v8 = vld [vmem:[#allocation3 + $0xb0] sm:$0xf0]  ;;  %v5974_v13 = vld [vmem:[#allocation3 + $0xb4] sm:$0xf0] }
   0xe   :  { %73 = vperm.xlu0 %8928, %v70_v2   ;;  %1532 = vperm.xlu2 %8930, %v6498_v3   ;;  %v5972_v7 = vld [vmem:[#allocation3 + $0xa8] sm:$0xf]  ;;  %v8392_v11 = vld [vmem:[#allocation3 + $0x170] sm:$0xf0]  ;;  %v8367_v12 = vld [vmem:[#allocation3 + $0xac] sm:$0xf] }
   0xf   :  { %v6068_v9 = vld [vmem:[#allocation3 + $0x168] sm:$0xf]  ;;  %v5973_v10 = vor.u32 %v8368_v8, %v5972_v7  ;;  %v6807_v14 = vld [vmem:[%s10281_s0 + $0x38] sm:$0xff]  ;;  %v6806_v15 = vld [vmem:[%s10281_s0 + $0x30] sm:$0xff]  ;;  %v5977_v17 = vor.u32 %v8367_v12, %v5974_v13 }
  0x10   :  { %v6069_v16 = vor.u32 %v8392_v11, %v6068_v9  ;;  %v8391_v18 = vld [vmem:[#allocation3 + $0x16c] sm:$0xf]  ;;  %v6070_v19 = vld [vmem:[#allocation3 + $0x174] sm:$0xf0]  ;;  %v5960_v20 = vld [vmem:[#allocation3 + $0x90] sm:$0xf] }
  0x11   :  { %415 = vmatpush.bf16.msra.mxu0 %v5973_v10  ;;  %v6073_v21 = vor.u32 %v8391_v18, %v6070_v19  ;;  %v8365_v22 = vld [vmem:[#allocation3 + $0x98] sm:$0xf0]  ;;  %v6056_v23 = vld [vmem:[#allocation3 + $0x150] sm:$0xf]  ;;  %v7114_v25 = vld [vmem:[%s10281_s0 + $0x40] sm:$0xff]  ;;  %443 = vmatpush.bf16.msra.mxu2 %v5977_v17 }
  0x12   :  { %v8389_v24 = vld [vmem:[#allocation3 + $0x158] sm:$0xf0]  ;;  %429 = vmatpush.bf16.msra.mxu1 %v6069_v16  ;;  %v5961_v26 = vor.u32 %v8365_v22, %v5960_v20  ;;  %v8364_v28 = vld [vmem:[#allocation3 + $0x94] sm:$0xf]  ;;  %v5962_v29 = vld [vmem:[#allocation3 + $0x9c] sm:$0xf0] }
  0x13   :  { %v6057_v27 = vor.u32 %v8389_v24, %v6056_v23  ;;  %v8388_v30 = vld [vmem:[#allocation3 + $0x154] sm:$0xf]  ;;  %457 = vmatpush.bf16.msra.mxu3 %v6073_v21  ;;  %v5965_v31 = vor.u32 %v8364_v28, %v5962_v29  ;;  %v6058_v32 = vld [vmem:[#allocation3 + $0x15c] sm:$0xf0]  ;;  %v5948_v33 = vld [vmem:[#allocation3 + $0x78] sm:$0xf] }
  0x14   :  { %v8362_v34 = vld [vmem:[#allocation3 + $0x80] sm:$0xf0]  ;;  %v6061_v35 = vor.u32 %v8388_v30, %v6058_v32  ;;  %v6044_v36 = vld [vmem:[#allocation3 + $0x138] sm:$0xf]  ;;  %v8361_v38 = vld [vmem:[#allocation3 + $0x7c] sm:$0xf] }
  0x15   :  { %810 = vperm.xlu1 %8929, %v6191_v4   ;;  %v8386_v37 = vld [vmem:[#allocation3 + $0x140] sm:$0xf0]  ;;  %v5950_v39 = vld [vmem:[#allocation3 + $0x84] sm:$0xf0]  ;;  %v8385_v40 = vld [vmem:[#allocation3 + $0x13c] sm:$0xf]  ;;  %416 = vmatpush.bf16.msra.mxu0 %v5961_v26  ;;  %v5949_v42 = vor.u32 %v8362_v34, %v5948_v33 }
  0x16   :  { %76 = vperm.xlu0 %8928, %v71_v5   ;;  %1535 = vperm.xlu2 %8930, %v6499_v6   ;;  %v6046_v41 = vld [vmem:[#allocation3 + $0x144] sm:$0xf0]  ;;  %v6045_v43 = vor.u32 %v8386_v37, %v6044_v36  ;;  %v5936_v44 = vld [vmem:[#allocation3 + $0x60] sm:$0xf]  ;;  %v5953_v45 = vor.u32 %v8361_v38, %v5950_v39  ;;  %v8359_v46 = vld [vmem:[#allocation3 + $0x68] sm:$0xf0] }
  0x17   :  { %430 = vmatpush.bf16.msra.mxu1 %v6057_v27  ;;  %444 = vmatpush.bf16.msra.mxu2 %v5965_v31  ;;  %v6032_v47 = vld [vmem:[#allocation3 + $0x120] sm:$0xf]  ;;  %v8383_v48 = vld [vmem:[#allocation3 + $0x128] sm:$0xf0]  ;;  %v6049_v49 = vor.u32 %v8385_v40, %v6046_v41  ;;  %v8358_v50 = vld [vmem:[#allocation3 + $0x64] sm:$0xf]  ;;  %v5937_v56 = vor.u32 %v8359_v46, %v5936_v44 }
  0x18   :  { %458 = vmatpush.bf16.msra.mxu3 %v6061_v35  ;;  %v5938_v51 = vld [vmem:[#allocation3 + $0x6c] sm:$0xf0]  ;;  %v8382_v52 = vld [vmem:[#allocation3 + $0x124] sm:$0xf]  ;;  %v7115_v55 = vld [vmem:[%s10281_s0 + $0x48] sm:$0xff]  ;;  %v6033_v57 = vor.u32 %v8383_v48, %v6032_v47 }
  0x19   :  { %v6034_v53 = vld [vmem:[#allocation3 + $0x12c] sm:$0xf0]  ;;  %417 = vmatpush.bf16.msra.mxu0 %v5949_v42  ;;  %v5924_v58 = vld [vmem:[#allocation3 + $0x48] sm:$0xf]  ;;  %v5941_v59 = vor.u32 %v8358_v50, %v5938_v51  ;;  %v8356_v60 = vld [vmem:[#allocation3 + $0x50] sm:$0xf0] }
  0x1a   :  { %v7422_v54 = vld [vmem:[%s10281_s0 + $0x50] sm:$0xff]  ;;  %v6020_v61 = vld [vmem:[#allocation3 + $0x108] sm:$0xf]  ;;  %v7423_v63 = vld [vmem:[%s10281_s0 + $0x58] sm:$0xff]  ;;  %v6037_v0 = vor.u32 %v8382_v52, %v6034_v53  ;;  %v5925_v5 = vor.u32 %v8356_v60, %v5924_v58 }
  0x1b   :  { %431 = vmatpush.bf16.msra.mxu1 %v6045_v43  ;;  %445 = vmatpush.bf16.msra.mxu2 %v5953_v45  ;;  %v8380_v62 = vld [vmem:[#allocation3 + $0x110] sm:$0xf0]  ;;  %v8355_v1 = vld [vmem:[#allocation3 + $0x4c] sm:$0xf]  ;;  %v5926_v2 = vld [vmem:[#allocation3 + $0x54] sm:$0xf0] }
  0x1c   :  { %459 = vmatpush.bf16.msra.mxu3 %v6049_v49  ;;  %v8379_v3 = vld [vmem:[#allocation3 + $0x10c] sm:$0xf]  ;;  %v6022_v4 = vld [vmem:[#allocation3 + $0x114] sm:$0xf0]  ;;  %v6021_v6 = vor.u32 %v8380_v62, %v6020_v61  ;;  %v5912_v7 = vld [vmem:[#allocation3 + $0x30] sm:$0xf]  ;;  %v5929_v8 = vor.u32 %v8355_v1, %v5926_v2 }
  0x1d   :  { %2260 = vperm.xlu1 %8929, %v6807_v14   ;;  %418 = vmatpush.bf16.msra.mxu0 %v5937_v56  ;;  %v8353_v9 = vld [vmem:[#allocation3 + $0x38] sm:$0xf0]  ;;  %v6008_v10 = vld [vmem:[#allocation3 + $0xf0] sm:$0xf]  ;;  %v6025_v12 = vor.u32 %v8379_v3, %v6022_v4  ;;  %v8352_v13 = vld [vmem:[#allocation3 + $0x34] sm:$0xf] }
  0x1e   :  { %2257 = vperm.xlu0 %8928, %v6806_v15   ;;  %2982 = vperm.xlu2 %8930, %v7114_v25   ;;  %v8377_v11 = vld [vmem:[#allocation3 + $0xf8] sm:$0xf0]  ;;  %v5914_v14 = vld [vmem:[#allocation3 + $0x3c] sm:$0xf0]  ;;  %v8376_v15 = vld [vmem:[#allocation3 + $0xf4] sm:$0xf]  ;;  %v5913_v19 = vor.u32 %v8353_v9, %v5912_v7 }
  0x1f   :  { %432 = vmatpush.bf16.msra.mxu1 %v6033_v57  ;;  %446 = vmatpush.bf16.msra.mxu2 %v5941_v59  ;;  %v6010_v16 = vld [vmem:[#allocation3 + $0xfc] sm:$0xf0]  ;;  %v7731_v17 = vld [vmem:[%s10281_s0 + $0x68] sm:$0xff]  ;;  %v6009_v20 = vor.u32 %v8377_v11, %v6008_v10  ;;  %v5900_v21 = vld [vmem:[#allocation3 + $0x18] sm:$0xf]  ;;  %v5917_v22 = vor.u32 %v8352_v13, %v5914_v14 }
  0x20   :  { %460 = vmatpush.bf16.msra.mxu3 %v6037_v0  ;;  %v7730_v18 = vld [vmem:[%s10281_s0 + $0x60] sm:$0xff]  ;;  %v5996_v24 = vld [vmem:[#allocation3 + $0xd8] sm:$0xf]  ;;  %v8038_v26 = vld [vmem:[%s10281_s0 + $0x70] sm:$0xff]  ;;  %v6013_v27 = vor.u32 %v8376_v15, %v6010_v16 }
  0x21   :  { %419 = vmatpush.bf16.msra.mxu0 %v5925_v5  ;;  %v8350_v23 = vld [vmem:[#allocation3 + $0x20] sm:$0xf0]  ;;  %v8349_v28 = vld [vmem:[#allocation3 + $0x1c] sm:$0xf]  ;;  %v5902_v29 = vld [vmem:[#allocation3 + $0x24] sm:$0xf0] }
  0x22   :  { %v8374_v25 = vld [vmem:[#allocation3 + $0xe0] sm:$0xf0]  ;;  %v8373_v30 = vld [vmem:[#allocation3 + $0xdc] sm:$0xf]  ;;  %v5998_v31 = vld [vmem:[#allocation3 + $0xe4] sm:$0xf0]  ;;  %v5901_v33 = vor.u32 %v8350_v23, %v5900_v21  ;;  %v5905_v38 = vor.u32 %v8349_v28, %v5902_v29 }
  0x23   :  { %433 = vmatpush.bf16.msra.mxu1 %v6021_v6  ;;  %447 = vmatpush.bf16.msra.mxu2 %v5929_v8  ;;  %v5888_v32 = vld [vmem:[#allocation3] sm:$0xf]  ;;  %v5997_v34 = vor.u32 %v8374_v25, %v5996_v24  ;;  %v8347_v35 = vld [vmem:[#allocation3 + $0x8] sm:$0xf0]  ;;  %v5980_v36 = vld [vmem:[#allocation3 + $0xb0] sm:$0xf]  ;;  %v6001_v43 = vor.u32 %v8373_v30, %v5998_v31 }
  0x24   :  { %461 = vmatpush.bf16.msra.mxu3 %v6025_v12  ;;  %v8369_v37 = vld [vmem:[#allocation3 + $0xb8] sm:$0xf0]  ;;  %v5984_v39 = vld [vmem:[#allocation3 + $0xc0] sm:$0xf]  ;;  %v8371_v40 = vld [vmem:[#allocation3 + $0xc8] sm:$0xf0]  ;;  %v5889_v50 = vor.u32 %v8347_v35, %v5888_v32 }
  0x25   :  { %3707 = vperm.xlu1 %8929, %v7422_v54   ;;  %420 = vmatpush.bf16.msra.mxu0 %v5913_v19  ;;  %v8346_v41 = vld [vmem:[#allocation3 + $0x4] sm:$0xf]  ;;  %v8039_v42 = vld [vmem:[%s10281_s0 + $0x78] sm:$0xff]  ;;  %v5890_v44 = vld [vmem:[#allocation3 + $0xc] sm:$0xf0]  ;;  %v5985_v51 = vor.u32 %v8371_v40, %v5984_v39 }
  0x26   :  { %2985 = vperm.xlu0 %8928, %v7115_v55   ;;  %3710 = vperm.xlu2 %8930, %v7423_v63   ;;  %v8370_v45 = vld [vmem:[#allocation3 + $0xc4] sm:$0xf]  ;;  %v5986_v46 = vld [vmem:[#allocation3 + $0xcc] sm:$0xf0]  ;;  %v8393_v48 = vld [vmem:[#allocation3 + $0x178] sm:$0xf0]  ;;  %v5981_v55 = vor.u32 %v8369_v37, %v5980_v36  ;;  %v5893_v56 = vor.u32 %v8346_v41, %v5890_v44  ;;  %v63_v37 = vlaneseq }
  0x27   :  { %434 = vmatpush.bf16.msra.mxu1 %v6009_v20  ;;  %448 = vmatpush.bf16.msra.mxu2 %v5917_v22  ;;  %v6076_v47 = vld [vmem:[#allocation3 + $0x170] sm:$0xf]  ;;  %v6176_v49 = vld [vmem:[#allocation5 + $0xa8] sm:$0xf]  ;;  %v8416_v52 = vld [vmem:[#allocation5 + $0xb0] sm:$0xf0]  ;;  %v5989_v57 = vor.u32 %v8370_v45, %v5986_v46 }
  0x28   :  { %462 = vmatpush.bf16.msra.mxu3 %v6013_v27  ;;  %v8415_v53 = vld [vmem:[#allocation5 + $0xac] sm:$0xf]  ;;  %v6178_v54 = vld [vmem:[#allocation5 + $0xb4] sm:$0xf0]  ;;  %v6077_v58 = vor.u32 %v8393_v48, %v6076_v47  ;;  %v8366_v60 = vld [vmem:[#allocation3 + $0xa0] sm:$0xf0]  ;;  %v6177_v61 = vor.u32 %v8416_v52, %v6176_v49 }
  0x29   :  { %421 = vmatpush.bf16.msra.mxu0 %v5901_v33  ;;  %v5968_v59 = vld [vmem:[#allocation3 + $0x98] sm:$0xf]  ;;  %v6181_v62 = vor.u32 %v8415_v53, %v6178_v54  ;;  %v8390_v1 = vld [vmem:[#allocation3 + $0x160] sm:$0xf0]  ;;  %v6164_v2 = vld [vmem:[#allocation5 + $0x90] sm:$0xf] }
  0x2a   :  { %v5969_v63 = vor.u32 %v8366_v60, %v5968_v59  ;;  %v6064_v0 = vld [vmem:[#allocation3 + $0x158] sm:$0xf]  ;;  %v8413_v4 = vld [vmem:[#allocation5 + $0x98] sm:$0xf0]  ;;  %v8412_v5 = vld [vmem:[#allocation5 + $0x94] sm:$0xf] }
  0x2b   :  { %435 = vmatpush.bf16.msra.mxu1 %v5997_v34  ;;  %449 = vmatpush.bf16.msra.mxu2 %v5905_v38  ;;  %v6065_v3 = vor.u32 %v8390_v1, %v6064_v0  ;;  %v6166_v6 = vld [vmem:[#allocation5 + $0x9c] sm:$0xf0]  ;;  %v6165_v7 = vor.u32 %v8413_v4, %v6164_v2  ;;  %v8363_v10 = vld [vmem:[#allocation3 + $0x88] sm:$0xf0]  ;;  %v6152_v14 = vld [vmem:[#allocation5 + $0x78] sm:$0xf] }
  0x2c   :  { %463 = vmatpush.bf16.msra.mxu3 %v6001_v43  ;;  %v6169_v8 = vor.u32 %v8412_v5, %v6166_v6  ;;  %v5956_v9 = vld [vmem:[#allocation3 + $0x80] sm:$0xf]  ;;  %v8387_v13 = vld [vmem:[#allocation3 + $0x148] sm:$0xf0]  ;;  %v8410_v16 = vld [vmem:[#allocation5 + $0x80] sm:$0xf0] }
  0x2d   :  { %4435 = vperm.xlu1 %8929, %v7731_v17   ;;  %422 = vmatpush.bf16.msra.mxu0 %v5889_v50  ;;  %v5957_v11 = vor.u32 %v8363_v10, %v5956_v9  ;;  %v6052_v12 = vld [vmem:[#allocation3 + $0x140] sm:$0xf]  ;;  %v8409_v17 = vld [vmem:[#allocation5 + $0x7c] sm:$0xf]  ;;  %v6153_v19 = vor.u32 %v8410_v16, %v6152_v14  ;;  %v5944_v21 = vld [vmem:[#allocation3 + $0x68] sm:$0xf] }
  0x2e   :  { %4432 = vperm.xlu0 %8928, %v7730_v18   ;;  %5157 = vperm.xlu2 %8930, %v8038_v26   ;;  %v6053_v15 = vor.u32 %v8387_v13, %v6052_v12  ;;  %v6154_v18 = vld [vmem:[#allocation5 + $0x84] sm:$0xf0]  ;;  %v8360_v22 = vld [vmem:[#allocation3 + $0x70] sm:$0xf0]  ;;  %v6140_v26 = vld [vmem:[#allocation5 + $0x60] sm:$0xf] }
  0x2f   :  { %436 = vmatpush.bf16.msra.mxu1 %v5985_v51  ;;  %450 = vmatpush.bf16.msra.mxu2 %v5893_v56  ;;  %v6157_v20 = vor.u32 %v8409_v17, %v6154_v18  ;;  %v5945_v23 = vor.u32 %v8360_v22, %v5944_v21  ;;  %v6040_v24 = vld [vmem:[#allocation3 + $0x128] sm:$0xf]  ;;  %v8384_v25 = vld [vmem:[#allocation3 + $0x130] sm:$0xf0]  ;;  %v8407_v28 = vld [vmem:[#allocation5 + $0x68] sm:$0xf0] }
  0x30   :  { %464 = vmatpush.bf16.msra.mxu3 %v5989_v57  ;;  %v6041_v27 = vor.u32 %v8384_v25, %v6040_v24  ;;  %v8406_v29 = vld [vmem:[#allocation5 + $0x64] sm:$0xf]  ;;  %v6142_v30 = vld [vmem:[#allocation5 + $0x6c] sm:$0xf0]  ;;  %v6141_v31 = vor.u32 %v8407_v28, %v6140_v26  ;;  %v8357_v34 = vld [vmem:[#allocation3 + $0x58] sm:$0xf0] }
  0x31   :  { %471 = vmatpush.bf16.msrb.mxu0 %v5981_v55  ;;  %v6145_v32 = vor.u32 %v8406_v29, %v6142_v30  ;;  %v5932_v33 = vld [vmem:[#allocation3 + $0x50] sm:$0xf]  ;;  %v8381_v39 = vld [vmem:[#allocation3 + $0x118] sm:$0xf0]  ;;  %v6128_v41 = vld [vmem:[#allocation5 + $0x48] sm:$0xf] }
  0x32   :  { %v5933_v35 = vor.u32 %v8357_v34, %v5932_v33  ;;  %v6028_v38 = vld [vmem:[#allocation3 + $0x110] sm:$0xf]  ;;  %v8403_v43 = vld [vmem:[#allocation5 + $0x4c] sm:$0xf]  ;;  %v6130_v45 = vld [vmem:[#allocation5 + $0x54] sm:$0xf0] }
  0x33   :  { %485 = vmatpush.bf16.msrb.mxu1 %v6077_v58  ;;  %660 = vmatpush.bf16.msrb.mxu2 %v6177_v61  ;;  %v6029_v40 = vor.u32 %v8381_v39, %v6028_v38  ;;  %v5920_v46 = vld [vmem:[#allocation3 + $0x38] sm:$0xf]  ;;  %v8354_v47 = vld [vmem:[#allocation3 + $0x40] sm:$0xf0]  ;;  %v9246_v48 = vand.u32 127, %v63_v37  ;;  %v6133_v49 = vor.u32 %v8403_v43, %v6130_v45 }
  0x34   :  { %674 = vmatpush.bf16.msrb.mxu3 %v6181_v62  ;;  %v5921_v50 = vor.u32 %v8354_v47, %v5920_v46  ;;  %v6016_v51 = vld [vmem:[#allocation3 + $0xf8] sm:$0xf]  ;;  %v8378_v52 = vld [vmem:[#allocation3 + $0x100] sm:$0xf0]  ;;  %v6116_v53 = vld [vmem:[#allocation5 + $0x30] sm:$0xf] }
  0x35   :  { %472 = vmatpush.bf16.msrb.mxu0 %v5969_v63  ;;  %v6017_v54 = vor.u32 %v8378_v52, %v6016_v51  ;;  %v8401_v55 = vld [vmem:[#allocation5 + $0x38] sm:$0xf0]  ;;  %v8400_v56 = vld [vmem:[#allocation5 + $0x34] sm:$0xf]  ;;  %v6118_v57 = vld [vmem:[#allocation5 + $0x3c] sm:$0xf0] }
  0x36   :  { %5160 = vperm.xlu0 %8928, %v8039_v42   ;;  %v8404_v42 = vld [vmem:[#allocation5 + $0x50] sm:$0xf0]  ;;  %v6117_v59 = vor.u32 %v8401_v55, %v6116_v53  ;;  %v6121_v60 = vor.u32 %v8400_v56, %v6118_v57  ;;  %v5908_v61 = vld [vmem:[#allocation3 + $0x20] sm:$0xf]  ;;  %v8351_v62 = vld [vmem:[#allocation3 + $0x28] sm:$0xf0] }
  0x37   :  { %486 = vmatpush.bf16.msrb.mxu1 %v6065_v3  ;;  %661 = vmatpush.bf16.msrb.mxu2 %v6165_v7  ;;  %v6129_v44 = vor.u32 %v8404_v42, %v6128_v41  ;;  %v5909_v63 = vor.u32 %v8351_v62, %v5908_v61  ;;  %v6004_v0 = vld [vmem:[#allocation3 + $0xe0] sm:$0xf]  ;;  %v8375_v1 = vld [vmem:[#allocation3 + $0xe8] sm:$0xf0]  ;;  %v6104_v2 = vld [vmem:[#allocation5 + $0x18] sm:$0xf] }
  0x38   :  { %675 = vmatpush.bf16.msrb.mxu3 %v6169_v8  ;;  %v6005_v4 = vor.u32 %v8375_v1, %v6004_v0  ;;  %v8398_v5 = vld [vmem:[#allocation5 + $0x20] sm:$0xf0]  ;;  %v8397_v6 = vld [vmem:[#allocation5 + $0x1c] sm:$0xf]  ;;  %v6106_v8 = vld [vmem:[#allocation5 + $0x24] sm:$0xf0] }
  0x39   :  { %473 = vmatpush.bf16.msrb.mxu0 %v5957_v11  ;;  %v6105_v7 = vor.u32 %v8398_v5, %v6104_v2  ;;  %v5896_v9 = vld [vmem:[#allocation3 + $0x8] sm:$0xf]  ;;  %v6109_v10 = vor.u32 %v8397_v6, %v6106_v8  ;;  %v8348_v11 = vld [vmem:[#allocation3 + $0x10] sm:$0xf0]  ;;  %v9262_v12 = vadd.s32 128, %v9246_v48  ;;  %v9319_v8 = vld [vmem:[%s10282_s1] sm:$0xff] }
  0x3a   :  { %v5897_v13 = vor.u32 %v8348_v11, %v5896_v9  ;;  %v5992_v14 = vld [vmem:[#allocation3 + $0xc8] sm:$0xf]  ;;  %v6092_v16 = vld [vmem:[#allocation5] sm:$0xf]  ;;  %v8395_v18 = vld [vmem:[#allocation5 + $0x8] sm:$0xf0] }
  0x3b   :  { %487 = vmatpush.bf16.msrb.mxu1 %v6053_v15  ;;  %662 = vmatpush.bf16.msrb.mxu2 %v6153_v19  ;;  %v8372_v15 = vld [vmem:[#allocation3 + $0xd0] sm:$0xf0]  ;;  %v8394_v19 = vld [vmem:[#allocation5 + $0x4] sm:$0xf]  ;;  %v6093_v22 = vor.u32 %v8395_v18, %v6092_v16  ;;  %v6184_v29 = vld [vmem:[#allocation5 + $0xb0] sm:$0xf] }
  0x3c   :  { %676 = vmatpush.bf16.msrb.mxu3 %v6157_v20  ;;  %v5993_v17 = vor.u32 %v8372_v15, %v5992_v14  ;;  %v6094_v20 = vld [vmem:[#allocation5 + $0xc] sm:$0xf0]  ;;  %v8417_v30 = vld [vmem:[#allocation5 + $0xb8] sm:$0xf0]  ;;  %v6172_v34 = vld [vmem:[#allocation5 + $0x98] sm:$0xf] }
  0x3d   :  { %474 = vmatpush.bf16.msrb.mxu0 %v5945_v23  ;;  %v6097_v23 = vor.u32 %v8394_v19, %v6094_v20  ;;  %v9154_v37 = vmov 1.0|1.0   ;;  %v6160_v39 = vld [vmem:[#allocation5 + $0x80] sm:$0xf]  ;;  %v8464_v41 = vld [vmem:[#allocation3 + $0x170] sm:$0xf0] }
  0x3e   :  { %v6278_v42 = vld [vmem:[#allocation3 + $0xa8] sm:$0xf]  ;;  %v8440_v45 = vld [vmem:[#allocation3 + $0xb0] sm:$0xf0]  ;;  %v6362_v46 = vld [vmem:[#allocation3 + $0x150] sm:$0xf] }
  0x3f   :  { %488 = vmatpush.bf16.msrb.mxu1 %v6041_v27  ;;  %663 = vmatpush.bf16.msrb.mxu2 %v6141_v31  ;;  %v8461_v47 = vld [vmem:[#allocation3 + $0x158] sm:$0xf0]  ;;  %v8411_v51 = vld [vmem:[#allocation5 + $0x88] sm:$0xf0]  ;;  %v6279_v52 = vor.u32 %v8440_v45, %v6278_v42  ;;  %v6266_v53 = vld [vmem:[#allocation3 + $0x90] sm:$0xf] }
  0x40   :  { %677 = vmatpush.bf16.msrb.mxu3 %v6145_v32  ;;  %v6185_v32 = vor.u32 %v8417_v30, %v6184_v29  ;;  %v6363_v55 = vor.u32 %v8461_v47, %v6362_v46  ;;  %v8439_v56 = vld [vmem:[#allocation3 + $0xac] sm:$0xf]  ;;  %v6280_v57 = vld [vmem:[#allocation3 + $0xb4] sm:$0xf0]  ;;  %v8458_v62 = vld [vmem:[#allocation3 + $0x140] sm:$0xf0]  ;;  %v6161_v1 = vor.u32 %v8411_v51, %v6160_v39 }
  0x41   :  { %475 = vmatpush.bf16.msrb.mxu0 %v5933_v35  ;;  %v8414_v35 = vld [vmem:[#allocation5 + $0xa0] sm:$0xf0]  ;;  %v6350_v61 = vld [vmem:[#allocation3 + $0x138] sm:$0xf]  ;;  %v8408_v5 = vld [vmem:[#allocation5 + $0x70] sm:$0xf0] }
  0x42   :  { %v6173_v43 = vor.u32 %v8414_v35, %v6172_v34  ;;  %v6254_v2 = vld [vmem:[#allocation3 + $0x78] sm:$0xf]  ;;  %v8436_v6 = vld [vmem:[#allocation3 + $0x94] sm:$0xf]  ;;  %v6351_v9 = vor.u32 %v8458_v62, %v6350_v61  ;;  %v9324_v11 = vld [vmem:[%s10282_s1 + $0x8] sm:$0xff] }
  0x43   :  { %489 = vmatpush.bf16.msrb.mxu1 %v6029_v40  ;;  %664 = vmatpush.bf16.msrb.mxu2 %v6129_v44  ;;  %v6374_v40 = vld [vmem:[#allocation3 + $0x168] sm:$0xf]  ;;  %v8433_v14 = vld [vmem:[#allocation3 + $0x7c] sm:$0xf]  ;;  %v6242_v29 = vld [vmem:[#allocation3 + $0x60] sm:$0xf] }
  0x44   :  { %678 = vmatpush.bf16.msrb.mxu3 %v6133_v49  ;;  %v6375_v44 = vor.u32 %v8464_v41, %v6374_v40  ;;  %v6256_v15 = vld [vmem:[#allocation3 + $0x84] sm:$0xf0]  ;;  %v8405_v20 = vld [vmem:[#allocation5 + $0x58] sm:$0xf0]  ;;  %v8431_v30 = vld [vmem:[#allocation3 + $0x68] sm:$0xf0] }
  0x45   :  { %476 = vmatpush.bf16.msrb.mxu0 %v5921_v50  ;;  %v6124_v35 = vld [vmem:[#allocation5 + $0x38] sm:$0xf]  ;;  %v8402_v40 = vld [vmem:[#allocation5 + $0x40] sm:$0xf0]  ;;  %v6243_v41 = vor.u32 %v8431_v30, %v6242_v29  ;;  %v6326_v42 = vld [vmem:[#allocation3 + $0x108] sm:$0xf] }
  0x46   :  { %v6125_v45 = vor.u32 %v8402_v40, %v6124_v35  ;;  %v6112_v51 = vld [vmem:[#allocation5 + $0x20] sm:$0xf]  ;;  %v8428_v61 = vld [vmem:[#allocation3 + $0x50] sm:$0xf0]  ;;  %v6314_v62 = vld [vmem:[#allocation3 + $0xf0] sm:$0xf] }
  0x47   :  { %490 = vmatpush.bf16.msrb.mxu1 %v6017_v54  ;;  %665 = vmatpush.bf16.msrb.mxu2 %v6117_v59  ;;  %v8437_v54 = vld [vmem:[#allocation3 + $0x98] sm:$0xf0]  ;;  %v6148_v59 = vld [vmem:[#allocation5 + $0x68] sm:$0xf]  ;;  %v8443_v29 = vld [vmem:[#allocation3 + $0xc8] sm:$0xf0] }
  0x48   :  { %679 = vmatpush.bf16.msrb.mxu3 %v6121_v60  ;;  %v6267_v60 = vor.u32 %v8437_v54, %v6266_v53  ;;  %v6149_v16 = vor.u32 %v8408_v5, %v6148_v59  ;;  %v6100_v54 = vld [vmem:[#allocation5 + $0x8] sm:$0xf]  ;;  %v8424_v30 = vld [vmem:[#allocation3 + $0x34] sm:$0xf]  ;;  %v6382_v40 = vld [vmem:[#allocation3 + $0x170] sm:$0xf] }
  0x49   :  { %477 = vmatpush.bf16.msrb.mxu0 %v5909_v63  ;;  %v6283_v63 = vor.u32 %v8439_v56, %v6280_v57  ;;  %v8550_v3 = vld [vmem:[#allocation5 + $0x64] sm:$0xf]  ;;  %v7118_v0 = vld [vmem:[#allocation3] sm:$0xf] }
  0x4a   :  { %v8042_v38 = vld [vmem:[#allocation3] sm:$0xf] }
  0x4b   :  { %491 = vmatpush.bf16.msrb.mxu1 %v6005_v4  ;;  %666 = vmatpush.bf16.msrb.mxu2 %v6105_v7  ;;  %v8434_v4 = vld [vmem:[#allocation3 + $0x80] sm:$0xf0]  ;;  %v6268_v7 = vld [vmem:[#allocation3 + $0x9c] sm:$0xf0] }
  0x4c   :  { %680 = vmatpush.bf16.msrb.mxu3 %v6109_v10  ;;  %v6271_v10 = vor.u32 %v8436_v6, %v6268_v7  ;;  %v6218_v7 = vld [vmem:[#allocation3 + $0x30] sm:$0xf] }
  0x4d   :  { %478 = vmatpush.bf16.msrb.mxu0 %v5897_v13  ;;  %v6255_v13 = vor.u32 %v8434_v4, %v6254_v2  ;;  %v8430_v2 = vld [vmem:[#allocation3 + $0x64] sm:$0xf]  ;;  %v6244_v4 = vld [vmem:[#allocation3 + $0x6c] sm:$0xf0] }
  0x4e   :  { %v6247_v6 = vor.u32 %v8430_v2, %v6244_v4  ;;  %v6370_v2 = vld [vmem:[#allocation3 + $0x158] sm:$0xf]  ;;  %v8462_v4 = vld [vmem:[#allocation3 + $0x160] sm:$0xf0] }
  0x4f   :  { %492 = vmatpush.bf16.msrb.mxu1 %v5993_v17  ;;  %667 = vmatpush.bf16.msrb.mxu2 %v6093_v22  ;;  %v6136_v17 = vld [vmem:[#allocation5 + $0x50] sm:$0xf]  ;;  %v6338_v22 = vld [vmem:[#allocation3 + $0x120] sm:$0xf] }
  0x50   :  { %681 = vmatpush.bf16.msrb.mxu3 %v6097_v23  ;;  %v8455_v23 = vld [vmem:[#allocation3 + $0x128] sm:$0xf0]  ;;  %v6137_v34 = vor.u32 %v8405_v20, %v6136_v17 }
  0x51   :  { %v6339_v39 = vor.u32 %v8455_v23, %v6338_v22  ;;  %v6206_v22 = vld [vmem:[#allocation3 + $0x18] sm:$0xf]  ;;  %v8422_v23 = vld [vmem:[#allocation3 + $0x20] sm:$0xf0] }
  0x68   :  { %v9244_v36 = vpop.permute.xlu2 %1532 }
  0x69   :  { %vm1537_vm0 = vcmp.eq.s32.totalorder %v9246_v48, %v9244_v36 }
  0x70   :  { %v9250_v58 = vpop.permute.xlu2 %1535 }
  0x71   :  { %vm1539_vm1 = vcmp.eq.s32.totalorder %v9246_v48, %v9250_v58 }
  0x72   :  { %vm9257_vm2 = vmpackc.low %vm1539_vm1, %vm1537_vm0 }
  0x78   :  { %v9264_v21 = vpop.permute.xlu2 %2982 }
  0x79   :  { %vm2988_vm3 = vcmp.eq.s32.totalorder %v9262_v12, %v9264_v21 }
  0x7f   :  { %v9268_v24 = vpop.permute.xlu1 %807 }
  0x80   :  { %v74_v25 = vpop.permute.xlu0 %73  ;;  %v9270_v26 = vpop.permute.xlu2 %3710 }
  0x81   :  { %vm3715_vm4 = vcmp.eq.s32.totalorder %v9262_v12, %v9270_v26  ;;  %vm78_vm7 = vcmp.eq.s32.totalorder %v9246_v48, %v74_v25  ;;  %vm79_vm9 = vcmp.eq.s32.totalorder %v9262_v12, %v74_v25  ;;  %v6259_v25 = vor.u32 %v8433_v14, %v6256_v15  ;;  %v8446_v14 = vld [vmem:[#allocation3 + $0xe0] sm:$0xf0]  ;;  %v8427_v15 = vld [vmem:[#allocation3 + $0x4c] sm:$0xf] }
  0x87   :  { %v9274_v27 = vpop.permute.xlu1 %810 }
  0x88   :  { %v77_v28 = vpop.permute.xlu0 %76  ;;  %v9278_v31 = vpop.permute.xlu2 %5157 }
  0x89   :  { %vm80_vm5 = vcmp.eq.s32.totalorder %v9246_v48, %v77_v28  ;;  %vm81_vm6 = vcmp.eq.s32.totalorder %v9262_v12, %v77_v28  ;;  %vm5163_vm8 = vcmp.eq.s32.totalorder %v9262_v12, %v9278_v31  ;;  %v499_v28 = vpack.c.bf16 %v9324_v11, %v9319_v8 }
  0x8a   :  { %vm9284_vm10 = vmpackc.low %vm80_vm5, %vm78_vm7 }
  0x8b   :  { %6079 = vmatmul.msk.bf16.vlgmr.msra.gmra.mxu0 %vm9284_vm10, %v9154_v37  ;;  %vm9291_vm11 = vmpackc.low %vm81_vm6, %vm79_vm9  ;;  %6083 = vmatmul.msk.bf16.vlgmr.msra.gmra.mxu2 %vm9284_vm10, %v9154_v37 }
  0x8c   :  { %6081 = vmatmul.msk.bf16.vlgmr.msra.gmra.mxu1 %vm9291_vm11, %v9154_v37  ;;  %6085 = vmatmul.msk.bf16.vlgmr.msra.gmra.mxu3 %vm9291_vm11, %v9154_v37 }
  0x8d   :  { %688 = vmatpush.bf16.msra.mxu0 %v6185_v32  ;;  %1156 = vmatpush.bf16.msra.mxu2 %v6375_v44  ;;  %v7426_v32 = vld [vmem:[#allocation3] sm:$0xf] }
  0x8e   :  { %1142 = vmatpush.bf16.msra.mxu1 %v6279_v52  ;;  %1170 = vmatpush.bf16.msra.mxu3 %v6283_v63  ;;  %v8399_v52 = vld [vmem:[#allocation5 + $0x28] sm:$0xf0]  ;;  %v7734_v44 = vld [vmem:[#allocation3] sm:$0xf] }
  0x8f   :  { %v9304_v49 = vpop.permute.xlu1 %2260  ;;  %v6113_v53 = vor.u32 %v8399_v52, %v6112_v51  ;;  %v8421_v52 = vld [vmem:[#allocation3 + $0x1c] sm:$0xf] }
  0x90   :  { %v9306_v50 = vpop.permute.xlu0 %2257  ;;  %vm2265_vm12 = vcmp.eq.s32.totalorder %v9262_v12, %v9304_v49 }
  0x91   :  { %vm2263_vm13 = vcmp.eq.s32.totalorder %v9262_v12, %v9306_v50  ;;  %689 = vmatpush.bf16.msra.mxu0 %v6173_v43  ;;  %1157 = vmatpush.bf16.msra.mxu2 %v6363_v55  ;;  %v8452_v43 = vld [vmem:[#allocation3 + $0x110] sm:$0xf0] }
  0x92   :  { %vm9312_vm14 = vmpackc.low %vm2265_vm12, %vm2263_vm13  ;;  %1143 = vmatpush.bf16.msra.mxu1 %v6267_v60  ;;  %1171 = vmatpush.bf16.msra.mxu3 %v6271_v10  ;;  %v6327_v33 = vor.u32 %v8452_v43, %v6326_v42  ;;  %v8396_v55 = vld [vmem:[#allocation5 + $0x10] sm:$0xf0]  ;;  %v6230_v60 = vld [vmem:[#allocation3 + $0x48] sm:$0xf]  ;;  %vm814_vm12 = vcmp.eq.s32.totalorder %v9246_v48, %v9274_v27 }
  0x93   :  { %v6101_v56 = vor.u32 %v8396_v55, %v6100_v54  ;;  %v6231_v63 = vor.u32 %v8428_v61, %v6230_v60  ;;  %v6302_v10 = vld [vmem:[#allocation3 + $0xd8] sm:$0xf]  ;;  %v8463_v54 = vld [vmem:[#allocation3 + $0x16c] sm:$0xf]  ;;  %v6286_v60 = vld [vmem:[#allocation3 + $0xb0] sm:$0xf] }
  0x94   :  { %v6303_v17 = vor.u32 %v8446_v14, %v6302_v10  ;;  %v8441_v61 = vld [vmem:[#allocation3 + $0xb8] sm:$0xf0]  ;;  %v6274_v10 = vld [vmem:[#allocation3 + $0x98] sm:$0xf] }
  0x95   :  { %690 = vmatpush.bf16.msra.mxu0 %v6161_v1  ;;  %1158 = vmatpush.bf16.msra.mxu2 %v6351_v9  ;;  %v8449_v1 = vld [vmem:[#allocation3 + $0xf8] sm:$0xf0] }
  0x96   :  { %1144 = vmatpush.bf16.msra.mxu1 %v6255_v13  ;;  %1172 = vmatpush.bf16.msra.mxu3 %v6259_v25  ;;  %v6315_v5 = vor.u32 %v8449_v1, %v6314_v62  ;;  %v8425_v9 = vld [vmem:[#allocation3 + $0x38] sm:$0xf0]  ;;  %v6290_v25 = vld [vmem:[#allocation3 + $0xc0] sm:$0xf]  ;;  %v6287_v1 = vor.u32 %v8441_v61, %v6286_v60  ;;  %v6334_v60 = vld [vmem:[#allocation3 + $0x110] sm:$0xf] }
  0x97   :  { %v9326_v18 = vpop.permute.xlu1 %3707  ;;  %v6219_v13 = vor.u32 %v8425_v9, %v6218_v7  ;;  %v6291_v35 = vor.u32 %v8443_v29, %v6290_v25  ;;  %v6364_v9 = vld [vmem:[#allocation3 + $0x15c] sm:$0xf0]  ;;  %v6352_v29 = vld [vmem:[#allocation3 + $0x144] sm:$0xf0]  ;;  %v8453_v61 = vld [vmem:[#allocation3 + $0x118] sm:$0xf0] }
  0x98   :  { %v9328_v19 = vpop.permute.xlu0 %2985  ;;  %vm3713_vm15 = vcmp.eq.s32.totalorder %v9262_v12, %v9326_v18 }
  0x99   :  { %vm2990_vm0 = vcmp.eq.s32.totalorder %v9262_v12, %v9328_v19  ;;  %691 = vmatpush.bf16.msra.mxu0 %v6149_v16  ;;  %1159 = vmatpush.bf16.msra.mxu2 %v6339_v39  ;;  %v6232_v16 = vld [vmem:[#allocation3 + $0x54] sm:$0xf0] }
  0x9a   :  { %vm9339_vm1 = vmpackc.low %vm2990_vm0, %vm2988_vm3  ;;  %1145 = vmatpush.bf16.msra.mxu1 %v6243_v41  ;;  %1173 = vmatpush.bf16.msra.mxu3 %v6247_v6  ;;  %v6235_v20 = vor.u32 %v8427_v15, %v6232_v16  ;;  %v8465_v41 = vld [vmem:[#allocation3 + $0x178] sm:$0xf0]  ;;  %v6196_v6 = vld [vmem:[#allocation3 + $0xc] sm:$0xf0] }
  0x9b   :  { %6087 = vmatmul.msk.bf16.vlgmr.msrb.gmra.mxu0 %vm9284_vm10, %v9154_v37  ;;  %668 = vmatmul.bf16.vlgmr.msrb.gmra.mxu2 %v499_v28  ;;  %vm9352_vm3 = vmpackc.low %vm3715_vm4, %vm3713_vm15  ;;  %vm815_vm10 = vcmp.eq.s32.totalorder %v9262_v12, %v9274_v27  ;;  %v6383_v42 = vor.u32 %v8465_v41, %v6382_v40  ;;  %v8460_v27 = vld [vmem:[#allocation3 + $0x154] sm:$0xf]  ;;  %v6358_v16 = vld [vmem:[#allocation3 + $0x140] sm:$0xf] }
  0x9c   :  { %6089 = vmatmul.msk.bf16.vlgmr.msrb.gmra.mxu1 %vm9291_vm11, %v9154_v37  ;;  %682 = vmatmul.bf16.vlgmr.msrb.gmra.mxu3 %v499_v28  ;;  %vm812_vm11 = vcmp.eq.s32.totalorder %v9246_v48, %v9268_v24  ;;  %v6367_v14 = vor.u32 %v8460_v27, %v6364_v9  ;;  %v8456_v40 = vld [vmem:[#allocation3 + $0x130] sm:$0xf0]  ;;  %v6238_v27 = vld [vmem:[#allocation3 + $0x50] sm:$0xf]  ;;  %v8429_v9 = vld [vmem:[#allocation3 + $0x58] sm:$0xf0] }
  0x9d   :  { %692 = vmatpush.bf16.msra.mxu0 %v6137_v34  ;;  %1160 = vmatpush.bf16.msra.mxu2 %v6327_v33  ;;  %v6220_v34 = vld [vmem:[#allocation3 + $0x3c] sm:$0xf0]  ;;  %v8419_v33 = vld [vmem:[#allocation3 + $0x8] sm:$0xf0]  ;;  %vm9400_vm15 = vmpackc.low %vm814_vm12, %vm812_vm11 }
  0x9e   :  { %1146 = vmatpush.bf16.msra.mxu1 %v6231_v63  ;;  %1174 = vmatpush.bf16.msra.mxu3 %v6235_v20  ;;  %v6223_v39 = vor.u32 %v8424_v30, %v6220_v34  ;;  %v6482_v20 = vld [vmem:[#allocation5 + $0xa8] sm:$0xf]  ;;  %v6262_v30 = vld [vmem:[#allocation3 + $0x80] sm:$0xf] }
  0x9f   :  { %v9359_v46 = vpop.permute.xlu1 %4435 }
  0xa0   :  { %v9361_v47 = vpop.permute.xlu0 %4432  ;;  %vm4440_vm4 = vcmp.eq.s32.totalorder %v9262_v12, %v9359_v46 }
  0xa1   :  { %vm4438_vm5 = vcmp.eq.s32.totalorder %v9262_v12, %v9361_v47  ;;  %693 = vmatpush.bf16.msra.mxu0 %v6125_v45  ;;  %1161 = vmatpush.bf16.msra.mxu2 %v6315_v5  ;;  %v6194_v45 = vld [vmem:[#allocation3] sm:$0xf]  ;;  %v6371_v5 = vor.u32 %v8462_v4, %v6370_v2  ;;  %v6458_v2 = vld [vmem:[#allocation5 + $0x78] sm:$0xf]  ;;  %v8482_v4 = vld [vmem:[#allocation5 + $0x80] sm:$0xf0] }
  0xa2   :  { %vm9367_vm6 = vmpackc.low %vm4440_vm4, %vm4438_vm5  ;;  %1147 = vmatpush.bf16.msra.mxu1 %v6219_v13  ;;  %1175 = vmatpush.bf16.msra.mxu3 %v6223_v39  ;;  %v6195_v51 = vor.u32 %v8419_v33, %v6194_v45  ;;  %v8438_v13 = vld [vmem:[#allocation3 + $0xa0] sm:$0xf0]  ;;  %v6346_v39 = vld [vmem:[#allocation3 + $0x128] sm:$0xf] }
  0xa3   :  { %v6275_v15 = vor.u32 %v8438_v13, %v6274_v10  ;;  %v6470_v45 = vld [vmem:[#allocation5 + $0x90] sm:$0xf]  ;;  %v8485_v33 = vld [vmem:[#allocation5 + $0x98] sm:$0xf0]  ;;  %v6322_v10 = vld [vmem:[#allocation3 + $0xf8] sm:$0xf] }
  0xa4   :  { %v8450_v13 = vld [vmem:[#allocation3 + $0x100] sm:$0xf0] }
  0xa5   :  { %694 = vmatpush.bf16.msra.mxu0 %v6113_v53  ;;  %1162 = vmatpush.bf16.msra.mxu2 %v6303_v17  ;;  %v6208_v53 = vld [vmem:[#allocation3 + $0x24] sm:$0xf0]  ;;  %v8459_v17 = vld [vmem:[#allocation3 + $0x148] sm:$0xf0] }
  0xa6   :  { %v6211_v55 = vor.u32 %v8421_v52, %v6208_v53  ;;  %v8454_v52 = vld [vmem:[#allocation3 + $0x124] sm:$0xf]  ;;  %v6340_v53 = vld [vmem:[#allocation3 + $0x12c] sm:$0xf0] }
  0xa8   :  { %v9371_v57 = vpop.permute.xlu0 %5160  ;;  %1176 = vmatpush.bf16.msra.mxu3 %v6211_v55  ;;  %v6343_v55 = vor.u32 %v8454_v52, %v6340_v53  ;;  %v6304_v52 = vld [vmem:[#allocation3 + $0xe4] sm:$0xf0]  ;;  %v6214_v53 = vld [vmem:[#allocation3 + $0x20] sm:$0xf] }
  0xa9   :  { %vm5165_vm7 = vcmp.eq.s32.totalorder %v9262_v12, %v9371_v57  ;;  %695 = vmatpush.bf16.msra.mxu0 %v6101_v56  ;;  %1163 = vmatpush.bf16.msra.mxu2 %v6291_v35  ;;  %v6376_v56 = vld [vmem:[#allocation3 + $0x174] sm:$0xf0]  ;;  %v8435_v35 = vld [vmem:[#allocation3 + $0x88] sm:$0xf0] }
  0xaa   :  { %vm9378_vm9 = vmpackc.low %vm5165_vm7, %vm5163_vm8  ;;  %vm813_vm8 = vcmp.eq.s32.totalorder %v9262_v12, %v9268_v24  ;;  %v6379_v63 = vor.u32 %v8463_v54, %v6376_v56  ;;  %v8418_v24 = vld [vmem:[#allocation3 + $0x4] sm:$0xf]  ;;  %v6263_v41 = vor.u32 %v8435_v35, %v6262_v30  ;;  %v6250_v54 = vld [vmem:[#allocation3 + $0x68] sm:$0xf] }
  0xab   :  { %vm9390_vm13 = vmpackc.low %vm815_vm10, %vm813_vm8  ;;  %v6199_v7 = vor.u32 %v8418_v24, %v6196_v6  ;;  %v8432_v56 = vld [vmem:[#allocation3 + $0x70] sm:$0xf0]  ;;  %v8451_v24 = vld [vmem:[#allocation3 + $0x10c] sm:$0xf] }
  0xac   :  { %696 = vmatmul.bf16.vlgmr.msra.gmra.mxu0 %v499_v28  ;;  %v6207_v28 = vor.u32 %v8422_v23, %v6206_v22  ;;  %6387 = vmatmul.msk.bf16.vlgmr.msra.gmra.mxu2 %vm9390_vm13, %v9154_v37  ;;  %v6359_v22 = vor.u32 %v8459_v17, %v6358_v16  ;;  %v8488_v23 = vld [vmem:[#allocation5 + $0xb0] sm:$0xf0]  ;;  %v6328_v6 = vld [vmem:[#allocation3 + $0x114] sm:$0xf0]  ;;  %v6446_v16 = vld [vmem:[#allocation5 + $0x60] sm:$0xf] }
  0xad   :  { %1212 = vmatpush.bf16.msrb.mxu2 %v6383_v42  ;;  %1184 = vmatpush.bf16.msrb.mxu0 %v6379_v63  ;;  %v6483_v25 = vor.u32 %v8488_v23, %v6482_v20  ;;  %v6347_v42 = vor.u32 %v8456_v40, %v6346_v39  ;;  %v6251_v63 = vor.u32 %v8432_v56, %v6250_v54  ;;  %v8479_v17 = vld [vmem:[#allocation5 + $0x68] sm:$0xf0]  ;;  %v6316_v23 = vld [vmem:[#allocation3 + $0xfc] sm:$0xf0]  ;;  %v6434_v40 = vld [vmem:[#allocation5 + $0x48] sm:$0xf] }
  0xae   :  { %1148 = vmatpush.bf16.msra.mxu1 %v6207_v28  ;;  %1177 = vmatpush.bf16.msra.mxu3 %v6199_v7  ;;  %v8457_v28 = vld [vmem:[#allocation3 + $0x13c] sm:$0xf]  ;;  %v6331_v7 = vor.u32 %v8451_v24, %v6328_v6  ;;  %v6447_v20 = vor.u32 %v8479_v17, %v6446_v16  ;;  %v6310_v30 = vld [vmem:[#allocation3 + $0xe0] sm:$0xf]  ;;  %v8423_v56 = vld [vmem:[#allocation3 + $0x28] sm:$0xf0] }
  0xaf   :  { %v6355_v34 = vor.u32 %v8457_v28, %v6352_v29  ;;  %v8426_v29 = vld [vmem:[#allocation3 + $0x40] sm:$0xf0] }
  0xb0   :  { %v8442_v6 = vld [vmem:[#allocation3 + $0xc4] sm:$0xf] }
  0xb1   :  { %1213 = vmatpush.bf16.msrb.mxu2 %v6371_v5  ;;  %1185 = vmatpush.bf16.msrb.mxu0 %v6367_v14  ;;  %v6459_v5 = vor.u32 %v8482_v4, %v6458_v2  ;;  %v6239_v14 = vor.u32 %v8429_v9, %v6238_v27  ;;  %v6422_v2 = vld [vmem:[#allocation5 + $0x30] sm:$0xf]  ;;  %v8473_v4 = vld [vmem:[#allocation5 + $0x38] sm:$0xf0] }
  0xb2   :  { %1149 = vmatpush.bf16.msra.mxu1 %v6195_v51  ;;  %1387 = vmatpush.bf16.msrb.mxu3 %v6483_v25  ;;  %v6471_v51 = vor.u32 %v8485_v33, %v6470_v45  ;;  %v6226_v25 = vld [vmem:[#allocation3 + $0x38] sm:$0xf]  ;;  %v6423_v24 = vor.u32 %v8473_v4, %v6422_v2  ;;  %v6292_v27 = vld [vmem:[#allocation3 + $0xcc] sm:$0xf0] }
  0xb3   :  { %6389 = vmatmul.msk.bf16.vlgmr.msra.gmra.mxu3 %vm9400_vm15, %v9154_v37  ;;  %v6227_v35 = vor.u32 %v8426_v29, %v6226_v25  ;;  %v6295_v9 = vor.u32 %v8442_v6, %v6292_v27  ;;  %v8487_v25 = vld [vmem:[#allocation5 + $0xac] sm:$0xf]  ;;  %v6490_v29 = vld [vmem:[#allocation5 + $0xb0] sm:$0xf]  ;;  %v8533_v6 = vld [vmem:[#allocation3 + $0x158] sm:$0xf0] }
  0xb5   :  { %6385 = vmatmul.msk.bf16.vlgmr.msra.gmra.mxu1 %vm9400_vm15, %v9154_v37  ;;  %1214 = vmatpush.bf16.msrb.mxu2 %v6359_v22  ;;  %v8448_v22 = vld [vmem:[#allocation3 + $0xf4] sm:$0xf] }
  0xb6   :  { %1198 = vmatpush.bf16.msrb.mxu1 %v6287_v1  ;;  %1186 = vmatpush.bf16.msrb.mxu0 %v6355_v34  ;;  %v6335_v1 = vor.u32 %v8453_v61, %v6334_v60  ;;  %v6319_v28 = vor.u32 %v8448_v22, %v6316_v23  ;;  %v8447_v34 = vld [vmem:[#allocation3 + $0xe8] sm:$0xf0]  ;;  %v6298_v60 = vld [vmem:[#allocation3 + $0xc8] sm:$0xf]  ;;  %v8444_v61 = vld [vmem:[#allocation3 + $0xd0] sm:$0xf0] }
  0xb7   :  { %1388 = vmatpush.bf16.msrb.mxu3 %v6471_v51  ;;  %v6311_v39 = vor.u32 %v8447_v34, %v6310_v30  ;;  %v8445_v51 = vld [vmem:[#allocation3 + $0xdc] sm:$0xf] }
  0xb8   :  { %v8489_v34 = vld [vmem:[#allocation5 + $0xb8] sm:$0xf0] }
  0xb9   :  { %1215 = vmatpush.bf16.msrb.mxu2 %v6347_v42 }
  0xba   :  { %1199 = vmatpush.bf16.msrb.mxu1 %v6275_v15  ;;  %1187 = vmatpush.bf16.msrb.mxu0 %v6343_v55  ;;  %v6323_v15 = vor.u32 %v8450_v13, %v6322_v10  ;;  %v6307_v55 = vor.u32 %v8445_v51, %v6304_v52  ;;  %v8420_v10 = vld [vmem:[#allocation3 + $0x10] sm:$0xf0]  ;;  %v6410_v13 = vld [vmem:[#allocation5 + $0x18] sm:$0xf]  ;;  %v6682_v51 = vld [vmem:[#allocation3 + $0x168] sm:$0xf] }
  0xbb   :  { %1389 = vmatpush.bf16.msrb.mxu3 %v6459_v5  ;;  %v9418_v5 = vld [vmem:[%s10285_s4] sm:$0x7]  ;;  %v8536_v52 = vld [vmem:[#allocation3 + $0x170] sm:$0xf0] }
  0xbd   :  { %1216 = vmatpush.bf16.msrb.mxu2 %v6335_v1  ;;  %v6299_v1 = vor.u32 %v8444_v61, %v6298_v60  ;;  %v6683_v60 = vor.u32 %v8536_v52, %v6682_v51  ;;  %v6472_v61 = vld [vmem:[#allocation5 + $0x9c] sm:$0xf0]  ;;  %v6454_v51 = vld [vmem:[#allocation5 + $0x68] sm:$0xf] }
  0xbe   :  { %1200 = vmatpush.bf16.msrb.mxu1 %v6263_v41  ;;  %1188 = vmatpush.bf16.msrb.mxu0 %v6331_v7  ;;  %v8476_v41 = vld [vmem:[#allocation5 + $0x50] sm:$0xf0]  ;;  %v6202_v7 = vld [vmem:[#allocation3 + $0x8] sm:$0xf] }
  0xbf   :  { %1390 = vmatpush.bf16.msrb.mxu3 %v6447_v20  ;;  %v6435_v45 = vor.u32 %v8476_v41, %v6434_v40  ;;  %v6203_v16 = vor.u32 %v8420_v10, %v6202_v7  ;;  %v9424_v20 = vperm.slane %v9418_v5, 1  ;;  %v6491_v41 = vor.u32 %v8489_v34, %v6490_v29  ;;  %v8481_v10 = vld [vmem:[#allocation5 + $0x7c] sm:$0xf]  ;;  %v6658_v34 = vld [vmem:[#allocation3 + $0x138] sm:$0xf] }
  0xc1   :  { %1217 = vmatpush.bf16.msrb.mxu2 %v6323_v15  ;;  %v9421_v15 = vperm.slane %v9418_v5, 0 }
  0xc2   :  { %1201 = vmatpush.bf16.msrb.mxu1 %v6251_v63  ;;  %1189 = vmatpush.bf16.msrb.mxu0 %v6319_v28  ;;  %v6215_v63 = vor.u32 %v8423_v56, %v6214_v53  ;;  %v6484_v28 = vld [vmem:[#allocation5 + $0xb4] sm:$0xf0] }
  0xc3   :  { %1391 = vmatpush.bf16.msrb.mxu3 %v6435_v45  ;;  %v6487_v30 = vor.u32 %v8487_v25, %v6484_v28  ;;  %v8483_v25 = vld [vmem:[#allocation5 + $0x88] sm:$0xf0] }
  0xc5   :  { %1218 = vmatpush.bf16.msrb.mxu2 %v6311_v39  ;;  %v8467_v39 = vld [vmem:[#allocation5 + $0x8] sm:$0xf0] }
  0xc6   :  { %1202 = vmatpush.bf16.msrb.mxu1 %v6239_v14  ;;  %1190 = vmatpush.bf16.msrb.mxu0 %v6307_v55  ;;  %v8470_v14 = vld [vmem:[#allocation5 + $0x20] sm:$0xf0] }
  0xc7   :  { %1392 = vmatpush.bf16.msrb.mxu3 %v6423_v24  ;;  %v6411_v17 = vor.u32 %v8470_v14, %v6410_v13  ;;  %v6670_v24 = vld [vmem:[#allocation3 + $0x150] sm:$0xf]  ;;  %v6460_v13 = vld [vmem:[#allocation5 + $0x84] sm:$0xf0]  ;;  %v6466_v14 = vld [vmem:[#allocation5 + $0x80] sm:$0xf] }
  0xc8   :  { %v6671_v62 = vor.u32 %v8533_v6, %v6670_v24  ;;  %v8475_v24 = vld [vmem:[#allocation5 + $0x4c] sm:$0xf]  ;;  %v6436_v6 = vld [vmem:[#allocation5 + $0x54] sm:$0xf0] }
  0xc9   :  { %1219 = vmatpush.bf16.msrb.mxu2 %v6299_v1  ;;  %v8486_v1 = vld [vmem:[#allocation5 + $0xa0] sm:$0xf0] }
  0xca   :  { %1203 = vmatpush.bf16.msrb.mxu1 %v6227_v35  ;;  %1191 = vmatpush.bf16.msrb.mxu0 %v6295_v9  ;;  %v6398_v35 = vld [vmem:[#allocation5] sm:$0xf] }
  0xcb   :  { %1393 = vmatpush.bf16.msrb.mxu3 %v6411_v17  ;;  %v6399_v45 = vor.u32 %v8467_v39, %v6398_v35  ;;  %v6463_v17 = vor.u32 %v8481_v10, %v6460_v13  ;;  %v8530_v35 = vld [vmem:[#allocation3 + $0x140] sm:$0xf0] }
  0xcc   :  { %6395 = vmatmul.msk.bf16.vlgmr.msrb.gmra.mxu2 %vm9390_vm13, %v9154_v37 }
  0xcd   :  { %6391 = vmatmul.msk.bf16.vlgmr.msrb.gmra.mxu0 %vm9390_vm13, %v9154_v37 }
  0xce   :  { %1204 = vmatpush.bf16.msrb.mxu1 %v6215_v63  ;;  %1401 = vmatpush.bf16.msra.mxu0 %v6487_v30  ;;  %v6478_v63 = vld [vmem:[#allocation5 + $0x98] sm:$0xf]  ;;  %v6467_v30 = vor.u32 %v8483_v25, %v6466_v14  ;;  %v6634_v14 = vld [vmem:[#allocation3 + $0x108] sm:$0xf] }
  0xcf   :  { %1394 = vmatpush.bf16.msrb.mxu3 %v6399_v45  ;;  %v6479_v4 = vor.u32 %v8486_v1, %v6478_v63  ;;  %v6448_v45 = vld [vmem:[#allocation5 + $0x6c] sm:$0xf0]  ;;  %v8527_v63 = vld [vmem:[#allocation3 + $0x128] sm:$0xf0] }
  0xd2   :  { %1205 = vmatpush.bf16.msrb.mxu1 %v6203_v16 }
  0xd3   :  { %1881 = vmatpush.bf16.msra.mxu3 %v6683_v60 }
  0xd5   :  { %6393 = vmatmul.msk.bf16.vlgmr.msrb.gmra.mxu1 %vm9400_vm15, %v9154_v37 }
  0xd6   :  { %1415 = vmatpush.bf16.msra.mxu1 %v6491_v41  ;;  %v8478_v41 = vld [vmem:[#allocation5 + $0x64] sm:$0xf] }
  0xd7   :  { %1882 = vmatpush.bf16.msra.mxu3 %v6671_v62  ;;  %v6439_v62 = vor.u32 %v8475_v24, %v6436_v6 }
  0xda   :  { %1416 = vmatpush.bf16.msra.mxu1 %v6479_v4 }
  0xde   :  { %1417 = vmatpush.bf16.msra.mxu1 %v6467_v30  ;;  %v8472_v30 = vld [vmem:[#allocation5 + $0x34] sm:$0xf] }
 0x108   :  { %v424_v54 = vpop.f32.mrf.mxu0 }
 0x109   :  { %v425_v40 = vadd.f32 %v424_v54, %v9421_v15  ;;  %v438_v53 = vpop.f32.mrf.mxu1  ;;  %v8484_v54 = vld [vmem:[#allocation5 + $0x94] sm:$0xf] }
 0x10a   :  { %v6475_v43 = vor.u32 %v8484_v54, %v6472_v61  ;;  %v6646_v61 = vld [vmem:[#allocation3 + $0x120] sm:$0xf] }
 0x10b   :  { %v439_v2 = vadd.f32 %v438_v53, %v425_v40  ;;  %v6659_v40 = vor.u32 %v8530_v35, %v6658_v34  ;;  %v6647_v1 = vor.u32 %v8527_v63, %v6646_v61  ;;  %v6424_v34 = vld [vmem:[#allocation5 + $0x3c] sm:$0xf0]  ;;  %v6430_v35 = vld [vmem:[#allocation5 + $0x38] sm:$0xf]  ;;  %v8471_v61 = vld [vmem:[#allocation5 + $0x28] sm:$0xf0] }
 0x10c   :  { %1402 = vmatpush.bf16.msra.mxu0 %v6475_v43  ;;  %v6610_v63 = vld [vmem:[#allocation3 + $0xd8] sm:$0xf] }
 0x10d   :  { %1883 = vmatpush.bf16.msra.mxu3 %v6659_v40  ;;  %v6427_v40 = vor.u32 %v8472_v30, %v6424_v34 }
 0x10e   :  { %v452_v42 = vpop.f32.mrf.mxu2 }
 0x10f   :  { %v9413_v33 = vpop.f32.mrf.mxu3  ;;  %v453_v55 = vadd.f32 %v452_v42, %v9424_v20 }
 0x110   :  { %v426_v56 = vpop.f32.mrf.mxu0  ;;  %1403 = vmatpush.bf16.msra.mxu0 %v6463_v17 }
 0x111   :  { %v467_v42 = vadd.f32 %v9413_v33, %v453_v55  ;;  %v427_v28 = vadd.f32 %v426_v56, %v9421_v15  ;;  %v440_v52 = vpop.f32.mrf.mxu1  ;;  %v6451_v55 = vor.u32 %v8478_v41, %v6448_v45  ;;  %v8480_v56 = vld [vmem:[#allocation5 + $0x70] sm:$0xf0]  ;;  %1884 = vmatpush.bf16.msra.mxu3 %v6647_v1  ;;  %v6622_v41 = vld [vmem:[#allocation3 + $0xf0] sm:$0xf]  ;;  %v8521_v45 = vld [vmem:[#allocation3 + $0xf8] sm:$0xf0] }
 0x112   :  { %v6455_v54 = vor.u32 %v8480_v56, %v6454_v51  ;;  %v6412_v56 = vld [vmem:[#allocation5 + $0x24] sm:$0xf0]  ;;  %v8518_v1 = vld [vmem:[#allocation3 + $0xe0] sm:$0xf0] }
 0x113   :  { %v441_v60 = vadd.f32 %v440_v52, %v427_v28  ;;  %v6623_v52 = vor.u32 %v8521_v45, %v6622_v41 }
 0x114   :  { %1404 = vmatpush.bf16.msra.mxu0 %v6451_v55  ;;  %1418 = vmatpush.bf16.msra.mxu1 %v6455_v54  ;;  %v8469_v55 = vld [vmem:[#allocation5 + $0x1c] sm:$0xf]  ;;  %v6418_v54 = vld [vmem:[#allocation5 + $0x20] sm:$0xf] }
 0x116   :  { %v454_v22 = vpop.f32.mrf.mxu2 }
 0x117   :  { %v9429_v23 = vpop.f32.mrf.mxu3  ;;  %v455_v33 = vadd.f32 %v454_v22, %v9424_v20 }
 0x118   :  { %v9442_v53 = vpop.f32.mrf.mxu0  ;;  %1405 = vmatpush.bf16.msra.mxu0 %v6439_v62  ;;  %v8468_v62 = vld [vmem:[#allocation5 + $0x10] sm:$0xf0] }
 0x119   :  { %v469_v22 = vadd.f32 %v9429_v23, %v455_v33  ;;  %v8474_v33 = vld [vmem:[#allocation5 + $0x40] sm:$0xf0] }
 0x11a   :  { %v6431_v51 = vor.u32 %v8474_v33, %v6430_v35 }
 0x11c   :  { %1406 = vmatpush.bf16.msra.mxu0 %v6427_v40 }
 0x11e   :  { %v669_v27 = vpop.f32.mrf.mxu2 }
 0x11f   :  { %v702_v7 = vadd.f32 %v669_v27, %v439_v2  ;;  %v683_v9 = vpop.f32.mrf.mxu3 }
 0x120   :  { %v742_v16 = vadd.f32 %v683_v9, %v467_v42  ;;  %v6442_v42 = vld [vmem:[#allocation5 + $0x50] sm:$0xf] }
 0x121   :  { %v6186_v29 = vmul.f32 -1.442695, %v702_v7  ;;  %v8477_v7 = vld [vmem:[#allocation5 + $0x58] sm:$0xf0] }
 0x122   :  { %v6188_v39 = vmul.f32 -1.442695, %v742_v16  ;;  %v6443_v13 = vor.u32 %v8477_v7, %v6442_v42  ;;  %v8524_v16 = vld [vmem:[#allocation3 + $0x110] sm:$0xf0]  ;;  %v6611_v42 = vor.u32 %v8518_v1, %v6610_v63 }
 0x123   :  { %8932 = vpow2.f32 %v6186_v29  ;;  %v6635_v28 = vor.u32 %v8524_v16, %v6634_v14  ;;  %v9459_v16 = vperm.slane %v9418_v5, 2  ;;  %v8931_v5 = vld [vmem:[%s10286_s5] ss:$0 sm:$0xff] }
 0x124   :  { %8934 = vpow2.f32 %v6188_v39  ;;  %1419 = vmatpush.bf16.msra.mxu1 %v6443_v13  ;;  %v9451_v39 = vpop.f32.mrf.mxu0  ;;  %v8515_v13 = vld [vmem:[#allocation3 + $0xc8] sm:$0xf0] }
 0x125   :  { %1885 = vmatpush.bf16.msra.mxu3 %v6635_v28  ;;  %v481_v45 = vadd.f32 %v9442_v53, %v9459_v16 }
 0x126   :  { %v671_v43 = vpop.f32.mrf.mxu2 }
 0x127   :  { %v703_v2 = vadd.f32 %v671_v43, %v441_v60  ;;  %v685_v4 = vpop.f32.mrf.mxu3  ;;  %v6415_v60 = vor.u32 %v8469_v55, %v6412_v56  ;;  %v6419_v43 = vor.u32 %v8471_v61, %v6418_v54 }
 0x128   :  { %v743_v27 = vadd.f32 %v685_v4, %v469_v22  ;;  %1420 = vmatpush.bf16.msra.mxu1 %v6431_v51  ;;  %v6400_v4 = vld [vmem:[#allocation5 + $0xc] sm:$0xf0] }
 0x129   :  { %v8933_v9 = vpop.eup %8932  ;;  %v6187_v10 = vmul.f32 -1.442695, %v703_v2  ;;  %1886 = vmatpush.bf16.msra.mxu3 %v6623_v52  ;;  %v8466_v2 = vld [vmem:[#allocation5 + $0x4] sm:$0xf]  ;;  %1407 = vmatpush.bf16.msra.mxu0 %v6415_v60  ;;  %v494_v60 = vpop.f32.mrf.mxu1 }
 0x12a   :  { %v8935_v17 = vpop.eup %8934  ;;  %v9445_v23 = vadd.f32 1.0, %v8933_v9  ;;  %v6189_v25 = vmul.f32 -1.442695, %v743_v27  ;;  %v6406_v27 = vld [vmem:[#allocation5 + $0x8] sm:$0xf]  ;;  %v495_v53 = vadd.f32 %v494_v60, %v481_v45 }
 0x12b   :  { %v9447_v29 = vadd.f32 1.0, %v8935_v17  ;;  %8936 = vpow2.f32 %v6187_v10  ;;  %v6598_v10 = vld [vmem:[#allocation3 + $0xc0] sm:$0xf]  ;;  %v6407_v34 = vor.u32 %v8468_v62, %v6406_v27 }
 0x12c   :  { %8938 = vrcp.f32 %v9445_v23  ;;  %1421 = vmatpush.bf16.msra.mxu1 %v6419_v43  ;;  %v697_v33 = vpop.f32.mrf.mxu0  ;;  %v6599_v40 = vor.u32 %v8515_v13, %v6598_v10  ;;  %v723_v41 = vand.u32 2147483648, %v9445_v23  ;;  %v721_v52 = vand.u32 2147483647, %v9445_v23 }
 0x12d   :  { %8940 = vrcp.f32 %v9447_v29  ;;  %1887 = vmatpush.bf16.msra.mxu3 %v6611_v42  ;;  %vm717_vm4 = vweird.f32 %v9445_v23  ;;  %v785_v61 = vadd.f32 %v8931_v5, %v697_v33  ;;  %vm757_vm7 = vweird.f32 %v9447_v29 }
 0x12e   :  { %8942 = vpow2.f32 %v6189_v25  ;;  %v6403_v25 = vor.u32 %v8466_v2, %v6400_v4  ;;  %v724_v63 = vor.u32 1.1754944e-38, %v723_v41  ;;  %vm722_vm8 = vcmp.eq.f32.partialorder %v721_v52, 8.507059e+37 }
 0x12f   :  { %v763_v27 = vand.u32 2147483648, %v9447_v29  ;;  %v761_v10 = vand.u32 2147483647, %v9447_v29 }
 0x130   :  { %1408 = vmatpush.bf16.msra.mxu0 %v6403_v25  ;;  %1422 = vmatpush.bf16.msra.mxu1 %v6407_v34  ;;  %v483_v34 = vadd.f32 %v9451_v39, %v9459_v16 }
 0x131   :  { %v8937_v22 = vpop.eup %8936  ;;  %1888 = vmatpush.bf16.msra.mxu3 %v6599_v40  ;;  %v764_v40 = vor.u32 1.1754944e-38, %v763_v27  ;;  %v496_v52 = vpop.f32.mrf.mxu1 }
 0x132   :  { %v8939_v24 = vpop.eup %8938  ;;  %v9453_v6 = vadd.f32 1.0, %v8937_v22 }
 0x133   :  { %v9455_v7 = vpop.eup %8940  ;;  %v713_v9 = vmul.f32 %v8939_v24, %v9445_v23  ;;  %vm718_vm0 = vweird.f32 %v8939_v24 }
 0x134   :  { %v8943_v14 = vpop.eup %8942  ;;  %v753_v17 = vmul.f32 %v9455_v7, %v9447_v29  ;;  %8944 = vrcp.f32 %v9453_v6  ;;  %vm719_vm5 = vmor %vm717_vm4, %vm718_vm0  ;;  %vm758_vm10 = vweird.f32 %v9455_v7  ;;  %vm732_vm13 = vweird.f32 %v9453_v6 }
 0x135   :  { %v9464_v28 = vadd.f32 1.0, %v8943_v14  ;;  %v714_v30 = vsub.f32 1.0, %v713_v9  ;;  %v738_v9 = vand.u32 2147483648, %v9453_v6  ;;  %vm9487_vm12 = vmor %vm757_vm7, %vm758_vm10  ;;  %vm762_vm0 = vcmp.eq.f32.partialorder %v761_v10, 8.507059e+37  ;;  %v8537_v10 = vld [vmem:[#allocation3 + $0x178] sm:$0xf0] }
 0x136   :  { %v754_v35 = vsub.f32 1.0, %v753_v17  ;;  %v8534_v14 = vld [vmem:[#allocation3 + $0x160] sm:$0xf0] }
 0x137   :  { %8946 = vrcp.f32 %v9464_v28  ;;  %v715_v51 = vmul.f32 %v8939_v24, %v714_v30  ;;  %v699_v30 = vpop.f32.mrf.mxu0  ;;  %v739_v29 = vor.u32 1.1754944e-38, %v738_v9  ;;  %vm772_vm7 = vweird.f32 %v9464_v28  ;;  %v6690_v9 = vld [vmem:[#allocation3 + $0x170] sm:$0xf] }
 0x138   :  { %v755_v55 = vmul.f32 %v9455_v7, %v754_v35 }
 0x139   :  { %v716_v54 = vadd.f32 %v8939_v24, %v715_v51  ;;  %v786_v51 = vadd.f32 %v8931_v5, %v699_v30  ;;  %v8531_v30 = vld [vmem:[#allocation3 + $0x148] sm:$0xf0] }
 0x13a   :  { %v8945_v56 = vpop.eup %8944  ;;  %v756_v2 = vadd.f32 %v9455_v7, %v755_v55 }
 0x13b   :  { %v728_v22 = vmul.f32 %v8945_v56, %v9453_v6  ;;  %v720_v43 = vsel %vm719_vm5, %v8939_v24, %v716_v54  ;;  %vm733_vm11 = vweird.f32 %v8945_v56  ;;  %v736_v24 = vand.u32 2147483647, %v9453_v6 }
 0x13c   :  { %v725_v4 = vsel %vm722_vm8, %v724_v63, %v720_v43  ;;  %v760_v35 = vsel %vm9487_vm12, %v9455_v7, %v756_v2  ;;  %vm734_vm15 = vmor %vm732_vm13, %vm733_vm11  ;;  %v497_v54 = vadd.f32 %v496_v52, %v483_v34  ;;  %v778_v7 = vand.u32 2147483648, %v9464_v28  ;;  %v6654_v34 = vld [vmem:[#allocation3 + $0x128] sm:$0xf]  ;;  %v8522_v52 = vld [vmem:[#allocation3 + $0x100] sm:$0xf0] }
 0x13d   :  { %v8947_v1 = vpop.eup %8946  ;;  %v729_v42 = vsub.f32 1.0, %v728_v22  ;;  %v787_v62 = vmul.f32 %v785_v61, %v725_v4  ;;  %vm737_vm4 = vcmp.eq.f32.partialorder %v736_v24, 8.507059e+37  ;;  %v765_v39 = vsel %vm762_vm0, %v764_v40, %v760_v35  ;;  %v6678_v24 = vld [vmem:[#allocation3 + $0x158] sm:$0xf]  ;;  %v8528_v35 = vld [vmem:[#allocation3 + $0x130] sm:$0xf0] }
 0x13e   :  { %v768_v23 = vmul.f32 %v8947_v1, %v9464_v28  ;;  %vm773_vm5 = vweird.f32 %v8947_v1  ;;  %v776_v6 = vand.u32 2147483647, %v9464_v28  ;;  %v793_v63 = vsub.f32 1.0, %v765_v39  ;;  %v6642_v40 = vld [vmem:[#allocation3 + $0x110] sm:$0xf] }
 0x13f   :  { %v730_v13 = vmul.f32 %v8945_v56, %v729_v42  ;;  %v789_v25 = vadd.f32 %v787_v62, %v495_v53  ;;  %vm774_vm8 = vmor %vm772_vm7, %vm773_vm5  ;;  %v779_v43 = vor.u32 1.1754944e-38, %v778_v7  ;;  %v797_v2 = vmul.f32 %v765_v39, %v9319_v8  ;;  %v8519_v39 = vld [vmem:[#allocation3 + $0xe8] sm:$0xf0]  ;;  %v8584_v7 = vld [vmem:[#allocation3 + $0xb0] sm:$0xf0] }
 0x140   :  { %v769_v17 = vsub.f32 1.0, %v768_v23  ;;  %vm777_vm10 = vcmp.eq.f32.partialorder %v776_v6, 8.507059e+37  ;;  %vm1538_vm11 = vcmp.eq.s32.totalorder %v9262_v12, %v9244_v36  ;;  %vm1540_vm12 = vcmp.eq.s32.totalorder %v9262_v12, %v9250_v58  ;;  %v6618_v36 = vld [vmem:[#allocation3 + $0xe0] sm:$0xf]  ;;  %v6606_v12 = vld [vmem:[#allocation3 + $0xc8] sm:$0xf] }
 0x141   :  { %v731_v33 = vadd.f32 %v8945_v56, %v730_v13  ;;  %8948 = vtanh.f32 %v789_v25  ;;  %v6691_v13 = vor.u32 %v8537_v10, %v6690_v9  ;;  %v6666_v25 = vld [vmem:[#allocation3 + $0x140] sm:$0xf]  ;;  %vm9512_vm13 = vmpackc.low %vm1540_vm12, %vm1538_vm11  ;;  %v6619_v58 = vor.u32 %v8519_v39, %v6618_v36  ;;  %v8569_v9 = vld [vmem:[#allocation3 + $0x38] sm:$0xf0] }
 0x142   :  { %v770_v41 = vmul.f32 %v8947_v1, %v769_v17  ;;  %v6679_v17 = vor.u32 %v8534_v14, %v6678_v24  ;;  %v6810_v24 = vld [vmem:[#allocation3] sm:$0xf]  ;;  %v8563_v14 = vld [vmem:[#allocation3 + $0x8] sm:$0xf0]  ;;  %vm2262_vm0 = vcmp.eq.s32.totalorder %v9246_v48, %v9306_v50  ;;  %v6562_v36 = vld [vmem:[#allocation3 + $0x78] sm:$0xf] }
 0x143   :  { %v735_v45 = vsel %vm734_vm15, %v8945_v56, %v731_v33  ;;  %v6655_v33 = vor.u32 %v8528_v35, %v6654_v34  ;;  %vm2264_vm15 = vcmp.eq.s32.totalorder %v9246_v48, %v9304_v49  ;;  %v6811_v35 = vor.u32 %v8563_v14, %v6810_v24  ;;  %v8506_v49 = vld [vmem:[#allocation3 + $0x80] sm:$0xf0]  ;;  %v6550_v39 = vld [vmem:[#allocation3 + $0x60] sm:$0xf]  ;;  %v8532_v24 = vld [vmem:[#allocation3 + $0x154] sm:$0xf] }
 0x144   :  { %v771_v55 = vadd.f32 %v8947_v1, %v770_v41  ;;  %v740_v60 = vsel %vm737_vm4, %v739_v29, %v735_v45  ;;  %v8525_v41 = vld [vmem:[#allocation3 + $0x118] sm:$0xf0]  ;;  %vm9526_vm4 = vmpackc.low %vm2264_vm15, %vm2262_vm0 }
 0x145   :  { %v788_v61 = vmul.f32 %v786_v51, %v740_v60  ;;  %v6643_v45 = vor.u32 %v8525_v41, %v6642_v40  ;;  %v6630_v51 = vld [vmem:[#allocation3 + $0xf8] sm:$0xf]  ;;  %v8516_v60 = vld [vmem:[#allocation3 + $0xd0] sm:$0xf0]  ;;  %v6574_v40 = vld [vmem:[#allocation3 + $0x90] sm:$0xf] }
 0x146   :  { %v775_v56 = vsel %vm774_vm8, %v8947_v1, %v771_v55  ;;  %v6631_v55 = vor.u32 %v8522_v52, %v6630_v51  ;;  %v8509_v41 = vld [vmem:[#allocation3 + $0x98] sm:$0xf0]  ;;  %v8582_v51 = vld [vmem:[#allocation3 + $0xa0] sm:$0xf0] }
 0x147   :  { %v790_v22 = vadd.f32 %v788_v61, %v497_v54  ;;  %v8949_v53 = vpop.eup %8948  ;;  %v780_v4 = vsel %vm777_vm10, %v779_v43, %v775_v56  ;;  %v6894_v54 = vld [vmem:[#allocation3 + $0xa8] sm:$0xf]  ;;  %v6607_v61 = vor.u32 %v8516_v60, %v6606_v12  ;;  %v6870_v56 = vld [vmem:[#allocation3 + $0x78] sm:$0xf]  ;;  %v8578_v43 = vld [vmem:[#allocation3 + $0x80] sm:$0xf0]  ;;  %v6575_v52 = vor.u32 %v8509_v41, %v6574_v40 }
 0x148   :  { %v795_v5 = vmul.f32 %v8949_v53, %v793_v63  ;;  %v794_v27 = vsub.f32 1.0, %v780_v4  ;;  %v798_v62 = vmul.f32 %v780_v4, %v9324_v11  ;;  %v6667_v11 = vor.u32 %v8531_v30, %v6666_v25  ;;  %v6882_v63 = vld [vmem:[#allocation3 + $0x90] sm:$0xf]  ;;  %v8575_v4 = vld [vmem:[#allocation3 + $0x68] sm:$0xf0] }
 0x149   :  { %8950 = vtanh.f32 %v790_v22  ;;  %v6895_v6 = vor.u32 %v8584_v7, %v6894_v54  ;;  %v8581_v22 = vld [vmem:[#allocation3 + $0x98] sm:$0xf0]  ;;  %v8512_v25 = vld [vmem:[#allocation3 + $0xb0] sm:$0xf0]  ;;  %v6902_v30 = vld [vmem:[#allocation3 + $0xb0] sm:$0xf] }
 0x14a   :  { %v799_v42 = vadd.f32 %v797_v2, %v795_v5  ;;  %v6883_v53 = vor.u32 %v8581_v22, %v6882_v63  ;;  %v6871_v5 = vor.u32 %v8578_v43, %v6870_v56  ;;  %v6858_v2 = vld [vmem:[#allocation3 + $0x60] sm:$0xf]  ;;  %v8503_v12 = vld [vmem:[#allocation3 + $0x68] sm:$0xf0]  ;;  %v6588_v54 = vld [vmem:[#allocation3 + $0xb4] sm:$0xf0] }
 0x14b   :  { %v8511_v60 = vld [vmem:[#allocation3 + $0xac] sm:$0xf]  ;;  %v6878_v7 = vld [vmem:[#allocation3 + $0x80] sm:$0xf]  ;;  %v8508_v63 = vld [vmem:[#allocation3 + $0x94] sm:$0xf] }
 0x14c   :  { %801 = vst [vmem:[%s10287_s6] sm:$0xff] %v799_v42  ;;  %v6576_v22 = vld [vmem:[#allocation3 + $0x9c] sm:$0xf0]  ;;  %v6538_v56 = vld [vmem:[#allocation3 + $0x48] sm:$0xf] }
 0x14d   :  { %v6579_v43 = vor.u32 %v8508_v63, %v6576_v22  ;;  %v6660_v40 = vld [vmem:[#allocation3 + $0x144] sm:$0xf0]  ;;  %v8491_v63 = vld [vmem:[#allocation3 + $0x8] sm:$0xf0]  ;;  %v8496_v22 = vld [vmem:[#allocation3 + $0x34] sm:$0xf] }
 0x14f   :  { %v8951_v23 = vpop.eup %8950 }
 0x150   :  { %v796_v28 = vmul.f32 %v8951_v23, %v794_v27  ;;  %v6846_v27 = vld [vmem:[#allocation3 + $0x48] sm:$0xf]  ;;  %v8572_v23 = vld [vmem:[#allocation3 + $0x50] sm:$0xf0] }
 0x152   :  { %v800_v1 = vadd.f32 %v798_v62, %v796_v28  ;;  %v6847_v28 = vor.u32 %v8572_v23, %v6846_v27  ;;  %v6834_v62 = vld [vmem:[#allocation3 + $0x30] sm:$0xf]  ;;  %v6866_v27 = vld [vmem:[#allocation3 + $0x68] sm:$0xf]  ;;  %v8576_v23 = vld [vmem:[#allocation3 + $0x70] sm:$0xf0] }
 0x153   :  { %v6835_v10 = vor.u32 %v8569_v9, %v6834_v62  ;;  %v6684_v62 = vld [vmem:[#allocation3 + $0x174] sm:$0xf0]  ;;  %v6867_v14 = vor.u32 %v8576_v23, %v6866_v27  ;;  %v6818_v27 = vld [vmem:[#allocation3 + $0x8] sm:$0xf] }
 0x154   :  { %802 = vst [vmem:[%s10287_s6 + $0x8] sm:$0xff] %v800_v1  ;;  %v1226_v8 = vpack.c.bf16 %v800_v1, %v799_v42  ;;  %v6859_v42 = vor.u32 %v8575_v4, %v6858_v2  ;;  %v6822_v1 = vld [vmem:[#allocation3 + $0x18] sm:$0xf]  ;;  %v8500_v2 = vld [vmem:[#allocation3 + $0x50] sm:$0xf0] }
 0x155   :  { %v8505_v4 = vld [vmem:[#allocation3 + $0x7c] sm:$0xf]  ;;  %v6539_v9 = vor.u32 %v8500_v2, %v6538_v56  ;;  %v8567_v56 = vld [vmem:[#allocation3 + $0x28] sm:$0xf0] }
 0x156   :  { %1395 = vmatmul.bf16.vlgmr.msrb.gmra.mxu3 %v1226_v8  ;;  %1409 = vmatmul.bf16.vlgmr.msra.gmra.mxu0 %v1226_v8 }
 0x157   :  { %1423 = vmatmul.bf16.vlgmr.msra.gmra.mxu1 %v1226_v8  ;;  %1937 = vmatpush.bf16.msrb.mxu3 %v6691_v13  ;;  %v8566_v13 = vld [vmem:[#allocation3 + $0x20] sm:$0xf0] }
 0x158   :  { %v6823_v8 = vor.u32 %v8566_v13, %v6822_v1  ;;  %v8497_v1 = vld [vmem:[#allocation3 + $0x38] sm:$0xf0] }
 0x15b   :  { %1938 = vmatpush.bf16.msrb.mxu3 %v6679_v17  ;;  %v6586_v17 = vld [vmem:[#allocation3 + $0xa8] sm:$0xf] }
 0x15c   :  { %v6587_v34 = vor.u32 %v8512_v25, %v6586_v17  ;;  %v8502_v17 = vld [vmem:[#allocation3 + $0x64] sm:$0xf]  ;;  %v6552_v25 = vld [vmem:[#allocation3 + $0x6c] sm:$0xf0] }
 0x15e   :  { %1867 = vmatpush.bf16.msra.mxu2 %v6587_v34  ;;  %v8573_v34 = vld [vmem:[#allocation3 + $0x58] sm:$0xf0] }
 0x15f   :  { %1939 = vmatpush.bf16.msrb.mxu3 %v6667_v11  ;;  %v8585_v11 = vld [vmem:[#allocation3 + $0xb8] sm:$0xf0] }
 0x162   :  { %1868 = vmatpush.bf16.msra.mxu2 %v6575_v52 }
 0x163   :  { %1940 = vmatpush.bf16.msrb.mxu3 %v6655_v33  ;;  %v6903_v33 = vor.u32 %v8585_v11, %v6902_v30  ;;  %v6672_v30 = vld [vmem:[#allocation3 + $0x15c] sm:$0xf0]  ;;  %v6854_v11 = vld [vmem:[#allocation3 + $0x50] sm:$0xf] }
 0x164   :  { %v6855_v52 = vor.u32 %v8573_v34, %v6854_v11  ;;  %v6648_v11 = vld [vmem:[#allocation3 + $0x12c] sm:$0xf0]  ;;  %v6558_v34 = vld [vmem:[#allocation3 + $0x68] sm:$0xf] }
 0x166   :  { %6695 = vmatmul.msk.bf16.vlgmr.msra.gmra.mxu3 %vm9512_vm13, %v9154_v37 }
 0x167   :  { %1941 = vmatpush.bf16.msrb.mxu3 %v6643_v45  ;;  %v6890_v45 = vld [vmem:[#allocation3 + $0x98] sm:$0xf] }
 0x168   :  { %v6891_v50 = vor.u32 %v8582_v51, %v6890_v45  ;;  %v6514_v45 = vld [vmem:[#allocation3 + $0x18] sm:$0xf]  ;;  %v6555_v51 = vor.u32 %v8502_v17, %v6552_v25  ;;  %v8507_v17 = vld [vmem:[#allocation3 + $0x88] sm:$0xf0] }
 0x16b   :  { %1942 = vmatpush.bf16.msrb.mxu3 %v6631_v55  ;;  %v8653_v55 = vld [vmem:[#allocation3 + $0x98] sm:$0xf0] }
 0x16f   :  { %1943 = vmatpush.bf16.msrb.mxu3 %v6619_v58  ;;  %v6563_v58 = vor.u32 %v8506_v49, %v6562_v36  ;;  %v8494_v36 = vld [vmem:[#allocation3 + $0x20] sm:$0xf0]  ;;  %v8499_v49 = vld [vmem:[#allocation3 + $0x4c] sm:$0xf] }
 0x171   :  { %1869 = vmatpush.bf16.msra.mxu2 %v6563_v58  ;;  %v8570_v58 = vld [vmem:[#allocation3 + $0x40] sm:$0xf0] }
 0x173   :  { %1944 = vmatpush.bf16.msrb.mxu3 %v6607_v61  ;;  %v8579_v61 = vld [vmem:[#allocation3 + $0x88] sm:$0xf0] }
 0x176   :  { %6703 = vmatmul.msk.bf16.vlgmr.msrb.gmra.mxu3 %vm9512_vm13, %v9154_v37 }
 0x177   :  { %2592 = vmatpush.bf16.msra.mxu3 %v6895_v6  ;;  %v6591_v6 = vor.u32 %v8511_v60, %v6588_v54  ;;  %v6830_v60 = vld [vmem:[#allocation3 + $0x20] sm:$0xf]  ;;  %v6515_v54 = vor.u32 %v8494_v36, %v6514_v45  ;;  %v6504_v45 = vld [vmem:[#allocation3 + $0xc] sm:$0xf0]  ;;  %v8560_v36 = vld [vmem:[#allocation5 + $0xb0] sm:$0xf0] }
 0x179   :  { %1895 = vmatpush.bf16.msrb.mxu0 %v6591_v6 }
 0x17b   :  { %2593 = vmatpush.bf16.msra.mxu3 %v6883_v53  ;;  %v6551_v53 = vor.u32 %v8503_v12, %v6550_v39  ;;  %v6540_v39 = vld [vmem:[#allocation3 + $0x54] sm:$0xf0] }
 0x17d   :  { %1870 = vmatpush.bf16.msra.mxu2 %v6551_v53  ;;  %1896 = vmatpush.bf16.msrb.mxu0 %v6579_v43  ;;  %v6528_v53 = vld [vmem:[#allocation3 + $0x3c] sm:$0xf0]  ;;  %v6594_v43 = vld [vmem:[#allocation3 + $0xb0] sm:$0xf] }
 0x17f   :  { %2594 = vmatpush.bf16.msra.mxu3 %v6871_v5  ;;  %v6879_v5 = vor.u32 %v8579_v61, %v6878_v7  ;;  %v6502_v7 = vld [vmem:[#allocation3] sm:$0xf]  ;;  %v6543_v61 = vor.u32 %v8499_v49, %v6540_v39  ;;  %v8523_v39 = vld [vmem:[#allocation3 + $0x10c] sm:$0xf] }
 0x180   :  { %v6503_v2 = vor.u32 %v8491_v63, %v6502_v7  ;;  %v6778_v7 = vld [vmem:[#allocation5 + $0x90] sm:$0xf]  ;;  %v8520_v63 = vld [vmem:[#allocation3 + $0xf4] sm:$0xf] }
 0x181   :  { %1871 = vmatpush.bf16.msra.mxu2 %v6539_v9  ;;  %v8564_v9 = vld [vmem:[#allocation3 + $0x10] sm:$0xf0] }
 0x183   :  { %2595 = vmatpush.bf16.msra.mxu3 %v6859_v42  ;;  %v6564_v42 = vld [vmem:[#allocation3 + $0x84] sm:$0xf0] }
 0x184   :  { %v6567_v13 = vor.u32 %v8505_v4, %v6564_v42  ;;  %v6531_v4 = vor.u32 %v8496_v22, %v6528_v53  ;;  %v6831_v42 = vor.u32 %v8567_v56, %v6830_v60  ;;  %v8501_v60 = vld [vmem:[#allocation3 + $0x58] sm:$0xf0]  ;;  %v6624_v22 = vld [vmem:[#allocation3 + $0xfc] sm:$0xf0]  ;;  %v6534_v53 = vld [vmem:[#allocation3 + $0x38] sm:$0xf] }
 0x185   :  { %v6627_v56 = vor.u32 %v8520_v63, %v6624_v22  ;;  %v6730_v63 = vld [vmem:[#allocation5 + $0x30] sm:$0xf]  ;;  %v8545_v22 = vld [vmem:[#allocation5 + $0x38] sm:$0xf0] }
 0x186   :  { %1897 = vmatpush.bf16.msrb.mxu0 %v6567_v13 }
 0x187   :  { %2596 = vmatpush.bf16.msra.mxu3 %v6847_v28  ;;  %v8535_v28 = vld [vmem:[#allocation3 + $0x16c] sm:$0xf] }
 0x18a   :  { %1898 = vmatpush.bf16.msrb.mxu0 %v6555_v51 }
 0x18b   :  { %2597 = vmatpush.bf16.msra.mxu3 %v6835_v10  ;;  %v6526_v10 = vld [vmem:[#allocation3 + $0x30] sm:$0xf] }
 0x18c   :  { %v6527_v41 = vor.u32 %v8497_v1, %v6526_v10  ;;  %v6582_v10 = vld [vmem:[#allocation3 + $0x98] sm:$0xf]  ;;  %v8510_v1 = vld [vmem:[#allocation3 + $0xa0] sm:$0xf0] }
 0x18e   :  { %1872 = vmatpush.bf16.msra.mxu2 %v6527_v41  ;;  %1899 = vmatpush.bf16.msrb.mxu0 %v6543_v61  ;;  %v8490_v41 = vld [vmem:[#allocation3 + $0x4] sm:$0xf]  ;;  %v8557_v61 = vld [vmem:[#allocation5 + $0x98] sm:$0xf0] }
 0x18f   :  { %2598 = vmatpush.bf16.msra.mxu3 %v6823_v8  ;;  %v6687_v8 = vor.u32 %v8535_v28, %v6684_v62  ;;  %v8493_v28 = vld [vmem:[#allocation3 + $0x1c] sm:$0xf]  ;;  %v6516_v62 = vld [vmem:[#allocation3 + $0x24] sm:$0xf0]  ;;  %v6507_v51 = vor.u32 %v8490_v41, %v6504_v45  ;;  %v6798_v41 = vld [vmem:[#allocation5 + $0xb0] sm:$0xf] }
 0x190   :  { %v6519_v13 = vor.u32 %v8493_v28, %v6516_v62  ;;  %v6522_v28 = vld [vmem:[#allocation3 + $0x20] sm:$0xf]  ;;  %v9542_v62 = vpop.f32.mrf.mxu0  ;;  %v8561_v45 = vld [vmem:[#allocation5 + $0xb8] sm:$0xf0] }
 0x191   :  { %1909 = vmatpush.bf16.msrb.mxu1 %v6687_v8  ;;  %v6819_v8 = vor.u32 %v8564_v9, %v6818_v27  ;;  %v8517_v27 = vld [vmem:[#allocation3 + $0xdc] sm:$0xf] }
 0x192   :  { %1873 = vmatpush.bf16.msra.mxu2 %v6515_v54  ;;  %1900 = vmatpush.bf16.msrb.mxu0 %v6531_v4  ;;  %v8554_v4 = vld [vmem:[#allocation5 + $0x80] sm:$0xf0] }
 0x193   :  { %2599 = vmatpush.bf16.msra.mxu3 %v6811_v35  ;;  %v6675_v35 = vor.u32 %v8532_v24, %v6672_v30  ;;  %v6583_v24 = vor.u32 %v8510_v1, %v6582_v10  ;;  %v8526_v30 = vld [vmem:[#allocation3 + $0x124] sm:$0xf]  ;;  %v8495_v10 = vld [vmem:[#allocation3 + $0x28] sm:$0xf0] }
 0x194   :  { %v6523_v1 = vor.u32 %v8495_v10, %v6522_v28  ;;  %v6756_v10 = vld [vmem:[#allocation5 + $0x6c] sm:$0xf0] }
 0x195   :  { %1910 = vmatpush.bf16.msrb.mxu1 %v6675_v35  ;;  %v6651_v35 = vor.u32 %v8526_v30, %v6648_v11  ;;  %v8492_v11 = vld [vmem:[#allocation3 + $0x10] sm:$0xf0] }
 0x196   :  { %7001 = vmatmul.msk.bf16.vlgmr.msra.gmra.mxu3 %vm9526_vm4, %v9154_v37  ;;  %1874 = vmatpush.bf16.msra.mxu2 %v6503_v2  ;;  %v6766_v2 = vld [vmem:[#allocation5 + $0x78] sm:$0xf] }
 0x197   :  { %2648 = vmatpush.bf16.msrb.mxu3 %v6903_v33  ;;  %v8529_v33 = vld [vmem:[#allocation3 + $0x13c] sm:$0xf]  ;;  %1901 = vmatpush.bf16.msrb.mxu0 %v6519_v13  ;;  %v6754_v13 = vld [vmem:[#allocation5 + $0x60] sm:$0xf] }
 0x198   :  { %v6663_v12 = vor.u32 %v8529_v33, %v6660_v40  ;;  %v8504_v33 = vld [vmem:[#allocation3 + $0x70] sm:$0xf0] }
 0x199   :  { %6693 = vmatmul.msk.bf16.vlgmr.msra.gmra.mxu2 %vm9257_vm2, %v9154_v37  ;;  %v6559_v40 = vor.u32 %v8504_v33, %v6558_v34  ;;  %v8559_v34 = vld [vmem:[#allocation5 + $0xac] sm:$0xf] }
 0x19a   :  { %1911 = vmatpush.bf16.msrb.mxu1 %v6663_v12 }
 0x19b   :  { %2649 = vmatpush.bf16.msrb.mxu3 %v6891_v50  ;;  %v6842_v50 = vld [vmem:[#allocation3 + $0x38] sm:$0xf]  ;;  %1902 = vmatpush.bf16.msrb.mxu0 %v6507_v51  ;;  %v1179_v51 = vpop.f32.mrf.mxu3 }
 0x19c   :  { %v6843_v6 = vor.u32 %v8570_v58, %v6842_v50  ;;  %v6636_v50 = vld [vmem:[#allocation3 + $0x114] sm:$0xf0]  ;;  %v6546_v58 = vld [vmem:[#allocation3 + $0x50] sm:$0xf] }
 0x19d   :  { %v6639_v12 = vor.u32 %v8523_v39, %v6636_v50  ;;  %v6547_v54 = vor.u32 %v8501_v60, %v6546_v58  ;;  %v8556_v50 = vld [vmem:[#allocation5 + $0x94] sm:$0xf]  ;;  %v6780_v58 = vld [vmem:[#allocation5 + $0x9c] sm:$0xf0] }
 0x19e   :  { %1912 = vmatpush.bf16.msrb.mxu1 %v6651_v35  ;;  %6697 = vmatmul.msk.bf16.vlgmr.msrb.gmra.mxu0 %vm9257_vm2, %v9154_v37  ;;  %v6792_v35 = vld [vmem:[#allocation5 + $0xb4] sm:$0xf0]  ;;  %v6783_v60 = vor.u32 %v8556_v50, %v6780_v58  ;;  %v8549_v58 = vld [vmem:[#allocation5 + $0x58] sm:$0xf0] }
 0x19f   :  { %2650 = vmatpush.bf16.msrb.mxu3 %v6879_v5  ;;  %v8513_v5 = vld [vmem:[#allocation3 + $0xb8] sm:$0xf0] }
 0x1a0   :  { %v6595_v23 = vor.u32 %v8513_v5, %v6594_v43  ;;  %v8498_v43 = vld [vmem:[#allocation3 + $0x40] sm:$0xf0] }
 0x1a1   :  { %v6535_v5 = vor.u32 %v8498_v43, %v6534_v53  ;;  %v6731_v53 = vor.u32 %v8545_v22, %v6730_v63  ;;  %v6768_v43 = vld [vmem:[#allocation5 + $0x84] sm:$0xf0]  ;;  %v8544_v22 = vld [vmem:[#allocation5 + $0x34] sm:$0xf] }
 0x1a2   :  { %1923 = vmatpush.bf16.msrb.mxu2 %v6595_v23  ;;  %1913 = vmatpush.bf16.msrb.mxu1 %v6639_v12  ;;  %v6612_v23 = vld [vmem:[#allocation3 + $0xe4] sm:$0xf0]  ;;  %v6786_v12 = vld [vmem:[#allocation5 + $0x98] sm:$0xf] }
 0x1a3   :  { %2651 = vmatpush.bf16.msrb.mxu3 %v6867_v14  ;;  %v6570_v14 = vld [vmem:[#allocation3 + $0x80] sm:$0xf]  ;;  %v6615_v9 = vor.u32 %v8517_v27, %v6612_v23  ;;  %v6718_v27 = vld [vmem:[#allocation5 + $0x18] sm:$0xf]  ;;  %v8542_v23 = vld [vmem:[#allocation5 + $0x20] sm:$0xf0] }
 0x1a4   :  { %v6571_v25 = vor.u32 %v8507_v17, %v6570_v14  ;;  %v8514_v14 = vld [vmem:[#allocation3 + $0xc4] sm:$0xf]  ;;  %v6600_v17 = vld [vmem:[#allocation3 + $0xcc] sm:$0xf0]  ;;  %v6719_v28 = vor.u32 %v8542_v23, %v6718_v27 }
 0x1a5   :  { %v6603_v30 = vor.u32 %v8514_v14, %v6600_v17 }
 0x1a6   :  { %1924 = vmatpush.bf16.msrb.mxu2 %v6583_v24  ;;  %1914 = vmatpush.bf16.msrb.mxu1 %v6627_v56  ;;  %v8553_v56 = vld [vmem:[#allocation5 + $0x7c] sm:$0xf] }
 0x1a7   :  { %2652 = vmatpush.bf16.msrb.mxu3 %v6855_v52  ;;  %v6790_v52 = vld [vmem:[#allocation5 + $0xa8] sm:$0xf]  ;;  %v6771_v29 = vor.u32 %v8553_v56, %v6768_v43  ;;  %v6738_v56 = vld [vmem:[#allocation5 + $0x38] sm:$0xf] }
 0x1a8   :  { %v6791_v49 = vor.u32 %v8560_v36, %v6790_v52  ;;  %v6799_v52 = vor.u32 %v8561_v45, %v6798_v41  ;;  %v6742_v36 = vld [vmem:[#allocation5 + $0x48] sm:$0xf]  ;;  %v1165_v41 = vpop.f32.mrf.mxu2 }
 0x1aa   :  { %1925 = vmatpush.bf16.msrb.mxu2 %v6571_v25  ;;  %2112 = vmatpush.bf16.msra.mxu0 %v6791_v49  ;;  %v6510_v25 = vld [vmem:[#allocation3 + $0x8] sm:$0xf]  ;;  %v8548_v49 = vld [vmem:[#allocation5 + $0x50] sm:$0xf0] }
 0x1ab   :  { %2653 = vmatpush.bf16.msrb.mxu3 %v6843_v6  ;;  %v6779_v6 = vor.u32 %v8557_v61, %v6778_v7  ;;  %1915 = vmatpush.bf16.msrb.mxu1 %v6615_v9  ;;  %v6511_v33 = vor.u32 %v8492_v11, %v6510_v25  ;;  %v6743_v39 = vor.u32 %v8548_v49, %v6742_v36  ;;  %v1151_v7 = vpop.f32.mrf.mxu1  ;;  %v9547_v61 = vpop.f32.mrf.mxu0  ;;  %v6706_v25 = vld [vmem:[#allocation5] sm:$0xf]  ;;  %v6750_v36 = vld [vmem:[#allocation5 + $0x50] sm:$0xf] }
 0x1ac   :  { %v1181_v9 = vpop.f32.mrf.mxu3  ;;  %v1152_v11 = vadd.f32 %v1151_v7, %v9421_v15  ;;  %v8605_v7 = vld [vmem:[#allocation3 + $0x158] sm:$0xf0] }
 0x1ad   :  { %v1182_v49 = vadd.f32 %v1181_v9, %v9424_v20  ;;  %v6966_v9 = vld [vmem:[#allocation3 + $0x138] sm:$0xf] }
 0x1ae   :  { %1926 = vmatpush.bf16.msrb.mxu2 %v6559_v40  ;;  %2113 = vmatpush.bf16.msra.mxu0 %v6779_v6  ;;  %v6795_v40 = vor.u32 %v8559_v34, %v6792_v35 }
 0x1af   :  { %2654 = vmatpush.bf16.msrb.mxu3 %v6831_v42  ;;  %v6767_v42 = vor.u32 %v8554_v4, %v6766_v2  ;;  %1916 = vmatpush.bf16.msrb.mxu1 %v6603_v30  ;;  %v1180_v2 = vadd.f32 %v1179_v51, %v9424_v20  ;;  %v8555_v4 = vld [vmem:[#allocation5 + $0x88] sm:$0xf0]  ;;  %v1196_v43 = vadd.f32 %v9547_v61, %v1182_v49  ;;  %v6714_v49 = vld [vmem:[#allocation5 + $0x8] sm:$0xf] }
 0x1b0   :  { %v8539_v30 = vld [vmem:[#allocation5 + $0x8] sm:$0xf0] }
 0x1b1   :  { %v6707_v35 = vor.u32 %v8539_v30, %v6706_v25  ;;  %v1167_v25 = vpop.f32.mrf.mxu2 }
 0x1b2   :  { %1927 = vmatpush.bf16.msrb.mxu2 %v6547_v54  ;;  %2114 = vmatpush.bf16.msra.mxu0 %v6767_v42  ;;  %v8558_v54 = vld [vmem:[#allocation5 + $0xa0] sm:$0xf0] }
 0x1b3   :  { %2655 = vmatpush.bf16.msrb.mxu3 %v6819_v8  ;;  %v8551_v8 = vld [vmem:[#allocation5 + $0x68] sm:$0xf0]  ;;  %2126 = vmatpush.bf16.msra.mxu1 %v6795_v40  ;;  %v6787_v6 = vor.u32 %v8558_v54, %v6786_v12  ;;  %v8608_v40 = vld [vmem:[#allocation3 + $0x170] sm:$0xf0]  ;;  %v1153_v45 = vpop.f32.mrf.mxu1  ;;  %v6751_v12 = vor.u32 %v8549_v58, %v6750_v36  ;;  %v6978_v54 = vld [vmem:[#allocation3 + $0x150] sm:$0xf] }
 0x1b4   :  { %v6755_v24 = vor.u32 %v8551_v8, %v6754_v13  ;;  %6699 = vmatmul.msk.bf16.vlgmr.msrb.gmra.mxu1 %vm9512_vm13, %v9154_v37  ;;  %v1194_v13 = vadd.f32 %v9542_v62, %v1180_v2  ;;  %v6759_v8 = vor.u32 %v8550_v3, %v6756_v10  ;;  %v6744_v62 = vld [vmem:[#allocation5 + $0x54] sm:$0xf0]  ;;  %v6979_v63 = vor.u32 %v8605_v7, %v6978_v54  ;;  %v8602_v3 = vld [vmem:[#allocation3 + $0x140] sm:$0xf0] }
 0x1b5   :  { %v1154_v27 = vadd.f32 %v1153_v45, %v9421_v15  ;;  %v6967_v10 = vor.u32 %v8602_v3, %v6966_v9 }
 0x1b6   :  { %7009 = vmatmul.msk.bf16.vlgmr.msrb.gmra.mxu3 %vm9526_vm4, %v9154_v37  ;;  %1928 = vmatpush.bf16.msrb.mxu2 %v6535_v5  ;;  %v6774_v5 = vld [vmem:[#allocation5 + $0x80] sm:$0xf] }
 0x1b7   :  { %2115 = vmatpush.bf16.msra.mxu0 %v6755_v24  ;;  %2127 = vmatpush.bf16.msra.mxu1 %v6783_v60  ;;  %v6775_v42 = vor.u32 %v8555_v4, %v6774_v5  ;;  %v8552_v24 = vld [vmem:[#allocation5 + $0x70] sm:$0xf0]  ;;  %v1166_v60 = vadd.f32 %v1165_v41, %v1152_v11  ;;  %v8538_v41 = vld [vmem:[#allocation5 + $0x4] sm:$0xf] }
 0x1ba   :  { %1929 = vmatpush.bf16.msrb.mxu2 %v6523_v1  ;;  %v6762_v1 = vld [vmem:[#allocation5 + $0x68] sm:$0xf] }
 0x1bb   :  { %2116 = vmatpush.bf16.msra.mxu0 %v6743_v39  ;;  %2128 = vmatpush.bf16.msra.mxu1 %v6771_v29  ;;  %v6763_v17 = vor.u32 %v8552_v24, %v6762_v1  ;;  %v8546_v29 = vld [vmem:[#allocation5 + $0x40] sm:$0xf0]  ;;  %v8541_v1 = vld [vmem:[#allocation5 + $0x1c] sm:$0xf]  ;;  %v9558_v30 = vpop.f32.mrf.mxu1 }
 0x1be   :  { %1930 = vmatpush.bf16.msrb.mxu2 %v6511_v33  ;;  %v6990_v33 = vld [vmem:[#allocation3 + $0x168] sm:$0xf] }
 0x1bf   :  { %2117 = vmatpush.bf16.msra.mxu0 %v6731_v53  ;;  %2129 = vmatpush.bf16.msra.mxu1 %v6759_v8  ;;  %v6991_v51 = vor.u32 %v8608_v40, %v6990_v33  ;;  %v6732_v53 = vld [vmem:[#allocation5 + $0x3c] sm:$0xf0]  ;;  %v8599_v40 = vld [vmem:[#allocation3 + $0x128] sm:$0xf0] }
 0x1c0   :  { %v6735_v2 = vor.u32 %v8544_v22, %v6732_v53  ;;  %v6726_v8 = vld [vmem:[#allocation5 + $0x20] sm:$0xf]  ;;  %v6942_v22 = vld [vmem:[#allocation3 + $0x108] sm:$0xf] }
 0x1c1   :  { %6701 = vmatmul.msk.bf16.vlgmr.msrb.gmra.mxu2 %vm9257_vm2, %v9154_v37  ;;  %v6954_v33 = vld [vmem:[#allocation3 + $0x120] sm:$0xf] }
 0x1c2   :  { %2140 = vmatpush.bf16.msra.mxu2 %v6799_v52  ;;  %v8547_v52 = vld [vmem:[#allocation5 + $0x4c] sm:$0xf] }
 0x1c3   :  { %2118 = vmatpush.bf16.msra.mxu0 %v6719_v28  ;;  %v6747_v50 = vor.u32 %v8547_v52, %v6744_v62  ;;  %v6955_v62 = vor.u32 %v8599_v40, %v6954_v33  ;;  %v6918_v33 = vld [vmem:[#allocation3 + $0xd8] sm:$0xf]  ;;  %v8590_v40 = vld [vmem:[#allocation3 + $0xe0] sm:$0xf0] }
 0x1c5   :  { %2130 = vmatpush.bf16.msra.mxu1 %v6747_v50  ;;  %v8583_v50 = vld [vmem:[#allocation3 + $0xac] sm:$0xf] }
 0x1c6   :  { %2141 = vmatpush.bf16.msra.mxu2 %v6787_v6 }
 0x1c7   :  { %2119 = vmatpush.bf16.msra.mxu0 %v6707_v35  ;;  %v1168_v35 = vadd.f32 %v1167_v25, %v1154_v27  ;;  %v6980_v27 = vld [vmem:[#allocation3 + $0x15c] sm:$0xf0] }
 0x1c9   :  { %2131 = vmatpush.bf16.msra.mxu1 %v6735_v2 }
 0x1ca   :  { %2142 = vmatpush.bf16.msra.mxu2 %v6775_v42  ;;  %v6739_v42 = vor.u32 %v8546_v29, %v6738_v56 }
 0x1cb   :  { %2606 = vmatpush.bf16.msrb.mxu0 %v6991_v51  ;;  %v6708_v51 = vld [vmem:[#allocation5 + $0xc] sm:$0xf0] }
 0x1cc   :  { %v6711_v36 = vor.u32 %v8538_v41, %v6708_v51  ;;  %v8574_v51 = vld [vmem:[#allocation3 + $0x64] sm:$0xf] }
 0x1ce   :  { %2143 = vmatpush.bf16.msra.mxu2 %v6763_v17  ;;  %v8543_v17 = vld [vmem:[#allocation5 + $0x28] sm:$0xf0] }
 0x1cf   :  { %2607 = vmatpush.bf16.msrb.mxu0 %v6979_v63  ;;  %v6992_v63 = vld [vmem:[#allocation3 + $0x174] sm:$0xf0] }
 0x1d2   :  { %2144 = vmatpush.bf16.msra.mxu2 %v6751_v12  ;;  %v6896_v12 = vld [vmem:[#allocation3 + $0xb4] sm:$0xf0] }
 0x1d3   :  { %v1410_v14 = vpop.f32.mrf.mxu0  ;;  %2608 = vmatpush.bf16.msrb.mxu0 %v6967_v10  ;;  %v8593_v10 = vld [vmem:[#allocation3 + $0xf8] sm:$0xf0] }
 0x1d4   :  { %v1469_v34 = vadd.f32 %v1410_v14, %v1194_v13  ;;  %v6720_v13 = vld [vmem:[#allocation5 + $0x24] sm:$0xf0] }
 0x1d5   :  { %v6723_v14 = vor.u32 %v8541_v1, %v6720_v13  ;;  %v8577_v1 = vld [vmem:[#allocation3 + $0x7c] sm:$0xf]  ;;  %v9570_v13 = vpop.f32.mrf.mxu1 }
 0x1d6   :  { %v6494_v39 = vmul.f32 -1.442695, %v1469_v34  ;;  %2145 = vmatpush.bf16.msra.mxu2 %v6739_v42  ;;  %v6727_v34 = vor.u32 %v8543_v17, %v6726_v8  ;;  %v8604_v42 = vld [vmem:[#allocation3 + $0x154] sm:$0xf]  ;;  %v6968_v17 = vld [vmem:[#allocation3 + $0x144] sm:$0xf0] }
 0x1d7   :  { %2132 = vmatpush.bf16.msra.mxu1 %v6723_v14  ;;  %2609 = vmatpush.bf16.msrb.mxu0 %v6955_v62  ;;  %v6983_v8 = vor.u32 %v8604_v42, %v6980_v27  ;;  %v8601_v14 = vld [vmem:[#allocation3 + $0x13c] sm:$0xf]  ;;  %v8598_v62 = vld [vmem:[#allocation3 + $0x124] sm:$0xf] }
 0x1d8   :  { %8952 = vpow2.f32 %v6494_v39  ;;  %v8540_v39 = vld [vmem:[#allocation5 + $0x10] sm:$0xf0] }
 0x1d9   :  { %v1396_v6 = vpop.f32.mrf.mxu3  ;;  %v6715_v58 = vor.u32 %v8540_v39, %v6714_v49  ;;  %v6956_v39 = vld [vmem:[#allocation3 + $0x12c] sm:$0xf0] }
 0x1da   :  { %v1429_v5 = vadd.f32 %v1396_v6, %v1166_v60  ;;  %2146 = vmatpush.bf16.msra.mxu2 %v6727_v34  ;;  %v8607_v60 = vld [vmem:[#allocation3 + $0x16c] sm:$0xf]  ;;  %v6899_v6 = vor.u32 %v8583_v50, %v6896_v12  ;;  %v6906_v50 = vld [vmem:[#allocation3 + $0xc0] sm:$0xf] }
 0x1db   :  { %v1412_v4 = vpop.f32.mrf.mxu0  ;;  %2133 = vmatpush.bf16.msra.mxu1 %v6711_v36  ;;  %v6995_v56 = vor.u32 %v8607_v60, %v6992_v63  ;;  %v8587_v60 = vld [vmem:[#allocation3 + $0xc8] sm:$0xf0] }
 0x1dc   :  { %v6492_v23 = vmul.f32 -1.442695, %v1429_v5  ;;  %v1470_v28 = vadd.f32 %v1412_v4, %v1196_v43  ;;  %v8596_v43 = vld [vmem:[#allocation3 + $0x110] sm:$0xf0]  ;;  %v6884_v4 = vld [vmem:[#allocation3 + $0x9c] sm:$0xf0] }
 0x1dd   :  { %v8580_v5 = vld [vmem:[#allocation3 + $0x94] sm:$0xf]  ;;  %v6943_v29 = vor.u32 %v8596_v43, %v6942_v22  ;;  %v6907_v22 = vor.u32 %v8587_v60, %v6906_v50 }
 0x1de   :  { %v8953_v24 = vpop.eup %8952  ;;  %8954 = vpow2.f32 %v6492_v23  ;;  %v6495_v61 = vmul.f32 -1.442695, %v1470_v28  ;;  %2147 = vmatpush.bf16.msra.mxu2 %v6715_v58  ;;  %v6930_v23 = vld [vmem:[#allocation3 + $0xf0] sm:$0xf]  ;;  %v6887_v3 = vor.u32 %v8580_v5, %v6884_v4  ;;  %v1221_v4 = vpop.f32.mrf.mxu2  ;;  %v8568_v50 = vld [vmem:[#allocation3 + $0x34] sm:$0xf] }
 0x1df   :  { %v9560_v11 = vadd.f32 1.0, %v8953_v24  ;;  %2620 = vmatpush.bf16.msrb.mxu1 %v6899_v6  ;;  %2610 = vmatpush.bf16.msrb.mxu0 %v6943_v29  ;;  %v6931_v24 = vor.u32 %v8593_v10, %v6930_v23  ;;  %v1208_v29 = vadd.f32 %v9558_v30, %v9459_v16  ;;  %v8571_v23 = vld [vmem:[#allocation3 + $0x4c] sm:$0xf]  ;;  %v9591_v10 = vld [vmem:[%s10286_s5] ss:$0 sm:$0xff] }
 0x1e0   :  { %8956 = vpow2.f32 %v6495_v61  ;;  %v6872_v61 = vld [vmem:[#allocation3 + $0x84] sm:$0xf0] }
 0x1e1   :  { %v1398_v45 = vpop.f32.mrf.mxu3  ;;  %8958 = vrcp.f32 %v9560_v11  ;;  %v6875_v34 = vor.u32 %v8577_v1, %v6872_v61  ;;  %v6944_v61 = vld [vmem:[#allocation3 + $0x114] sm:$0xf0]  ;;  %vm1484_vm11 = vweird.f32 %v9560_v11 }
 0x1e2   :  { %v1430_v52 = vadd.f32 %v1398_v45, %v1168_v35  ;;  %2634 = vmatpush.bf16.msrb.mxu2 %v6995_v56  ;;  %v6971_v35 = vor.u32 %v8601_v14, %v6968_v17  ;;  %v6919_v45 = vor.u32 %v8590_v40, %v6918_v33  ;;  %v1424_v56 = vpop.f32.mrf.mxu1  ;;  %v1488_v17 = vand.u32 2147483647, %v9560_v11 }
 0x1e3   :  { %2621 = vmatpush.bf16.msrb.mxu1 %v6887_v3  ;;  %2611 = vmatpush.bf16.msrb.mxu0 %v6931_v24  ;;  %v6848_v3 = vld [vmem:[#allocation3 + $0x54] sm:$0xf0]  ;;  %v1509_v1 = vadd.f32 %v9591_v10, %v1424_v56  ;;  %v8595_v24 = vld [vmem:[#allocation3 + $0x10c] sm:$0xf] }
 0x1e4   :  { %v8955_v54 = vpop.eup %8954  ;;  %v6493_v7 = vmul.f32 -1.442695, %v1430_v52  ;;  %v6860_v52 = vld [vmem:[#allocation3 + $0x6c] sm:$0xf0]  ;;  %v6851_v30 = vor.u32 %v8571_v23, %v6848_v3  ;;  %v6920_v23 = vld [vmem:[#allocation3 + $0xe4] sm:$0xf0] }
 0x1e5   :  { %v9563_v53 = vadd.f32 1.0, %v8955_v54  ;;  %v6863_v12 = vor.u32 %v8574_v51, %v6860_v52  ;;  %v1222_v52 = vadd.f32 %v1221_v4, %v1208_v29  ;;  %vm1489_vm0 = vcmp.eq.f32.partialorder %v1488_v17, 8.507059e+37 }
 0x1e6   :  { %v8957_v2 = vpop.eup %8956  ;;  %8960 = vpow2.f32 %v6493_v7  ;;  %2635 = vmatpush.bf16.msrb.mxu2 %v6983_v8  ;;  %v6959_v7 = vor.u32 %v8598_v62, %v6956_v39 }
 0x1e7   :  { %8962 = vrcp.f32 %v9563_v53  ;;  %v9566_v28 = vpop.eup %8958  ;;  %v9568_v9 = vadd.f32 1.0, %v8957_v2  ;;  %2622 = vmatpush.bf16.msrb.mxu1 %v6875_v34  ;;  %2612 = vmatpush.bf16.msrb.mxu0 %v6919_v45  ;;  %v1450_v43 = vand.u32 2147483648, %v9563_v53  ;;  %v1448_v2 = vand.u32 2147483647, %v9563_v53 }
 0x1e8   :  { %v1480_v25 = vmul.f32 %v9566_v28, %v9560_v11  ;;  %vm1444_vm5 = vweird.f32 %v9563_v53  ;;  %vm1485_vm8 = vweird.f32 %v9566_v28 }
 0x1e9   :  { %8964 = vrcp.f32 %v9568_v9  ;;  %v1451_v34 = vor.u32 1.1754944e-38, %v1450_v43  ;;  %vm1449_vm10 = vcmp.eq.f32.partialorder %v1448_v2, 8.507059e+37  ;;  %vm9608_vm12 = vmor %vm1484_vm11, %vm1485_vm8  ;;  %v6824_v2 = vld [vmem:[#allocation3 + $0x24] sm:$0xf0]  ;;  %vm1499_vm8 = vweird.f32 %v9568_v9 }
 0x1ea   :  { %v1481_v54 = vsub.f32 1.0, %v1480_v25  ;;  %2636 = vmatpush.bf16.msrb.mxu2 %v6971_v35  ;;  %v1490_v25 = vand.u32 2147483648, %v9560_v11  ;;  %v6947_v35 = vor.u32 %v8595_v24, %v6944_v61  ;;  %v1426_v29 = vpop.f32.mrf.mxu1 }
 0x1eb   :  { %2623 = vmatpush.bf16.msrb.mxu1 %v6863_v12  ;;  %2613 = vmatpush.bf16.msrb.mxu0 %v6907_v22  ;;  %v1210_v12 = vadd.f32 %v9570_v13, %v9459_v16  ;;  %v1510_v24 = vadd.f32 %v9591_v10, %v1426_v29  ;;  %v6986_v29 = vld [vmem:[#allocation3 + $0x158] sm:$0xf] }
 0x1ec   :  { %v8961_v41 = vpop.eup %8960  ;;  %v1482_v42 = vmul.f32 %v9566_v28, %v1481_v54  ;;  %v8592_v54 = vld [vmem:[#allocation3 + $0xf4] sm:$0xf]  ;;  %v1491_v13 = vor.u32 1.1754944e-38, %v1490_v25 }
 0x1ed   :  { %v8963_v36 = vpop.eup %8962  ;;  %v9575_v49 = vadd.f32 1.0, %v8961_v41 }
 0x1ee   :  { %v1440_v58 = vmul.f32 %v8963_v36, %v9563_v53  ;;  %vm1445_vm2 = vweird.f32 %v8963_v36  ;;  %2637 = vmatpush.bf16.msrb.mxu2 %v6959_v7  ;;  %v1483_v53 = vadd.f32 %v9566_v28, %v1482_v42  ;;  %v6932_v7 = vld [vmem:[#allocation3 + $0xfc] sm:$0xf0] }
 0x1ef   :  { %8966 = vrcp.f32 %v9575_v49  ;;  %v9579_v6 = vpop.eup %8964  ;;  %vm1446_vm7 = vmor %vm1444_vm5, %vm1445_vm2  ;;  %2624 = vmatpush.bf16.msrb.mxu1 %v6851_v30  ;;  %v1463_v51 = vand.u32 2147483647, %v9575_v49  ;;  %v6935_v43 = vor.u32 %v8592_v54, %v6932_v7  ;;  %vm1459_vm15 = vweird.f32 %v9575_v49 }
 0x1f0   :  { %v1441_v63 = vsub.f32 1.0, %v1440_v58  ;;  %v1495_v27 = vmul.f32 %v9579_v6, %v9568_v9  ;;  %v6836_v58 = vld [vmem:[#allocation3 + $0x3c] sm:$0xf0]  ;;  %v1487_v4 = vsel %vm9608_vm12, %v9566_v28, %v1483_v53  ;;  %v8586_v53 = vld [vmem:[#allocation3 + $0xc4] sm:$0xf] }
 0x1f1   :  { %v6839_v60 = vor.u32 %v8568_v50, %v6836_v58  ;;  %vm1464_vm5 = vcmp.eq.f32.partialorder %v1463_v51, 8.507059e+37  ;;  %v1492_v28 = vsel %vm1489_vm0, %v1491_v13, %v1487_v4  ;;  %v8606_v4 = vld [vmem:[#allocation3 + $0x160] sm:$0xf0] }
 0x1f2   :  { %v1442_v5 = vmul.f32 %v8963_v36, %v1441_v63  ;;  %v1496_v45 = vsub.f32 1.0, %v1495_v27  ;;  %2638 = vmatpush.bf16.msrb.mxu2 %v6947_v35  ;;  %v8589_v27 = vld [vmem:[#allocation3 + $0xdc] sm:$0xf]  ;;  %v8562_v35 = vld [vmem:[#allocation3 + $0x4] sm:$0xf] }
 0x1f3   :  { %2625 = vmatpush.bf16.msrb.mxu1 %v6839_v60 }
 0x1f4   :  { %v1443_v8 = vadd.f32 %v8963_v36, %v1442_v5  ;;  %v8565_v5 = vld [vmem:[#allocation3 + $0x1c] sm:$0xf]  ;;  %v1497_v11 = vmul.f32 %v9579_v6, %v1496_v45  ;;  %v1517_v45 = vsub.f32 1.0, %v1492_v28 }
 0x1f5   :  { %v8967_v14 = vpop.eup %8966  ;;  %v6827_v42 = vor.u32 %v8565_v5, %v6824_v2  ;;  %v8609_v5 = vld [vmem:[#allocation3 + $0x178] sm:$0xf0] }
 0x1f6   :  { %v1447_v33 = vsel %vm1446_vm7, %v8963_v36, %v1443_v8  ;;  %v1455_v40 = vmul.f32 %v8967_v14, %v9575_v49  ;;  %v1465_v36 = vand.u32 2147483648, %v9575_v49  ;;  %vm1460_vm13 = vweird.f32 %v8967_v14  ;;  %2639 = vmatpush.bf16.msrb.mxu2 %v6935_v43  ;;  %v1223_v8 = vpop.f32.mrf.mxu2  ;;  %v6998_v43 = vld [vmem:[#allocation3 + $0x170] sm:$0xf] }
 0x1f7   :  { %v1452_v41 = vsel %vm1449_vm10, %v1451_v34, %v1447_v33  ;;  %vm1461_vm2 = vmor %vm1459_vm15, %vm1460_vm13  ;;  %v1498_v25 = vadd.f32 %v9579_v6, %v1497_v11  ;;  %vm1500_vm7 = vweird.f32 %v9579_v6  ;;  %v1505_v34 = vand.u32 2147483648, %v9568_v9  ;;  %2626 = vmatpush.bf16.msrb.mxu1 %v6827_v42 }
 0x1f8   :  { %v1511_v62 = vmul.f32 %v1509_v1, %v1452_v41  ;;  %v1456_v39 = vsub.f32 1.0, %v1455_v40  ;;  %v6923_v1 = vor.u32 %v8589_v27, %v6920_v23  ;;  %v1466_v30 = vor.u32 1.1754944e-38, %v1465_v36  ;;  %v6812_v40 = vld [vmem:[#allocation3 + $0xc] sm:$0xf0]  ;;  %vm1501_vm10 = vmor %vm1499_vm8, %vm1500_vm7  ;;  %v6974_v27 = vld [vmem:[#allocation3 + $0x140] sm:$0xf] }
 0x1f9   :  { %v1224_v33 = vadd.f32 %v1223_v8, %v1210_v12  ;;  %v6908_v41 = vld [vmem:[#allocation3 + $0xcc] sm:$0xf0]  ;;  %v6815_v51 = vor.u32 %v8562_v35, %v6812_v40  ;;  %v1502_v50 = vsel %vm1501_vm10, %v9579_v6, %v1498_v25  ;;  %v9093_v12 = vld [vmem:[%s10287_s6] sm:$0xff]  ;;  %v1506_v60 = vor.u32 1.1754944e-38, %v1505_v34  ;;  %v8603_v23 = vld [vmem:[#allocation3 + $0x148] sm:$0xf0] }
 0x1fa   :  { %v1457_v22 = vmul.f32 %v8967_v14, %v1456_v39  ;;  %v1513_v56 = vadd.f32 %v1511_v62, %v1222_v52  ;;  %2640 = vmatpush.bf16.msrb.mxu2 %v6923_v1  ;;  %v6911_v52 = vor.u32 %v8586_v53, %v6908_v41  ;;  %v1521_v36 = vmul.f32 %v9093_v12, %v1492_v28  ;;  %v6962_v1 = vld [vmem:[#allocation3 + $0x128] sm:$0xf]  ;;  %v8600_v8 = vld [vmem:[#allocation3 + $0x130] sm:$0xf0]  ;;  %v6938_v25 = vld [vmem:[#allocation3 + $0xf8] sm:$0xf] }
 0x1fb   :  { %2627 = vmatpush.bf16.msrb.mxu1 %v6815_v51  ;;  %v6999_v13 = vor.u32 %v8609_v5, %v6998_v43  ;;  %v6987_v42 = vor.u32 %v8606_v4, %v6986_v29  ;;  %v8594_v34 = vld [vmem:[#allocation3 + $0x100] sm:$0xf0]  ;;  %v6926_v35 = vld [vmem:[#allocation3 + $0xe0] sm:$0xf]  ;;  %v6914_v40 = vld [vmem:[#allocation3 + $0xc8] sm:$0xf] }
 0x1fc   :  { %v1458_v3 = vadd.f32 %v8967_v14, %v1457_v22  ;;  %8968 = vtanh.f32 %v1513_v56  ;;  %v9094_v22 = vld [vmem:[%s10287_s6 + $0x8] sm:$0xff]  ;;  %v8588_v53 = vld [vmem:[#allocation3 + $0xd0] sm:$0xf0]  ;;  %v7166_v12 = vld [vmem:[#allocation3 + $0x60] sm:$0xf] }
 0x1fd   :  { %v7202_v41 = vld [vmem:[#allocation3 + $0xa8] sm:$0xf]  ;;  %v7130_v43 = vld [vmem:[#allocation3 + $0x18] sm:$0xf]  ;;  %v8638_v5 = vld [vmem:[#allocation3 + $0x20] sm:$0xf0] }
 0x1fe   :  { %v1462_v61 = vsel %vm1461_vm2, %v8967_v14, %v1458_v3  ;;  %v1503_v14 = vand.u32 2147483647, %v9568_v9  ;;  %2641 = vmatpush.bf16.msrb.mxu2 %v6911_v52  ;;  %v6975_v3 = vor.u32 %v8603_v23, %v6974_v27  ;;  %v7190_v52 = vld [vmem:[#allocation3 + $0x90] sm:$0xf]  ;;  %v8657_v4 = vld [vmem:[#allocation3 + $0xb8] sm:$0xf0] }
 0x1ff   :  { %v1467_v49 = vsel %vm1464_vm5, %v1466_v30, %v1462_v61  ;;  %v6963_v30 = vor.u32 %v8600_v8, %v6962_v1  ;;  %v8597_v61 = vld [vmem:[#allocation3 + $0x118] sm:$0xf0]  ;;  %v7210_v29 = vld [vmem:[#allocation3 + $0xb0] sm:$0xf]  ;;  %v7198_v23 = vld [vmem:[#allocation3 + $0x98] sm:$0xf] }
 0x200   :  { %v1512_v17 = vmul.f32 %v1510_v24, %v1467_v49  ;;  %vm1504_vm11 = vcmp.eq.f32.partialorder %v1503_v14, 8.507059e+37  ;;  %v6950_v24 = vld [vmem:[#allocation3 + $0x110] sm:$0xf]  ;;  %v6939_v49 = vor.u32 %v8594_v34, %v6938_v25  ;;  %v8656_v14 = vld [vmem:[#allocation3 + $0xb0] sm:$0xf0]  ;;  %v7211_v27 = vor.u32 %v8657_v4, %v7210_v29 }
 0x201   :  { %v1507_v54 = vsel %vm1504_vm11, %v1506_v60, %v1502_v50  ;;  %v6951_v28 = vor.u32 %v8597_v61, %v6950_v24  ;;  %v7203_v51 = vor.u32 %v8656_v14, %v7202_v41  ;;  %v8650_v50 = vld [vmem:[#allocation3 + $0x80] sm:$0xf0]  ;;  %v7098_v1 = vld [vmem:[#allocation5 + $0xa8] sm:$0xf]  ;;  %v8632_v8 = vld [vmem:[#allocation5 + $0xb0] sm:$0xf0] }
 0x202   :  { %v8969_v62 = vpop.eup %8968  ;;  %v1514_v39 = vadd.f32 %v1512_v17, %v1224_v33  ;;  %v1518_v6 = vsub.f32 1.0, %v1507_v54  ;;  %v1522_v56 = vmul.f32 %v9094_v22, %v1507_v54  ;;  %v8591_v33 = vld [vmem:[#allocation3 + $0xe8] sm:$0xf0]  ;;  %v7154_v54 = vld [vmem:[#allocation3 + $0x48] sm:$0xf]  ;;  %v7099_v24 = vor.u32 %v8632_v8, %v7098_v1 }
 0x203   :  { %v1519_v58 = vmul.f32 %v8969_v62, %v1517_v45  ;;  %v6927_v17 = vor.u32 %v8591_v33, %v6926_v35  ;;  %v6915_v45 = vor.u32 %v8588_v53, %v6914_v40  ;;  %v7191_v62 = vor.u32 %v8653_v55, %v7190_v52  ;;  %v8641_v22 = vld [vmem:[#allocation3 + $0x38] sm:$0xf0]  ;;  %v8651_v25 = vld [vmem:[#allocation3 + $0x88] sm:$0xf0]  ;;  %v8648_v34 = vld [vmem:[#allocation3 + $0x70] sm:$0xf0] }
 0x204   :  { %8970 = vtanh.f32 %v1514_v39  ;;  %v7178_v39 = vld [vmem:[#allocation3 + $0x78] sm:$0xf]  ;;  %v7162_v35 = vld [vmem:[#allocation3 + $0x50] sm:$0xf]  ;;  %v8645_v33 = vld [vmem:[#allocation3 + $0x58] sm:$0xf0] }
 0x205   :  { %v9630_v9 = vadd.f32 %v1521_v36, %v1519_v58  ;;  %v7179_v58 = vor.u32 %v8650_v50, %v7178_v39  ;;  %v8647_v36 = vld [vmem:[#allocation3 + $0x68] sm:$0xf0]  ;;  %v7150_v40 = vld [vmem:[#allocation3 + $0x38] sm:$0xf]  ;;  %v8642_v53 = vld [vmem:[#allocation3 + $0x40] sm:$0xf0] }
 0x206   :  { %v7167_v60 = vor.u32 %v8647_v36, %v7166_v12  ;;  %v7151_v41 = vor.u32 %v8642_v53, %v7150_v40  ;;  %v7138_v14 = vld [vmem:[#allocation3 + $0x20] sm:$0xf]  ;;  %v7126_v52 = vld [vmem:[#allocation3 + $0x8] sm:$0xf]  ;;  %v8636_v55 = vld [vmem:[#allocation3 + $0x10] sm:$0xf0] }
 0x207   :  { %6496 = vst [vmem:[%s10287_s6 + $0x10] sm:$0xff] %v9630_v9  ;;  %v7086_v39 = vld [vmem:[#allocation5 + $0x90] sm:$0xf]  ;;  %v8629_v50 = vld [vmem:[#allocation5 + $0x98] sm:$0xf0] }
 0x208   :  { %v7074_v12 = vld [vmem:[#allocation5 + $0x78] sm:$0xf]  ;;  %v8626_v36 = vld [vmem:[#allocation5 + $0x80] sm:$0xf0]  ;;  %v7050_v4 = vld [vmem:[#allocation5 + $0x48] sm:$0xf] }
 0x209   :  { %v7094_v1 = vld [vmem:[#allocation5 + $0x98] sm:$0xf]  ;;  %v8725_v61 = vld [vmem:[#allocation3 + $0x98] sm:$0xf0] }
 0x20a   :  { %v8971_v7 = vpop.eup %8970 }
 0x20b   :  { %v1520_v63 = vmul.f32 %v8971_v7, %v1518_v6  ;;  %v8644_v6 = vld [vmem:[#allocation3 + $0x50] sm:$0xf0] }
 0x20c   :  { %v7155_v7 = vor.u32 %v8644_v6, %v7154_v54  ;;  %v7062_v54 = vld [vmem:[#allocation5 + $0x60] sm:$0xf]  ;;  %v8623_v6 = vld [vmem:[#allocation5 + $0x68] sm:$0xf0] }
 0x20d   :  { %v9639_v2 = vadd.f32 %v1522_v56, %v1520_v63  ;;  %v7142_v63 = vld [vmem:[#allocation3 + $0x30] sm:$0xf] }
 0x20e   :  { %v7143_v56 = vor.u32 %v8641_v22, %v7142_v63 }
 0x20f   :  { %6497 = vst [vmem:[%s10287_s6 + $0x18] sm:$0xff] %v9639_v2  ;;  %v1951_v11 = vpack.c.bf16 %v9639_v2, %v9630_v9 }
 0x211   :  { %2120 = vmatmul.bf16.vlgmr.msra.gmra.mxu0 %v1951_v11  ;;  %2134 = vmatmul.bf16.vlgmr.msra.gmra.mxu1 %v1951_v11 }
 0x212   :  { %2148 = vmatmul.bf16.vlgmr.msra.gmra.mxu2 %v1951_v11  ;;  %2662 = vmatpush.bf16.msra.mxu0 %v6999_v13  ;;  %v7131_v13 = vor.u32 %v8638_v5, %v7130_v43  ;;  %v8635_v11 = vld [vmem:[#allocation3 + $0x8] sm:$0xf0]  ;;  %v7100_v43 = vld [vmem:[#allocation5 + $0xb4] sm:$0xf0]  ;;  %v7106_v5 = vld [vmem:[#allocation5 + $0xb0] sm:$0xf] }
 0x213   :  { %2837 = vmatpush.bf16.msra.mxu1 %v7099_v24 }
 0x216   :  { %2663 = vmatpush.bf16.msra.mxu0 %v6987_v42  ;;  %v7119_v42 = vor.u32 %v8635_v11, %v7118_v0  ;;  %v8633_v11 = vld [vmem:[#allocation5 + $0xb8] sm:$0xf0] }
 0x217   :  { %v7107_v29 = vor.u32 %v8633_v11, %v7106_v5  ;;  %v7052_v11 = vld [vmem:[#allocation5 + $0x54] sm:$0xf0] }
 0x219   :  { %2865 = vmatpush.bf16.msra.mxu3 %v7107_v29  ;;  %v7058_v29 = vld [vmem:[#allocation5 + $0x50] sm:$0xf] }
 0x21a   :  { %2664 = vmatpush.bf16.msra.mxu0 %v6975_v3  ;;  %v8654_v3 = vld [vmem:[#allocation3 + $0xa0] sm:$0xf0] }
 0x21b   :  { %v1904_v63 = vpop.f32.mrf.mxu0 }
 0x21e   :  { %2665 = vmatpush.bf16.msra.mxu0 %v6963_v30  ;;  %v7199_v30 = vor.u32 %v8654_v3, %v7198_v23  ;;  %v8628_v23 = vld [vmem:[#allocation5 + $0x94] sm:$0xf]  ;;  %v7088_v3 = vld [vmem:[#allocation5 + $0x9c] sm:$0xf0] }
 0x21f   :  { %v7091_v8 = vor.u32 %v8628_v23, %v7088_v3 }
 0x221   :  { %7003 = vmatmul.msk.bf16.vlgmr.msrb.gmra.mxu0 %vm9312_vm14, %v9154_v37  ;;  %7005 = vmatmul.msk.bf16.vlgmr.msrb.gmra.mxu1 %vm9526_vm4, %v9154_v37  ;;  %vm2989_vm4 = vcmp.eq.s32.totalorder %v9246_v48, %v9328_v19  ;;  %v7174_v19 = vld [vmem:[#allocation3 + $0x68] sm:$0xf] }
 0x222   :  { %7007 = vmatmul.msk.bf16.vlgmr.msrb.gmra.mxu2 %vm9312_vm14, %v9154_v37  ;;  %2666 = vmatpush.bf16.msra.mxu0 %v6951_v28  ;;  %v7186_v28 = vld [vmem:[#allocation3 + $0x80] sm:$0xf] }
 0x226   :  { %2667 = vmatpush.bf16.msra.mxu0 %v6939_v49  ;;  %v7175_v49 = vor.u32 %v8648_v34, %v7174_v19  ;;  %v8625_v19 = vld [vmem:[#allocation5 + $0x7c] sm:$0xf]  ;;  %v7076_v34 = vld [vmem:[#allocation5 + $0x84] sm:$0xf0] }
 0x22a   :  { %2668 = vmatpush.bf16.msra.mxu0 %v6927_v17  ;;  %v7163_v17 = vor.u32 %v8645_v33, %v7162_v35  ;;  %v7079_v35 = vor.u32 %v8625_v19, %v7076_v34  ;;  %v8627_v33 = vld [vmem:[#allocation5 + $0x88] sm:$0xf0]  ;;  %v7040_v19 = vld [vmem:[#allocation5 + $0x3c] sm:$0xf0] }
 0x22e   :  { %2669 = vmatpush.bf16.msra.mxu0 %v6915_v45  ;;  %v8639_v45 = vld [vmem:[#allocation3 + $0x28] sm:$0xf0] }
 0x231   :  { %7011 = vmatmul.msk.bf16.vlgmr.msra.gmra.mxu0 %vm9312_vm14, %v9154_v37  ;;  %vm2987_vm14 = vcmp.eq.s32.totalorder %v9246_v48, %v9264_v21  ;;  %v7187_v21 = vor.u32 %v8651_v25, %v7186_v28  ;;  %v1918_v22 = vpop.f32.mrf.mxu1  ;;  %v7038_v28 = vld [vmem:[#allocation5 + $0x30] sm:$0xf]  ;;  %v8617_v25 = vld [vmem:[#allocation5 + $0x38] sm:$0xf0] }
 0x232   :  { %3317 = vmatpush.bf16.msrb.mxu0 %v7203_v51  ;;  %vm9663_vm12 = vmpackc.low %vm2989_vm4, %vm2987_vm14  ;;  %v7139_v51 = vor.u32 %v8639_v45, %v7138_v14  ;;  %v8614_v14 = vld [vmem:[#allocation5 + $0x20] sm:$0xf0] }
 0x236   :  { %3318 = vmatpush.bf16.msrb.mxu0 %v7191_v62  ;;  %v7127_v62 = vor.u32 %v8636_v55, %v7126_v52  ;;  %v8622_v52 = vld [vmem:[#allocation5 + $0x64] sm:$0xf]  ;;  %v7064_v55 = vld [vmem:[#allocation5 + $0x6c] sm:$0xf0] }
 0x239   :  { %v9673_v40 = vpop.f32.mrf.mxu1 }
 0x23a   :  { %3319 = vmatpush.bf16.msrb.mxu0 %v7179_v58  ;;  %v7087_v58 = vor.u32 %v8629_v50, %v7086_v39  ;;  %v1905_v50 = vadd.f32 %v1904_v63, %v9424_v20 }
 0x23c   :  { %2838 = vmatpush.bf16.msra.mxu1 %v7087_v58  ;;  %v7067_v58 = vor.u32 %v8622_v52, %v7064_v55  ;;  %v8674_v52 = vld [vmem:[#allocation3 + $0x140] sm:$0xf0] }
 0x23e   :  { %3320 = vmatpush.bf16.msrb.mxu0 %v7167_v60  ;;  %v7075_v60 = vor.u32 %v8626_v36, %v7074_v12  ;;  %v8624_v12 = vld [vmem:[#allocation5 + $0x70] sm:$0xf0]  ;;  %v1890_v36 = vpop.f32.mrf.mxu3 }
 0x240   :  { %2839 = vmatpush.bf16.msra.mxu1 %v7075_v60 }
 0x242   :  { %3321 = vmatpush.bf16.msrb.mxu0 %v7155_v7  ;;  %v7063_v7 = vor.u32 %v8623_v6, %v7062_v54  ;;  %v7014_v54 = vld [vmem:[#allocation5] sm:$0xf]  ;;  %v8611_v6 = vld [vmem:[#allocation5 + $0x8] sm:$0xf0] }
 0x244   :  { %2840 = vmatpush.bf16.msra.mxu1 %v7063_v7  ;;  %v7015_v7 = vor.u32 %v8611_v6, %v7014_v54 }
 0x246   :  { %3322 = vmatpush.bf16.msrb.mxu0 %v7143_v56  ;;  %v8631_v56 = vld [vmem:[#allocation5 + $0xac] sm:$0xf] }
 0x247   :  { %v7103_v0 = vor.u32 %v8631_v56, %v7100_v43  ;;  %v7298_v56 = vld [vmem:[#allocation3 + $0x168] sm:$0xf]  ;;  %v8680_v43 = vld [vmem:[#allocation3 + $0x170] sm:$0xf0] }
 0x248   :  { %v7299_v5 = vor.u32 %v8680_v43, %v7298_v56  ;;  %v7262_v43 = vld [vmem:[#allocation3 + $0x120] sm:$0xf] }
 0x249   :  { %2851 = vmatpush.bf16.msra.mxu2 %v7103_v0  ;;  %v8619_v0 = vld [vmem:[#allocation5 + $0x4c] sm:$0xf] }
 0x24a   :  { %3323 = vmatpush.bf16.msrb.mxu0 %v7131_v13  ;;  %v1876_v13 = vpop.f32.mrf.mxu2  ;;  %v7055_v63 = vor.u32 %v8619_v0, %v7052_v11  ;;  %v8610_v11 = vld [vmem:[#allocation5 + $0x4] sm:$0xf] }
 0x24b   :  { %v1877_v39 = vadd.f32 %v1876_v13, %v9421_v15 }
 0x24d   :  { %2852 = vmatpush.bf16.msra.mxu2 %v7091_v8  ;;  %v1891_v13 = vadd.f32 %v1890_v36, %v1877_v39  ;;  %v7028_v39 = vld [vmem:[#allocation5 + $0x24] sm:$0xf0]  ;;  %v8615_v36 = vld [vmem:[#allocation5 + $0x28] sm:$0xf0] }
 0x24e   :  { %3324 = vmatpush.bf16.msrb.mxu0 %v7119_v42  ;;  %v8620_v42 = vld [vmem:[#allocation5 + $0x50] sm:$0xf0] }
 0x251   :  { %7309 = vmatmul.msk.bf16.vlgmr.msrb.gmra.mxu0 %vm9663_vm12, %v9154_v37  ;;  %2853 = vmatpush.bf16.msra.mxu2 %v7079_v35 }
 0x252   :  { %3373 = vmatpush.bf16.msra.mxu0 %v7211_v27  ;;  %v7051_v27 = vor.u32 %v8620_v42, %v7050_v4  ;;  %v1878_v45 = vpop.f32.mrf.mxu2  ;;  %v1919_v4 = vadd.f32 %v1918_v22, %v1905_v50  ;;  %v8621_v42 = vld [vmem:[#allocation5 + $0x58] sm:$0xf0]  ;;  %v7046_v22 = vld [vmem:[#allocation5 + $0x38] sm:$0xf]  ;;  %v7034_v50 = vld [vmem:[#allocation5 + $0x20] sm:$0xf] }
 0x253   :  { %v7059_v3 = vor.u32 %v8621_v42, %v7058_v29  ;;  %v7035_v6 = vor.u32 %v8615_v36, %v7034_v50  ;;  %v7016_v29 = vld [vmem:[#allocation5 + $0xc] sm:$0xf0]  ;;  %v7180_v50 = vld [vmem:[#allocation3 + $0x84] sm:$0xf0] }
 0x254   :  { %2841 = vmatpush.bf16.msra.mxu1 %v7051_v27  ;;  %v7019_v42 = vor.u32 %v8610_v11, %v7016_v29 }
 0x255   :  { %2854 = vmatpush.bf16.msra.mxu2 %v7067_v58 }
 0x256   :  { %3374 = vmatpush.bf16.msra.mxu0 %v7199_v30  ;;  %v8630_v30 = vld [vmem:[#allocation5 + $0xa0] sm:$0xf0] }
 0x257   :  { %v7095_v24 = vor.u32 %v8630_v30, %v7094_v1  ;;  %v7286_v30 = vld [vmem:[#allocation3 + $0x150] sm:$0xf] }
 0x259   :  { %2866 = vmatpush.bf16.msra.mxu3 %v7095_v24  ;;  %2855 = vmatpush.bf16.msra.mxu2 %v7055_v63  ;;  %v8677_v24 = vld [vmem:[#allocation3 + $0x158] sm:$0xf0] }
 0x25a   :  { %3375 = vmatpush.bf16.msra.mxu0 %v7187_v21  ;;  %v7039_v21 = vor.u32 %v8617_v25, %v7038_v28  ;;  %v1879_v28 = vadd.f32 %v1878_v45, %v9421_v15  ;;  %v7287_v25 = vor.u32 %v8677_v24, %v7286_v30  ;;  %v9678_v34 = vpop.f32.mrf.mxu2  ;;  %v1892_v45 = vpop.f32.mrf.mxu3  ;;  %v7204_v30 = vld [vmem:[#allocation3 + $0xb4] sm:$0xf0] }
 0x25c   :  { %2842 = vmatpush.bf16.msra.mxu1 %v7039_v21  ;;  %v8616_v21 = vld [vmem:[#allocation5 + $0x34] sm:$0xf] }
 0x25e   :  { %3376 = vmatpush.bf16.msra.mxu0 %v7175_v49  ;;  %v7082_v49 = vld [vmem:[#allocation5 + $0x80] sm:$0xf] }
 0x25f   :  { %v7083_v53 = vor.u32 %v8627_v33, %v7082_v49 }
 0x261   :  { %2867 = vmatpush.bf16.msra.mxu3 %v7083_v53  ;;  %v7043_v53 = vor.u32 %v8616_v21, %v7040_v19  ;;  %v8679_v21 = vld [vmem:[#allocation3 + $0x16c] sm:$0xf]  ;;  %v7300_v19 = vld [vmem:[#allocation3 + $0x174] sm:$0xf0] }
 0x262   :  { %3377 = vmatpush.bf16.msra.mxu0 %v7163_v17  ;;  %v1906_v17 = vpop.f32.mrf.mxu0  ;;  %v9684_v24 = vpop.f32.mrf.mxu2 }
 0x263   :  { %v1907_v49 = vadd.f32 %v1906_v17, %v9424_v20  ;;  %2856 = vmatpush.bf16.msra.mxu2 %v7043_v53  ;;  %v1893_v17 = vadd.f32 %v1892_v45, %v1879_v28  ;;  %v8676_v53 = vld [vmem:[#allocation3 + $0x154] sm:$0xf]  ;;  %v7238_v45 = vld [vmem:[#allocation3 + $0xf0] sm:$0xf] }
 0x265   :  { %v1921_v58 = vadd.f32 %v9673_v40, %v1907_v49  ;;  %v8668_v49 = vld [vmem:[#allocation3 + $0x110] sm:$0xf0] }
 0x266   :  { %3378 = vmatpush.bf16.msra.mxu0 %v7151_v41  ;;  %v7026_v41 = vld [vmem:[#allocation5 + $0x18] sm:$0xf] }
 0x26a   :  { %3379 = vmatpush.bf16.msra.mxu0 %v7139_v51  ;;  %v7027_v51 = vor.u32 %v8614_v14, %v7026_v41  ;;  %v8618_v41 = vld [vmem:[#allocation5 + $0x40] sm:$0xf0] }
 0x26b   :  { %v7047_v14 = vor.u32 %v8618_v41, %v7046_v22  ;;  %v7250_v22 = vld [vmem:[#allocation3 + $0x108] sm:$0xf]  ;;  %v7288_v41 = vld [vmem:[#allocation3 + $0x15c] sm:$0xf0] }
 0x26c   :  { %2843 = vmatpush.bf16.msra.mxu1 %v7027_v51  ;;  %v7274_v51 = vld [vmem:[#allocation3 + $0x138] sm:$0xf] }
 0x26d   :  { %v7275_v55 = vor.u32 %v8674_v52, %v7274_v51  ;;  %v7251_v51 = vor.u32 %v8668_v49, %v7250_v22  ;;  %v7214_v22 = vld [vmem:[#allocation3 + $0xc0] sm:$0xf]  ;;  %v8659_v49 = vld [vmem:[#allocation3 + $0xc8] sm:$0xf0] }
 0x26e   :  { %3380 = vmatpush.bf16.msra.mxu0 %v7127_v62  ;;  %v7070_v62 = vld [vmem:[#allocation5 + $0x68] sm:$0xf] }
 0x26f   :  { %v7071_v60 = vor.u32 %v8624_v12, %v7070_v62  ;;  %v8613_v62 = vld [vmem:[#allocation5 + $0x1c] sm:$0xf] }
 0x270   :  { %2844 = vmatpush.bf16.msra.mxu1 %v7015_v7  ;;  %v7031_v12 = vor.u32 %v8613_v62, %v7028_v39  ;;  %v8649_v62 = vld [vmem:[#allocation3 + $0x7c] sm:$0xf] }
 0x271   :  { %7317 = vmatmul.msk.bf16.vlgmr.msra.gmra.mxu0 %vm9663_vm12, %v9154_v37  ;;  %2868 = vmatpush.bf16.msra.mxu3 %v7071_v60 }
 0x272   :  { %2857 = vmatpush.bf16.msra.mxu2 %v7031_v12  ;;  %v7291_v12 = vor.u32 %v8676_v53, %v7288_v41  ;;  %v8643_v53 = vld [vmem:[#allocation3 + $0x4c] sm:$0xf] }
 0x274   :  { %3331 = vmatpush.bf16.msrb.mxu1 %v7299_v5  ;;  %v8671_v5 = vld [vmem:[#allocation3 + $0x128] sm:$0xf0] }
 0x275   :  { %2869 = vmatpush.bf16.msra.mxu3 %v7059_v3  ;;  %v7263_v0 = vor.u32 %v8671_v5, %v7262_v43  ;;  %v7276_v43 = vld [vmem:[#allocation3 + $0x144] sm:$0xf0]  ;;  %v7226_v5 = vld [vmem:[#allocation3 + $0xd8] sm:$0xf] }
 0x276   :  { %2858 = vmatpush.bf16.msra.mxu2 %v7019_v42 }
 0x278   :  { %3332 = vmatpush.bf16.msrb.mxu1 %v7287_v25 }
 0x279   :  { %2870 = vmatpush.bf16.msra.mxu3 %v7047_v14  ;;  %v7303_v14 = vor.u32 %v8679_v21, %v7300_v19  ;;  %v7264_v19 = vld [vmem:[#allocation3 + $0x12c] sm:$0xf0] }
 0x27c   :  { %3333 = vmatpush.bf16.msrb.mxu1 %v7275_v55  ;;  %v8665_v55 = vld [vmem:[#allocation3 + $0xf8] sm:$0xf0] }
 0x27d   :  { %2871 = vmatpush.bf16.msra.mxu3 %v7035_v6  ;;  %v7239_v36 = vor.u32 %v8665_v55, %v7238_v45 }
 0x280   :  { %3334 = vmatpush.bf16.msrb.mxu1 %v7263_v0  ;;  %v8662_v0 = vld [vmem:[#allocation3 + $0xe0] sm:$0xf0] }
 0x284   :  { %3335 = vmatpush.bf16.msrb.mxu1 %v7251_v51  ;;  %v7156_v51 = vld [vmem:[#allocation3 + $0x54] sm:$0xf0] }
 0x288   :  { %3336 = vmatpush.bf16.msrb.mxu1 %v7239_v36  ;;  %v7159_v36 = vor.u32 %v8643_v53, %v7156_v51 }
 0x28e   :  { %v2121_v27 = vpop.f32.mrf.mxu0  ;;  %v2135_v23 = vpop.f32.mrf.mxu1 }
 0x28f   :  { %v2154_v1 = vadd.f32 %v2121_v27, %v1891_v13  ;;  %v2194_v8 = vadd.f32 %v2135_v23, %v1919_v4  ;;  %v7022_v4 = vld [vmem:[#allocation5 + $0x8] sm:$0xf]  ;;  %v8612_v27 = vld [vmem:[#allocation5 + $0x10] sm:$0xf0] }
 0x291   :  { %v6800_v35 = vmul.f32 -1.442695, %v2154_v1  ;;  %v6802_v33 = vmul.f32 -1.442695, %v2194_v8  ;;  %v7023_v1 = vor.u32 %v8612_v27, %v7022_v4  ;;  %v8655_v8 = vld [vmem:[#allocation3 + $0xac] sm:$0xf] }
 0x292   :  { %v7207_v25 = vor.u32 %v8655_v8, %v7204_v30  ;;  %v8646_v4 = vld [vmem:[#allocation3 + $0x64] sm:$0xf]  ;;  %v7227_v30 = vor.u32 %v8662_v0, %v7226_v5 }
 0x293   :  { %8972 = vpow2.f32 %v6800_v35  ;;  %2872 = vmatpush.bf16.msra.mxu3 %v7023_v1  ;;  %v8652_v35 = vld [vmem:[#allocation3 + $0x94] sm:$0xf] }
 0x294   :  { %8974 = vpow2.f32 %v6802_v33  ;;  %3345 = vmatpush.bf16.msrb.mxu2 %v7207_v25  ;;  %v7192_v33 = vld [vmem:[#allocation3 + $0x9c] sm:$0xf0]  ;;  %v8670_v25 = vld [vmem:[#allocation3 + $0x124] sm:$0xf]  ;;  %3337 = vmatpush.bf16.msrb.mxu1 %v7227_v30  ;;  %v8664_v30 = vld [vmem:[#allocation3 + $0xf4] sm:$0xf] }
 0x295   :  { %v7195_v52 = vor.u32 %v8652_v35, %v7192_v33  ;;  %v2149_v6 = vpop.f32.mrf.mxu2  ;;  %v1946_v35 = vpop.f32.mrf.mxu3 }
 0x296   :  { %v2123_v60 = vpop.f32.mrf.mxu0  ;;  %v2137_v54 = vpop.f32.mrf.mxu1 }
 0x297   :  { %v2155_v7 = vadd.f32 %v2123_v60, %v1893_v17  ;;  %v2195_v56 = vadd.f32 %v2137_v54, %v1921_v58  ;;  %3359 = vmatpush.bf16.msrb.mxu3 %v7303_v14  ;;  %v8673_v60 = vld [vmem:[#allocation3 + $0x13c] sm:$0xf] }
 0x298   :  { %3346 = vmatpush.bf16.msrb.mxu2 %v7195_v52  ;;  %v7279_v8 = vor.u32 %v8673_v60, %v7276_v43  ;;  %v8667_v60 = vld [vmem:[#allocation3 + $0x10c] sm:$0xf] }
 0x299   :  { %v8973_v13 = vpop.eup %8972  ;;  %v6801_v63 = vmul.f32 -1.442695, %v2155_v7  ;;  %v6803_v40 = vmul.f32 -1.442695, %v2195_v56  ;;  %v7183_v56 = vor.u32 %v8649_v62, %v7180_v50  ;;  %v2234_v62 = vadd.f32 %v9591_v10, %v2149_v6 }
 0x29a   :  { %v8975_v23 = vpop.eup %8974  ;;  %v9682_v3 = vadd.f32 1.0, %v8973_v13  ;;  %v7168_v13 = vld [vmem:[#allocation3 + $0x6c] sm:$0xf0]  ;;  %v7215_v50 = vor.u32 %v8659_v49, %v7214_v22  ;;  %v8637_v49 = vld [vmem:[#allocation3 + $0x1c] sm:$0xf] }
 0x29b   :  { %v9686_v28 = vadd.f32 1.0, %v8975_v23  ;;  %8976 = vpow2.f32 %v6801_v63  ;;  %v1933_v63 = vadd.f32 %v9678_v34, %v9459_v16  ;;  %3360 = vmatpush.bf16.msrb.mxu3 %v7291_v12  ;;  %v7171_v34 = vor.u32 %v8646_v4, %v7168_v13  ;;  %v8640_v4 = vld [vmem:[#allocation3 + $0x34] sm:$0xf]  ;;  %v7144_v13 = vld [vmem:[#allocation3 + $0x3c] sm:$0xf0] }
 0x29c   :  { %8978 = vrcp.f32 %v9682_v3  ;;  %v2173_v42 = vand.u32 2147483647, %v9682_v3  ;;  %v2175_v1 = vand.u32 2147483648, %v9682_v3  ;;  %3347 = vmatpush.bf16.msrb.mxu2 %v7183_v56  ;;  %vm2169_vm15 = vweird.f32 %v9682_v3  ;;  %3338 = vmatpush.bf16.msrb.mxu1 %v7215_v50 }
 0x29d   :  { %8980 = vrcp.f32 %v9686_v28  ;;  %v1947_v41 = vadd.f32 %v1946_v35, %v1933_v63  ;;  %v1935_v56 = vadd.f32 %v9684_v24, %v9459_v16  ;;  %vm2209_vm7 = vweird.f32 %v9686_v28  ;;  %v7132_v35 = vld [vmem:[#allocation3 + $0x24] sm:$0xf0] }
 0x29e   :  { %8982 = vpow2.f32 %v6803_v40  ;;  %v2176_v55 = vor.u32 1.1754944e-38, %v2175_v1  ;;  %vm2174_vm2 = vcmp.eq.f32.partialorder %v2173_v42, 8.507059e+37  ;;  %v2213_v63 = vand.u32 2147483647, %v9686_v28 }
 0x29f   :  { %3361 = vmatpush.bf16.msrb.mxu3 %v7279_v8  ;;  %v7147_v22 = vor.u32 %v8640_v4, %v7144_v13  ;;  %v7135_v45 = vor.u32 %v8637_v49, %v7132_v35  ;;  %v7216_v4 = vld [vmem:[#allocation3 + $0xcc] sm:$0xf0]  ;;  %v7282_v49 = vld [vmem:[#allocation3 + $0x140] sm:$0xf]  ;;  %v8675_v35 = vld [vmem:[#allocation3 + $0x148] sm:$0xf0] }
 0x2a0   :  { %3348 = vmatpush.bf16.msrb.mxu2 %v7171_v34  ;;  %vm2214_vm14 = vcmp.eq.f32.partialorder %v2213_v63, 8.507059e+37 }
 0x2a1   :  { %v8977_v39 = vpop.eup %8976 }
 0x2a2   :  { %v9690_v58 = vpop.eup %8978  ;;  %v9692_v17 = vadd.f32 1.0, %v8977_v39  ;;  %v7267_v39 = vor.u32 %v8670_v25, %v7264_v19  ;;  %v7240_v25 = vld [vmem:[#allocation3 + $0xfc] sm:$0xf0] }
 0x2a3   :  { %v9694_v54 = vpop.eup %8980  ;;  %v2165_v7 = vmul.f32 %v9690_v58, %v9682_v3  ;;  %vm2170_vm13 = vweird.f32 %v9690_v58 }
 0x2a4   :  { %v8983_v11 = vpop.eup %8982  ;;  %v2205_v29 = vmul.f32 %v9694_v54, %v9686_v28  ;;  %8984 = vrcp.f32 %v9692_v17  ;;  %vm9717_vm0 = vmor %vm2169_vm15, %vm2170_vm13  ;;  %vm2210_vm5 = vweird.f32 %v9694_v54  ;;  %3362 = vmatpush.bf16.msrb.mxu3 %v7267_v39  ;;  %3349 = vmatpush.bf16.msrb.mxu2 %v7159_v36  ;;  %vm2184_vm11 = vweird.f32 %v9692_v17  ;;  %v1948_v39 = vpop.f32.mrf.mxu3 }
 0x2a5   :  { %v2166_v40 = vsub.f32 1.0, %v2165_v7  ;;  %v9704_v27 = vadd.f32 1.0, %v8983_v11  ;;  %v7252_v7 = vld [vmem:[#allocation3 + $0x114] sm:$0xf0]  ;;  %v2151_v11 = vpop.f32.mrf.mxu2  ;;  %vm9741_vm8 = vmor %vm2209_vm7, %vm2210_vm5 }
 0x2a6   :  { %v2206_v23 = vsub.f32 1.0, %v2205_v29  ;;  %v7255_v42 = vor.u32 %v8667_v60, %v7252_v7  ;;  %v2235_v19 = vadd.f32 %v9591_v10, %v2151_v11  ;;  %v7120_v7 = vld [vmem:[#allocation3 + $0xc] sm:$0xf0] }
 0x2a7   :  { %v2167_v21 = vmul.f32 %v9690_v58, %v2166_v40  ;;  %8986 = vrcp.f32 %v9704_v27  ;;  %v2190_v40 = vand.u32 2147483648, %v9692_v17  ;;  %v2230_v36 = vand.u32 2147483648, %v9704_v27 }
 0x2a8   :  { %v2207_v33 = vmul.f32 %v9694_v54, %v2206_v23  ;;  %3363 = vmatpush.bf16.msrb.mxu3 %v7255_v42  ;;  %3350 = vmatpush.bf16.msrb.mxu2 %v7147_v22  ;;  %v8678_v22 = vld [vmem:[#allocation3 + $0x160] sm:$0xf0] }
 0x2a9   :  { %v2168_v14 = vadd.f32 %v9690_v58, %v2167_v21 }
 0x2aa   :  { %v9713_v52 = vpop.eup %8984  ;;  %v2208_v6 = vadd.f32 %v9694_v54, %v2207_v33 }
 0x2ab   :  { %v2172_v3 = vsel %vm9717_vm0, %v9690_v58, %v2168_v14  ;;  %v2180_v12 = vmul.f32 %v9713_v52, %v9692_v17  ;;  %v2215_v58 = vand.u32 2147483648, %v9686_v28  ;;  %vm2185_vm10 = vweird.f32 %v9713_v52 }
 0x2ac   :  { %v2177_v43 = vsel %vm2174_vm2, %v2176_v55, %v2172_v3  ;;  %v2188_v28 = vand.u32 2147483647, %v9692_v17  ;;  %v2212_v21 = vsel %vm9741_vm8, %v9694_v54, %v2208_v6  ;;  %vm2186_vm4 = vmor %vm2184_vm11, %vm2185_vm10  ;;  %v2191_v14 = vor.u32 1.1754944e-38, %v2190_v40  ;;  %v8661_v55 = vld [vmem:[#allocation3 + $0xdc] sm:$0xf]  ;;  %3351 = vmatpush.bf16.msrb.mxu2 %v7135_v45 }
 0x2ad   :  { %v9731_v5 = vpop.eup %8986  ;;  %v2236_v0 = vmul.f32 %v2234_v62, %v2177_v43  ;;  %v2181_v29 = vsub.f32 1.0, %v2180_v12  ;;  %v2216_v33 = vor.u32 1.1754944e-38, %v2215_v58  ;;  %v7243_v54 = vor.u32 %v8664_v30, %v7240_v25  ;;  %v7228_v62 = vld [vmem:[#allocation3 + $0xe4] sm:$0xf0]  ;;  %v8634_v3 = vld [vmem:[#allocation3 + $0x4] sm:$0xf] }
 0x2ae   :  { %v2220_v24 = vmul.f32 %v9731_v5, %v9704_v27  ;;  %vm2189_vm13 = vcmp.eq.f32.partialorder %v2188_v28, 8.507059e+37  ;;  %vm2225_vm15 = vweird.f32 %v9731_v5  ;;  %v1949_v12 = vadd.f32 %v1948_v39, %v1935_v56  ;;  %v8658_v56 = vld [vmem:[#allocation3 + $0xc4] sm:$0xf]  ;;  %v7306_v28 = vld [vmem:[#allocation3 + $0x170] sm:$0xf] }
 0x2af   :  { %v2238_v1 = vadd.f32 %v2236_v0, %v1947_v41  ;;  %v2182_v8 = vmul.f32 %v9713_v52, %v2181_v29  ;;  %v2217_v51 = vsel %vm2214_vm14, %v2216_v33, %v2212_v21  ;;  %vm2224_vm0 = vweird.f32 %v9704_v27  ;;  %3364 = vmatpush.bf16.msrb.mxu3 %v7243_v54  ;;  %v8681_v30 = vld [vmem:[#allocation3 + $0x178] sm:$0xf0]  ;;  %v7258_v54 = vld [vmem:[#allocation3 + $0x110] sm:$0xf]  ;;  %v7246_v45 = vld [vmem:[#allocation3 + $0xf8] sm:$0xf] }
 0x2b0   :  { %v2221_v34 = vsub.f32 1.0, %v2220_v24  ;;  %v2242_v6 = vsub.f32 1.0, %v2217_v51  ;;  %v7231_v43 = vor.u32 %v8661_v55, %v7228_v62  ;;  %vm9763_vm2 = vmor %vm2224_vm0, %vm2225_vm15  ;;  %v7123_v29 = vor.u32 %v8634_v3, %v7120_v7  ;;  %v8666_v55 = vld [vmem:[#allocation3 + $0x100] sm:$0xf0]  ;;  %v7234_v39 = vld [vmem:[#allocation3 + $0xe0] sm:$0xf] }
 0x2b1   :  { %8988 = vtanh.f32 %v2238_v1  ;;  %v2183_v53 = vadd.f32 %v9713_v52, %v2182_v8  ;;  %v2246_v24 = vmul.f32 %v2217_v51, %v9630_v9  ;;  %v7219_v42 = vor.u32 %v8658_v56, %v7216_v4  ;;  %v8669_v51 = vld [vmem:[#allocation3 + $0x118] sm:$0xf0]  ;;  %v7222_v3 = vld [vmem:[#allocation3 + $0xc8] sm:$0xf]  ;;  %v8722_v0 = vld [vmem:[#allocation3 + $0x80] sm:$0xf0] }
 0x2b2   :  { %v2222_v41 = vmul.f32 %v9731_v5, %v2221_v34  ;;  %3352 = vmatpush.bf16.msrb.mxu2 %v7123_v29  ;;  %v7307_v21 = vor.u32 %v8681_v30, %v7306_v28  ;;  %v7283_v33 = vor.u32 %v8675_v35, %v7282_v49  ;;  %v7247_v62 = vor.u32 %v8666_v55, %v7246_v45  ;;  %v7474_v29 = vld [vmem:[#allocation3 + $0x60] sm:$0xf]  ;;  %v8719_v56 = vld [vmem:[#allocation3 + $0x68] sm:$0xf0]  ;;  %v7518_v28 = vld [vmem:[#allocation3 + $0xb0] sm:$0xf] }
 0x2b3   :  { %v2187_v10 = vsel %vm2186_vm4, %v9713_v52, %v2183_v53  ;;  %v2228_v52 = vand.u32 2147483647, %v9704_v27  ;;  %v2231_v27 = vor.u32 1.1754944e-38, %v2230_v36  ;;  %3365 = vmatpush.bf16.msrb.mxu3 %v7231_v43  ;;  %v7270_v53 = vld [vmem:[#allocation3 + $0x128] sm:$0xf]  ;;  %v7475_v4 = vor.u32 %v8719_v56, %v7474_v29 }
 0x2b4   :  { %v2223_v17 = vadd.f32 %v9731_v5, %v2222_v41  ;;  %v2192_v50 = vsel %vm2189_vm13, %v2191_v14, %v2187_v10  ;;  %v8672_v41 = vld [vmem:[#allocation3 + $0x130] sm:$0xf0]  ;;  %v7259_v10 = vor.u32 %v8669_v51, %v7258_v54  ;;  %v7510_v36 = vld [vmem:[#allocation3 + $0xa8] sm:$0xf]  ;;  %v8729_v30 = vld [vmem:[#allocation3 + $0xb8] sm:$0xf0] }
 0x2b5   :  { %v2237_v60 = vmul.f32 %v2235_v19, %v2192_v50  ;;  %vm2229_vm5 = vcmp.eq.f32.partialorder %v2228_v52, 8.507059e+37  ;;  %v7294_v19 = vld [vmem:[#allocation3 + $0x158] sm:$0xf]  ;;  %v7271_v14 = vor.u32 %v8672_v41, %v7270_v53  ;;  %v7498_v52 = vld [vmem:[#allocation3 + $0x90] sm:$0xf] }
 0x2b6   :  { %v2227_v63 = vsel %vm9763_vm2, %v9731_v5, %v2223_v17  ;;  %v8663_v17 = vld [vmem:[#allocation3 + $0xe8] sm:$0xf0]  ;;  %v7499_v43 = vor.u32 %v8725_v61, %v7498_v52  ;;  %v8704_v49 = vld [vmem:[#allocation5 + $0xb0] sm:$0xf0]  ;;  %v7494_v41 = vld [vmem:[#allocation3 + $0x80] sm:$0xf] }
 0x2b7   :  { %v8989_v58 = vpop.eup %8988  ;;  %v2239_v11 = vadd.f32 %v2237_v60, %v1949_v12  ;;  %v2232_v23 = vsel %vm2229_vm5, %v2231_v27, %v2227_v63  ;;  %3366 = vmatpush.bf16.msrb.mxu3 %v7219_v42  ;;  %v7235_v50 = vor.u32 %v8663_v17, %v7234_v39  ;;  %v8660_v12 = vld [vmem:[#allocation3 + $0xd0] sm:$0xf0]  ;;  %v7450_v27 = vld [vmem:[#allocation3 + $0x30] sm:$0xf]  ;;  %v8713_v42 = vld [vmem:[#allocation3 + $0x38] sm:$0xf0] }
 0x2b8   :  { %v2244_v13 = vmul.f32 %v8989_v58, %v2242_v6  ;;  %v2243_v1 = vsub.f32 1.0, %v2232_v23  ;;  %v2247_v9 = vmul.f32 %v2232_v23, %v9639_v2  ;;  %v7295_v2 = vor.u32 %v8678_v22, %v7294_v19  ;;  %v8728_v60 = vld [vmem:[#allocation3 + $0xb0] sm:$0xf0]  ;;  %v7486_v58 = vld [vmem:[#allocation3 + $0x78] sm:$0xf] }
 0x2b9   :  { %8990 = vtanh.f32 %v2239_v11  ;;  %v7223_v7 = vor.u32 %v8660_v12, %v7222_v3  ;;  %v7511_v6 = vor.u32 %v8728_v60, %v7510_v36  ;;  %v7487_v11 = vor.u32 %v8722_v0, %v7486_v58  ;;  %v8716_v63 = vld [vmem:[#allocation3 + $0x50] sm:$0xf0]  ;;  %v7506_v19 = vld [vmem:[#allocation3 + $0x98] sm:$0xf]  ;;  %v8726_v22 = vld [vmem:[#allocation3 + $0xa0] sm:$0xf0] }
 0x2ba   :  { %v9771_v40 = vadd.f32 %v2246_v24, %v2244_v13  ;;  %v7462_v13 = vld [vmem:[#allocation3 + $0x48] sm:$0xf]  ;;  %v7451_v23 = vor.u32 %v8713_v42, %v7450_v27  ;;  %v7507_v35 = vor.u32 %v8726_v22, %v7506_v19  ;;  %v8720_v54 = vld [vmem:[#allocation3 + $0x70] sm:$0xf0]  ;;  %v8717_v45 = vld [vmem:[#allocation3 + $0x58] sm:$0xf0] }
 0x2bb   :  { %v7463_v24 = vor.u32 %v8716_v63, %v7462_v13  ;;  %v8714_v39 = vld [vmem:[#allocation3 + $0x40] sm:$0xf0]  ;;  %v8711_v3 = vld [vmem:[#allocation3 + $0x28] sm:$0xf0]  ;;  %v7434_v36 = vld [vmem:[#allocation3 + $0x8] sm:$0xf] }
 0x2bc   :  { %6804 = vst [vmem:[%s10287_s6 + $0x20] sm:$0xff] %v9771_v40  ;;  %v8708_v60 = vld [vmem:[#allocation3 + $0x10] sm:$0xf0]  ;;  %v8701_v52 = vld [vmem:[#allocation5 + $0x98] sm:$0xf0] }
 0x2bd   :  { %v8698_v58 = vld [vmem:[#allocation5 + $0x80] sm:$0xf0]  ;;  %v8695_v29 = vld [vmem:[#allocation5 + $0x68] sm:$0xf0]  ;;  %v7408_v63 = vld [vmem:[#allocation5 + $0xb4] sm:$0xf0] }
 0x2be   :  { %v8703_v13 = vld [vmem:[#allocation5 + $0xac] sm:$0xf]  ;;  %v8705_v42 = vld [vmem:[#allocation5 + $0xb8] sm:$0xf0]  ;;  %v7346_v22 = vld [vmem:[#allocation5 + $0x30] sm:$0xf] }
 0x2bf   :  { %v8991_v8 = vpop.eup %8990  ;;  %v7411_v27 = vor.u32 %v8703_v13, %v7408_v63  ;;  %v8797_v53 = vld [vmem:[#allocation3 + $0x98] sm:$0xf0] }
 0x2c0   :  { %v2245_v5 = vmul.f32 %v8991_v8, %v2243_v1  ;;  %v7438_v1 = vld [vmem:[#allocation3 + $0x18] sm:$0xf]  ;;  %v8710_v8 = vld [vmem:[#allocation3 + $0x20] sm:$0xf0] }
 0x2c2   :  { %v9778_v25 = vadd.f32 %v2247_v9, %v2245_v5  ;;  %v7439_v5 = vor.u32 %v8710_v8, %v7438_v1  ;;  %v8707_v9 = vld [vmem:[#allocation3 + $0x8] sm:$0xf0]  ;;  %v7358_v1 = vld [vmem:[#allocation5 + $0x48] sm:$0xf]  ;;  %v8692_v8 = vld [vmem:[#allocation5 + $0x50] sm:$0xf0] }
 0x2c4   :  { %6805 = vst [vmem:[%s10287_s6 + $0x28] sm:$0xff] %v9778_v25  ;;  %v2676_v34 = vpack.c.bf16 %v9778_v25, %v9771_v40 }
 0x2c6   :  { %2845 = vmatmul.bf16.vlgmr.msra.gmra.mxu1 %v2676_v34  ;;  %2859 = vmatmul.bf16.vlgmr.msra.gmra.mxu2 %v2676_v34 }
 0x2c7   :  { %2873 = vmatmul.bf16.vlgmr.msra.gmra.mxu3 %v2676_v34  ;;  %3387 = vmatpush.bf16.msra.mxu1 %v7307_v21  ;;  %v7427_v21 = vor.u32 %v8707_v9, %v7426_v32  ;;  %v7519_v34 = vor.u32 %v8729_v30, %v7518_v28  ;;  %v8700_v32 = vld [vmem:[#allocation5 + $0x94] sm:$0xf]  ;;  %v7396_v9 = vld [vmem:[#allocation5 + $0x9c] sm:$0xf0]  ;;  %v7402_v28 = vld [vmem:[#allocation5 + $0x98] sm:$0xf] }
 0x2c8   :  { %3576 = vmatpush.bf16.msra.mxu3 %v7411_v27  ;;  %v7399_v30 = vor.u32 %v8700_v32, %v7396_v9  ;;  %v8693_v27 = vld [vmem:[#allocation5 + $0x58] sm:$0xf0]  ;;  %v8688_v9 = vld [vmem:[#allocation5 + $0x34] sm:$0xf] }
 0x2cb   :  { %3388 = vmatpush.bf16.msra.mxu1 %v7295_v2  ;;  %v7406_v2 = vld [vmem:[#allocation5 + $0xa8] sm:$0xf] }
 0x2cc   :  { %3577 = vmatpush.bf16.msra.mxu3 %v7399_v30  ;;  %v7354_v30 = vld [vmem:[#allocation5 + $0x38] sm:$0xf] }
 0x2cf   :  { %3389 = vmatpush.bf16.msra.mxu1 %v7283_v33  ;;  %v7407_v33 = vor.u32 %v8704_v49, %v7406_v2  ;;  %v8689_v2 = vld [vmem:[#allocation5 + $0x38] sm:$0xf0]  ;;  %v2601_v49 = vpop.f32.mrf.mxu3 }
 0x2d1   :  { %3562 = vmatpush.bf16.msra.mxu2 %v7407_v33  ;;  %v8697_v33 = vld [vmem:[#allocation5 + $0x7c] sm:$0xf] }
 0x2d3   :  { %3390 = vmatpush.bf16.msra.mxu1 %v7271_v14  ;;  %v8723_v14 = vld [vmem:[#allocation3 + $0x88] sm:$0xf0] }
 0x2d6   :  { %7311 = vmatmul.msk.bf16.vlgmr.msrb.gmra.mxu1 %vm9339_vm1, %v9154_v37  ;;  %7313 = vmatmul.msk.bf16.vlgmr.msrb.gmra.mxu2 %vm9663_vm12, %v9154_v37  ;;  %vm3714_vm12 = vcmp.eq.s32.totalorder %v9246_v48, %v9270_v26  ;;  %v7482_v26 = vld [vmem:[#allocation3 + $0x68] sm:$0xf] }
 0x2d7   :  { %7315 = vmatmul.msk.bf16.vlgmr.msrb.gmra.mxu3 %vm9339_vm1, %v9154_v37  ;;  %3391 = vmatpush.bf16.msra.mxu1 %v7259_v10  ;;  %v7483_v51 = vor.u32 %v8720_v54, %v7482_v26  ;;  %v7470_v10 = vld [vmem:[#allocation3 + $0x50] sm:$0xf]  ;;  %v8699_v26 = vld [vmem:[#allocation5 + $0x88] sm:$0xf0]  ;;  %v2603_v13 = vpop.f32.mrf.mxu3 }
 0x2d8   :  { %v7471_v55 = vor.u32 %v8717_v45, %v7470_v10  ;;  %v7334_v10 = vld [vmem:[#allocation5 + $0x18] sm:$0xf]  ;;  %v8686_v45 = vld [vmem:[#allocation5 + $0x20] sm:$0xf0] }
 0x2db   :  { %3392 = vmatpush.bf16.msra.mxu1 %v7247_v62  ;;  %v7458_v62 = vld [vmem:[#allocation3 + $0x38] sm:$0xf] }
 0x2dc   :  { %v7459_v17 = vor.u32 %v8714_v39, %v7458_v62  ;;  %v2615_v62 = vpop.f32.mrf.mxu0  ;;  %v8694_v39 = vld [vmem:[#allocation5 + $0x64] sm:$0xf] }
 0x2df   :  { %3393 = vmatpush.bf16.msra.mxu1 %v7235_v50  ;;  %v7446_v50 = vld [vmem:[#allocation3 + $0x20] sm:$0xf] }
 0x2e0   :  { %v7447_v12 = vor.u32 %v8711_v3, %v7446_v50  ;;  %v7378_v50 = vld [vmem:[#allocation5 + $0x68] sm:$0xf] }
 0x2e3   :  { %3394 = vmatpush.bf16.msra.mxu1 %v7223_v7  ;;  %v7435_v7 = vor.u32 %v8708_v60, %v7434_v36  ;;  %v7322_v60 = vld [vmem:[#allocation5] sm:$0xf] }
 0x2e6   :  { %7319 = vmatmul.msk.bf16.vlgmr.msra.gmra.mxu1 %vm9339_vm1, %v9154_v37  ;;  %vm3712_vm1 = vcmp.eq.s32.totalorder %v9246_v48, %v9326_v18  ;;  %v7495_v18 = vor.u32 %v8723_v14, %v7494_v41  ;;  %v7384_v41 = vld [vmem:[#allocation5 + $0x84] sm:$0xf0]  ;;  %v7390_v14 = vld [vmem:[#allocation5 + $0x80] sm:$0xf] }
 0x2e7   :  { %4042 = vmatpush.bf16.msrb.mxu1 %v7511_v6  ;;  %vm9802_vm7 = vmpackc.low %vm3714_vm12, %vm3712_vm1  ;;  %v7394_v6 = vld [vmem:[#allocation5 + $0x90] sm:$0xf] }
 0x2e8   :  { %v7395_v61 = vor.u32 %v8701_v52, %v7394_v6  ;;  %v2602_v6 = vadd.f32 %v2601_v49, %v9421_v15  ;;  %v2617_v49 = vpop.f32.mrf.mxu0 }
 0x2ea   :  { %3563 = vmatpush.bf16.msra.mxu2 %v7395_v61  ;;  %v7606_v61 = vld [vmem:[#allocation3 + $0x168] sm:$0xf]  ;;  %v2616_v63 = vadd.f32 %v2615_v62, %v2602_v6 }
 0x2eb   :  { %4043 = vmatpush.bf16.msrb.mxu1 %v7499_v43  ;;  %v7382_v43 = vld [vmem:[#allocation5 + $0x78] sm:$0xf] }
 0x2ec   :  { %v7383_v0 = vor.u32 %v8698_v58, %v7382_v43  ;;  %v8752_v43 = vld [vmem:[#allocation3 + $0x170] sm:$0xf0] }
 0x2ee   :  { %3564 = vmatpush.bf16.msra.mxu2 %v7383_v0  ;;  %v7607_v0 = vor.u32 %v8752_v43, %v7606_v61  ;;  %v7324_v61 = vld [vmem:[#allocation5 + $0xc] sm:$0xf0]  ;;  %v7330_v43 = vld [vmem:[#allocation5 + $0x8] sm:$0xf] }
 0x2ef   :  { %4044 = vmatpush.bf16.msrb.mxu1 %v7487_v11  ;;  %v7370_v11 = vld [vmem:[#allocation5 + $0x60] sm:$0xf] }
 0x2f0   :  { %v7371_v56 = vor.u32 %v8695_v29, %v7370_v11  ;;  %v8691_v11 = vld [vmem:[#allocation5 + $0x4c] sm:$0xf]  ;;  %v7360_v29 = vld [vmem:[#allocation5 + $0x54] sm:$0xf0] }
 0x2f2   :  { %3565 = vmatpush.bf16.msra.mxu2 %v7371_v56  ;;  %v7366_v56 = vld [vmem:[#allocation5 + $0x50] sm:$0xf] }
 0x2f3   :  { %4045 = vmatpush.bf16.msrb.mxu1 %v7475_v4  ;;  %v9812_v4 = vpop.f32.mrf.mxu1 }
 0x2f7   :  { %4046 = vmatpush.bf16.msrb.mxu1 %v7463_v24  ;;  %v7414_v24 = vld [vmem:[#allocation5 + $0xb0] sm:$0xf] }
 0x2fb   :  { %4047 = vmatpush.bf16.msrb.mxu1 %v7451_v23  ;;  %v7415_v23 = vor.u32 %v8705_v42, %v7414_v24  ;;  %v9816_v54 = vpop.f32.mrf.mxu1  ;;  %v7363_v24 = vor.u32 %v8691_v11, %v7360_v29 }
 0x2fc   :  { %v2632_v11 = vadd.f32 %v9816_v54, %v9424_v20 }
 0x2fd   :  { %3590 = vmatpush.bf16.msrb.mxu0 %v7415_v23  ;;  %v7367_v23 = vor.u32 %v8693_v27, %v7366_v56 }
 0x2ff   :  { %4048 = vmatpush.bf16.msrb.mxu1 %v7439_v5  ;;  %v7359_v5 = vor.u32 %v8692_v8, %v7358_v1  ;;  %v7594_v8 = vld [vmem:[#allocation3 + $0x150] sm:$0xf] }
 0x301   :  { %3566 = vmatpush.bf16.msra.mxu2 %v7359_v5  ;;  %v8749_v5 = vld [vmem:[#allocation3 + $0x158] sm:$0xf0] }
 0x302   :  { %v7595_v32 = vor.u32 %v8749_v5, %v7594_v8  ;;  %v7608_v5 = vld [vmem:[#allocation3 + $0x174] sm:$0xf0] }
 0x303   :  { %4049 = vmatpush.bf16.msrb.mxu1 %v7427_v21  ;;  %v8702_v21 = vld [vmem:[#allocation5 + $0xa0] sm:$0xf0] }
 0x304   :  { %v7403_v19 = vor.u32 %v8702_v21, %v7402_v28  ;;  %v7348_v28 = vld [vmem:[#allocation5 + $0x3c] sm:$0xf0]  ;;  %v2630_v21 = vadd.f32 %v9812_v4, %v9424_v20 }
 0x305   :  { %v7342_v4 = vld [vmem:[#allocation5 + $0x20] sm:$0xf] }
 0x306   :  { %7617 = vmatmul.msk.bf16.vlgmr.msrb.gmra.mxu1 %vm9802_vm7, %v9154_v37  ;;  %3591 = vmatpush.bf16.msrb.mxu0 %v7403_v19 }
 0x307   :  { %4098 = vmatpush.bf16.msra.mxu1 %v7519_v34  ;;  %v9814_v34 = vpop.f32.mrf.mxu2 }
 0x30b   :  { %4099 = vmatpush.bf16.msra.mxu1 %v7507_v35  ;;  %v7347_v35 = vor.u32 %v8689_v2, %v7346_v22  ;;  %v7351_v22 = vor.u32 %v8688_v9, %v7348_v28  ;;  %v8690_v2 = vld [vmem:[#allocation5 + $0x40] sm:$0xf0]  ;;  %v8740_v9 = vld [vmem:[#allocation3 + $0x110] sm:$0xf0] }
 0x30d   :  { %3567 = vmatpush.bf16.msra.mxu2 %v7347_v35  ;;  %v7355_v35 = vor.u32 %v8690_v2, %v7354_v30  ;;  %v8748_v2 = vld [vmem:[#allocation3 + $0x154] sm:$0xf] }
 0x30f   :  { %4100 = vmatpush.bf16.msra.mxu1 %v7495_v18  ;;  %v7387_v18 = vor.u32 %v8697_v33, %v7384_v41  ;;  %v9819_v58 = vpop.f32.mrf.mxu2  ;;  %v2604_v33 = vadd.f32 %v2603_v13, %v9421_v15  ;;  %v2644_v41 = vadd.f32 %v9814_v34, %v2630_v21  ;;  %v8684_v13 = vld [vmem:[#allocation5 + $0x10] sm:$0xf0] }
 0x310   :  { %v7331_v27 = vor.u32 %v8684_v13, %v7330_v43  ;;  %v7572_v13 = vld [vmem:[#allocation3 + $0x12c] sm:$0xf0] }
 0x311   :  { %3578 = vmatpush.bf16.msra.mxu3 %v7387_v18  ;;  %v8746_v18 = vld [vmem:[#allocation3 + $0x140] sm:$0xf0]  ;;  %v2618_v62 = vadd.f32 %v2617_v49, %v2604_v33 }
 0x313   :  { %4101 = vmatpush.bf16.msra.mxu1 %v7483_v51  ;;  %v7391_v51 = vor.u32 %v8699_v26, %v7390_v14  ;;  %v7582_v14 = vld [vmem:[#allocation3 + $0x138] sm:$0xf] }
 0x315   :  { %3592 = vmatpush.bf16.msrb.mxu0 %v7391_v51  ;;  %v7583_v51 = vor.u32 %v8746_v18, %v7582_v14  ;;  %v7546_v18 = vld [vmem:[#allocation3 + $0xf0] sm:$0xf] }
 0x317   :  { %4102 = vmatpush.bf16.msra.mxu1 %v7471_v55  ;;  %v7335_v55 = vor.u32 %v8686_v45, %v7334_v10  ;;  %v8685_v10 = vld [vmem:[#allocation5 + $0x1c] sm:$0xf]  ;;  %v7336_v45 = vld [vmem:[#allocation5 + $0x24] sm:$0xf0] }
 0x319   :  { %3568 = vmatpush.bf16.msra.mxu2 %v7335_v55  ;;  %v9825_v55 = vpop.f32.mrf.mxu3 }
 0x31b   :  { %4103 = vmatpush.bf16.msra.mxu1 %v7459_v17  ;;  %v7372_v17 = vld [vmem:[#allocation5 + $0x6c] sm:$0xf0] }
 0x31c   :  { %v7375_v3 = vor.u32 %v8694_v39, %v7372_v17  ;;  %v7339_v17 = vor.u32 %v8685_v10, %v7336_v45 }
 0x31e   :  { %3579 = vmatpush.bf16.msra.mxu3 %v7375_v3 }
 0x31f   :  { %4104 = vmatpush.bf16.msra.mxu1 %v7447_v12  ;;  %v8696_v12 = vld [vmem:[#allocation5 + $0x70] sm:$0xf0] }
 0x320   :  { %v7379_v36 = vor.u32 %v8696_v12, %v7378_v50  ;;  %v8687_v50 = vld [vmem:[#allocation5 + $0x28] sm:$0xf0] }
 0x321   :  { %v7343_v12 = vor.u32 %v8687_v50, %v7342_v4  ;;  %v9833_v33 = vpop.f32.mrf.mxu3  ;;  %v8721_v4 = vld [vmem:[#allocation3 + $0x7c] sm:$0xf]  ;;  %v7584_v50 = vld [vmem:[#allocation3 + $0x144] sm:$0xf0] }
 0x322   :  { %3593 = vmatpush.bf16.msrb.mxu0 %v7379_v36  ;;  %3580 = vmatpush.bf16.msra.mxu3 %v7363_v24 }
 0x323   :  { %4105 = vmatpush.bf16.msra.mxu1 %v7435_v7  ;;  %v8683_v7 = vld [vmem:[#allocation5 + $0x8] sm:$0xf0] }
 0x324   :  { %v7323_v52 = vor.u32 %v8683_v7, %v7322_v60  ;;  %v7570_v60 = vld [vmem:[#allocation3 + $0x120] sm:$0xf]  ;;  %v8743_v7 = vld [vmem:[#allocation3 + $0x128] sm:$0xf0] }
 0x325   :  { %v7571_v6 = vor.u32 %v8743_v7, %v7570_v60  ;;  %v8734_v60 = vld [vmem:[#allocation3 + $0xe0] sm:$0xf0] }
 0x326   :  { %7625 = vmatmul.msk.bf16.vlgmr.msra.gmra.mxu1 %vm9802_vm7, %v9154_v37  ;;  %3569 = vmatpush.bf16.msra.mxu2 %v7323_v52  ;;  %v8682_v52 = vld [vmem:[#allocation5 + $0x4] sm:$0xf] }
 0x327   :  { %3594 = vmatpush.bf16.msrb.mxu0 %v7367_v23  ;;  %3581 = vmatpush.bf16.msra.mxu3 %v7351_v22  ;;  %v7327_v56 = vor.u32 %v8682_v52, %v7324_v61  ;;  %v8751_v23 = vld [vmem:[#allocation3 + $0x16c] sm:$0xf]  ;;  %v7500_v22 = vld [vmem:[#allocation3 + $0x9c] sm:$0xf0]  ;;  %v8718_v52 = vld [vmem:[#allocation3 + $0x64] sm:$0xf] }
 0x328   :  { %v7611_v30 = vor.u32 %v8751_v23, %v7608_v5  ;;  %v7476_v61 = vld [vmem:[#allocation3 + $0x6c] sm:$0xf0] }
 0x32a   :  { %4056 = vmatpush.bf16.msrb.mxu2 %v7607_v0 }
 0x32b   :  { %3595 = vmatpush.bf16.msrb.mxu0 %v7355_v35  ;;  %3582 = vmatpush.bf16.msra.mxu3 %v7339_v17  ;;  %v7596_v35 = vld [vmem:[#allocation3 + $0x15c] sm:$0xf0] }
 0x32c   :  { %v7599_v14 = vor.u32 %v8748_v2, %v7596_v35  ;;  %v8739_v2 = vld [vmem:[#allocation3 + $0x10c] sm:$0xf] }
 0x32e   :  { %4057 = vmatpush.bf16.msrb.mxu2 %v7595_v32  ;;  %v7558_v32 = vld [vmem:[#allocation3 + $0x108] sm:$0xf] }
 0x32f   :  { %3596 = vmatpush.bf16.msrb.mxu0 %v7343_v12  ;;  %3583 = vmatpush.bf16.msra.mxu3 %v7327_v56  ;;  %v7559_v21 = vor.u32 %v8740_v9, %v7558_v32  ;;  %v7479_v56 = vor.u32 %v8718_v52, %v7476_v61  ;;  %v2671_v32 = vpop.f32.mrf.mxu0  ;;  %v7548_v52 = vld [vmem:[#allocation3 + $0xfc] sm:$0xf0] }
 0x332   :  { %4058 = vmatpush.bf16.msrb.mxu2 %v7583_v51 }
 0x333   :  { %3597 = vmatpush.bf16.msrb.mxu0 %v7331_v27 }
 0x336   :  { %4059 = vmatpush.bf16.msrb.mxu2 %v7571_v6 }
 0x337   :  { %4084 = vmatpush.bf16.msra.mxu0 %v7611_v30 }
 0x33a   :  { %4060 = vmatpush.bf16.msrb.mxu2 %v7559_v21 }
 0x33b   :  { %4085 = vmatpush.bf16.msra.mxu0 %v7599_v14 }
 0x343   :  { %v2846_v42 = vpop.f32.mrf.mxu1 }
 0x344   :  { %v2879_v1 = vadd.f32 %v2846_v42, %v2616_v63  ;;  %v8727_v63 = vld [vmem:[#allocation3 + $0xac] sm:$0xf]  ;;  %v7512_v42 = vld [vmem:[#allocation3 + $0xb4] sm:$0xf0] }
 0x345   :  { %v7515_v8 = vor.u32 %v8727_v63, %v7512_v42  ;;  %v7522_v63 = vld [vmem:[#allocation3 + $0xc0] sm:$0xf] }
 0x346   :  { %v7108_v19 = vmul.f32 -1.442695, %v2879_v1  ;;  %v2646_v1 = vadd.f32 %v9819_v58, %v2632_v11  ;;  %v8742_v11 = vld [vmem:[#allocation3 + $0x124] sm:$0xf] }
 0x347   :  { %4070 = vmatpush.bf16.msrb.mxu3 %v7515_v8  ;;  %v8731_v8 = vld [vmem:[#allocation3 + $0xc8] sm:$0xf0] }
 0x348   :  { %8992 = vpow2.f32 %v7108_v19  ;;  %v8724_v19 = vld [vmem:[#allocation3 + $0x94] sm:$0xf] }
 0x349   :  { %v2860_v26 = vpop.f32.mrf.mxu2  ;;  %v7503_v49 = vor.u32 %v8724_v19, %v7500_v22  ;;  %v8715_v19 = vld [vmem:[#allocation3 + $0x4c] sm:$0xf]  ;;  %v7464_v22 = vld [vmem:[#allocation3 + $0x54] sm:$0xf0] }
 0x34a   :  { %v2919_v39 = vadd.f32 %v2860_v26, %v2644_v41  ;;  %v8737_v26 = vld [vmem:[#allocation3 + $0xf8] sm:$0xf0]  ;;  %v2874_v42 = vpop.f32.mrf.mxu3 }
 0x34b   :  { %v2848_v3 = vpop.f32.mrf.mxu1  ;;  %v7547_v10 = vor.u32 %v8737_v26, %v7546_v18  ;;  %4071 = vmatpush.bf16.msrb.mxu3 %v7503_v49  ;;  %v7467_v26 = vor.u32 %v8715_v19, %v7464_v22 }
 0x34c   :  { %v7110_v34 = vmul.f32 -1.442695, %v2919_v39  ;;  %v2880_v36 = vadd.f32 %v2848_v3, %v2618_v62  ;;  %v7488_v62 = vld [vmem:[#allocation3 + $0x84] sm:$0xf0]  ;;  %v8745_v39 = vld [vmem:[#allocation3 + $0x13c] sm:$0xf] }
 0x34d   :  { %4061 = vmatpush.bf16.msrb.mxu2 %v7547_v10  ;;  %v7587_v7 = vor.u32 %v8745_v39, %v7584_v50 }
 0x34e   :  { %v8993_v0 = vpop.eup %8992  ;;  %8994 = vpow2.f32 %v7110_v34  ;;  %v7109_v29 = vmul.f32 -1.442695, %v2880_v36  ;;  %v7491_v34 = vor.u32 %v8721_v4, %v7488_v62  ;;  %v7534_v36 = vld [vmem:[#allocation3 + $0xd8] sm:$0xf] }
 0x34f   :  { %v9829_v24 = vadd.f32 1.0, %v8993_v0  ;;  %v7535_v6 = vor.u32 %v8734_v60, %v7534_v36  ;;  %4086 = vmatpush.bf16.msra.mxu0 %v7587_v7  ;;  %v7452_v36 = vld [vmem:[#allocation3 + $0x3c] sm:$0xf0] }
 0x350   :  { %8996 = vpow2.f32 %v7109_v29  ;;  %4072 = vmatpush.bf16.msrb.mxu3 %v7491_v34  ;;  %v8712_v34 = vld [vmem:[#allocation3 + $0x34] sm:$0xf] }
 0x351   :  { %8998 = vrcp.f32 %v9829_v24  ;;  %v2862_v54 = vpop.f32.mrf.mxu2  ;;  %v2898_v0 = vand.u32 2147483647, %v9829_v24  ;;  %v2900_v29 = vand.u32 2147483648, %v9829_v24  ;;  %4062 = vmatpush.bf16.msrb.mxu2 %v7535_v6  ;;  %vm2894_vm10 = vweird.f32 %v9829_v24 }
 0x352   :  { %v2920_v28 = vadd.f32 %v2862_v54, %v2646_v1  ;;  %v7575_v1 = vor.u32 %v8742_v11, %v7572_v13  ;;  %v7523_v54 = vor.u32 %v8731_v8, %v7522_v63  ;;  %v7455_v6 = vor.u32 %v8712_v34, %v7452_v36 }
 0x353   :  { %vm2899_vm14 = vcmp.eq.f32.partialorder %v2898_v0, 8.507059e+37  ;;  %v2901_v35 = vor.u32 1.1754944e-38, %v2900_v29 }
 0x354   :  { %v8995_v58 = vpop.eup %8994  ;;  %v7111_v41 = vmul.f32 -1.442695, %v2920_v28  ;;  %v2658_v28 = vadd.f32 %v9825_v55, %v9459_v16  ;;  %4073 = vmatpush.bf16.msrb.mxu3 %v7479_v56  ;;  %v9861_v55 = vld [vmem:[%s10286_s5] ss:$0 sm:$0xff]  ;;  %4087 = vmatpush.bf16.msra.mxu0 %v7575_v1 }
 0x355   :  { %v9835_v51 = vadd.f32 1.0, %v8995_v58  ;;  %v2959_v58 = vadd.f32 %v9861_v55, %v2874_v42  ;;  %4063 = vmatpush.bf16.msrb.mxu2 %v7523_v54  ;;  %v7440_v42 = vld [vmem:[#allocation3 + $0x24] sm:$0xf0]  ;;  %v2876_v54 = vpop.f32.mrf.mxu3 }
 0x356   :  { %v8997_v45 = vpop.eup %8996  ;;  %9000 = vpow2.f32 %v7111_v41  ;;  %v2672_v39 = vadd.f32 %v2671_v32, %v2658_v28  ;;  %v7536_v28 = vld [vmem:[#allocation3 + $0xe4] sm:$0xf0] }
 0x357   :  { %v8999_v17 = vpop.eup %8998  ;;  %9002 = vrcp.f32 %v9835_v51  ;;  %v9839_v12 = vadd.f32 1.0, %v8997_v45  ;;  %v2940_v45 = vand.u32 2147483648, %v9835_v51  ;;  %vm2934_vm13 = vweird.f32 %v9835_v51 }
 0x358   :  { %v2890_v3 = vmul.f32 %v8999_v17, %v9829_v24  ;;  %vm2895_vm8 = vweird.f32 %v8999_v17  ;;  %v7560_v24 = vld [vmem:[#allocation3 + $0x114] sm:$0xf0]  ;;  %4074 = vmatpush.bf16.msrb.mxu3 %v7467_v26  ;;  %v2938_v60 = vand.u32 2147483647, %v9835_v51  ;;  %v8730_v26 = vld [vmem:[#allocation3 + $0xc4] sm:$0xf] }
 0x359   :  { %9004 = vrcp.f32 %v9839_v12  ;;  %vm9854_vm11 = vmor %vm2894_vm10, %vm2895_vm8  ;;  %v7563_v10 = vor.u32 %v8739_v2, %v7560_v24  ;;  %v2913_v11 = vand.u32 2147483647, %v9839_v12  ;;  %v2915_v29 = vand.u32 2147483648, %v9839_v12 }
 0x35a   :  { %v2891_v43 = vsub.f32 1.0, %v2890_v3  ;;  %v2941_v1 = vor.u32 1.1754944e-38, %v2940_v45  ;;  %vm2939_vm2 = vcmp.eq.f32.partialorder %v2938_v60, 8.507059e+37  ;;  %vm2909_vm5 = vweird.f32 %v9839_v12 }
 0x35b   :  { %4088 = vmatpush.bf16.msra.mxu0 %v7563_v10  ;;  %v2916_v2 = vor.u32 1.1754944e-38, %v2915_v29  ;;  %vm2914_vm12 = vcmp.eq.f32.partialorder %v2913_v11, 8.507059e+37  ;;  %v7524_v10 = vld [vmem:[#allocation3 + $0xcc] sm:$0xf0]  ;;  %v8753_v29 = vld [vmem:[#allocation3 + $0x178] sm:$0xf0] }
 0x35c   :  { %v9001_v27 = vpop.eup %9000  ;;  %v2892_v23 = vmul.f32 %v8999_v17, %v2891_v43  ;;  %4075 = vmatpush.bf16.msrb.mxu3 %v7455_v6  ;;  %v7527_v34 = vor.u32 %v8730_v26, %v7524_v10  ;;  %v7806_v26 = vld [vmem:[#allocation3 + $0x90] sm:$0xf] }
 0x35d   :  { %v9844_v5 = vpop.eup %9002  ;;  %v9846_v9 = vadd.f32 1.0, %v9001_v27  ;;  %v8709_v27 = vld [vmem:[#allocation3 + $0x1c] sm:$0xf]  ;;  %v7807_v10 = vor.u32 %v8797_v53, %v7806_v26  ;;  %v7690_v26 = vld [vmem:[#allocation5 + $0x78] sm:$0xf] }
 0x35e   :  { %v2930_v30 = vmul.f32 %v9844_v5, %v9835_v51  ;;  %v2893_v21 = vadd.f32 %v8999_v17, %v2892_v23  ;;  %vm2935_vm4 = vweird.f32 %v9844_v5  ;;  %v2660_v51 = vadd.f32 %v9833_v33, %v9459_v16  ;;  %v8733_v23 = vld [vmem:[#allocation3 + $0xdc] sm:$0xf]  ;;  %v2673_v33 = vpop.f32.mrf.mxu0  ;;  %v8770_v53 = vld [vmem:[#allocation5 + $0x80] sm:$0xf0] }
 0x35f   :  { %9006 = vrcp.f32 %v9846_v9  ;;  %v9865_v41 = vpop.eup %9004  ;;  %vm9879_vm15 = vmor %vm2934_vm13, %vm2935_vm4  ;;  %vm2949_vm10 = vweird.f32 %v9846_v9 }
 0x360   :  { %v2931_v14 = vsub.f32 1.0, %v2930_v30  ;;  %v2897_v18 = vsel %vm9854_vm11, %v8999_v17, %v2893_v21  ;;  %v2905_v62 = vmul.f32 %v9865_v41, %v9839_v12  ;;  %v8736_v17 = vld [vmem:[#allocation3 + $0xf4] sm:$0xf]  ;;  %vm2910_vm0 = vweird.f32 %v9865_v41  ;;  %v7428_v12 = vld [vmem:[#allocation3 + $0xc] sm:$0xf0] }
 0x361   :  { %v2902_v4 = vsel %vm2899_vm14, %v2901_v35, %v2897_v18  ;;  %v7551_v63 = vor.u32 %v8736_v17, %v7548_v52  ;;  %v7443_v21 = vor.u32 %v8709_v27, %v7440_v42  ;;  %vm2911_vm1 = vmor %vm2909_vm5, %vm2910_vm0  ;;  %v2960_v35 = vadd.f32 %v9861_v55, %v2876_v54  ;;  %v8750_v27 = vld [vmem:[#allocation3 + $0x160] sm:$0xf0]  ;;  %v7590_v42 = vld [vmem:[#allocation3 + $0x140] sm:$0xf] }
 0x362   :  { %v2932_v50 = vmul.f32 %v9844_v5, %v2931_v14  ;;  %v2961_v3 = vmul.f32 %v2959_v58, %v2902_v4  ;;  %v2906_v7 = vsub.f32 1.0, %v2905_v62  ;;  %v8706_v58 = vld [vmem:[#allocation3 + $0x4] sm:$0xf]  ;;  %v2674_v24 = vadd.f32 %v2673_v33, %v2660_v51  ;;  %v8741_v33 = vld [vmem:[#allocation3 + $0x118] sm:$0xf0] }
 0x363   :  { %4089 = vmatpush.bf16.msra.mxu0 %v7551_v63  ;;  %4076 = vmatpush.bf16.msrb.mxu3 %v7443_v21  ;;  %v2955_v4 = vand.u32 2147483648, %v9846_v9  ;;  %v7602_v63 = vld [vmem:[#allocation3 + $0x158] sm:$0xf] }
 0x364   :  { %v2933_v61 = vadd.f32 %v9844_v5, %v2932_v50  ;;  %v2963_v0 = vadd.f32 %v2961_v3, %v2672_v39  ;;  %v2907_v13 = vmul.f32 %v9865_v41, %v2906_v7  ;;  %v7431_v39 = vor.u32 %v8706_v58, %v7428_v12  ;;  %v7554_v21 = vld [vmem:[#allocation3 + $0xf8] sm:$0xf]  ;;  %v8732_v58 = vld [vmem:[#allocation3 + $0xd0] sm:$0xf0] }
 0x365   :  { %v9007_v56 = vpop.eup %9006  ;;  %v2956_v6 = vor.u32 1.1754944e-38, %v2955_v4  ;;  %v8794_v4 = vld [vmem:[#allocation3 + $0x80] sm:$0xf0] }
 0x366   :  { %v2937_v8 = vsel %vm9879_vm15, %v9844_v5, %v2933_v61  ;;  %9008 = vtanh.f32 %v2963_v0  ;;  %v2945_v32 = vmul.f32 %v9007_v56, %v9846_v9  ;;  %v2908_v30 = vadd.f32 %v9865_v41, %v2907_v13 }
 0x367   :  { %v2942_v19 = vsel %vm2939_vm2, %v2941_v1, %v2937_v8  ;;  %v7539_v5 = vor.u32 %v8733_v23, %v7536_v28  ;;  %vm2950_vm8 = vweird.f32 %v9007_v56  ;;  %4077 = vmatpush.bf16.msrb.mxu3 %v7431_v39  ;;  %v8747_v23 = vld [vmem:[#allocation3 + $0x148] sm:$0xf0]  ;;  %v7578_v8 = vld [vmem:[#allocation3 + $0x128] sm:$0xf]  ;;  %v7566_v28 = vld [vmem:[#allocation3 + $0x110] sm:$0xf] }
 0x368   :  { %v2946_v22 = vsub.f32 1.0, %v2945_v32  ;;  %v2912_v49 = vsel %vm2911_vm1, %v9865_v41, %v2908_v30  ;;  %v2967_v45 = vsub.f32 1.0, %v2942_v19  ;;  %v2953_v41 = vand.u32 2147483647, %v9846_v9  ;;  %vm2951_vm11 = vmor %vm2949_vm10, %vm2950_vm8  ;;  %v8744_v32 = vld [vmem:[#allocation3 + $0x130] sm:$0xf0] }
 0x369   :  { %v2917_v18 = vsel %vm2914_vm12, %v2916_v2, %v2912_v49  ;;  %4090 = vmatpush.bf16.msra.mxu0 %v7539_v5  ;;  %v2971_v60 = vmul.f32 %v2942_v19, %v9771_v40  ;;  %v7614_v40 = vld [vmem:[#allocation3 + $0x170] sm:$0xf]  ;;  %v7591_v1 = vor.u32 %v8747_v23, %v7590_v42  ;;  %v7579_v54 = vor.u32 %v8744_v32, %v7578_v8  ;;  %v8738_v19 = vld [vmem:[#allocation3 + $0x100] sm:$0xf0]  ;;  %v7542_v2 = vld [vmem:[#allocation3 + $0xe0] sm:$0xf] }
 0x36a   :  { %v2947_v14 = vmul.f32 %v9007_v56, %v2946_v22  ;;  %v2962_v62 = vmul.f32 %v2960_v35, %v2917_v18  ;;  %vm2954_vm14 = vcmp.eq.f32.partialorder %v2953_v41, 8.507059e+37  ;;  %v7615_v51 = vor.u32 %v8753_v29, %v7614_v40  ;;  %v8735_v5 = vld [vmem:[#allocation3 + $0xe8] sm:$0xf0]  ;;  %v7530_v35 = vld [vmem:[#allocation3 + $0xc8] sm:$0xf] }
 0x36b   :  { %v7567_v30 = vor.u32 %v8741_v33, %v7566_v28  ;;  %v7555_v22 = vor.u32 %v8738_v19, %v7554_v21  ;;  %v7543_v49 = vor.u32 %v8735_v5, %v7542_v2  ;;  %v7531_v18 = vor.u32 %v8732_v58, %v7530_v35  ;;  %v7782_v39 = vld [vmem:[#allocation3 + $0x60] sm:$0xf]  ;;  %v7770_v41 = vld [vmem:[#allocation3 + $0x48] sm:$0xf]  ;;  %v8795_v42 = vld [vmem:[#allocation3 + $0x88] sm:$0xf0] }
 0x36c   :  { %v9009_v50 = vpop.eup %9008  ;;  %v2948_v3 = vadd.f32 %v9007_v56, %v2947_v14  ;;  %v2964_v17 = vadd.f32 %v2962_v62, %v2674_v24  ;;  %v7818_v24 = vld [vmem:[#allocation3 + $0xa8] sm:$0xf]  ;;  %v8800_v14 = vld [vmem:[#allocation3 + $0xb0] sm:$0xf0]  ;;  %v8789_v32 = vld [vmem:[#allocation3 + $0x58] sm:$0xf0] }
 0x36d   :  { %v2969_v36 = vmul.f32 %v9009_v50, %v2967_v45  ;;  %4091 = vmatpush.bf16.msra.mxu0 %v7527_v34  ;;  %v7819_v12 = vor.u32 %v8800_v14, %v7818_v24  ;;  %v7794_v45 = vld [vmem:[#allocation3 + $0x78] sm:$0xf]  ;;  %v8791_v50 = vld [vmem:[#allocation3 + $0x68] sm:$0xf0]  ;;  %v8788_v34 = vld [vmem:[#allocation3 + $0x50] sm:$0xf0] }
 0x36e   :  { %v2952_v7 = vsel %vm2951_vm11, %v9007_v56, %v2948_v3  ;;  %9010 = vtanh.f32 %v2964_v17  ;;  %v7795_v62 = vor.u32 %v8794_v4, %v7794_v45  ;;  %v7783_v3 = vor.u32 %v8791_v50, %v7782_v39  ;;  %v7758_v17 = vld [vmem:[#allocation3 + $0x30] sm:$0xf]  ;;  %v7766_v28 = vld [vmem:[#allocation3 + $0x38] sm:$0xf]  ;;  %v8786_v33 = vld [vmem:[#allocation3 + $0x40] sm:$0xf0] }
 0x36f   :  { %v9904_v52 = vadd.f32 %v2971_v60, %v2969_v36  ;;  %v2957_v61 = vsel %vm2954_vm14, %v2956_v6, %v2952_v7  ;;  %v7771_v36 = vor.u32 %v8788_v34, %v7770_v41  ;;  %v8785_v60 = vld [vmem:[#allocation3 + $0x38] sm:$0xf0]  ;;  %v7746_v6 = vld [vmem:[#allocation3 + $0x18] sm:$0xf]  ;;  %v7754_v21 = vld [vmem:[#allocation3 + $0x20] sm:$0xf]  ;;  %v3354_v41 = vpop.f32.mrf.mxu2  ;;  %v9945_v34 = vpop.f32.mrf.mxu3 }
 0x370   :  { %v2968_v9 = vsub.f32 1.0, %v2957_v61  ;;  %v2972_v11 = vmul.f32 %v2957_v61, %v9778_v25  ;;  %v7603_v25 = vor.u32 %v8750_v27, %v7602_v63  ;;  %v7759_v7 = vor.u32 %v8785_v60, %v7758_v17  ;;  %v8782_v61 = vld [vmem:[#allocation3 + $0x20] sm:$0xf0]  ;;  %v8783_v19 = vld [vmem:[#allocation3 + $0x28] sm:$0xf0] }
 0x371   :  { %7112 = vst [vmem:[%s10287_s6 + $0x30] sm:$0xff] %v9904_v52  ;;  %v7742_v2 = vld [vmem:[#allocation3 + $0x8] sm:$0xf]  ;;  %v8780_v5 = vld [vmem:[#allocation3 + $0x10] sm:$0xf0] }
 0x372   :  { %v7714_v35 = vld [vmem:[#allocation5 + $0xa8] sm:$0xf]  ;;  %v8776_v58 = vld [vmem:[#allocation5 + $0xb0] sm:$0xf0]  ;;  %v7702_v14 = vld [vmem:[#allocation5 + $0x90] sm:$0xf] }
 0x373   :  { %v7715_v24 = vor.u32 %v8776_v58, %v7714_v35  ;;  %v7678_v45 = vld [vmem:[#allocation5 + $0x60] sm:$0xf]  ;;  %v8767_v4 = vld [vmem:[#allocation5 + $0x68] sm:$0xf0]  ;;  %v7716_v50 = vld [vmem:[#allocation5 + $0xb4] sm:$0xf0] }
 0x374   :  { %v9011_v43 = vpop.eup %9010  ;;  %v8775_v39 = vld [vmem:[#allocation5 + $0xac] sm:$0xf]  ;;  %v8777_v17 = vld [vmem:[#allocation5 + $0xb8] sm:$0xf0]  ;;  %v7630_v58 = vld [vmem:[#allocation5] sm:$0xf] }
 0x375   :  { %v2970_v0 = vmul.f32 %v9011_v43, %v2968_v9  ;;  %v7747_v9 = vor.u32 %v8782_v61, %v7746_v6  ;;  %v8779_v43 = vld [vmem:[#allocation3 + $0x8] sm:$0xf0]  ;;  %v8764_v6 = vld [vmem:[#allocation5 + $0x50] sm:$0xf0]  ;;  %v8869_v27 = vld [vmem:[#allocation3 + $0x98] sm:$0xf0] }
 0x376   :  { %v7735_v40 = vor.u32 %v8779_v43, %v7734_v44  ;;  %v7704_v44 = vld [vmem:[#allocation5 + $0x9c] sm:$0xf0]  ;;  %v7710_v43 = vld [vmem:[#allocation5 + $0x98] sm:$0xf] }
 0x377   :  { %v9911_v56 = vadd.f32 %v2972_v11, %v2970_v0  ;;  %v7826_v0 = vld [vmem:[#allocation3 + $0xb0] sm:$0xf]  ;;  %v8801_v11 = vld [vmem:[#allocation3 + $0xb8] sm:$0xf0] }
 0x378   :  { %v7827_v29 = vor.u32 %v8801_v11, %v7826_v0  ;;  %v8774_v11 = vld [vmem:[#allocation5 + $0xa0] sm:$0xf0] }
 0x379   :  { %7113 = vst [vmem:[%s10287_s6 + $0x38] sm:$0xff] %v9911_v56  ;;  %v3401_v13 = vpack.c.bf16 %v9911_v56, %v9904_v52 }
 0x37b   :  { %3570 = vmatmul.bf16.vlgmr.msra.gmra.mxu2 %v3401_v13  ;;  %3584 = vmatmul.bf16.vlgmr.msra.gmra.mxu3 %v3401_v13 }
 0x37c   :  { %3598 = vmatmul.bf16.vlgmr.msrb.gmra.mxu0 %v3401_v13  ;;  %4112 = vmatpush.bf16.msra.mxu2 %v7615_v51  ;;  %v7814_v51 = vld [vmem:[#allocation3 + $0x98] sm:$0xf]  ;;  %v8798_v13 = vld [vmem:[#allocation3 + $0xa0] sm:$0xf0] }
 0x37d   :  { %v7815_v63 = vor.u32 %v8798_v13, %v7814_v51  ;;  %4287 = vmatpush.bf16.msra.mxu3 %v7715_v24  ;;  %v8761_v51 = vld [vmem:[#allocation5 + $0x38] sm:$0xf0]  ;;  %v3326_v13 = vpop.f32.mrf.mxu0  ;;  %v8755_v24 = vld [vmem:[#allocation5 + $0x8] sm:$0xf0] }
 0x380   :  { %4113 = vmatpush.bf16.msra.mxu2 %v7603_v25  ;;  %v7802_v25 = vld [vmem:[#allocation3 + $0x80] sm:$0xf] }
 0x381   :  { %v7803_v23 = vor.u32 %v8795_v42, %v7802_v25  ;;  %v8769_v25 = vld [vmem:[#allocation5 + $0x7c] sm:$0xf]  ;;  %v7692_v42 = vld [vmem:[#allocation5 + $0x84] sm:$0xf0] }
 0x384   :  { %4114 = vmatpush.bf16.msra.mxu2 %v7591_v1  ;;  %v7790_v1 = vld [vmem:[#allocation3 + $0x68] sm:$0xf] }
 0x388   :  { %4115 = vmatpush.bf16.msra.mxu2 %v7579_v54 }
 0x38b   :  { %7619 = vmatmul.msk.bf16.vlgmr.msrb.gmra.mxu2 %vm9352_vm3, %v9154_v37  ;;  %7621 = vmatmul.msk.bf16.vlgmr.msrb.gmra.mxu3 %vm9802_vm7, %v9154_v37  ;;  %vm4437_vm7 = vcmp.eq.s32.totalorder %v9246_v48, %v9361_v47  ;;  %v7778_v47 = vld [vmem:[#allocation3 + $0x50] sm:$0xf] }
 0x38c   :  { %7623 = vmatmul.msk.bf16.vlgmr.msra.gmra.mxu0 %vm9352_vm3, %v9154_v37  ;;  %4116 = vmatpush.bf16.msra.mxu2 %v7567_v30  ;;  %v7779_v54 = vor.u32 %v8789_v32, %v7778_v47  ;;  %v7767_v30 = vor.u32 %v8786_v33, %v7766_v28  ;;  %v7642_v47 = vld [vmem:[#allocation5 + $0x18] sm:$0xf]  ;;  %v8758_v32 = vld [vmem:[#allocation5 + $0x20] sm:$0xf0]  ;;  %v9947_v28 = vpop.f32.mrf.mxu3 }
 0x38d   :  { %v7643_v33 = vor.u32 %v8758_v32, %v7642_v47  ;;  %v7644_v47 = vld [vmem:[#allocation5 + $0x24] sm:$0xf0]  ;;  %v7650_v32 = vld [vmem:[#allocation5 + $0x20] sm:$0xf] }
 0x390   :  { %4117 = vmatpush.bf16.msra.mxu2 %v7555_v22  ;;  %v7755_v22 = vor.u32 %v8783_v19, %v7754_v21  ;;  %v7680_v21 = vld [vmem:[#allocation5 + $0x6c] sm:$0xf0]  ;;  %v7686_v19 = vld [vmem:[#allocation5 + $0x68] sm:$0xf] }
 0x394   :  { %4118 = vmatpush.bf16.msra.mxu2 %v7543_v49  ;;  %v7743_v49 = vor.u32 %v8780_v5, %v7742_v2  ;;  %v8768_v5 = vld [vmem:[#allocation5 + $0x70] sm:$0xf0] }
 0x395   :  { %v7687_v35 = vor.u32 %v8768_v5, %v7686_v19 }
 0x398   :  { %4119 = vmatpush.bf16.msra.mxu2 %v7531_v18  ;;  %v8773_v18 = vld [vmem:[#allocation5 + $0x98] sm:$0xf0] }
 0x39b   :  { %7627 = vmatmul.msk.bf16.vlgmr.msra.gmra.mxu2 %vm9352_vm3, %v9154_v37  ;;  %vm4439_vm3 = vcmp.eq.s32.totalorder %v9246_v48, %v9359_v46  ;;  %v8792_v46 = vld [vmem:[#allocation3 + $0x70] sm:$0xf0] }
 0x39c   :  { %4767 = vmatpush.bf16.msrb.mxu2 %v7819_v12  ;;  %vm9935_vm4 = vmpackc.low %vm4439_vm3, %vm4437_vm7  ;;  %v7791_v8 = vor.u32 %v8792_v46, %v7790_v1  ;;  %v7703_v12 = vor.u32 %v8773_v18, %v7702_v14  ;;  %v7695_v1 = vor.u32 %v8769_v25, %v7692_v42  ;;  %v8771_v46 = vld [vmem:[#allocation5 + $0x88] sm:$0xf0]  ;;  %v7631_v14 = vor.u32 %v8755_v24, %v7630_v58  ;;  %v7914_v18 = vld [vmem:[#allocation3 + $0x168] sm:$0xf] }
 0x39d   :  { %v7890_v42 = vld [vmem:[#allocation3 + $0x138] sm:$0xf] }
 0x39e   :  { %4288 = vmatpush.bf16.msra.mxu3 %v7703_v12  ;;  %v8824_v12 = vld [vmem:[#allocation3 + $0x170] sm:$0xf0] }
 0x3a0   :  { %4768 = vmatpush.bf16.msrb.mxu2 %v7807_v10  ;;  %v7691_v10 = vor.u32 %v8770_v53, %v7690_v26  ;;  %v3327_v26 = vadd.f32 %v3326_v13, %v9421_v15  ;;  %v7915_v53 = vor.u32 %v8824_v12, %v7914_v18  ;;  %v8754_v18 = vld [vmem:[#allocation5 + $0x4] sm:$0xf]  ;;  %v7632_v12 = vld [vmem:[#allocation5 + $0xc] sm:$0xf0] }
 0x3a2   :  { %4289 = vmatpush.bf16.msra.mxu3 %v7691_v10  ;;  %v8763_v10 = vld [vmem:[#allocation5 + $0x4c] sm:$0xf] }
 0x3a4   :  { %4769 = vmatpush.bf16.msrb.mxu2 %v7795_v62  ;;  %v7679_v62 = vor.u32 %v8767_v4, %v7678_v45  ;;  %v7668_v45 = vld [vmem:[#allocation5 + $0x54] sm:$0xf0]  ;;  %v7674_v4 = vld [vmem:[#allocation5 + $0x50] sm:$0xf] }
 0x3a6   :  { %4290 = vmatpush.bf16.msra.mxu3 %v7679_v62  ;;  %v3328_v62 = vpop.f32.mrf.mxu0 }
 0x3a8   :  { %4770 = vmatpush.bf16.msrb.mxu2 %v7783_v3  ;;  %v7722_v3 = vld [vmem:[#allocation5 + $0xb0] sm:$0xf] }
 0x3a9   :  { %v7723_v60 = vor.u32 %v8777_v17, %v7722_v3 }
 0x3ab   :  { %4315 = vmatpush.bf16.msrb.mxu1 %v7723_v60 }
 0x3ac   :  { %4771 = vmatpush.bf16.msrb.mxu2 %v7771_v36  ;;  %v7719_v36 = vor.u32 %v8775_v39, %v7716_v50  ;;  %v7671_v39 = vor.u32 %v8763_v10, %v7668_v45  ;;  %v8765_v50 = vld [vmem:[#allocation5 + $0x58] sm:$0xf0]  ;;  %v8756_v10 = vld [vmem:[#allocation5 + $0x10] sm:$0xf0]  ;;  %v8799_v45 = vld [vmem:[#allocation3 + $0xac] sm:$0xf] }
 0x3ae   :  { %4301 = vmatpush.bf16.msrb.mxu0 %v7719_v36  ;;  %v7675_v36 = vor.u32 %v8765_v50, %v7674_v4  ;;  %v7820_v4 = vld [vmem:[#allocation3 + $0xb4] sm:$0xf0] }
 0x3af   :  { %v7823_v50 = vor.u32 %v8799_v45, %v7820_v4 }
 0x3b0   :  { %4772 = vmatpush.bf16.msrb.mxu2 %v7759_v7  ;;  %v7666_v7 = vld [vmem:[#allocation5 + $0x48] sm:$0xf] }
 0x3b1   :  { %v7667_v61 = vor.u32 %v8764_v6, %v7666_v7  ;;  %v7902_v7 = vld [vmem:[#allocation3 + $0x150] sm:$0xf]  ;;  %v8821_v6 = vld [vmem:[#allocation3 + $0x158] sm:$0xf0] }
 0x3b3   :  { %4291 = vmatpush.bf16.msra.mxu3 %v7667_v61 }
 0x3b4   :  { %4773 = vmatpush.bf16.msrb.mxu2 %v7747_v9  ;;  %v8772_v9 = vld [vmem:[#allocation5 + $0x94] sm:$0xf] }
 0x3b5   :  { %v7707_v0 = vor.u32 %v8772_v9, %v7704_v44  ;;  %v7903_v44 = vor.u32 %v8821_v6, %v7902_v7 }
 0x3b7   :  { %4302 = vmatpush.bf16.msrb.mxu0 %v7707_v0  ;;  %v7656_v0 = vld [vmem:[#allocation5 + $0x3c] sm:$0xf0] }
 0x3b8   :  { %4774 = vmatpush.bf16.msrb.mxu2 %v7735_v40  ;;  %v7711_v40 = vor.u32 %v8774_v11, %v7710_v43  ;;  %v8760_v43 = vld [vmem:[#allocation5 + $0x34] sm:$0xf]  ;;  %v7662_v11 = vld [vmem:[#allocation5 + $0x38] sm:$0xf] }
 0x3ba   :  { %4316 = vmatpush.bf16.msrb.mxu1 %v7711_v40  ;;  %v7659_v40 = vor.u32 %v8760_v43, %v7656_v0  ;;  %v7808_v43 = vld [vmem:[#allocation3 + $0x9c] sm:$0xf0]  ;;  %v8820_v0 = vld [vmem:[#allocation3 + $0x154] sm:$0xf] }
 0x3bb   :  { %7925 = vmatmul.msk.bf16.vlgmr.msrb.gmra.mxu2 %vm9935_vm4, %v9154_v37  ;;  %4303 = vmatpush.bf16.msrb.mxu0 %v7695_v1  ;;  %v3329_v1 = vadd.f32 %v3328_v62, %v9421_v15 }
 0x3bc   :  { %4823 = vmatpush.bf16.msra.mxu2 %v7827_v29  ;;  %v7654_v29 = vld [vmem:[#allocation5 + $0x30] sm:$0xf] }
 0x3c0   :  { %4824 = vmatpush.bf16.msra.mxu2 %v7815_v63  ;;  %v7655_v63 = vor.u32 %v8761_v51, %v7654_v29  ;;  %v8762_v29 = vld [vmem:[#allocation5 + $0x40] sm:$0xf0] }
 0x3c2   :  { %4292 = vmatpush.bf16.msra.mxu3 %v7655_v63  ;;  %v7663_v63 = vor.u32 %v8762_v29, %v7662_v11  ;;  %v7904_v29 = vld [vmem:[#allocation3 + $0x15c] sm:$0xf0] }
 0x3c4   :  { %4825 = vmatpush.bf16.msra.mxu2 %v7803_v23  ;;  %v7698_v23 = vld [vmem:[#allocation5 + $0x80] sm:$0xf] }
 0x3c6   :  { %4293 = vmatpush.bf16.msra.mxu3 %v7643_v33  ;;  %v9954_v33 = vpop.f32.mrf.mxu0 }
 0x3c8   :  { %4826 = vmatpush.bf16.msra.mxu2 %v7791_v8  ;;  %v7699_v8 = vor.u32 %v8771_v46, %v7698_v23  ;;  %v8818_v23 = vld [vmem:[#allocation3 + $0x140] sm:$0xf0] }
 0x3c9   :  { %v7891_v46 = vor.u32 %v8818_v23, %v7890_v42  ;;  %v7796_v23 = vld [vmem:[#allocation3 + $0x84] sm:$0xf0] }
 0x3ca   :  { %4317 = vmatpush.bf16.msrb.mxu1 %v7699_v8  ;;  %4294 = vmatpush.bf16.msra.mxu3 %v7631_v14  ;;  %v8757_v8 = vld [vmem:[#allocation5 + $0x1c] sm:$0xf] }
 0x3cc   :  { %4827 = vmatpush.bf16.msra.mxu2 %v7779_v54  ;;  %v3356_v54 = vpop.f32.mrf.mxu2 }
 0x3cd   :  { %v3357_v51 = vadd.f32 %v3356_v54, %v9424_v20  ;;  %v7647_v54 = vor.u32 %v8757_v8, %v7644_v47  ;;  %v7842_v47 = vld [vmem:[#allocation3 + $0xd8] sm:$0xf] }
 0x3ce   :  { %4318 = vmatpush.bf16.msrb.mxu1 %v7687_v35  ;;  %4781 = vmatpush.bf16.msrb.mxu3 %v7915_v53  ;;  %v8815_v35 = vld [vmem:[#allocation3 + $0x128] sm:$0xf0]  ;;  %v7635_v53 = vor.u32 %v8754_v18, %v7632_v12  ;;  %v9963_v11 = vpop.f32.mrf.mxu0 }
 0x3cf   :  { %v3371_v19 = vadd.f32 %v9947_v28, %v3357_v51  ;;  %v7854_v51 = vld [vmem:[#allocation3 + $0xf0] sm:$0xf] }
 0x3d0   :  { %4828 = vmatpush.bf16.msra.mxu2 %v7767_v30  ;;  %v8766_v30 = vld [vmem:[#allocation5 + $0x64] sm:$0xf] }
 0x3d1   :  { %v7683_v2 = vor.u32 %v8766_v30, %v7680_v21  ;;  %v8759_v30 = vld [vmem:[#allocation5 + $0x28] sm:$0xf0] }
 0x3d2   :  { %4319 = vmatpush.bf16.msrb.mxu1 %v7675_v36  ;;  %4782 = vmatpush.bf16.msrb.mxu3 %v7903_v44  ;;  %v8796_v44 = vld [vmem:[#allocation3 + $0x94] sm:$0xf] }
 0x3d3   :  { %4304 = vmatpush.bf16.msrb.mxu0 %v7683_v2 }
 0x3d4   :  { %4829 = vmatpush.bf16.msra.mxu2 %v7755_v22  ;;  %v3340_v22 = vpop.f32.mrf.mxu1 }
 0x3d5   :  { %v3341_v3 = vadd.f32 %v3340_v22, %v3327_v26  ;;  %v7651_v22 = vor.u32 %v8759_v30, %v7650_v32  ;;  %v7638_v26 = vld [vmem:[#allocation5 + $0x8] sm:$0xf]  ;;  %v8806_v32 = vld [vmem:[#allocation3 + $0xe0] sm:$0xf0] }
 0x3d6   :  { %4320 = vmatpush.bf16.msrb.mxu1 %v7663_v63  ;;  %4783 = vmatpush.bf16.msrb.mxu3 %v7891_v46  ;;  %v7811_v63 = vor.u32 %v8796_v44, %v7808_v43  ;;  %v7892_v46 = vld [vmem:[#allocation3 + $0x144] sm:$0xf0]  ;;  %v7843_v18 = vor.u32 %v8806_v32, %v7842_v47  ;;  %v7772_v44 = vld [vmem:[#allocation3 + $0x54] sm:$0xf0]  ;;  %v8811_v43 = vld [vmem:[#allocation3 + $0x10c] sm:$0xf] }
 0x3d7   :  { %4305 = vmatpush.bf16.msrb.mxu0 %v7671_v39  ;;  %v7639_v39 = vor.u32 %v8756_v10, %v7638_v26  ;;  %v8803_v10 = vld [vmem:[#allocation3 + $0xc8] sm:$0xf0] }
 0x3d8   :  { %4830 = vmatpush.bf16.msra.mxu2 %v7743_v49  ;;  %v3355_v49 = vadd.f32 %v3354_v41, %v9424_v20 }
 0x3da   :  { %v3369_v41 = vadd.f32 %v9945_v34, %v3355_v49  ;;  %v7878_v49 = vld [vmem:[#allocation3 + $0x120] sm:$0xf]  ;;  %4321 = vmatpush.bf16.msrb.mxu1 %v7651_v22  ;;  %v8790_v22 = vld [vmem:[#allocation3 + $0x64] sm:$0xf] }
 0x3db   :  { %7933 = vmatmul.msk.bf16.vlgmr.msra.gmra.mxu2 %vm9935_vm4, %v9154_v37  ;;  %4306 = vmatpush.bf16.msrb.mxu0 %v7659_v40  ;;  %v7879_v14 = vor.u32 %v8815_v35, %v7878_v49  ;;  %v7784_v49 = vld [vmem:[#allocation3 + $0x6c] sm:$0xf0]  ;;  %v8814_v35 = vld [vmem:[#allocation3 + $0x124] sm:$0xf] }
 0x3dc   :  { %v3342_v25 = vpop.f32.mrf.mxu1 }
 0x3dd   :  { %v3343_v21 = vadd.f32 %v3342_v25, %v3329_v1  ;;  %4784 = vmatpush.bf16.msrb.mxu3 %v7879_v14  ;;  %v7907_v25 = vor.u32 %v8820_v0, %v7904_v29  ;;  %v8817_v1 = vld [vmem:[#allocation3 + $0x13c] sm:$0xf]  ;;  %v7868_v0 = vld [vmem:[#allocation3 + $0x114] sm:$0xf0] }
 0x3de   :  { %4322 = vmatpush.bf16.msrb.mxu1 %v7639_v39 }
 0x3df   :  { %4307 = vmatpush.bf16.msrb.mxu0 %v7647_v54 }
 0x3e3   :  { %4308 = vmatpush.bf16.msrb.mxu0 %v7635_v53  ;;  %v7830_v53 = vld [vmem:[#allocation3 + $0xc0] sm:$0xf] }
 0x3e7   :  { %4795 = vmatpush.bf16.msra.mxu0 %v7823_v50  ;;  %v3396_v50 = vpop.f32.mrf.mxu1 }
 0x3eb   :  { %4796 = vmatpush.bf16.msra.mxu0 %v7811_v63 }
 0x3f9   :  { %v3599_v45 = vpop.f32.mrf.mxu0 }
 0x3fe   :  { %v3571_v17 = vpop.f32.mrf.mxu2  ;;  %v3585_v60 = vpop.f32.mrf.mxu3 }
 0x3ff   :  { %v3604_v61 = vadd.f32 %v3571_v17, %v3341_v3  ;;  %v3644_v9 = vadd.f32 %v3585_v60, %v3369_v41  ;;  %v8823_v3 = vld [vmem:[#allocation3 + $0x16c] sm:$0xf]  ;;  %v7916_v60 = vld [vmem:[#allocation3 + $0x174] sm:$0xf0] }
 0x400   :  { %v7919_v6 = vor.u32 %v8823_v3, %v7916_v60 }
 0x401   :  { %v7416_v13 = vmul.f32 -1.442695, %v3604_v61  ;;  %v7418_v34 = vmul.f32 -1.442695, %v3644_v9  ;;  %v7866_v61 = vld [vmem:[#allocation3 + $0x108] sm:$0xf] }
 0x402   :  { %v8812_v9 = vld [vmem:[#allocation3 + $0x110] sm:$0xf0]  ;;  %4809 = vmatpush.bf16.msra.mxu1 %v7919_v6  ;;  %v7831_v6 = vor.u32 %v8803_v10, %v7830_v53  ;;  %v3385_v53 = vadd.f32 %v9963_v11, %v9459_v16 }
 0x403   :  { %9012 = vpow2.f32 %v7416_v13  ;;  %v7867_v40 = vor.u32 %v8812_v9, %v7866_v61  ;;  %v8809_v13 = vld [vmem:[#allocation3 + $0xf8] sm:$0xf0]  ;;  %v8787_v61 = vld [vmem:[#allocation3 + $0x4c] sm:$0xf] }
 0x404   :  { %9014 = vpow2.f32 %v7418_v34  ;;  %v8793_v34 = vld [vmem:[#allocation3 + $0x7c] sm:$0xf]  ;;  %v7855_v42 = vor.u32 %v8809_v13, %v7854_v51  ;;  %v3684_v51 = vadd.f32 %v9861_v55, %v3599_v45  ;;  %v7874_v45 = vld [vmem:[#allocation3 + $0x110] sm:$0xf] }
 0x405   :  { %4785 = vmatpush.bf16.msrb.mxu3 %v7867_v40 }
 0x406   :  { %v3573_v2 = vpop.f32.mrf.mxu2  ;;  %v3587_v5 = vpop.f32.mrf.mxu3  ;;  %4810 = vmatpush.bf16.msra.mxu1 %v7907_v25 }
 0x407   :  { %v3605_v58 = vadd.f32 %v3573_v2, %v3343_v21  ;;  %v3645_v24 = vadd.f32 %v3587_v5, %v3371_v19  ;;  %v7799_v21 = vor.u32 %v8793_v34, %v7796_v23  ;;  %v7895_v19 = vor.u32 %v8817_v1, %v7892_v46  ;;  %v8784_v1 = vld [vmem:[#allocation3 + $0x34] sm:$0xf]  ;;  %v7760_v46 = vld [vmem:[#allocation3 + $0x3c] sm:$0xf0] }
 0x409   :  { %v9013_v62 = vpop.eup %9012  ;;  %v7417_v28 = vmul.f32 -1.442695, %v3605_v58  ;;  %v7419_v17 = vmul.f32 -1.442695, %v3645_v24  ;;  %v7880_v58 = vld [vmem:[#allocation3 + $0x12c] sm:$0xf0]  ;;  %4786 = vmatpush.bf16.msrb.mxu3 %v7855_v42  ;;  %4797 = vmatpush.bf16.msra.mxu0 %v7799_v21 }
 0x40a   :  { %v9015_v41 = vpop.eup %9014  ;;  %v9957_v36 = vadd.f32 1.0, %v9013_v62  ;;  %4811 = vmatpush.bf16.msra.mxu1 %v7895_v19  ;;  %v7883_v39 = vor.u32 %v8814_v35, %v7880_v58  ;;  %v8808_v21 = vld [vmem:[#allocation3 + $0xf4] sm:$0xf]  ;;  %v7856_v19 = vld [vmem:[#allocation3 + $0xfc] sm:$0xf0]  ;;  %v7763_v35 = vor.u32 %v8784_v1, %v7760_v46 }
 0x40b   :  { %v9959_v7 = vadd.f32 1.0, %v9015_v41  ;;  %9016 = vpow2.f32 %v7417_v28  ;;  %v7787_v28 = vor.u32 %v8790_v22, %v7784_v49 }
 0x40c   :  { %9018 = vrcp.f32 %v9957_v36  ;;  %v3625_v4 = vand.u32 2147483648, %v9957_v36  ;;  %v3623_v41 = vand.u32 2147483647, %v9957_v36  ;;  %vm3619_vm15 = vweird.f32 %v9957_v36 }
 0x40d   :  { %9020 = vrcp.f32 %v9959_v7  ;;  %4787 = vmatpush.bf16.msrb.mxu3 %v7843_v18  ;;  %4798 = vmatpush.bf16.msra.mxu0 %v7787_v28  ;;  %v3663_v23 = vand.u32 2147483647, %v9959_v7  ;;  %vm3659_vm1 = vweird.f32 %v9959_v7  ;;  %v3665_v32 = vand.u32 2147483648, %v9959_v7  ;;  %v8781_v18 = vld [vmem:[#allocation3 + $0x1c] sm:$0xf] }
 0x40e   :  { %9022 = vpow2.f32 %v7419_v17  ;;  %v3383_v17 = vadd.f32 %v9954_v33, %v9459_v16  ;;  %v3626_v13 = vor.u32 1.1754944e-38, %v3625_v4  ;;  %4812 = vmatpush.bf16.msra.mxu1 %v7883_v39  ;;  %v7775_v33 = vor.u32 %v8787_v61, %v7772_v44  ;;  %v3601_v4 = vpop.f32.mrf.mxu0  ;;  %v8805_v28 = vld [vmem:[#allocation3 + $0xdc] sm:$0xf]  ;;  %v7844_v39 = vld [vmem:[#allocation3 + $0xe4] sm:$0xf0] }
 0x40f   :  { %vm3624_vm2 = vcmp.eq.f32.partialorder %v3623_v41, 8.507059e+37  ;;  %vm10012_vm10 = vcmp.eq.f32.partialorder %v3663_v23, 8.507059e+37  ;;  %v3398_v41 = vpop.f32.mrf.mxu1  ;;  %v3685_v61 = vadd.f32 %v9861_v55, %v3601_v4  ;;  %v8813_v4 = vld [vmem:[#allocation3 + $0x118] sm:$0xf0] }
 0x410   :  { %v3397_v29 = vadd.f32 %v3396_v50, %v3383_v17  ;;  %v3666_v50 = vor.u32 1.1754944e-38, %v3665_v32 }
 0x411   :  { %v9017_v8 = vpop.eup %9016  ;;  %4788 = vmatpush.bf16.msrb.mxu3 %v7831_v6  ;;  %4799 = vmatpush.bf16.msra.mxu0 %v7775_v33 }
 0x412   :  { %v9019_v54 = vpop.eup %9018  ;;  %v9965_v30 = vadd.f32 1.0, %v9017_v8 }
 0x413   :  { %v9967_v2 = vpop.eup %9020  ;;  %v3615_v5 = vmul.f32 %v9019_v54, %v9957_v36  ;;  %vm3620_vm13 = vweird.f32 %v9019_v54  ;;  %v7871_v36 = vor.u32 %v8811_v43, %v7868_v0  ;;  %v8778_v43 = vld [vmem:[#allocation3 + $0x4] sm:$0xf]  ;;  %v7736_v0 = vld [vmem:[#allocation3 + $0xc] sm:$0xf0] }
 0x414   :  { %v9023_v24 = vpop.eup %9022  ;;  %v3655_v14 = vmul.f32 %v9967_v2, %v9959_v7  ;;  %9024 = vrcp.f32 %v9965_v30  ;;  %vm3621_vm0 = vmor %vm3619_vm15, %vm3620_vm13  ;;  %vm3660_vm5 = vweird.f32 %v9967_v2  ;;  %v3638_v22 = vand.u32 2147483647, %v9965_v30 }
 0x415   :  { %v3616_v12 = vsub.f32 1.0, %v3615_v5  ;;  %v9973_v26 = vadd.f32 1.0, %v9023_v24  ;;  %v3640_v5 = vand.u32 2147483648, %v9965_v30  ;;  %4813 = vmatpush.bf16.msra.mxu1 %v7871_v36  ;;  %vm10001_vm12 = vmor %vm3659_vm1, %vm3660_vm5  ;;  %vm3634_vm11 = vweird.f32 %v9965_v30  ;;  %4800 = vmatpush.bf16.msra.mxu0 %v7763_v35  ;;  %v8822_v24 = vld [vmem:[#allocation3 + $0x160] sm:$0xf0] }
 0x416   :  { %v3656_v62 = vsub.f32 1.0, %v3655_v14  ;;  %v7859_v14 = vor.u32 %v8808_v21, %v7856_v19  ;;  %vm3639_vm3 = vcmp.eq.f32.partialorder %v3638_v22, 8.507059e+37  ;;  %v7922_v22 = vld [vmem:[#allocation3 + $0x170] sm:$0xf] }
 0x417   :  { %v3617_v3 = vmul.f32 %v9019_v54, %v3616_v12  ;;  %9026 = vrcp.f32 %v9973_v26  ;;  %v7748_v12 = vld [vmem:[#allocation3 + $0x24] sm:$0xf0]  ;;  %v3641_v11 = vor.u32 1.1754944e-38, %v3640_v5  ;;  %vm3674_vm13 = vweird.f32 %v9973_v26 }
 0x418   :  { %v3657_v60 = vmul.f32 %v9967_v2, %v3656_v62  ;;  %v7751_v17 = vor.u32 %v8781_v18, %v7748_v12  ;;  %v3680_v33 = vand.u32 2147483648, %v9973_v26  ;;  %v3678_v55 = vand.u32 2147483647, %v9973_v26  ;;  %v7886_v12 = vld [vmem:[#allocation3 + $0x128] sm:$0xf] }
 0x419   :  { %v3618_v9 = vadd.f32 %v9019_v54, %v3617_v3  ;;  %4814 = vmatpush.bf16.msra.mxu1 %v7859_v14  ;;  %v8819_v14 = vld [vmem:[#allocation3 + $0x148] sm:$0xf0] }
 0x41a   :  { %v9982_v40 = vpop.eup %9024  ;;  %v3658_v42 = vadd.f32 %v9967_v2, %v3657_v60  ;;  %v7847_v60 = vor.u32 %v8805_v28, %v7844_v39  ;;  %4801 = vmatpush.bf16.msra.mxu0 %v7751_v17  ;;  %v7862_v28 = vld [vmem:[#allocation3 + $0xf8] sm:$0xf]  ;;  %v8810_v39 = vld [vmem:[#allocation3 + $0x100] sm:$0xf0]  ;;  %v8804_v17 = vld [vmem:[#allocation3 + $0xd0] sm:$0xf0] }
 0x41b   :  { %v3622_v34 = vsel %vm3621_vm0, %v9019_v54, %v3618_v9  ;;  %v3630_v63 = vmul.f32 %v9982_v40, %v9965_v30  ;;  %vm3635_vm8 = vweird.f32 %v9982_v40  ;;  %vm3679_vm0 = vcmp.eq.f32.partialorder %v3678_v55, 8.507059e+37 }
 0x41c   :  { %v3627_v25 = vsel %vm3624_vm2, %v3626_v13, %v3622_v34  ;;  %v3662_v10 = vsel %vm10001_vm12, %v9967_v2, %v3658_v42  ;;  %vm3636_vm14 = vmor %vm3634_vm11, %vm3635_vm8  ;;  %v7832_v34 = vld [vmem:[#allocation3 + $0xcc] sm:$0xf0] }
 0x41d   :  { %v9991_v8 = vpop.eup %9026  ;;  %v3686_v47 = vmul.f32 %v3684_v51, %v3627_v25  ;;  %v3631_v54 = vsub.f32 1.0, %v3630_v63  ;;  %v3667_v6 = vsel %vm10012_vm10, %v3666_v50, %v3662_v10  ;;  %v3399_v51 = vadd.f32 %v3398_v41, %v3385_v53  ;;  %4815 = vmatpush.bf16.msra.mxu1 %v7847_v60  ;;  %v8816_v53 = vld [vmem:[#allocation3 + $0x130] sm:$0xf0]  ;;  %v8807_v41 = vld [vmem:[#allocation3 + $0xe8] sm:$0xf0] }
 0x41e   :  { %v3670_v49 = vmul.f32 %v9991_v8, %v9973_v26  ;;  %vm3675_vm7 = vweird.f32 %v9991_v8  ;;  %v3692_v63 = vsub.f32 1.0, %v3667_v6  ;;  %v3696_v46 = vmul.f32 %v3667_v6, %v9904_v52  ;;  %v8825_v52 = vld [vmem:[#allocation3 + $0x178] sm:$0xf0]  ;;  %v8126_v60 = vld [vmem:[#allocation3 + $0xa8] sm:$0xf] }
 0x41f   :  { %v3688_v58 = vadd.f32 %v3686_v47, %v3397_v29  ;;  %v3632_v7 = vmul.f32 %v9982_v40, %v3631_v54  ;;  %v8802_v29 = vld [vmem:[#allocation3 + $0xc4] sm:$0xf]  ;;  %vm3676_vm15 = vmor %vm3674_vm13, %vm3675_vm7  ;;  %v3681_v47 = vor.u32 1.1754944e-38, %v3680_v33  ;;  %v7887_v10 = vor.u32 %v8816_v53, %v7886_v12  ;;  %v8872_v6 = vld [vmem:[#allocation3 + $0xb0] sm:$0xf0] }
 0x420   :  { %v3671_v62 = vsub.f32 1.0, %v3670_v49  ;;  %v7835_v36 = vor.u32 %v8802_v29, %v7832_v34  ;;  %v7923_v49 = vor.u32 %v8825_v52, %v7922_v22  ;;  %v7863_v50 = vor.u32 %v8810_v39, %v7862_v28  ;;  %v8078_v34 = vld [vmem:[#allocation3 + $0x48] sm:$0xf]  ;;  %v8062_v53 = vld [vmem:[#allocation3 + $0x20] sm:$0xf] }
 0x421   :  { %9028 = vtanh.f32 %v3688_v58  ;;  %v3633_v3 = vadd.f32 %v9982_v40, %v3632_v7  ;;  %v7910_v58 = vld [vmem:[#allocation3 + $0x158] sm:$0xf]  ;;  %v7898_v7 = vld [vmem:[#allocation3 + $0x140] sm:$0xf]  ;;  %v8022_v39 = vld [vmem:[#allocation5 + $0xa8] sm:$0xf] }
 0x422   :  { %v3672_v2 = vmul.f32 %v9991_v8, %v3671_v62  ;;  %4816 = vmatpush.bf16.msra.mxu1 %v7835_v36  ;;  %v7899_v18 = vor.u32 %v8819_v14, %v7898_v7  ;;  %v7875_v62 = vor.u32 %v8813_v4, %v7874_v45  ;;  %v8857_v36 = vld [vmem:[#allocation3 + $0x38] sm:$0xf0]  ;;  %v8074_v14 = vld [vmem:[#allocation3 + $0x38] sm:$0xf]  ;;  %v8050_v4 = vld [vmem:[#allocation3 + $0x8] sm:$0xf] }
 0x423   :  { %v3637_v9 = vsel %vm3636_vm14, %v9982_v40, %v3633_v3  ;;  %v7739_v40 = vor.u32 %v8778_v43, %v7736_v0  ;;  %v7850_v3 = vld [vmem:[#allocation3 + $0xe0] sm:$0xf]  ;;  %v8102_v43 = vld [vmem:[#allocation3 + $0x78] sm:$0xf]  ;;  %v8866_v0 = vld [vmem:[#allocation3 + $0x80] sm:$0xf0] }
 0x424   :  { %v3642_v30 = vsel %vm3639_vm3, %v3641_v11, %v3637_v9  ;;  %v3673_v44 = vadd.f32 %v9991_v8, %v3672_v2  ;;  %v7851_v11 = vor.u32 %v8807_v41, %v7850_v3  ;;  %v7838_v2 = vld [vmem:[#allocation3 + $0xc8] sm:$0xf]  ;;  %v8127_v9 = vor.u32 %v8872_v6, %v8126_v60  ;;  %v8010_v41 = vld [vmem:[#allocation5 + $0x90] sm:$0xf]  ;;  %v7998_v60 = vld [vmem:[#allocation5 + $0x78] sm:$0xf] }
 0x425   :  { %v3687_v13 = vmul.f32 %v3685_v61, %v3642_v30  ;;  %4802 = vmatpush.bf16.msra.mxu0 %v7739_v40  ;;  %v7839_v61 = vor.u32 %v8804_v17, %v7838_v2  ;;  %v8114_v30 = vld [vmem:[#allocation3 + $0x90] sm:$0xf]  ;;  %v8103_v29 = vor.u32 %v8866_v0, %v8102_v43  ;;  %v4093_v17 = vpop.f32.mrf.mxu0  ;;  %v8842_v6 = vld [vmem:[#allocation5 + $0x80] sm:$0xf0]  ;;  %v8024_v43 = vld [vmem:[#allocation5 + $0xb4] sm:$0xf0] }
 0x426   :  { %v3677_v23 = vsel %vm3676_vm15, %v9991_v8, %v3673_v44  ;;  %v8115_v44 = vor.u32 %v8869_v27, %v8114_v30  ;;  %v8066_v40 = vld [vmem:[#allocation3 + $0x30] sm:$0xf]  ;;  %v8839_v30 = vld [vmem:[#allocation5 + $0x68] sm:$0xf0] }
 0x427   :  { %v9029_v25 = vpop.eup %9028  ;;  %v3689_v42 = vadd.f32 %v3687_v13, %v3399_v51  ;;  %v3682_v26 = vsel %vm3679_vm0, %v3681_v47, %v3677_v23  ;;  %v8090_v51 = vld [vmem:[#allocation3 + $0x60] sm:$0xf]  ;;  %v8863_v13 = vld [vmem:[#allocation3 + $0x68] sm:$0xf0]  ;;  %v8854_v23 = vld [vmem:[#allocation3 + $0x20] sm:$0xf0] }
 0x428   :  { %v3694_v1 = vmul.f32 %v9029_v25, %v3692_v63  ;;  %v3693_v54 = vsub.f32 1.0, %v3682_v26  ;;  %v3697_v8 = vmul.f32 %v3682_v26, %v9911_v56  ;;  %v7911_v56 = vor.u32 %v8822_v24, %v7910_v58  ;;  %v8860_v63 = vld [vmem:[#allocation3 + $0x50] sm:$0xf0]  ;;  %v8134_v47 = vld [vmem:[#allocation3 + $0xb0] sm:$0xf] }
 0x429   :  { %9030 = vtanh.f32 %v3689_v42  ;;  %v8091_v33 = vor.u32 %v8863_v13, %v8090_v51  ;;  %v8079_v55 = vor.u32 %v8860_v63, %v8078_v34  ;;  %v8067_v25 = vor.u32 %v8857_v36, %v8066_v40  ;;  %v8054_v42 = vld [vmem:[#allocation3 + $0x18] sm:$0xf]  ;;  %v8873_v26 = vld [vmem:[#allocation3 + $0xb8] sm:$0xf0]  ;;  %v8098_v24 = vld [vmem:[#allocation3 + $0x68] sm:$0xf] }
 0x42a   :  { %v10034_v32 = vadd.f32 %v3696_v46, %v3694_v1  ;;  %v8055_v1 = vor.u32 %v8854_v23, %v8054_v42  ;;  %v8851_v46 = vld [vmem:[#allocation3 + $0x8] sm:$0xf0]  ;;  %v8030_v0 = vld [vmem:[#allocation5 + $0xb0] sm:$0xf]  ;;  %v8849_v13 = vld [vmem:[#allocation5 + $0xb8] sm:$0xf0] }
 0x42b   :  { %v7974_v34 = vld [vmem:[#allocation5 + $0x48] sm:$0xf]  ;;  %v8836_v63 = vld [vmem:[#allocation5 + $0x50] sm:$0xf0]  ;;  %v8012_v36 = vld [vmem:[#allocation5 + $0x9c] sm:$0xf0] }
 0x42c   :  { %7420 = vst [vmem:[%s10287_s6 + $0x40] sm:$0xff] %v10034_v32  ;;  %v8844_v40 = vld [vmem:[#allocation5 + $0x94] sm:$0xf] }
 0x42d   :  { %v4095_v42 = vpop.f32.mrf.mxu0  ;;  %v8015_v23 = vor.u32 %v8844_v40, %v8012_v36  ;;  %v8834_v36 = vld [vmem:[#allocation5 + $0x40] sm:$0xf0] }
 0x42f   :  { %v9031_v21 = vpop.eup %9030 }
 0x430   :  { %v3695_v19 = vmul.f32 %v9031_v21, %v3693_v54  ;;  %v8043_v54 = vor.u32 %v8851_v46, %v8042_v38  ;;  %v8135_v21 = vor.u32 %v8873_v26, %v8134_v47  ;;  %v4051_v38 = vpop.f32.mrf.mxu1  ;;  %v7962_v47 = vld [vmem:[#allocation5 + $0x30] sm:$0xf]  ;;  %v8833_v26 = vld [vmem:[#allocation5 + $0x38] sm:$0xf0] }
 0x432   :  { %v10041_v5 = vadd.f32 %v3697_v8, %v3695_v19  ;;  %v8122_v19 = vld [vmem:[#allocation3 + $0x98] sm:$0xf]  ;;  %v8870_v8 = vld [vmem:[#allocation3 + $0xa0] sm:$0xf0] }
 0x433   :  { %v8123_v22 = vor.u32 %v8870_v8, %v8122_v19  ;;  %v8841_v19 = vld [vmem:[#allocation5 + $0x7c] sm:$0xf]  ;;  %v8000_v8 = vld [vmem:[#allocation5 + $0x84] sm:$0xf0] }
 0x434   :  { %7421 = vst [vmem:[%s10287_s6 + $0x48] sm:$0xff] %v10041_v5  ;;  %v4126_v35 = vpack.c.bf16 %v10041_v5, %v10034_v32 }
 0x436   :  { %4295 = vmatmul.bf16.vlgmr.msra.gmra.mxu3 %v4126_v35  ;;  %4309 = vmatmul.bf16.vlgmr.msrb.gmra.mxu0 %v4126_v35 }
 0x437   :  { %4323 = vmatmul.bf16.vlgmr.msrb.gmra.mxu1 %v4126_v35  ;;  %4837 = vmatpush.bf16.msra.mxu3 %v7923_v49  ;;  %v8110_v49 = vld [vmem:[#allocation3 + $0x80] sm:$0xf]  ;;  %v8867_v35 = vld [vmem:[#allocation3 + $0x88] sm:$0xf0] }
 0x438   :  { %v8111_v58 = vor.u32 %v8867_v35, %v8110_v49  ;;  %v8003_v49 = vor.u32 %v8841_v19, %v8000_v8  ;;  %v8843_v35 = vld [vmem:[#allocation5 + $0x88] sm:$0xf0]  ;;  %v8829_v8 = vld [vmem:[#allocation5 + $0x1c] sm:$0xf] }
 0x43b   :  { %4838 = vmatpush.bf16.msra.mxu3 %v7911_v56 }
 0x43f   :  { %4839 = vmatpush.bf16.msra.mxu3 %v7899_v18  ;;  %v8858_v18 = vld [vmem:[#allocation3 + $0x40] sm:$0xf0] }
 0x440   :  { %v8075_v12 = vor.u32 %v8858_v18, %v8074_v14  ;;  %v7988_v14 = vld [vmem:[#allocation5 + $0x6c] sm:$0xf0]  ;;  %v7994_v18 = vld [vmem:[#allocation5 + $0x68] sm:$0xf] }
 0x443   :  { %4840 = vmatpush.bf16.msra.mxu3 %v7887_v10  ;;  %v8855_v10 = vld [vmem:[#allocation3 + $0x28] sm:$0xf0] }
 0x444   :  { %v8063_v45 = vor.u32 %v8855_v10, %v8062_v53 }
 0x446   :  { %7927 = vmatmul.msk.bf16.vlgmr.msrb.gmra.mxu3 %vm9367_vm6, %v9154_v37  ;;  %7929 = vmatmul.msk.bf16.vlgmr.msra.gmra.mxu0 %vm9935_vm4, %v9154_v37  ;;  %vm5164_vm4 = vcmp.eq.s32.totalorder %v9246_v48, %v9371_v57  ;;  %v8861_v57 = vld [vmem:[#allocation3 + $0x58] sm:$0xf0] }
 0x447   :  { %7931 = vmatmul.msk.bf16.vlgmr.msra.gmra.mxu1 %vm9367_vm6, %v9154_v37  ;;  %4841 = vmatpush.bf16.msra.mxu3 %v7875_v62  ;;  %v8852_v62 = vld [vmem:[#allocation3 + $0x10] sm:$0xf0] }
 0x448   :  { %v8051_v28 = vor.u32 %v8852_v62, %v8050_v4 }
 0x44b   :  { %4842 = vmatpush.bf16.msra.mxu3 %v7863_v50  ;;  %v8848_v50 = vld [vmem:[#allocation5 + $0xb0] sm:$0xf0] }
 0x44c   :  { %v8023_v3 = vor.u32 %v8848_v50, %v8022_v39  ;;  %v8827_v39 = vld [vmem:[#allocation5 + $0x8] sm:$0xf0]  ;;  %v4052_v50 = vadd.f32 %v4051_v38, %v9421_v15 }
 0x44e   :  { %5012 = vmatpush.bf16.msrb.mxu0 %v8023_v3  ;;  %v4053_v3 = vpop.f32.mrf.mxu1 }
 0x44f   :  { %4843 = vmatpush.bf16.msra.mxu3 %v7851_v11  ;;  %v8845_v11 = vld [vmem:[#allocation5 + $0x98] sm:$0xf0] }
 0x450   :  { %v8011_v2 = vor.u32 %v8845_v11, %v8010_v41 }
 0x452   :  { %5013 = vmatpush.bf16.msrb.mxu0 %v8011_v2 }
 0x453   :  { %4844 = vmatpush.bf16.msra.mxu3 %v7839_v61  ;;  %v7999_v61 = vor.u32 %v8842_v6, %v7998_v60  ;;  %v7976_v60 = vld [vmem:[#allocation5 + $0x54] sm:$0xf0] }
 0x456   :  { %7935 = vmatmul.msk.bf16.vlgmr.msra.gmra.mxu3 %vm9367_vm6, %v9154_v37  ;;  %vm5162_vm6 = vcmp.eq.s32.totalorder %v9246_v48, %v9278_v31  ;;  %v8864_v31 = vld [vmem:[#allocation3 + $0x70] sm:$0xf0]  ;;  %v8086_v48 = vld [vmem:[#allocation3 + $0x50] sm:$0xf]  ;;  %5014 = vmatpush.bf16.msrb.mxu0 %v7999_v61 }
 0x457   :  { %5492 = vmatpush.bf16.msrb.mxu3 %v8127_v9  ;;  %vm10065_vm2 = vmpackc.low %vm5164_vm4, %vm5162_vm6  ;;  %v8099_v56 = vor.u32 %v8864_v31, %v8098_v24  ;;  %v8087_v7 = vor.u32 %v8861_v57, %v8086_v48  ;;  %v7986_v9 = vld [vmem:[#allocation5 + $0x60] sm:$0xf]  ;;  %v7950_v31 = vld [vmem:[#allocation5 + $0x18] sm:$0xf] }
 0x458   :  { %v7987_v27 = vor.u32 %v8839_v30, %v7986_v9  ;;  %v7982_v61 = vld [vmem:[#allocation5 + $0x50] sm:$0xf]  ;;  %v8837_v9 = vld [vmem:[#allocation5 + $0x58] sm:$0xf0]  ;;  %v8222_v30 = vld [vmem:[#allocation3 + $0x168] sm:$0xf] }
 0x45a   :  { %5015 = vmatpush.bf16.msrb.mxu0 %v7987_v27 }
 0x45b   :  { %5493 = vmatpush.bf16.msrb.mxu3 %v8115_v44  ;;  %v8847_v44 = vld [vmem:[#allocation5 + $0xac] sm:$0xf] }
 0x45c   :  { %v8027_v51 = vor.u32 %v8847_v44, %v8024_v43  ;;  %v7983_v44 = vor.u32 %v8837_v9, %v7982_v61  ;;  %v8896_v43 = vld [vmem:[#allocation3 + $0x170] sm:$0xf0]  ;;  %v8224_v9 = vld [vmem:[#allocation3 + $0x174] sm:$0xf0] }
 0x45e   :  { %5026 = vmatpush.bf16.msrb.mxu1 %v8027_v51 }
 0x45f   :  { %5494 = vmatpush.bf16.msrb.mxu3 %v8103_v29  ;;  %v4079_v29 = vpop.f32.mrf.mxu3 }
 0x462   :  { %5027 = vmatpush.bf16.msrb.mxu1 %v8015_v23  ;;  %v8893_v23 = vld [vmem:[#allocation3 + $0x158] sm:$0xf0] }
 0x463   :  { %5495 = vmatpush.bf16.msrb.mxu3 %v8091_v33  ;;  %v8031_v33 = vor.u32 %v8849_v13, %v8030_v0 }
 0x465   :  { %5040 = vmatpush.bf16.msrb.mxu2 %v8031_v33  ;;  %v8832_v33 = vld [vmem:[#allocation5 + $0x34] sm:$0xf] }
 0x466   :  { %5028 = vmatpush.bf16.msrb.mxu1 %v8003_v49 }
 0x467   :  { %5496 = vmatpush.bf16.msrb.mxu3 %v8079_v55  ;;  %v7975_v55 = vor.u32 %v8836_v63, %v7974_v34  ;;  %v4081_v24 = vpop.f32.mrf.mxu3  ;;  %v7964_v34 = vld [vmem:[#allocation5 + $0x3c] sm:$0xf0]  ;;  %v7970_v63 = vld [vmem:[#allocation5 + $0x38] sm:$0xf] }
 0x468   :  { %v4082_v41 = vadd.f32 %v4081_v24, %v9424_v20  ;;  %v7967_v40 = vor.u32 %v8832_v33, %v7964_v34  ;;  %v8831_v24 = vld [vmem:[#allocation5 + $0x28] sm:$0xf0]  ;;  %v8892_v33 = vld [vmem:[#allocation3 + $0x154] sm:$0xf] }
 0x469   :  { %5016 = vmatpush.bf16.msrb.mxu0 %v7975_v55 }
 0x46a   :  { %v4096_v13 = vadd.f32 %v4095_v42, %v4082_v41  ;;  %v10079_v42 = vpop.f32.mrf.mxu1  ;;  %v8871_v41 = vld [vmem:[#allocation3 + $0xac] sm:$0xf] }
 0x46b   :  { %5497 = vmatpush.bf16.msrb.mxu3 %v8067_v25  ;;  %v8018_v25 = vld [vmem:[#allocation5 + $0x98] sm:$0xf] }
 0x46f   :  { %5498 = vmatpush.bf16.msrb.mxu3 %v8055_v1  ;;  %v8846_v1 = vld [vmem:[#allocation5 + $0xa0] sm:$0xf0] }
 0x470   :  { %v8019_v46 = vor.u32 %v8846_v1, %v8018_v25  ;;  %v8210_v25 = vld [vmem:[#allocation3 + $0x150] sm:$0xf] }
 0x472   :  { %5041 = vmatpush.bf16.msrb.mxu2 %v8019_v46  ;;  %v7971_v46 = vor.u32 %v8834_v36, %v7970_v63  ;;  %v8881_v36 = vld [vmem:[#allocation3 + $0xf8] sm:$0xf0] }
 0x473   :  { %5499 = vmatpush.bf16.msrb.mxu3 %v8043_v54  ;;  %v4080_v54 = vadd.f32 %v4079_v29, %v9424_v20  ;;  %v8223_v29 = vor.u32 %v8896_v43, %v8222_v30  ;;  %v8174_v30 = vld [vmem:[#allocation3 + $0x108] sm:$0xf] }
 0x475   :  { %v4094_v48 = vadd.f32 %v4093_v17, %v4080_v54  ;;  %v8835_v17 = vld [vmem:[#allocation5 + $0x4c] sm:$0xf] }
 0x476   :  { %8233 = vmatmul.msk.bf16.vlgmr.msrb.gmra.mxu3 %vm10065_vm2, %v9154_v37  ;;  %v7979_v6 = vor.u32 %v8835_v17, %v7976_v60  ;;  %v8128_v17 = vld [vmem:[#allocation3 + $0xb4] sm:$0xf0]  ;;  %v8895_v60 = vld [vmem:[#allocation3 + $0x16c] sm:$0xf] }
 0x477   :  { %5548 = vmatpush.bf16.msra.mxu3 %v8135_v21  ;;  %v7963_v21 = vor.u32 %v8833_v26, %v7962_v47  ;;  %v8211_v47 = vor.u32 %v8893_v23, %v8210_v25  ;;  %v8131_v61 = vor.u32 %v8871_v41, %v8128_v17 }
 0x479   :  { %5017 = vmatpush.bf16.msrb.mxu0 %v7963_v21  ;;  %v4054_v21 = vadd.f32 %v4053_v3, %v9421_v15  ;;  %v8887_v3 = vld [vmem:[#allocation3 + $0x128] sm:$0xf0] }
 0x47b   :  { %5549 = vmatpush.bf16.msra.mxu3 %v8123_v22  ;;  %v8006_v22 = vld [vmem:[#allocation5 + $0x80] sm:$0xf] }
 0x47f   :  { %5550 = vmatpush.bf16.msra.mxu3 %v8111_v58  ;;  %v8007_v58 = vor.u32 %v8843_v35, %v8006_v22  ;;  %v7952_v22 = vld [vmem:[#allocation5 + $0x24] sm:$0xf0] }
 0x480   :  { %v7955_v35 = vor.u32 %v8829_v8, %v7952_v22  ;;  %v8150_v22 = vld [vmem:[#allocation3 + $0xd8] sm:$0xf] }
 0x481   :  { %5042 = vmatpush.bf16.msrb.mxu2 %v8007_v58  ;;  %v7958_v58 = vld [vmem:[#allocation5 + $0x20] sm:$0xf] }
 0x483   :  { %5551 = vmatpush.bf16.msra.mxu3 %v8099_v56  ;;  %v8830_v56 = vld [vmem:[#allocation5 + $0x20] sm:$0xf0] }
 0x484   :  { %v7951_v57 = vor.u32 %v8830_v56, %v7950_v31  ;;  %v7959_v56 = vor.u32 %v8831_v24, %v7958_v58 }
 0x486   :  { %5018 = vmatpush.bf16.msrb.mxu0 %v7951_v57  ;;  %v8890_v57 = vld [vmem:[#allocation3 + $0x140] sm:$0xf0] }
 0x487   :  { %5552 = vmatpush.bf16.msra.mxu3 %v8087_v7  ;;  %v8838_v7 = vld [vmem:[#allocation5 + $0x64] sm:$0xf] }
 0x488   :  { %v7991_v10 = vor.u32 %v8838_v7, %v7988_v14 }
 0x48a   :  { %5029 = vmatpush.bf16.msrb.mxu1 %v7991_v10  ;;  %v7946_v10 = vld [vmem:[#allocation5 + $0x8] sm:$0xf] }
 0x48b   :  { %5553 = vmatpush.bf16.msra.mxu3 %v8075_v12  ;;  %v4065_v12 = vpop.f32.mrf.mxu2 }
 0x48c   :  { %v4066_v27 = vadd.f32 %v4065_v12, %v4052_v50  ;;  %v8826_v12 = vld [vmem:[#allocation5 + $0x4] sm:$0xf] }
 0x48e   :  { %5030 = vmatpush.bf16.msrb.mxu1 %v7979_v6 }
 0x48f   :  { %5554 = vmatpush.bf16.msra.mxu3 %v8063_v45  ;;  %v8840_v45 = vld [vmem:[#allocation5 + $0x70] sm:$0xf0] }
 0x490   :  { %v7995_v62 = vor.u32 %v8840_v45, %v7994_v18 }
 0x492   :  { %5043 = vmatpush.bf16.msrb.mxu2 %v7995_v62  ;;  %5031 = vmatpush.bf16.msrb.mxu1 %v7967_v40  ;;  %v8186_v62 = vld [vmem:[#allocation3 + $0x120] sm:$0xf]  ;;  %v8162_v40 = vld [vmem:[#allocation3 + $0xf0] sm:$0xf] }
 0x493   :  { %5555 = vmatpush.bf16.msra.mxu3 %v8051_v28  ;;  %v7938_v28 = vld [vmem:[#allocation5] sm:$0xf]  ;;  %v4067_v26 = vpop.f32.mrf.mxu2 }
 0x494   :  { %v7939_v2 = vor.u32 %v8827_v39, %v7938_v28  ;;  %v4068_v31 = vadd.f32 %v4067_v26, %v4054_v21  ;;  %v8200_v21 = vld [vmem:[#allocation3 + $0x144] sm:$0xf0] }
 0x496   :  { %8241 = vmatmul.msk.bf16.vlgmr.msra.gmra.mxu3 %vm10065_vm2, %v9154_v37  ;;  %5019 = vmatpush.bf16.msrb.mxu0 %v7939_v2  ;;  %v8187_v2 = vor.u32 %v8887_v3, %v8186_v62 }
 0x497   :  { %5044 = vmatpush.bf16.msrb.mxu2 %v7983_v44  ;;  %5032 = vmatpush.bf16.msrb.mxu1 %v7955_v35  ;;  %v8868_v44 = vld [vmem:[#allocation3 + $0x94] sm:$0xf]  ;;  %v8878_v35 = vld [vmem:[#allocation3 + $0xe0] sm:$0xf0] }
 0x49a   :  { %5506 = vmatpush.bf16.msra.mxu0 %v8223_v29 }
 0x49b   :  { %5045 = vmatpush.bf16.msrb.mxu2 %v7971_v46  ;;  %v4121_v3 = vpop.f32.mrf.mxu2 }
 0x49e   :  { %5507 = vmatpush.bf16.msra.mxu0 %v8211_v47  ;;  %v8163_v47 = vor.u32 %v8881_v36, %v8162_v40 }
 0x49f   :  { %5046 = vmatpush.bf16.msrb.mxu2 %v7959_v56  ;;  %v8092_v56 = vld [vmem:[#allocation3 + $0x6c] sm:$0xf0] }
 0x4b3   :  { %v4310_v53 = vpop.f32.mrf.mxu0 }
 0x4b4   :  { %v4369_v4 = vadd.f32 %v4310_v53, %v4094_v48  ;;  %v8198_v48 = vld [vmem:[#allocation3 + $0x138] sm:$0xf]  ;;  %v7940_v53 = vld [vmem:[#allocation5 + $0xc] sm:$0xf0] }
 0x4b5   :  { %v8199_v18 = vor.u32 %v8890_v57, %v8198_v48  ;;  %v7943_v45 = vor.u32 %v8826_v12, %v7940_v53  ;;  %v8886_v53 = vld [vmem:[#allocation3 + $0x124] sm:$0xf] }
 0x4b6   :  { %v7726_v11 = vmul.f32 -1.442695, %v4369_v4  ;;  %v8828_v4 = vld [vmem:[#allocation5 + $0x10] sm:$0xf0] }
 0x4b7   :  { %5508 = vmatpush.bf16.msra.mxu0 %v8199_v18  ;;  %v7947_v50 = vor.u32 %v8828_v4, %v7946_v10  ;;  %5033 = vmatpush.bf16.msrb.mxu1 %v7943_v45  ;;  %v8151_v18 = vor.u32 %v8878_v35, %v8150_v22  ;;  %v8188_v10 = vld [vmem:[#allocation3 + $0x12c] sm:$0xf0] }
 0x4b8   :  { %9032 = vpow2.f32 %v7726_v11  ;;  %v8191_v17 = vor.u32 %v8886_v53, %v8188_v10  ;;  %v8877_v53 = vld [vmem:[#allocation3 + $0xdc] sm:$0xf]  ;;  %v8152_v10 = vld [vmem:[#allocation3 + $0xe4] sm:$0xf0] }
 0x4b9   :  { %v4296_v0 = vpop.f32.mrf.mxu3  ;;  %5047 = vmatpush.bf16.msrb.mxu2 %v7947_v50  ;;  %v4108_v50 = vadd.f32 %v10079_v42, %v9459_v16 }
 0x4ba   :  { %v4329_v51 = vadd.f32 %v4296_v0, %v4066_v27  ;;  %v8884_v27 = vld [vmem:[#allocation3 + $0x110] sm:$0xf0]  ;;  %v10089_v0 = vpop.f32.mrf.mxu1 }
 0x4bb   :  { %v4312_v55 = vpop.f32.mrf.mxu0  ;;  %5509 = vmatpush.bf16.msra.mxu0 %v8187_v2  ;;  %5520 = vmatpush.bf16.msra.mxu1 %v8131_v61  ;;  %v8175_v34 = vor.u32 %v8884_v27, %v8174_v30  ;;  %v8883_v27 = vld [vmem:[#allocation3 + $0x10c] sm:$0xf] }
 0x4bc   :  { %v7724_v1 = vmul.f32 -1.442695, %v4329_v51  ;;  %v4370_v38 = vadd.f32 %v4312_v55, %v4096_v13  ;;  %v8227_v51 = vor.u32 %v8895_v60, %v8224_v9  ;;  %v8116_v13 = vld [vmem:[#allocation3 + $0x9c] sm:$0xf0]  ;;  %v8859_v60 = vld [vmem:[#allocation3 + $0x4c] sm:$0xf] }
 0x4bd   :  { %v8119_v63 = vor.u32 %v8868_v44, %v8116_v13  ;;  %v8212_v55 = vld [vmem:[#allocation3 + $0x15c] sm:$0xf0]  ;;  %v8176_v44 = vld [vmem:[#allocation3 + $0x114] sm:$0xf0] }
 0x4be   :  { %v9033_v54 = vpop.eup %9032  ;;  %9034 = vpow2.f32 %v7724_v1  ;;  %v7727_v19 = vmul.f32 -1.442695, %v4370_v38  ;;  %5534 = vmatpush.bf16.msra.mxu2 %v8227_v51  ;;  %v8215_v23 = vor.u32 %v8892_v33, %v8212_v55  ;;  %v8865_v1 = vld [vmem:[#allocation3 + $0x7c] sm:$0xf]  ;;  %v8104_v38 = vld [vmem:[#allocation3 + $0x84] sm:$0xf0]  ;;  %v8179_v40 = vor.u32 %v8883_v27, %v8176_v44 }
 0x4bf   :  { %v10081_v49 = vadd.f32 1.0, %v9033_v54  ;;  %5510 = vmatpush.bf16.msra.mxu0 %v8175_v34  ;;  %5521 = vmatpush.bf16.msra.mxu1 %v8119_v63  ;;  %v8107_v26 = vor.u32 %v8865_v1, %v8104_v38  ;;  %v8889_v54 = vld [vmem:[#allocation3 + $0x13c] sm:$0xf]  ;;  %v10117_v33 = vld [vmem:[%s10286_s5] ss:$0 sm:$0xff] }
 0x4c0   :  { %9036 = vpow2.f32 %v7727_v19  ;;  %v8203_v24 = vor.u32 %v8889_v54, %v8200_v21  ;;  %v8856_v1 = vld [vmem:[#allocation3 + $0x34] sm:$0xf]  ;;  %v8068_v38 = vld [vmem:[#allocation3 + $0x3c] sm:$0xf0]  ;;  %v8140_v27 = vld [vmem:[#allocation3 + $0xcc] sm:$0xf0] }
 0x4c1   :  { %v4298_v7 = vpop.f32.mrf.mxu3  ;;  %9038 = vrcp.f32 %v10081_v49  ;;  %v4388_v42 = vand.u32 2147483647, %v10081_v49  ;;  %v4390_v13 = vand.u32 2147483648, %v10081_v49  ;;  %v8071_v54 = vor.u32 %v8856_v1, %v8068_v38  ;;  %v8880_v21 = vld [vmem:[#allocation3 + $0xf4] sm:$0xf] }
 0x4c2   :  { %v4330_v14 = vadd.f32 %v4298_v7, %v4068_v31  ;;  %5535 = vmatpush.bf16.msra.mxu2 %v8215_v23  ;;  %v8862_v31 = vld [vmem:[#allocation3 + $0x64] sm:$0xf]  ;;  %v4324_v7 = vpop.f32.mrf.mxu1  ;;  %vm4384_vm11 = vweird.f32 %v10081_v49  ;;  %v8230_v38 = vld [vmem:[#allocation3 + $0x170] sm:$0xf] }
 0x4c3   :  { %5511 = vmatpush.bf16.msra.mxu0 %v8163_v47  ;;  %5522 = vmatpush.bf16.msra.mxu1 %v8107_v26  ;;  %v8095_v12 = vor.u32 %v8862_v31, %v8092_v56  ;;  %v4409_v34 = vadd.f32 %v10117_v33, %v4324_v7  ;;  %vm4389_vm13 = vcmp.eq.f32.partialorder %v4388_v42, 8.507059e+37  ;;  %v4804_v52 = vpop.f32.mrf.mxu0 }
 0x4c4   :  { %v9035_v28 = vpop.eup %9034  ;;  %v7725_v39 = vmul.f32 -1.442695, %v4330_v14 }
 0x4c5   :  { %v10084_v11 = vadd.f32 1.0, %v9035_v28  ;;  %v8138_v28 = vld [vmem:[#allocation3 + $0xc0] sm:$0xf] }
 0x4c6   :  { %v9037_v6 = vpop.eup %9036  ;;  %9040 = vpow2.f32 %v7725_v39  ;;  %5536 = vmatpush.bf16.msra.mxu2 %v8203_v24  ;;  %v8875_v39 = vld [vmem:[#allocation3 + $0xc8] sm:$0xf0]  ;;  %v8888_v24 = vld [vmem:[#allocation3 + $0x130] sm:$0xf0] }
 0x4c7   :  { %9042 = vrcp.f32 %v10084_v11  ;;  %v10087_v43 = vpop.eup %9038  ;;  %v10091_v29 = vadd.f32 1.0, %v9037_v6  ;;  %v4350_v45 = vand.u32 2147483648, %v10084_v11  ;;  %v4348_v62 = vand.u32 2147483647, %v10084_v11  ;;  %v8080_v6 = vld [vmem:[#allocation3 + $0x54] sm:$0xf0]  ;;  %5512 = vmatpush.bf16.msra.mxu0 %v8151_v18  ;;  %5523 = vmatpush.bf16.msra.mxu1 %v8095_v12 }
 0x4c8   :  { %v4380_v25 = vmul.f32 %v10087_v43, %v10081_v49  ;;  %vm4344_vm1 = vweird.f32 %v10084_v11  ;;  %v8139_v9 = vor.u32 %v8875_v39, %v8138_v28  ;;  %v8083_v30 = vor.u32 %v8859_v60, %v8080_v6  ;;  %v8056_v49 = vld [vmem:[#allocation3 + $0x24] sm:$0xf0]  ;;  %v4123_v28 = vpop.f32.mrf.mxu2  ;;  %v8874_v60 = vld [vmem:[#allocation3 + $0xc4] sm:$0xf] }
 0x4c9   :  { %9044 = vrcp.f32 %v10091_v29  ;;  %vm4349_vm8 = vcmp.eq.f32.partialorder %v4348_v62, 8.507059e+37  ;;  %vm4385_vm10 = vweird.f32 %v10087_v43  ;;  %v4391_v18 = vor.u32 1.1754944e-38, %v4390_v13 }
 0x4ca   :  { %v4381_v48 = vsub.f32 1.0, %v4380_v25  ;;  %5537 = vmatpush.bf16.msra.mxu2 %v8191_v17  ;;  %vm10130_vm14 = vmor %vm4384_vm11, %vm4385_vm10  ;;  %v4326_v56 = vpop.f32.mrf.mxu1  ;;  %v4110_v62 = vadd.f32 %v10089_v0, %v9459_v16  ;;  %v8850_v0 = vld [vmem:[#allocation3 + $0x4] sm:$0xf]  ;;  %v8044_v17 = vld [vmem:[#allocation3 + $0xc] sm:$0xf0]  ;;  %vm4399_vm4 = vweird.f32 %v10091_v29 }
 0x4cb   :  { %5513 = vmatpush.bf16.msra.mxu0 %v8139_v9  ;;  %5524 = vmatpush.bf16.msra.mxu1 %v8083_v30  ;;  %v4410_v39 = vadd.f32 %v10117_v33, %v4326_v56  ;;  %v8047_v30 = vor.u32 %v8850_v0, %v8044_v17  ;;  %v8182_v56 = vld [vmem:[#allocation3 + $0x110] sm:$0xf]  ;;  %v4805_v0 = vadd.f32 %v4804_v52, %v9424_v20 }
 0x4cc   :  { %v9041_v46 = vpop.eup %9040  ;;  %v4382_v41 = vmul.f32 %v10087_v43, %v4381_v48  ;;  %v4124_v6 = vadd.f32 %v4123_v28, %v4110_v62 }
 0x4cd   :  { %v9043_v19 = vpop.eup %9042  ;;  %v10096_v8 = vadd.f32 1.0, %v9041_v46  ;;  %v4122_v46 = vadd.f32 %v4121_v3, %v4108_v50 }
 0x4ce   :  { %v4340_v58 = vmul.f32 %v9043_v19, %v10084_v11  ;;  %vm4345_vm5 = vweird.f32 %v9043_v19  ;;  %v4351_v11 = vor.u32 1.1754944e-38, %v4350_v45  ;;  %v4383_v36 = vadd.f32 %v10087_v43, %v4382_v41  ;;  %5538 = vmatpush.bf16.msra.mxu2 %v8179_v40 }
 0x4cf   :  { %9046 = vrcp.f32 %v10096_v8  ;;  %v10100_v57 = vpop.eup %9044  ;;  %vm4346_vm12 = vmor %vm4344_vm1, %vm4345_vm5  ;;  %v4363_v22 = vand.u32 2147483647, %v10096_v8  ;;  %v4365_v35 = vand.u32 2147483648, %v10096_v8  ;;  %vm4359_vm7 = vweird.f32 %v10096_v8  ;;  %5525 = vmatpush.bf16.msra.mxu1 %v8071_v54  ;;  %v8218_v54 = vld [vmem:[#allocation3 + $0x158] sm:$0xf] }
 0x4d0   :  { %v4341_v14 = vsub.f32 1.0, %v4340_v58  ;;  %v4395_v2 = vmul.f32 %v10100_v57, %v10091_v29  ;;  %v8853_v58 = vld [vmem:[#allocation3 + $0x1c] sm:$0xf]  ;;  %v8155_v41 = vor.u32 %v8877_v53, %v8152_v10  ;;  %vm4400_vm6 = vweird.f32 %v10100_v57  ;;  %v8879_v53 = vld [vmem:[#allocation3 + $0xe8] sm:$0xf0] }
 0x4d1   :  { %vm4364_vm0 = vcmp.eq.f32.partialorder %v4363_v22, 8.507059e+37  ;;  %vm4401_vm5 = vmor %vm4399_vm4, %vm4400_vm6  ;;  %v8891_v22 = vld [vmem:[#allocation3 + $0x148] sm:$0xf0] }
 0x4d2   :  { %v4342_v4 = vmul.f32 %v9043_v19, %v4341_v14  ;;  %v4396_v23 = vsub.f32 1.0, %v4395_v2  ;;  %v4387_v14 = vsel %vm10130_vm14, %v10087_v43, %v4383_v36  ;;  %v4366_v43 = vor.u32 1.1754944e-38, %v4365_v35  ;;  %v4818_v28 = vpop.f32.mrf.mxu1 }
 0x4d3   :  { %v4392_v50 = vsel %vm4389_vm13, %v4391_v18, %v4387_v14  ;;  %v8882_v14 = vld [vmem:[#allocation3 + $0x100] sm:$0xf0] }
 0x4d4   :  { %v4343_v61 = vadd.f32 %v9043_v19, %v4342_v4  ;;  %v4397_v12 = vmul.f32 %v10100_v57, %v4396_v23  ;;  %v8059_v4 = vor.u32 %v8853_v58, %v8056_v49  ;;  %v4417_v44 = vsub.f32 1.0, %v4392_v50  ;;  %v8194_v58 = vld [vmem:[#allocation3 + $0x128] sm:$0xf]  ;;  %v8170_v49 = vld [vmem:[#allocation3 + $0xf8] sm:$0xf] }
 0x4d5   :  { %v10110_v51 = vpop.eup %9046  ;;  %v8171_v18 = vor.u32 %v8882_v14, %v8170_v49  ;;  %v8911_v49 = vld [vmem:[#allocation5 + $0x68] sm:$0xf0]  ;;  %v8910_v14 = vld [vmem:[#allocation5 + $0x64] sm:$0xf] }
 0x4d6   :  { %v4347_v63 = vsel %vm4346_vm12, %v9043_v19, %v4343_v61  ;;  %v4355_v55 = vmul.f32 %v10110_v51, %v10096_v8  ;;  %v8164_v19 = vld [vmem:[#allocation3 + $0xfc] sm:$0xf0]  ;;  %vm4360_vm3 = vweird.f32 %v10110_v51  ;;  %v4398_v8 = vadd.f32 %v10100_v57, %v4397_v12  ;;  %5526 = vmatpush.bf16.msra.mxu1 %v8059_v4  ;;  %v8876_v4 = vld [vmem:[#allocation3 + $0xd0] sm:$0xf0] }
 0x4d7   :  { %v4352_v25 = vsel %vm4349_vm8, %v4351_v11, %v4347_v63  ;;  %v8167_v7 = vor.u32 %v8880_v21, %v8164_v19  ;;  %vm4361_vm15 = vmor %vm4359_vm7, %vm4360_vm3  ;;  %v4405_v61 = vand.u32 2147483648, %v10091_v29  ;;  %v8894_v21 = vld [vmem:[#allocation3 + $0x160] sm:$0xf0]  ;;  %v8206_v19 = vld [vmem:[#allocation3 + $0x140] sm:$0xf] }
 0x4d8   :  { %v4411_v47 = vmul.f32 %v4409_v34, %v4352_v25  ;;  %v4356_v26 = vsub.f32 1.0, %v4355_v55  ;;  %v8143_v34 = vor.u32 %v8874_v60, %v8140_v27  ;;  %v4402_v11 = vsel %vm4401_vm5, %v10100_v57, %v4398_v8  ;;  %v8158_v12 = vld [vmem:[#allocation3 + $0xe0] sm:$0xf]  ;;  %v8920_v8 = vld [vmem:[#allocation5 + $0xb0] sm:$0xf0] }
 0x4d9   :  { %5539 = vmatpush.bf16.msra.mxu2 %v8167_v7  ;;  %v4421_v55 = vmul.f32 %v4392_v50, %v10034_v32  ;;  %v4406_v40 = vor.u32 1.1754944e-38, %v4405_v61  ;;  %v8897_v32 = vld [vmem:[#allocation3 + $0x178] sm:$0xf0]  ;;  %v8207_v35 = vor.u32 %v8891_v22, %v8206_v19  ;;  %v8159_v10 = vor.u32 %v8879_v53, %v8158_v12  ;;  %v8332_v60 = vld [vmem:[#allocation5 + $0xb4] sm:$0xf0] }
 0x4da   :  { %v4413_v31 = vadd.f32 %v4411_v47, %v4122_v46  ;;  %v4357_v48 = vmul.f32 %v10110_v51, %v4356_v26  ;;  %5527 = vmatpush.bf16.msra.mxu1 %v8047_v30  ;;  %v8231_v47 = vor.u32 %v8897_v32, %v8230_v38  ;;  %v4820_v50 = vpop.f32.mrf.mxu1  ;;  %v8921_v61 = vld [vmem:[#allocation5 + $0xb8] sm:$0xf0]  ;;  %v8318_v27 = vld [vmem:[#allocation5 + $0x90] sm:$0xf]  ;;  %v8306_v38 = vld [vmem:[#allocation5 + $0x78] sm:$0xf] }
 0x4db   :  { %v8914_v32 = vld [vmem:[#allocation5 + $0x80] sm:$0xf0]  ;;  %v8308_v19 = vld [vmem:[#allocation5 + $0x84] sm:$0xf0] }
 0x4dc   :  { %9048 = vtanh.f32 %v4413_v31  ;;  %v4358_v45 = vadd.f32 %v10110_v51, %v4357_v48  ;;  %v8195_v31 = vor.u32 %v8888_v24, %v8194_v58  ;;  %v8885_v48 = vld [vmem:[#allocation3 + $0x118] sm:$0xf0]  ;;  %v8314_v58 = vld [vmem:[#allocation5 + $0x80] sm:$0xf]  ;;  %v8915_v24 = vld [vmem:[#allocation5 + $0x88] sm:$0xf0] }
 0x4dd   :  { %5540 = vmatpush.bf16.msra.mxu2 %v8155_v41  ;;  %v8183_v7 = vor.u32 %v8885_v48, %v8182_v56  ;;  %v8330_v41 = vld [vmem:[#allocation5 + $0xa8] sm:$0xf]  ;;  %v8315_v56 = vor.u32 %v8915_v24, %v8314_v58 }
 0x4de   :  { %v4362_v3 = vsel %vm4361_vm15, %v10110_v51, %v4358_v45  ;;  %v4403_v51 = vand.u32 2147483647, %v10091_v29  ;;  %v8146_v45 = vld [vmem:[#allocation3 + $0xc8] sm:$0xf]  ;;  %v8331_v17 = vor.u32 %v8920_v8, %v8330_v41  ;;  %v8908_v8 = vld [vmem:[#allocation5 + $0x50] sm:$0xf0] }
 0x4df   :  { %v4367_v2 = vsel %vm4364_vm0, %v4366_v43, %v4362_v3  ;;  %v8147_v62 = vor.u32 %v8876_v4, %v8146_v45  ;;  %v4806_v43 = vpop.f32.mrf.mxu0  ;;  %v4790_v3 = vpop.f32.mrf.mxu3  ;;  %v8302_v45 = vld [vmem:[#allocation5 + $0x68] sm:$0xf]  ;;  %v8912_v4 = vld [vmem:[#allocation5 + $0x70] sm:$0xf0] }
 0x4e0   :  { %v4412_v9 = vmul.f32 %v4410_v39, %v4367_v2  ;;  %vm4404_vm1 = vcmp.eq.f32.partialorder %v4403_v51, 8.507059e+37  ;;  %v4776_v39 = vpop.f32.mrf.mxu2  ;;  %v8919_v2 = vld [vmem:[#allocation5 + $0xac] sm:$0xf]  ;;  %v8916_v51 = vld [vmem:[#allocation5 + $0x94] sm:$0xf] }
 0x4e1   :  { %v4407_v25 = vsel %vm4404_vm1, %v4406_v40, %v4402_v11  ;;  %5541 = vmatpush.bf16.msra.mxu2 %v8143_v34  ;;  %v4777_v59 = vadd.f32 %v4776_v39, %v9421_v15  ;;  %v8320_v11 = vld [vmem:[#allocation5 + $0x9c] sm:$0xf0]  ;;  %v8303_v39 = vor.u32 %v8912_v4, %v8302_v45  ;;  %v8282_v41 = vld [vmem:[#allocation5 + $0x48] sm:$0xf]  ;;  %v8898_v4 = vld [vmem:[#allocation5 + $0x4] sm:$0xf] }
 0x4e2   :  { %v9049_v42 = vpop.eup %9048  ;;  %v4414_v13 = vadd.f32 %v4412_v9, %v4124_v6  ;;  %v4418_v29 = vsub.f32 1.0, %v4407_v25  ;;  %v4422_v57 = vmul.f32 %v4407_v25, %v10041_v5  ;;  %v8219_v5 = vor.u32 %v8894_v21, %v8218_v54  ;;  %v8338_v6 = vld [vmem:[#allocation5 + $0xb0] sm:$0xf] }
 0x4e3   :  { %v4419_v63 = vmul.f32 %v9049_v42, %v4417_v44  ;;  %v8335_v9 = vor.u32 %v8919_v2, %v8332_v60  ;;  %v8339_v30 = vor.u32 %v8921_v61, %v8338_v6  ;;  %v8917_v44 = vld [vmem:[#allocation5 + $0x98] sm:$0xf0]  ;;  %v4819_v42 = vadd.f32 %v4818_v28, %v4805_v0  ;;  %v8907_v2 = vld [vmem:[#allocation5 + $0x4c] sm:$0xf]  ;;  %v8284_v6 = vld [vmem:[#allocation5 + $0x54] sm:$0xf0] }
 0x4e4   :  { %9050 = vtanh.f32 %v4414_v13  ;;  %v4791_v13 = vadd.f32 %v4790_v3, %v4777_v59  ;;  %v8319_v34 = vor.u32 %v8917_v44, %v8318_v27  ;;  %v8283_v60 = vor.u32 %v8908_v8, %v8282_v41  ;;  %v8290_v59 = vld [vmem:[#allocation5 + $0x50] sm:$0xf] }
 0x4e5   :  { %v10157_v36 = vadd.f32 %v4421_v55, %v4419_v63  ;;  %5765 = vmatpush.bf16.msrb.mxu3 %v8339_v30  ;;  %v8326_v63 = vld [vmem:[#allocation5 + $0x98] sm:$0xf]  ;;  %v8918_v55 = vld [vmem:[#allocation5 + $0xa0] sm:$0xf0]  ;;  %v8287_v30 = vor.u32 %v8907_v2, %v8284_v6 }
 0x4e7   :  { %7728 = vst [vmem:[%s10287_s6 + $0x50] sm:$0xff] %v10157_v36  ;;  %v4792_v22 = vpop.f32.mrf.mxu3 }
 0x4ea   :  { %v9051_v23 = vpop.eup %9050 }
 0x4eb   :  { %v4420_v1 = vmul.f32 %v9051_v23, %v4418_v29  ;;  %v8323_v29 = vor.u32 %v8916_v51, %v8320_v11  ;;  %v8327_v23 = vor.u32 %v8918_v55, %v8326_v63  ;;  %v8270_v51 = vld [vmem:[#allocation5 + $0x30] sm:$0xf]  ;;  %v8272_v11 = vld [vmem:[#allocation5 + $0x3c] sm:$0xf0]  ;;  %v8278_v63 = vld [vmem:[#allocation5 + $0x38] sm:$0xf] }
 0x4ec   :  { %v8906_v55 = vld [vmem:[#allocation5 + $0x40] sm:$0xf0] }
 0x4ed   :  { %v10164_v46 = vadd.f32 %v4422_v57, %v4420_v1  ;;  %5766 = vmatpush.bf16.msrb.mxu3 %v8327_v23  ;;  %v8258_v23 = vld [vmem:[#allocation5 + $0x18] sm:$0xf] }
 0x4ef   :  { %7729 = vst [vmem:[%s10287_s6 + $0x58] sm:$0xff] %v10164_v46  ;;  %v4851_v26 = vpack.c.bf16 %v10164_v46, %v10157_v36 }
 0x4f1   :  { %5020 = vmatmul.bf16.vlgmr.msrb.gmra.mxu0 %v4851_v26  ;;  %5034 = vmatmul.bf16.vlgmr.msrb.gmra.mxu1 %v4851_v26 }
 0x4f2   :  { %5048 = vmatmul.bf16.vlgmr.msrb.gmra.mxu2 %v4851_v26  ;;  %5562 = vmatpush.bf16.msrb.mxu0 %v8231_v47  ;;  %v8913_v47 = vld [vmem:[#allocation5 + $0x7c] sm:$0xf]  ;;  %v4807_v26 = vadd.f32 %v4806_v43, %v9424_v20 }
 0x4f3   :  { %5737 = vmatpush.bf16.msrb.mxu1 %v8331_v17  ;;  %5751 = vmatpush.bf16.msrb.mxu2 %v8335_v9 }
 0x4f4   :  { %5767 = vmatpush.bf16.msrb.mxu3 %v8315_v56  ;;  %v8246_v56 = vld [vmem:[#allocation5] sm:$0xf] }
 0x4f6   :  { %5563 = vmatpush.bf16.msrb.mxu0 %v8219_v5  ;;  %v8307_v5 = vor.u32 %v8914_v32, %v8306_v38  ;;  %v8260_v32 = vld [vmem:[#allocation5 + $0x24] sm:$0xf0] }
 0x4f7   :  { %5738 = vmatpush.bf16.msrb.mxu1 %v8319_v34  ;;  %5752 = vmatpush.bf16.msrb.mxu2 %v8323_v29  ;;  %v8904_v34 = vld [vmem:[#allocation5 + $0x34] sm:$0xf]  ;;  %v8279_v29 = vor.u32 %v8906_v55, %v8278_v63 }
 0x4f8   :  { %5768 = vmatpush.bf16.msrb.mxu3 %v8303_v39  ;;  %v8900_v39 = vld [vmem:[#allocation5 + $0x10] sm:$0xf0] }
 0x4fa   :  { %5564 = vmatpush.bf16.msrb.mxu0 %v8207_v35  ;;  %v8311_v35 = vor.u32 %v8913_v47, %v8308_v19  ;;  %v8266_v47 = vld [vmem:[#allocation5 + $0x20] sm:$0xf] }
 0x4fb   :  { %5739 = vmatpush.bf16.msrb.mxu1 %v8307_v5 }
 0x4fc   :  { %5753 = vmatpush.bf16.msrb.mxu2 %v8311_v35 }
 0x4fe   :  { %5565 = vmatpush.bf16.msrb.mxu0 %v8195_v31 }
 0x501   :  { %8235 = vmatmul.msk.bf16.vlgmr.msra.gmra.mxu0 %vm9378_vm9, %v9154_v37  ;;  %8237 = vmatmul.msk.bf16.vlgmr.msra.gmra.mxu1 %vm10065_vm2, %v9154_v37 }
 0x502   :  { %8239 = vmatmul.msk.bf16.vlgmr.msra.gmra.mxu2 %vm9378_vm9, %v9154_v37  ;;  %5566 = vmatpush.bf16.msrb.mxu0 %v8183_v7  ;;  %v8294_v7 = vld [vmem:[#allocation5 + $0x60] sm:$0xf] }
 0x503   :  { %v8295_v53 = vor.u32 %v8911_v49, %v8294_v7  ;;  %v8899_v7 = vld [vmem:[#allocation5 + $0x8] sm:$0xf0] }
 0x504   :  { %v8247_v45 = vor.u32 %v8899_v7, %v8246_v56 }
 0x505   :  { %5740 = vmatpush.bf16.msrb.mxu1 %v8295_v53 }
 0x506   :  { %5567 = vmatpush.bf16.msrb.mxu0 %v8171_v18  ;;  %v4821_v18 = vadd.f32 %v4820_v50, %v4807_v26  ;;  %v8903_v26 = vld [vmem:[#allocation5 + $0x28] sm:$0xf0] }
 0x507   :  { %v8267_v58 = vor.u32 %v8903_v26, %v8266_v47 }
 0x509   :  { %5741 = vmatpush.bf16.msrb.mxu1 %v8283_v60 }
 0x50a   :  { %5568 = vmatpush.bf16.msrb.mxu0 %v8159_v10  ;;  %v8296_v10 = vld [vmem:[#allocation5 + $0x6c] sm:$0xf0] }
 0x50b   :  { %v8299_v28 = vor.u32 %v8910_v14, %v8296_v10 }
 0x50d   :  { %5754 = vmatpush.bf16.msrb.mxu2 %v8299_v28  ;;  %v8254_v28 = vld [vmem:[#allocation5 + $0x8] sm:$0xf] }
 0x50e   :  { %5569 = vmatpush.bf16.msrb.mxu0 %v8147_v62 }
 0x511   :  { %8243 = vmatmul.msk.bf16.vlgmr.msrb.gmra.mxu0 %vm9378_vm9, %v9154_v37  ;;  %v4778_v37 = vpop.f32.mrf.mxu2  ;;  %5755 = vmatpush.bf16.msrb.mxu2 %v8287_v30 }
 0x512   :  { %v4779_v31 = vadd.f32 %v4778_v37, %v9421_v15  ;;  %v8909_v37 = vld [vmem:[#allocation5 + $0x58] sm:$0xf0] }
 0x513   :  { %v8291_v44 = vor.u32 %v8909_v37, %v8290_v59 }
 0x514   :  { %v4793_v12 = vadd.f32 %v4792_v22, %v4779_v31 }
 0x515   :  { %5769 = vmatpush.bf16.msrb.mxu3 %v8291_v44 }
 0x519   :  { %v10188_v48 = vpop.f32.mrf.mxu2  ;;  %5770 = vmatpush.bf16.msrb.mxu3 %v8279_v29 }
 0x51a   :  { %v4833_v2 = vadd.f32 %v10188_v48, %v9459_v16 }
 0x51d   :  { %5771 = vmatpush.bf16.msrb.mxu3 %v8267_v58 }
 0x56e   :  { %v5021_v40 = vpop.f32.mrf.mxu0  ;;  %v5035_v25 = vpop.f32.mrf.mxu1 }
 0x56f   :  { %v5054_v1 = vadd.f32 %v5021_v40, %v4791_v13  ;;  %v5094_v57 = vadd.f32 %v5035_v25, %v4819_v42  ;;  %v8905_v42 = vld [vmem:[#allocation5 + $0x38] sm:$0xf0]  ;;  %v10196_v13 = vpop.f32.mrf.mxu2  ;;  %v8275_v25 = vor.u32 %v8904_v34, %v8272_v11 }
 0x570   :  { %v8271_v40 = vor.u32 %v8905_v42, %v8270_v51 }
 0x571   :  { %v8032_v54 = vmul.f32 -1.442695, %v5054_v1  ;;  %v8034_v21 = vmul.f32 -1.442695, %v5094_v57  ;;  %v8902_v1 = vld [vmem:[#allocation5 + $0x20] sm:$0xf0]  ;;  %5756 = vmatpush.bf16.msrb.mxu2 %v8275_v25 }
 0x572   :  { %v8901_v57 = vld [vmem:[#allocation5 + $0x1c] sm:$0xf]  ;;  %5742 = vmatpush.bf16.msrb.mxu1 %v8271_v40  ;;  %v8259_v5 = vor.u32 %v8902_v1, %v8258_v23 }
 0x573   :  { %9052 = vpow2.f32 %v8032_v54  ;;  %v8263_v19 = vor.u32 %v8901_v57, %v8260_v32 }
 0x574   :  { %9054 = vpow2.f32 %v8034_v21 }
 0x575   :  { %5757 = vmatpush.bf16.msrb.mxu2 %v8263_v19 }
 0x576   :  { %v5023_v62 = vpop.f32.mrf.mxu0  ;;  %v5037_v52 = vpop.f32.mrf.mxu1  ;;  %5743 = vmatpush.bf16.msrb.mxu1 %v8259_v5 }
 0x577   :  { %v5055_v43 = vadd.f32 %v5023_v62, %v4793_v12  ;;  %v5095_v3 = vadd.f32 %v5037_v52, %v4821_v18  ;;  %v5049_v12 = vpop.f32.mrf.mxu2  ;;  %v8248_v52 = vld [vmem:[#allocation5 + $0xc] sm:$0xf0] }
 0x578   :  { %v5134_v6 = vadd.f32 %v10117_v33, %v5049_v12 }
 0x579   :  { %v9053_v0 = vpop.eup %9052  ;;  %v8033_v17 = vmul.f32 -1.442695, %v5055_v43  ;;  %v8035_v50 = vmul.f32 -1.442695, %v5095_v3  ;;  %v4846_v43 = vpop.f32.mrf.mxu3 }
 0x57a   :  { %v9055_v61 = vpop.eup %9054  ;;  %v10190_v9 = vadd.f32 1.0, %v9053_v0  ;;  %5744 = vmatpush.bf16.msrb.mxu1 %v8247_v45  ;;  %v4847_v48 = vadd.f32 %v4846_v43, %v4833_v2 }
 0x57b   :  { %v10192_v27 = vadd.f32 1.0, %v9055_v61  ;;  %9056 = vpow2.f32 %v8033_v17  ;;  %v8251_v17 = vor.u32 %v8898_v4, %v8248_v52 }
 0x57c   :  { %9058 = vrcp.f32 %v10190_v9  ;;  %v5073_v53 = vand.u32 2147483647, %v10190_v9  ;;  %v5075_v10 = vand.u32 2147483648, %v10190_v9  ;;  %vm5069_vm2 = vweird.f32 %v10190_v9 }
 0x57d   :  { %9060 = vrcp.f32 %v10192_v27  ;;  %5758 = vmatpush.bf16.msrb.mxu2 %v8251_v17  ;;  %v5115_v37 = vand.u32 2147483648, %v10192_v27  ;;  %vm5109_vm11 = vweird.f32 %v10192_v27  ;;  %v5113_v42 = vand.u32 2147483647, %v10192_v27 }
 0x57e   :  { %9062 = vpow2.f32 %v8035_v50  ;;  %v5076_v0 = vor.u32 1.1754944e-38, %v5075_v10  ;;  %v8255_v50 = vor.u32 %v8900_v39, %v8254_v28  ;;  %vm5074_vm8 = vcmp.eq.f32.partialorder %v5073_v53, 8.507059e+37  ;;  %v5529_v39 = vpop.f32.mrf.mxu1 }
 0x57f   :  { %v5051_v1 = vpop.f32.mrf.mxu2  ;;  %vm5114_vm13 = vcmp.eq.f32.partialorder %v5113_v42, 8.507059e+37 }
 0x580   :  { %5772 = vmatpush.bf16.msrb.mxu3 %v8255_v50  ;;  %v5135_v19 = vadd.f32 %v10117_v33, %v5051_v1 }
 0x581   :  { %v9057_v38 = vpop.eup %9056  ;;  %v4848_v32 = vpop.f32.mrf.mxu3 }
 0x582   :  { %v9059_v54 = vpop.eup %9058  ;;  %v10198_v21 = vadd.f32 1.0, %v9057_v38  ;;  %v4835_v38 = vadd.f32 %v10196_v13, %v9459_v16 }
 0x583   :  { %v10200_v22 = vpop.eup %9060  ;;  %v5065_v35 = vmul.f32 %v9059_v54, %v10190_v9  ;;  %vm5070_vm9 = vweird.f32 %v9059_v54 }
 0x584   :  { %v9063_v24 = vpop.eup %9062  ;;  %v5105_v31 = vmul.f32 %v10200_v22, %v10192_v27  ;;  %9064 = vrcp.f32 %v10198_v21  ;;  %vm5071_vm12 = vmor %vm5069_vm2, %vm5070_vm9  ;;  %vm5110_vm10 = vweird.f32 %v10200_v22  ;;  %v5090_v11 = vand.u32 2147483648, %v10198_v21 }
 0x585   :  { %v5066_v49 = vsub.f32 1.0, %v5065_v35  ;;  %v10206_v14 = vadd.f32 1.0, %v9063_v24  ;;  %vm10224_vm14 = vmor %vm5109_vm11, %vm5110_vm10  ;;  %v5088_v25 = vand.u32 2147483647, %v10198_v21  ;;  %v5116_v27 = vor.u32 1.1754944e-38, %v5115_v37 }
 0x586   :  { %v5106_v18 = vsub.f32 1.0, %v5105_v31  ;;  %vm5084_vm7 = vweird.f32 %v10198_v21  ;;  %v5091_v26 = vor.u32 1.1754944e-38, %v5090_v11  ;;  %v4849_v58 = vadd.f32 %v4848_v32, %v4835_v38 }
 0x587   :  { %v5067_v62 = vmul.f32 %v9059_v54, %v5066_v49  ;;  %9066 = vrcp.f32 %v10206_v14  ;;  %vm5089_vm0 = vcmp.eq.f32.partialorder %v5088_v25, 8.507059e+37  ;;  %v5130_v24 = vand.u32 2147483648, %v10206_v14  ;;  %v5543_v43 = vpop.f32.mrf.mxu2 }
 0x588   :  { %v5107_v3 = vmul.f32 %v10200_v22, %v5106_v18  ;;  %vm5124_vm4 = vweird.f32 %v10206_v14  ;;  %v5128_v13 = vand.u32 2147483647, %v10206_v14 }
 0x589   :  { %v5068_v41 = vadd.f32 %v9059_v54, %v5067_v62  ;;  %v5131_v53 = vor.u32 1.1754944e-38, %v5130_v24 }
 0x58a   :  { %v9065_v8 = vpop.eup %9064  ;;  %v5108_v30 = vadd.f32 %v10200_v22, %v5107_v3  ;;  %vm5129_vm1 = vcmp.eq.f32.partialorder %v5128_v13, 8.507059e+37  ;;  %v5501_v3 = vpop.f32.mrf.mxu3 }
 0x58b   :  { %v5072_v60 = vsel %vm5071_vm12, %v9059_v54, %v5068_v41  ;;  %v5080_v61 = vmul.f32 %v9065_v8, %v10198_v21  ;;  %vm5085_vm3 = vweird.f32 %v9065_v8  ;;  %v5531_v41 = vpop.f32.mrf.mxu1 }
 0x58c   :  { %v5077_v9 = vsel %vm5074_vm8, %v5076_v0, %v5072_v60  ;;  %v5112_v29 = vsel %vm10224_vm14, %v10200_v22, %v5108_v30  ;;  %vm5086_vm15 = vmor %vm5084_vm7, %vm5085_vm3 }
 0x58d   :  { %v9067_v59 = vpop.eup %9066  ;;  %v5136_v44 = vmul.f32 %v5134_v6, %v5077_v9  ;;  %v5081_v51 = vsub.f32 1.0, %v5080_v61  ;;  %v5117_v54 = vsel %vm5114_vm13, %v5116_v27, %v5112_v29  ;;  %v5530_v6 = vadd.f32 %v5529_v39, %v9424_v20 }
 0x58e   :  { %v5120_v34 = vmul.f32 %v9067_v59, %v10206_v14  ;;  %vm5125_vm6 = vweird.f32 %v9067_v59  ;;  %v5142_v31 = vsub.f32 1.0, %v5117_v54  ;;  %v5146_v18 = vmul.f32 %v5117_v54, %v10157_v36 }
 0x58f   :  { %v5138_v55 = vadd.f32 %v5136_v44, %v4847_v48  ;;  %v5082_v40 = vmul.f32 %v9065_v8, %v5081_v51  ;;  %vm5126_vm5 = vmor %vm5124_vm4, %vm5125_vm6  ;;  %v5545_v2 = vpop.f32.mrf.mxu2 }
 0x590   :  { %v5121_v23 = vsub.f32 1.0, %v5120_v34 }
 0x591   :  { %9068 = vtanh.f32 %v5138_v55  ;;  %v5083_v57 = vadd.f32 %v9065_v8, %v5082_v40  ;;  %v5532_v55 = vadd.f32 %v5531_v41, %v9424_v20 }
 0x592   :  { %v5122_v47 = vmul.f32 %v9067_v59, %v5121_v23  ;;  %v5503_v0 = vpop.f32.mrf.mxu3 }
 0x593   :  { %v5087_v5 = vsel %vm5086_vm15, %v9065_v8, %v5083_v57  ;;  %v5515_v8 = vpop.f32.mrf.mxu0  ;;  %v5504_v9 = vadd.f32 %v5503_v0, %v9421_v15  ;;  %v5546_v29 = vadd.f32 %v5545_v2, %v5532_v55 }
 0x594   :  { %v5123_v22 = vadd.f32 %v9067_v59, %v5122_v47  ;;  %v5092_v35 = vsel %vm5089_vm0, %v5091_v26, %v5087_v5 }
 0x595   :  { %v5137_v21 = vmul.f32 %v5135_v19, %v5092_v35 }
 0x596   :  { %v5127_v12 = vsel %vm5126_vm5, %v9067_v59, %v5123_v22  ;;  %v5544_v59 = vadd.f32 %v5543_v43, %v5530_v6 }
 0x597   :  { %v9069_v56 = vpop.eup %9068  ;;  %v5139_v7 = vadd.f32 %v5137_v21, %v4849_v58  ;;  %v5132_v45 = vsel %vm5129_vm1, %v5131_v53, %v5127_v12 }
 0x598   :  { %v5144_v49 = vmul.f32 %v9069_v56, %v5142_v31  ;;  %v5143_v4 = vsub.f32 1.0, %v5132_v45  ;;  %v5147_v52 = vmul.f32 %v5132_v45, %v10164_v46  ;;  %v5502_v46 = vadd.f32 %v5501_v3, %v9421_v15 }
 0x599   :  { %9070 = vtanh.f32 %v5139_v7 }
 0x59a   :  { %v10240_v10 = vadd.f32 %v5146_v18, %v5144_v49  ;;  %v5516_v17 = vadd.f32 %v5515_v8, %v5502_v46  ;;  %v5557_v37 = vpop.f32.mrf.mxu3 }
 0x59b   :  { %v5517_v30 = vpop.f32.mrf.mxu0  ;;  %v5558_v7 = vadd.f32 %v5557_v37, %v9459_v16 }
 0x59c   :  { %8036 = vst [vmem:[%s10287_s6 + $0x60] sm:$0xff] %v10240_v10  ;;  %v5518_v44 = vadd.f32 %v5517_v30, %v5504_v9 }
 0x59f   :  { %v9071_v14 = vpop.eup %9070 }
 0x5a0   :  { %v5145_v62 = vmul.f32 %v9071_v14, %v5143_v4 }
 0x5a2   :  { %v10247_v28 = vadd.f32 %v5147_v52, %v5145_v62  ;;  %v10259_v27 = vpop.f32.mrf.mxu3 }
 0x5a3   :  { %v5571_v31 = vpop.f32.mrf.mxu0 }
 0x5a4   :  { %8037 = vst [vmem:[%s10287_s6 + $0x68] sm:$0xff] %v10247_v28  ;;  %v5576_v36 = vpack.c.bf16 %v10247_v28, %v10240_v10  ;;  %v5572_v4 = vadd.f32 %v5571_v31, %v5558_v7 }
 0x5a6   :  { %5745 = vmatmul.bf16.vlgmr.msrb.gmra.mxu1 %v5576_v36  ;;  %5759 = vmatmul.bf16.vlgmr.msrb.gmra.mxu2 %v5576_v36 }
 0x5a7   :  { %5773 = vmatmul.bf16.vlgmr.msrb.gmra.mxu3 %v5576_v36 }
 0x5ab   :  { %v5573_v9 = vpop.f32.mrf.mxu0 }
 0x623   :  { %v5746_v50 = vpop.f32.mrf.mxu1 }
 0x624   :  { %v5779_v60 = vadd.f32 %v5746_v50, %v5516_v17 }
 0x626   :  { %v8340_v61 = vmul.f32 -1.442695, %v5779_v60 }
 0x628   :  { %9072 = vpow2.f32 %v8340_v61 }
 0x629   :  { %v5760_v48 = vpop.f32.mrf.mxu2 }
 0x62a   :  { %v5819_v51 = vadd.f32 %v5760_v48, %v5544_v59  ;;  %v5774_v22 = vpop.f32.mrf.mxu3 }
 0x62b   :  { %v5748_v42 = vpop.f32.mrf.mxu1  ;;  %v5859_v45 = vadd.f32 %v10117_v33, %v5774_v22 }
 0x62c   :  { %v8342_v34 = vmul.f32 -1.442695, %v5819_v51  ;;  %v5780_v11 = vadd.f32 %v5748_v42, %v5518_v44  ;;  %v5560_v44 = vadd.f32 %v10259_v27, %v9459_v16 }
 0x62e   :  { %v9073_v63 = vpop.eup %9072  ;;  %9074 = vpow2.f32 %v8342_v34  ;;  %v8341_v40 = vmul.f32 -1.442695, %v5780_v11 }
 0x62f   :  { %v5787_v25 = vadd.f32 1.0, %v9073_v63  ;;  %v5574_v63 = vadd.f32 %v5573_v9, %v5560_v44 }
 0x630   :  { %9076 = vpow2.f32 %v8341_v40 }
 0x631   :  { %9078 = vrcp.f32 %v5787_v25  ;;  %v5762_v23 = vpop.f32.mrf.mxu2  ;;  %v5800_v5 = vand.u32 2147483648, %v5787_v25  ;;  %v5798_v58 = vand.u32 2147483647, %v5787_v25  ;;  %vm5794_vm2 = vweird.f32 %v5787_v25 }
 0x632   :  { %v5820_v15 = vadd.f32 %v5762_v23, %v5546_v29  ;;  %v5776_v61 = vpop.f32.mrf.mxu3 }
 0x633   :  { %v5801_v49 = vor.u32 1.1754944e-38, %v5800_v5  ;;  %vm5799_vm8 = vcmp.eq.f32.partialorder %v5798_v58, 8.507059e+37  ;;  %v5860_v42 = vadd.f32 %v10117_v33, %v5776_v61 }
 0x634   :  { %v9075_v1 = vpop.eup %9074  ;;  %v8343_v57 = vmul.f32 -1.442695, %v5820_v15 }
 0x635   :  { %v5827_v38 = vadd.f32 1.0, %v9075_v1 }
 0x636   :  { %v9077_v32 = vpop.eup %9076  ;;  %9080 = vpow2.f32 %v8343_v57 }
 0x637   :  { %v9079_v47 = vpop.eup %9078  ;;  %9082 = vrcp.f32 %v5827_v38  ;;  %v5788_v54 = vadd.f32 1.0, %v9077_v32  ;;  %v5840_v36 = vand.u32 2147483648, %v5827_v38  ;;  %v5838_v43 = vand.u32 2147483647, %v5827_v38 }
 0x638   :  { %v5790_v26 = vmul.f32 %v9079_v47, %v5787_v25  ;;  %vm5795_vm9 = vweird.f32 %v9079_v47  ;;  %vm5834_vm11 = vweird.f32 %v5827_v38 }
 0x639   :  { %9084 = vrcp.f32 %v5788_v54  ;;  %vm5796_vm12 = vmor %vm5794_vm2, %vm5795_vm9  ;;  %v5815_v46 = vand.u32 2147483648, %v5788_v54  ;;  %v5813_v17 = vand.u32 2147483647, %v5788_v54  ;;  %v5841_v50 = vor.u32 1.1754944e-38, %v5840_v36 }
 0x63a   :  { %v5791_v20 = vsub.f32 1.0, %v5790_v26  ;;  %vm5839_vm7 = vcmp.eq.f32.partialorder %v5838_v43, 8.507059e+37  ;;  %vm5809_vm13 = vweird.f32 %v5788_v54 }
 0x63b   :  { %v5816_v37 = vor.u32 1.1754944e-38, %v5815_v46  ;;  %vm5814_vm0 = vcmp.eq.f32.partialorder %v5813_v17, 8.507059e+37 }
 0x63c   :  { %v9081_v19 = vpop.eup %9080  ;;  %v5792_v35 = vmul.f32 %v9079_v47, %v5791_v20 }
 0x63d   :  { %v9083_v24 = vpop.eup %9082  ;;  %v10261_v21 = vadd.f32 1.0, %v9081_v19 }
 0x63e   :  { %v5830_v13 = vmul.f32 %v9083_v24, %v5827_v38  ;;  %v5793_v56 = vadd.f32 %v9079_v47, %v5792_v35  ;;  %vm5835_vm10 = vweird.f32 %v9083_v24 }
 0x63f   :  { %9086 = vrcp.f32 %v10261_v21  ;;  %v9085_v18 = vpop.eup %9084  ;;  %vm5836_vm14 = vmor %vm5834_vm11, %vm5835_vm10  ;;  %v5855_v40 = vand.u32 2147483648, %v10261_v21  ;;  %vm5849_vm4 = vweird.f32 %v10261_v21  ;;  %v5853_v15 = vand.u32 2147483647, %v10261_v21 }
 0x640   :  { %v5831_v12 = vsub.f32 1.0, %v5830_v13  ;;  %v5797_v53 = vsel %vm5796_vm12, %v9079_v47, %v5793_v56  ;;  %v5805_v62 = vmul.f32 %v9085_v18, %v5788_v54  ;;  %vm5810_vm3 = vweird.f32 %v9085_v18 }
 0x641   :  { %v5802_v14 = vsel %vm5799_vm8, %v5801_v49, %v5797_v53  ;;  %vm5811_vm15 = vmor %vm5809_vm13, %vm5810_vm3  ;;  %v5856_v38 = vor.u32 1.1754944e-38, %v5855_v40  ;;  %vm5854_vm1 = vcmp.eq.f32.partialorder %v5853_v15, 8.507059e+37 }
 0x642   :  { %v5832_v52 = vmul.f32 %v9083_v24, %v5831_v12  ;;  %v5861_v39 = vmul.f32 %v5859_v45, %v5802_v14  ;;  %v5806_v3 = vsub.f32 1.0, %v5805_v62 }
 0x644   :  { %v5833_v41 = vadd.f32 %v9083_v24, %v5832_v52  ;;  %v5863_v8 = vadd.f32 %v5861_v39, %v5572_v4  ;;  %v5807_v0 = vmul.f32 %v9085_v18, %v5806_v3 }
 0x645   :  { %v9087_v2 = vpop.eup %9086 }
 0x646   :  { %v5837_v60 = vsel %vm5836_vm14, %v9083_v24, %v5833_v41  ;;  %9088 = vtanh.f32 %v5863_v8  ;;  %v5845_v6 = vmul.f32 %v9087_v2, %v10261_v21  ;;  %v5808_v30 = vadd.f32 %v9085_v18, %v5807_v0 }
 0x647   :  { %v5842_v59 = vsel %vm5839_vm7, %v5841_v50, %v5837_v60  ;;  %vm5850_vm6 = vweird.f32 %v9087_v2 }
 0x648   :  { %v5846_v48 = vsub.f32 1.0, %v5845_v6  ;;  %v5812_v51 = vsel %vm5811_vm15, %v9085_v18, %v5808_v30  ;;  %v5867_v55 = vsub.f32 1.0, %v5842_v59  ;;  %v5871_v16 = vmul.f32 %v5842_v59, %v10240_v10  ;;  %vm5851_vm5 = vmor %vm5849_vm4, %vm5850_vm6 }
 0x649   :  { %v5817_v11 = vsel %vm5814_vm0, %v5816_v37, %v5812_v51 }
 0x64a   :  { %v5847_v34 = vmul.f32 %v9087_v2, %v5846_v48  ;;  %v5862_v25 = vmul.f32 %v5860_v42, %v5817_v11 }
 0x64c   :  { %v9089_v29 = vpop.eup %9088  ;;  %v5848_v23 = vadd.f32 %v9087_v2, %v5847_v34  ;;  %v5864_v27 = vadd.f32 %v5862_v25, %v5574_v63 }
 0x64d   :  { %v5869_v1 = vmul.f32 %v9089_v29, %v5867_v55 }
 0x64e   :  { %v5852_v33 = vsel %vm5851_vm5, %v9087_v2, %v5848_v23  ;;  %9090 = vtanh.f32 %v5864_v27 }
 0x64f   :  { %v5873_v57 = vadd.f32 %v5871_v16, %v5869_v1  ;;  %v5857_v32 = vsel %vm5854_vm1, %v5856_v38, %v5852_v33 }
 0x650   :  { %v5868_v47 = vsub.f32 1.0, %v5857_v32  ;;  %v5872_v20 = vmul.f32 %v5857_v32, %v10247_v28 }
 0x651   :  { %8344 = vst [vmem:[%s10287_s6 + $0x70] sm:$0xff] %v5873_v57 }
 0x654   :  { %v9091_v26 = vpop.eup %9090 }
 0x655   :  { %v5870_v54 = vmul.f32 %v9091_v26, %v5868_v47 }
 0x657   :  { %v5874_v5 = vadd.f32 %v5872_v20, %v5870_v54 }
 0x659   :  { %8345 = vst [vmem:[%s10287_s6 + $0x78] sm:$0xff] %v5874_v5 }
 0x65a   :  { %5884 = vsyncpa [#allocation4], 1 }
 0x65b   :  { %5885 = vsyncpa [#allocation6], 1 }

</bundles_post_ra>
